<compile_context>
chip_gen: v7x
topology: tpu7x:2x2x1
jax: 0.10.0
libtpu: 0.0.40
codegen_flags: <defaults>
</compile_context>

<pallas_src>
import numpy as np
import jax
import jax.numpy as jnp
from jax.experimental import pallas as pl
from jax.experimental.pallas import tpu as pltpu

EPS = 1e-5
MAX_TB = 128      # max batch tile = M of every matmul (keeps vreg pressure sane)
NEG = -1e30       # "minus infinity" for the padded logit lanes


def _pick_mxu_dtype():
    """bf16 MXU operands run at full rate on v5e/v6e/v7x; accumulation is f32 and
    all element-wise math stays f32 (v5e's VPU/EUP have no bf16)."""
    try:
        if jax.devices()[0].platform == "tpu":
            return jnp.bfloat16
    except Exception:
        pass
    return jnp.float32


MXU_DTYPE = _pick_mxu_dtype()


def _round_up(n, m):
    return ((n + m - 1) // m) * m


def _pick_batch_tile(B):
    bp = _round_up(B, 16)
    if bp <= 16:
        return 16
    if bp <= MAX_TB:
        # keep >=2 grid steps when possible so both v7x TensorCores get work
        return _round_up(-(-bp // 2), 16)
    return MAX_TB


# ------------------------------ fused kernel --------------------------------

def _net_kernel(x_ref, w1_ref, s1_ref, b1_ref, w2_ref, s2_ref, b2_ref,
                fc1_ref, s3_ref, b3_ref, w4_ref, b4_ref, o_ref, p1_ref):
    tb = x_ref.shape[0]
    dt = w1_ref.dtype                       # MXU operand dtype (f32 or bf16)

    # ---- conv1 (3x3, 1->8) + BN1 + ReLU + 2x2/2 max-pool -> p1 scratch -----
    # One K=84 dot per conv output row (the 3 kernel-row taps are fused into K).
    # Output lanes are pool-phase major (L = px*104 + j*8 + c), so pooling is a
    # max over two contiguous 104-lane halves of two consecutive rows.
    def conv1_row(i):
        a = jnp.dot(x_ref[:, i * 28:(i + 3) * 28].astype(dt), w1_ref[...],
                    preferred_element_type=jnp.float32)             # (tb, 208)
        return jnp.maximum(a * s1_ref[...] + b1_ref[...], 0.0)

    zpad = jnp.zeros((tb, 24), jnp.float32)                         # 104 -> 128 lane pad
    for i in range(12):                  # pool1 row 12 is never consumed -> skipped
        a0 = conv1_row(2 * i)
        a1 = conv1_row(2 * i + 1)
        p = jnp.maximum(jnp.maximum(a0[:, :104], a0[:, 104:]),
                        jnp.maximum(a1[:, :104], a1[:, 104:]))      # (tb, 104)
        p1_ref[:, i * 128:(i + 1) * 128] = jnp.concatenate([p, zpad], axis=-1)

    # ---- conv2 (3x3, 8->16) + BN2 + ReLU + pool2, accumulated into fc1 -----
    # One K=384 dot per conv2 output row: its 3 input rows sit contiguously
    # (each lane-padded to 128) in the p1 scratch; W2 has zero rows at the pads.
    def conv2_row(r):
        a = jnp.dot(p1_ref[:, r * 128:r * 128 + 384].astype(dt), w2_ref[...],
                    preferred_element_type=jnp.float32)             # (tb, 160)
        return jnp.maximum(a * s2_ref[...] + b2_ref[...], 0.0)

    h = jnp.zeros((tb, 64), jnp.float32)
    for u in range(5):
        a0 = conv2_row(2 * u)
        a1 = conv2_row(2 * u + 1)
        p2 = jnp.maximum(jnp.maximum(a0[:, :80], a0[:, 80:]),
                         jnp.maximum(a1[:, :80], a1[:, 80:]))       # (tb, 80)
        h = h + jnp.dot(p2.astype(dt), fc1_ref[u],
                        preferred_element_type=jnp.float32)

    # TODO(synk): dropout1/2/3 are identity in eval mode (train-only); omitted.
    h = jnp.maximum(h * s3_ref[...] + b3_ref[...], 0.0)             # BN1d + ReLU
    logits = jnp.dot(h.astype(dt), w4_ref[...],
                     preferred_element_type=jnp.float32) + b4_ref[...]   # (tb, 128)
    z = logits - jnp.max(logits, axis=-1, keepdims=True)
    o_ref[...] = z - jnp.log(jnp.sum(jnp.exp(z), axis=-1, keepdims=True))


# ------------------------- weight packing (one-time) -------------------------

def _fold_bn(gamma, beta, mean, var, prev_bias):
    scale = gamma / jnp.sqrt(var + EPS)
    bias = beta + (prev_bias - mean) * scale
    return scale, bias


def prepare_tables(params, mxu_dtype=MXU_DTYPE):
    """One-time weight packing (BN folding, conv->matmul tables, lane permutations).
    Hoisted out of the per-inference path; call once at model-load time."""
    f32 = jnp.float32
    s1, b1 = _fold_bn(params["bn1_gamma"], params["bn1_beta"],
                      params["bn1_mean"], params["bn1_var"], params["conv1_b"])
    s2, b2 = _fold_bn(params["bn2_gamma"], params["bn2_beta"],
                      params["bn2_mean"], params["bn2_var"], params["conv2_b"])
    s3, b3 = _fold_bn(params["bn3_gamma"], params["bn3_beta"],
                      params["bn3_mean"], params["bn3_var"], params["fc1_b"])

    # conv1 as one K=84 matmul per row: W1[ki, v, L(w,c)] = w1[ki, v-w, 0, c]
    # (0<=v-w<3), output lanes L = px*104 + j*8 + c pool-phase major (w = 2j+px).
    w1 = params["conv1_w"]                                          # (3,3,1,8) HWIO
    oh1 = (jnp.arange(28)[:, None, None]
           == jnp.arange(26)[None, :, None] + jnp.arange(3)[None, None, :]).astype(f32)
    W1 = jnp.einsum("vwq,kqc->kvwc", oh1, w1[:, :, 0, :])           # (3,28,26,8)
    W1 = W1.reshape(3, 28, 13, 2, 8).transpose(0, 1, 3, 2, 4).reshape(3, 28, 208)
    W1f = W1.reshape(84, 208)                                       # K-fused (3 row taps)
    s1l, b1l = jnp.tile(s1, 26).reshape(1, 208), jnp.tile(b1, 26).reshape(1, 208)

    # conv2: W2[ki, j*8+ci, L(s,co)] = w2[ki, j-s, ci, co], lanes L = px*80+t*16+co
    # with s = 2t+px (conv2 column 10 is dropped by the floor-mode pool). Rows are
    # zero-padded 104->128 per tap to match the lane-padded p1 scratch, then the
    # 3 taps are stacked into K=384.
    w2 = params["conv2_w"]                                          # (3,3,8,16) HWIO
    oh2 = (jnp.arange(13)[:, None, None]
           == jnp.arange(10)[None, :, None] + jnp.arange(3)[None, None, :]).astype(f32)
    W2 = jnp.einsum("jsq,kqio->kjiso", oh2, w2)                     # (3,13,8,10,16)
    W2 = W2.reshape(3, 13, 8, 5, 2, 16).transpose(0, 1, 2, 4, 3, 5).reshape(3, 104, 160)
    W2p = jnp.pad(W2, ((0, 0), (0, 24), (0, 0))).reshape(384, 160)
    s2l, b2l = jnp.tile(s2, 10).reshape(1, 160), jnp.tile(b2, 10).reshape(1, 160)

    # fc1: torch flattens NCHW as (c,h,w); our pooled rows are (h, w*16+c), so
    # permute fc1 rows into (h, w, c) order and split into 5 per-row chunks.
    fc1 = params["fc1_w"].reshape(16, 5, 5, 64).transpose(1, 2, 0, 3).reshape(5, 80, 64)

    # fc2 padded to 128 lanes; pad bias = -1e30 so log-softmax ignores pad lanes.
    w4p = jnp.zeros((64, 128), f32).at[:, :10].set(params["fc2_w"])
    b4p = jnp.full((1, 128), NEG, f32).at[0, :10].set(params["fc2_b"])

    dt = mxu_dtype
    return (W1f.astype(dt), s1l, b1l, W2p.astype(dt), s2l, b2l, fc1.astype(dt),
            s3.reshape(1, 64), b3.reshape(1, 64), w4p.astype(dt), b4p)


# --------------------------------- wrapper -----------------------------------

def _const_spec(arr):
    n = arr.ndim
    return pl.BlockSpec(arr.shape, lambda i, _n=n: (0,) * _n)      # VMEM-resident weights


@jax.jit
def net_forward(tables, x_nchw):
    (W1f, s1l, b1l, W2p, s2l, b2l, fc1, s3, b3, w4p, b4p) = tables
    B = x_nchw.shape[0]
    tb = _pick_batch_tile(B)
    Bp = _round_up(B, tb)

    x2d = x_nchw.astype(jnp.float32).reshape(B, 28 * 28)            # lane-dense rows
    if Bp != B:
        x2d = jnp.pad(x2d, ((0, Bp - B), (0, 0)))

    out = pl.pallas_call(
        _net_kernel,
        out_shape=jax.ShapeDtypeStruct((Bp, 128), jnp.float32),
        grid=(Bp // tb,),
        in_specs=[
            pl.BlockSpec((tb, 28 * 28), lambda i: (i, 0)),
            _const_spec(W1f), _const_spec(s1l), _const_spec(b1l),
            _const_spec(W2p), _const_spec(s2l), _const_spec(b2l),
            _const_spec(fc1), _const_spec(s3), _const_spec(b3),
            _const_spec(w4p), _const_spec(b4p),
        ],
        out_specs=pl.BlockSpec((tb, 128), lambda i: (i, 0)),
        scratch_shapes=[pltpu.VMEM((tb, 12 * 128), jnp.float32)],   # lane-padded pool1
        compiler_params=pltpu.CompilerParams(dimension_semantics=("parallel",)),
    )(x2d, W1f, s1l, b1l, W2p, s2l, b2l, fc1, s3, b3, w4p, b4p)
    return out[:B, :10]


# ---------------------- deterministic parameter init ------------------------

def init_params(key):
    ks = jax.random.split(key, 20)
    f32 = jnp.float32
    p = {}
    # conv1: torch shape (8,1,3,3) -> stored HWIO (3,3,1,8)
    p["conv1_w"] = 0.2 * jax.random.normal(ks[0], (3, 3, 1, 8), f32)
    p["conv1_b"] = 0.1 * jax.random.normal(ks[1], (8,), f32)
    p["bn1_gamma"] = 1.0 + 0.1 * jax.random.normal(ks[2], (8,), f32)
    p["bn1_beta"] = 0.1 * jax.random.normal(ks[3], (8,), f32)
    p["bn1_mean"] = 0.1 * jax.random.normal(ks[4], (8,), f32)
    p["bn1_var"] = 1.0 + 0.1 * jnp.abs(jax.random.normal(ks[5], (8,), f32))
    # conv2: torch shape (16,8,3,3) -> HWIO (3,3,8,16)
    p["conv2_w"] = 0.1 * jax.random.normal(ks[6], (3, 3, 8, 16), f32)
    p["conv2_b"] = 0.1 * jax.random.normal(ks[7], (16,), f32)
    p["bn2_gamma"] = 1.0 + 0.1 * jax.random.normal(ks[8], (16,), f32)
    p["bn2_beta"] = 0.1 * jax.random.normal(ks[9], (16,), f32)
    p["bn2_mean"] = 0.1 * jax.random.normal(ks[10], (16,), f32)
    p["bn2_var"] = 1.0 + 0.1 * jnp.abs(jax.random.normal(ks[11], (16,), f32))
    # fc1: torch (64,400) -> stored (400,64); fc2: torch (10,64) -> (64,10)
    p["fc1_w"] = 0.05 * jax.random.normal(ks[12], (400, 64), f32)
    p["fc1_b"] = 0.05 * jax.random.normal(ks[13], (64,), f32)
    p["bn3_gamma"] = 1.0 + 0.1 * jax.random.normal(ks[14], (64,), f32)
    p["bn3_beta"] = 0.1 * jax.random.normal(ks[15], (64,), f32)
    p["bn3_mean"] = 0.1 * jax.random.normal(ks[16], (64,), f32)
    p["bn3_var"] = 1.0 + 0.1 * jnp.abs(jax.random.normal(ks[17], (64,), f32))
    p["fc2_w"] = 0.1 * jax.random.normal(ks[18], (64, 10), f32)
    p["fc2_b"] = 0.1 * jax.random.normal(ks[19], (10,), f32)
    return p


# --------------------------- pure-JAX reference ------------------------------

def ref_forward(params, x_nchw):
    x = x_nchw.astype(jnp.float32)

    def conv(x, w_hwio, b):
        w_oihw = jnp.transpose(w_hwio, (3, 2, 0, 1))
        y = jax.lax.conv_general_dilated(
            x, w_oihw, (1, 1), "VALID",
            dimension_numbers=("NCHW", "OIHW", "NCHW"))
        return y + b[None, :, None, None]

    def bn2d(x, g, be, m, v):
        return ((x - m[None, :, None, None]) / jnp.sqrt(v[None, :, None, None] + EPS)
                * g[None, :, None, None] + be[None, :, None, None])

    def pool(x):
        B, C, H, W = x.shape
        Hp, Wp = H // 2, W // 2
        x = x[:, :, :2 * Hp, :2 * Wp].reshape(B, C, Hp, 2, Wp, 2)
        return x.max(axis=(3, 5))

    x = jax.nn.relu(bn2d(conv(x, params["conv1_w"], params["conv1_b"]),
                         params["bn1_gamma"], params["bn1_beta"],
                         params["bn1_mean"], params["bn1_var"]))
    x = pool(x)
    x = jax.nn.relu(bn2d(conv(x, params["conv2_w"], params["conv2_b"]),
                         params["bn2_gamma"], params["bn2_beta"],
                         params["bn2_mean"], params["bn2_var"]))
    x = pool(x)
    x = x.reshape(x.shape[0], -1)
    h = x @ params["fc1_w"] + params["fc1_b"]
    h = ((h - params["bn3_mean"]) / jnp.sqrt(params["bn3_var"] + EPS)
         * params["bn3_gamma"] + params["bn3_beta"])
    h = jax.nn.relu(h)
    logits = h @ params["fc2_w"] + params["fc2_b"]
    return jax.nn.log_softmax(logits, axis=1)


# --------------------------------- main --------------------------------------

if __name__ == "__main__":
    key = jax.random.PRNGKey(0)
    pkey, xkey = jax.random.split(key)
    params = init_params(pkey)
    # MNIST-shaped input (B=2, C=1, 28x28): required so flatten -> 400 == fc1.in_features
    x = jax.random.normal(xkey, (2, 1, 28, 28), jnp.float32)

    tables = prepare_tables(params)      # one-time packing, outside the inference path
    out = net_forward(tables, x)
    out = jax.block_until_ready(out)
    assert out.shape == (2, 10)

    ref = ref_forward(params, x)
    tol = 3e-2 if MXU_DTYPE == jnp.bfloat16 else 2e-4   # bf16 MXU operands need slack
    np.testing.assert_allclose(np.asarray(out), np.asarray(ref), rtol=tol, atol=tol)
    print("KERNEL_OK")
</pallas_src>

<mosaic_0001>
module attributes {stable_mosaic.version = 11 : i64} {
  func.func @_net_kernel(%arg0: i32, %arg1: memref<16x784xf32, #tpu.memory_space<vmem>>, %arg2: memref<84x208xf32, #tpu.memory_space<vmem>>, %arg3: memref<1x208xf32, #tpu.memory_space<vmem>>, %arg4: memref<1x208xf32, #tpu.memory_space<vmem>>, %arg5: memref<384x160xf32, #tpu.memory_space<vmem>>, %arg6: memref<1x160xf32, #tpu.memory_space<vmem>>, %arg7: memref<1x160xf32, #tpu.memory_space<vmem>>, %arg8: memref<5x80x64xf32, #tpu.memory_space<vmem>>, %arg9: memref<1x64xf32, #tpu.memory_space<vmem>>, %arg10: memref<1x64xf32, #tpu.memory_space<vmem>>, %arg11: memref<64x128xf32, #tpu.memory_space<vmem>>, %arg12: memref<1x128xf32, #tpu.memory_space<vmem>>, %arg13: memref<16x128xf32, #tpu.memory_space<vmem>>, %arg14: memref<16x1536xf32, #tpu.memory_space<vmem>>) attributes {dimension_semantics = [#tpu.dimension_semantics<parallel>], iteration_bounds = array<i64: 1>, scalar_prefetch = 0 : i64, scratch_operands = 1 : i64, tpu.core_type = #tpu.core_type<tc>, window_params = [{transform_indices = @transform_0, window_bounds = array<i64: 16, 784>}, {pipeline_mode = #tpu.pipeline_mode<synchronous>, transform_indices = @transform_1, window_bounds = array<i64: 84, 208>}, {pipeline_mode = #tpu.pipeline_mode<synchronous>, transform_indices = @transform_2, window_bounds = array<i64: 1, 208>}, {pipeline_mode = #tpu.pipeline_mode<synchronous>, transform_indices = @transform_3, window_bounds = array<i64: 1, 208>}, {pipeline_mode = #tpu.pipeline_mode<synchronous>, transform_indices = @transform_4, window_bounds = array<i64: 384, 160>}, {pipeline_mode = #tpu.pipeline_mode<synchronous>, transform_indices = @transform_5, window_bounds = array<i64: 1, 160>}, {pipeline_mode = #tpu.pipeline_mode<synchronous>, transform_indices = @transform_6, window_bounds = array<i64: 1, 160>}, {pipeline_mode = #tpu.pipeline_mode<synchronous>, transform_indices = @transform_7, window_bounds = array<i64: 5, 80, 64>}, {pipeline_mode = #tpu.pipeline_mode<synchronous>, transform_indices = @transform_8, window_bounds = array<i64: 1, 64>}, {pipeline_mode = #tpu.pipeline_mode<synchronous>, transform_indices = @transform_9, window_bounds = array<i64: 1, 64>}, {pipeline_mode = #tpu.pipeline_mode<synchronous>, transform_indices = @transform_10, window_bounds = array<i64: 64, 128>}, {pipeline_mode = #tpu.pipeline_mode<synchronous>, transform_indices = @transform_11, window_bounds = array<i64: 1, 128>}, {transform_indices = @transform_12, window_bounds = array<i64: 16, 128>}]} {
    %cst = arith.constant 0.000000e+00 : f32
    %0 = vector.broadcast %cst : f32 to vector<16x24xf32>
    %c0 = arith.constant 0 : index
    %c0_0 = arith.constant 0 : index
    %1 = vector.load %arg1[%c0, %c0_0] : memref<16x784xf32, #tpu.memory_space<vmem>>, vector<16x84xf32>
    %c0_1 = arith.constant 0 : index
    %c0_2 = arith.constant 0 : index
    %2 = vector.load %arg2[%c0_1, %c0_2] : memref<84x208xf32, #tpu.memory_space<vmem>>, vector<84x208xf32>
    %cst_3 = arith.constant dense<0.000000e+00> : vector<16x208xf32>
    %3 = tpu.matmul %1, %2, %cst_3 {dimension_numbers = #tpu.dot_dimension_numbers<[1], [0], [0], [1], [0, 0, 1, 1], [], []>} : vector<16x84xf32>, vector<84x208xf32>, vector<16x208xf32> -> vector<16x208xf32>
    %c0_4 = arith.constant 0 : index
    %c0_5 = arith.constant 0 : index
    %4 = vector.load %arg3[%c0_4, %c0_5] : memref<1x208xf32, #tpu.memory_space<vmem>>, vector<1x208xf32>
    %5 = vector.broadcast %4 : vector<1x208xf32> to vector<16x208xf32>
    %6 = arith.mulf %3, %5 : vector<16x208xf32>
    %c0_6 = arith.constant 0 : index
    %c0_7 = arith.constant 0 : index
    %7 = vector.load %arg4[%c0_6, %c0_7] : memref<1x208xf32, #tpu.memory_space<vmem>>, vector<1x208xf32>
    %8 = vector.broadcast %7 : vector<1x208xf32> to vector<16x208xf32>
    %9 = arith.addf %6, %8 : vector<16x208xf32>
    %cst_8 = arith.constant 0.000000e+00 : f32
    %10 = vector.broadcast %cst_8 : f32 to vector<16x208xf32>
    %11 = arith.maximumf %9, %10 : vector<16x208xf32>
    %c0_9 = arith.constant 0 : index
    %c28 = arith.constant 28 : index
    %12 = vector.load %arg1[%c0_9, %c28] : memref<16x784xf32, #tpu.memory_space<vmem>>, vector<16x84xf32>
    %c0_10 = arith.constant 0 : index
    %c0_11 = arith.constant 0 : index
    %13 = vector.load %arg2[%c0_10, %c0_11] : memref<84x208xf32, #tpu.memory_space<vmem>>, vector<84x208xf32>
    %cst_12 = arith.constant dense<0.000000e+00> : vector<16x208xf32>
    %14 = tpu.matmul %12, %13, %cst_12 {dimension_numbers = #tpu.dot_dimension_numbers<[1], [0], [0], [1], [0, 0, 1, 1], [], []>} : vector<16x84xf32>, vector<84x208xf32>, vector<16x208xf32> -> vector<16x208xf32>
    %c0_13 = arith.constant 0 : index
    %c0_14 = arith.constant 0 : index
    %15 = vector.load %arg3[%c0_13, %c0_14] : memref<1x208xf32, #tpu.memory_space<vmem>>, vector<1x208xf32>
    %16 = vector.broadcast %15 : vector<1x208xf32> to vector<16x208xf32>
    %17 = arith.mulf %14, %16 : vector<16x208xf32>
    %c0_15 = arith.constant 0 : index
    %c0_16 = arith.constant 0 : index
    %18 = vector.load %arg4[%c0_15, %c0_16] : memref<1x208xf32, #tpu.memory_space<vmem>>, vector<1x208xf32>
    %19 = vector.broadcast %18 : vector<1x208xf32> to vector<16x208xf32>
    %20 = arith.addf %17, %19 : vector<16x208xf32>
    %cst_17 = arith.constant 0.000000e+00 : f32
    %21 = vector.broadcast %cst_17 : f32 to vector<16x208xf32>
    %22 = arith.maximumf %20, %21 : vector<16x208xf32>
    %23 = vector.extract_strided_slice %11 {offsets = [0, 0], sizes = [16, 104], strides = [1, 1]} : vector<16x208xf32> to vector<16x104xf32>
    %24 = vector.extract_strided_slice %11 {offsets = [0, 104], sizes = [16, 104], strides = [1, 1]} : vector<16x208xf32> to vector<16x104xf32>
    %25 = arith.maximumf %23, %24 : vector<16x104xf32>
    %26 = vector.extract_strided_slice %22 {offsets = [0, 0], sizes = [16, 104], strides = [1, 1]} : vector<16x208xf32> to vector<16x104xf32>
    %27 = vector.extract_strided_slice %22 {offsets = [0, 104], sizes = [16, 104], strides = [1, 1]} : vector<16x208xf32> to vector<16x104xf32>
    %28 = arith.maximumf %26, %27 : vector<16x104xf32>
    %29 = arith.maximumf %25, %28 : vector<16x104xf32>
    %30 = tpu.concatenate %29, %0 in 1 : vector<16x104xf32>, vector<16x24xf32> -> vector<16x128xf32>
    %c0_18 = arith.constant 0 : index
    %c0_19 = arith.constant 0 : index
    %31 = vector.load %arg14[%c0_18, %c0_19] : memref<16x1536xf32, #tpu.memory_space<vmem>>, vector<16x128xf32>
    tpu.vector_store %arg14[%c0_18, %c0_19], %30 {strides = array<i32>} : memref<16x1536xf32, #tpu.memory_space<vmem>>, vector<16x128xf32>,
    %c0_20 = arith.constant 0 : index
    %c56 = arith.constant 56 : index
    %32 = vector.load %arg1[%c0_20, %c56] : memref<16x784xf32, #tpu.memory_space<vmem>>, vector<16x84xf32>
    %c0_21 = arith.constant 0 : index
    %c0_22 = arith.constant 0 : index
    %33 = vector.load %arg2[%c0_21, %c0_22] : memref<84x208xf32, #tpu.memory_space<vmem>>, vector<84x208xf32>
    %cst_23 = arith.constant dense<0.000000e+00> : vector<16x208xf32>
    %34 = tpu.matmul %32, %33, %cst_23 {dimension_numbers = #tpu.dot_dimension_numbers<[1], [0], [0], [1], [0, 0, 1, 1], [], []>} : vector<16x84xf32>, vector<84x208xf32>, vector<16x208xf32> -> vector<16x208xf32>
    %c0_24 = arith.constant 0 : index
    %c0_25 = arith.constant 0 : index
    %35 = vector.load %arg3[%c0_24, %c0_25] : memref<1x208xf32, #tpu.memory_space<vmem>>, vector<1x208xf32>
    %36 = vector.broadcast %35 : vector<1x208xf32> to vector<16x208xf32>
    %37 = arith.mulf %34, %36 : vector<16x208xf32>
    %c0_26 = arith.constant 0 : index
    %c0_27 = arith.constant 0 : index
    %38 = vector.load %arg4[%c0_26, %c0_27] : memref<1x208xf32, #tpu.memory_space<vmem>>, vector<1x208xf32>
    %39 = vector.broadcast %38 : vector<1x208xf32> to vector<16x208xf32>
    %40 = arith.addf %37, %39 : vector<16x208xf32>
    %cst_28 = arith.constant 0.000000e+00 : f32
    %41 = vector.broadcast %cst_28 : f32 to vector<16x208xf32>
    %42 = arith.maximumf %40, %41 : vector<16x208xf32>
    %c0_29 = arith.constant 0 : index
    %c84 = arith.constant 84 : index
    %43 = vector.load %arg1[%c0_29, %c84] : memref<16x784xf32, #tpu.memory_space<vmem>>, vector<16x84xf32>
    %c0_30 = arith.constant 0 : index
    %c0_31 = arith.constant 0 : index
    %44 = vector.load %arg2[%c0_30, %c0_31] : memref<84x208xf32, #tpu.memory_space<vmem>>, vector<84x208xf32>
    %cst_32 = arith.constant dense<0.000000e+00> : vector<16x208xf32>
    %45 = tpu.matmul %43, %44, %cst_32 {dimension_numbers = #tpu.dot_dimension_numbers<[1], [0], [0], [1], [0, 0, 1, 1], [], []>} : vector<16x84xf32>, vector<84x208xf32>, vector<16x208xf32> -> vector<16x208xf32>
    %c0_33 = arith.constant 0 : index
    %c0_34 = arith.constant 0 : index
    %46 = vector.load %arg3[%c0_33, %c0_34] : memref<1x208xf32, #tpu.memory_space<vmem>>, vector<1x208xf32>
    %47 = vector.broadcast %46 : vector<1x208xf32> to vector<16x208xf32>
    %48 = arith.mulf %45, %47 : vector<16x208xf32>
    %c0_35 = arith.constant 0 : index
    %c0_36 = arith.constant 0 : index
    %49 = vector.load %arg4[%c0_35, %c0_36] : memref<1x208xf32, #tpu.memory_space<vmem>>, vector<1x208xf32>
    %50 = vector.broadcast %49 : vector<1x208xf32> to vector<16x208xf32>
    %51 = arith.addf %48, %50 : vector<16x208xf32>
    %cst_37 = arith.constant 0.000000e+00 : f32
    %52 = vector.broadcast %cst_37 : f32 to vector<16x208xf32>
    %53 = arith.maximumf %51, %52 : vector<16x208xf32>
    %54 = vector.extract_strided_slice %42 {offsets = [0, 0], sizes = [16, 104], strides = [1, 1]} : vector<16x208xf32> to vector<16x104xf32>
    %55 = vector.extract_strided_slice %42 {offsets = [0, 104], sizes = [16, 104], strides = [1, 1]} : vector<16x208xf32> to vector<16x104xf32>
    %56 = arith.maximumf %54, %55 : vector<16x104xf32>
    %57 = vector.extract_strided_slice %53 {offsets = [0, 0], sizes = [16, 104], strides = [1, 1]} : vector<16x208xf32> to vector<16x104xf32>
    %58 = vector.extract_strided_slice %53 {offsets = [0, 104], sizes = [16, 104], strides = [1, 1]} : vector<16x208xf32> to vector<16x104xf32>
    %59 = arith.maximumf %57, %58 : vector<16x104xf32>
    %60 = arith.maximumf %56, %59 : vector<16x104xf32>
    %61 = tpu.concatenate %60, %0 in 1 : vector<16x104xf32>, vector<16x24xf32> -> vector<16x128xf32>
    %c0_38 = arith.constant 0 : index
    %c128 = arith.constant 128 : index
    %62 = vector.load %arg14[%c0_38, %c128] : memref<16x1536xf32, #tpu.memory_space<vmem>>, vector<16x128xf32>
    tpu.vector_store %arg14[%c0_38, %c128], %61 {strides = array<i32>} : memref<16x1536xf32, #tpu.memory_space<vmem>>, vector<16x128xf32>,
    %c0_39 = arith.constant 0 : index
    %c112 = arith.constant 112 : index
    %63 = vector.load %arg1[%c0_39, %c112] : memref<16x784xf32, #tpu.memory_space<vmem>>, vector<16x84xf32>
    %c0_40 = arith.constant 0 : index
    %c0_41 = arith.constant 0 : index
    %64 = vector.load %arg2[%c0_40, %c0_41] : memref<84x208xf32, #tpu.memory_space<vmem>>, vector<84x208xf32>
    %cst_42 = arith.constant dense<0.000000e+00> : vector<16x208xf32>
    %65 = tpu.matmul %63, %64, %cst_42 {dimension_numbers = #tpu.dot_dimension_numbers<[1], [0], [0], [1], [0, 0, 1, 1], [], []>} : vector<16x84xf32>, vector<84x208xf32>, vector<16x208xf32> -> vector<16x208xf32>
    %c0_43 = arith.constant 0 : index
    %c0_44 = arith.constant 0 : index
    %66 = vector.load %arg3[%c0_43, %c0_44] : memref<1x208xf32, #tpu.memory_space<vmem>>, vector<1x208xf32>
    %67 = vector.broadcast %66 : vector<1x208xf32> to vector<16x208xf32>
    %68 = arith.mulf %65, %67 : vector<16x208xf32>
    %c0_45 = arith.constant 0 : index
    %c0_46 = arith.constant 0 : index
    %69 = vector.load %arg4[%c0_45, %c0_46] : memref<1x208xf32, #tpu.memory_space<vmem>>, vector<1x208xf32>
    %70 = vector.broadcast %69 : vector<1x208xf32> to vector<16x208xf32>
    %71 = arith.addf %68, %70 : vector<16x208xf32>
    %cst_47 = arith.constant 0.000000e+00 : f32
    %72 = vector.broadcast %cst_47 : f32 to vector<16x208xf32>
    %73 = arith.maximumf %71, %72 : vector<16x208xf32>
    %c0_48 = arith.constant 0 : index
    %c140 = arith.constant 140 : index
    %74 = vector.load %arg1[%c0_48, %c140] : memref<16x784xf32, #tpu.memory_space<vmem>>, vector<16x84xf32>
    %c0_49 = arith.constant 0 : index
    %c0_50 = arith.constant 0 : index
    %75 = vector.load %arg2[%c0_49, %c0_50] : memref<84x208xf32, #tpu.memory_space<vmem>>, vector<84x208xf32>
    %cst_51 = arith.constant dense<0.000000e+00> : vector<16x208xf32>
    %76 = tpu.matmul %74, %75, %cst_51 {dimension_numbers = #tpu.dot_dimension_numbers<[1], [0], [0], [1], [0, 0, 1, 1], [], []>} : vector<16x84xf32>, vector<84x208xf32>, vector<16x208xf32> -> vector<16x208xf32>
    %c0_52 = arith.constant 0 : index
    %c0_53 = arith.constant 0 : index
    %77 = vector.load %arg3[%c0_52, %c0_53] : memref<1x208xf32, #tpu.memory_space<vmem>>, vector<1x208xf32>
    %78 = vector.broadcast %77 : vector<1x208xf32> to vector<16x208xf32>
    %79 = arith.mulf %76, %78 : vector<16x208xf32>
    %c0_54 = arith.constant 0 : index
    %c0_55 = arith.constant 0 : index
    %80 = vector.load %arg4[%c0_54, %c0_55] : memref<1x208xf32, #tpu.memory_space<vmem>>, vector<1x208xf32>
    %81 = vector.broadcast %80 : vector<1x208xf32> to vector<16x208xf32>
    %82 = arith.addf %79, %81 : vector<16x208xf32>
    %cst_56 = arith.constant 0.000000e+00 : f32
    %83 = vector.broadcast %cst_56 : f32 to vector<16x208xf32>
    %84 = arith.maximumf %82, %83 : vector<16x208xf32>
    %85 = vector.extract_strided_slice %73 {offsets = [0, 0], sizes = [16, 104], strides = [1, 1]} : vector<16x208xf32> to vector<16x104xf32>
    %86 = vector.extract_strided_slice %73 {offsets = [0, 104], sizes = [16, 104], strides = [1, 1]} : vector<16x208xf32> to vector<16x104xf32>
    %87 = arith.maximumf %85, %86 : vector<16x104xf32>
    %88 = vector.extract_strided_slice %84 {offsets = [0, 0], sizes = [16, 104], strides = [1, 1]} : vector<16x208xf32> to vector<16x104xf32>
    %89 = vector.extract_strided_slice %84 {offsets = [0, 104], sizes = [16, 104], strides = [1, 1]} : vector<16x208xf32> to vector<16x104xf32>
    %90 = arith.maximumf %88, %89 : vector<16x104xf32>
    %91 = arith.maximumf %87, %90 : vector<16x104xf32>
    %92 = tpu.concatenate %91, %0 in 1 : vector<16x104xf32>, vector<16x24xf32> -> vector<16x128xf32>
    %c0_57 = arith.constant 0 : index
    %c256 = arith.constant 256 : index
    %93 = vector.load %arg14[%c0_57, %c256] : memref<16x1536xf32, #tpu.memory_space<vmem>>, vector<16x128xf32>
    tpu.vector_store %arg14[%c0_57, %c256], %92 {strides = array<i32>} : memref<16x1536xf32, #tpu.memory_space<vmem>>, vector<16x128xf32>,
    %c0_58 = arith.constant 0 : index
    %c168 = arith.constant 168 : index
    %94 = vector.load %arg1[%c0_58, %c168] : memref<16x784xf32, #tpu.memory_space<vmem>>, vector<16x84xf32>
    %c0_59 = arith.constant 0 : index
    %c0_60 = arith.constant 0 : index
    %95 = vector.load %arg2[%c0_59, %c0_60] : memref<84x208xf32, #tpu.memory_space<vmem>>, vector<84x208xf32>
    %cst_61 = arith.constant dense<0.000000e+00> : vector<16x208xf32>
    %96 = tpu.matmul %94, %95, %cst_61 {dimension_numbers = #tpu.dot_dimension_numbers<[1], [0], [0], [1], [0, 0, 1, 1], [], []>} : vector<16x84xf32>, vector<84x208xf32>, vector<16x208xf32> -> vector<16x208xf32>
    %c0_62 = arith.constant 0 : index
    %c0_63 = arith.constant 0 : index
    %97 = vector.load %arg3[%c0_62, %c0_63] : memref<1x208xf32, #tpu.memory_space<vmem>>, vector<1x208xf32>
    %98 = vector.broadcast %97 : vector<1x208xf32> to vector<16x208xf32>
    %99 = arith.mulf %96, %98 : vector<16x208xf32>
    %c0_64 = arith.constant 0 : index
    %c0_65 = arith.constant 0 : index
    %100 = vector.load %arg4[%c0_64, %c0_65] : memref<1x208xf32, #tpu.memory_space<vmem>>, vector<1x208xf32>
    %101 = vector.broadcast %100 : vector<1x208xf32> to vector<16x208xf32>
    %102 = arith.addf %99, %101 : vector<16x208xf32>
    %cst_66 = arith.constant 0.000000e+00 : f32
    %103 = vector.broadcast %cst_66 : f32 to vector<16x208xf32>
    %104 = arith.maximumf %102, %103 : vector<16x208xf32>
    %c0_67 = arith.constant 0 : index
    %c196 = arith.constant 196 : index
    %105 = vector.load %arg1[%c0_67, %c196] : memref<16x784xf32, #tpu.memory_space<vmem>>, vector<16x84xf32>
    %c0_68 = arith.constant 0 : index
    %c0_69 = arith.constant 0 : index
    %106 = vector.load %arg2[%c0_68, %c0_69] : memref<84x208xf32, #tpu.memory_space<vmem>>, vector<84x208xf32>
    %cst_70 = arith.constant dense<0.000000e+00> : vector<16x208xf32>
    %107 = tpu.matmul %105, %106, %cst_70 {dimension_numbers = #tpu.dot_dimension_numbers<[1], [0], [0], [1], [0, 0, 1, 1], [], []>} : vector<16x84xf32>, vector<84x208xf32>, vector<16x208xf32> -> vector<16x208xf32>
    %c0_71 = arith.constant 0 : index
    %c0_72 = arith.constant 0 : index
    %108 = vector.load %arg3[%c0_71, %c0_72] : memref<1x208xf32, #tpu.memory_space<vmem>>, vector<1x208xf32>
    %109 = vector.broadcast %108 : vector<1x208xf32> to vector<16x208xf32>
    %110 = arith.mulf %107, %109 : vector<16x208xf32>
    %c0_73 = arith.constant 0 : index
    %c0_74 = arith.constant 0 : index
    %111 = vector.load %arg4[%c0_73, %c0_74] : memref<1x208xf32, #tpu.memory_space<vmem>>, vector<1x208xf32>
    %112 = vector.broadcast %111 : vector<1x208xf32> to vector<16x208xf32>
    %113 = arith.addf %110, %112 : vector<16x208xf32>
    %cst_75 = arith.constant 0.000000e+00 : f32
    %114 = vector.broadcast %cst_75 : f32 to vector<16x208xf32>
    %115 = arith.maximumf %113, %114 : vector<16x208xf32>
    %116 = vector.extract_strided_slice %104 {offsets = [0, 0], sizes = [16, 104], strides = [1, 1]} : vector<16x208xf32> to vector<16x104xf32>
    %117 = vector.extract_strided_slice %104 {offsets = [0, 104], sizes = [16, 104], strides = [1, 1]} : vector<16x208xf32> to vector<16x104xf32>
    %118 = arith.maximumf %116, %117 : vector<16x104xf32>
    %119 = vector.extract_strided_slice %115 {offsets = [0, 0], sizes = [16, 104], strides = [1, 1]} : vector<16x208xf32> to vector<16x104xf32>
    %120 = vector.extract_strided_slice %115 {offsets = [0, 104], sizes = [16, 104], strides = [1, 1]} : vector<16x208xf32> to vector<16x104xf32>
    %121 = arith.maximumf %119, %120 : vector<16x104xf32>
    %122 = arith.maximumf %118, %121 : vector<16x104xf32>
    %123 = tpu.concatenate %122, %0 in 1 : vector<16x104xf32>, vector<16x24xf32> -> vector<16x128xf32>
    %c0_76 = arith.constant 0 : index
    %c384 = arith.constant 384 : index
    %124 = vector.load %arg14[%c0_76, %c384] : memref<16x1536xf32, #tpu.memory_space<vmem>>, vector<16x128xf32>
    tpu.vector_store %arg14[%c0_76, %c384], %123 {strides = array<i32>} : memref<16x1536xf32, #tpu.memory_space<vmem>>, vector<16x128xf32>,
    %c0_77 = arith.constant 0 : index
    %c224 = arith.constant 224 : index
    %125 = vector.load %arg1[%c0_77, %c224] : memref<16x784xf32, #tpu.memory_space<vmem>>, vector<16x84xf32>
    %c0_78 = arith.constant 0 : index
    %c0_79 = arith.constant 0 : index
    %126 = vector.load %arg2[%c0_78, %c0_79] : memref<84x208xf32, #tpu.memory_space<vmem>>, vector<84x208xf32>
    %cst_80 = arith.constant dense<0.000000e+00> : vector<16x208xf32>
    %127 = tpu.matmul %125, %126, %cst_80 {dimension_numbers = #tpu.dot_dimension_numbers<[1], [0], [0], [1], [0, 0, 1, 1], [], []>} : vector<16x84xf32>, vector<84x208xf32>, vector<16x208xf32> -> vector<16x208xf32>
    %c0_81 = arith.constant 0 : index
    %c0_82 = arith.constant 0 : index
    %128 = vector.load %arg3[%c0_81, %c0_82] : memref<1x208xf32, #tpu.memory_space<vmem>>, vector<1x208xf32>
    %129 = vector.broadcast %128 : vector<1x208xf32> to vector<16x208xf32>
    %130 = arith.mulf %127, %129 : vector<16x208xf32>
    %c0_83 = arith.constant 0 : index
    %c0_84 = arith.constant 0 : index
    %131 = vector.load %arg4[%c0_83, %c0_84] : memref<1x208xf32, #tpu.memory_space<vmem>>, vector<1x208xf32>
    %132 = vector.broadcast %131 : vector<1x208xf32> to vector<16x208xf32>
    %133 = arith.addf %130, %132 : vector<16x208xf32>
    %cst_85 = arith.constant 0.000000e+00 : f32
    %134 = vector.broadcast %cst_85 : f32 to vector<16x208xf32>
    %135 = arith.maximumf %133, %134 : vector<16x208xf32>
    %c0_86 = arith.constant 0 : index
    %c252 = arith.constant 252 : index
    %136 = vector.load %arg1[%c0_86, %c252] : memref<16x784xf32, #tpu.memory_space<vmem>>, vector<16x84xf32>
    %c0_87 = arith.constant 0 : index
    %c0_88 = arith.constant 0 : index
    %137 = vector.load %arg2[%c0_87, %c0_88] : memref<84x208xf32, #tpu.memory_space<vmem>>, vector<84x208xf32>
    %cst_89 = arith.constant dense<0.000000e+00> : vector<16x208xf32>
    %138 = tpu.matmul %136, %137, %cst_89 {dimension_numbers = #tpu.dot_dimension_numbers<[1], [0], [0], [1], [0, 0, 1, 1], [], []>} : vector<16x84xf32>, vector<84x208xf32>, vector<16x208xf32> -> vector<16x208xf32>
    %c0_90 = arith.constant 0 : index
    %c0_91 = arith.constant 0 : index
    %139 = vector.load %arg3[%c0_90, %c0_91] : memref<1x208xf32, #tpu.memory_space<vmem>>, vector<1x208xf32>
    %140 = vector.broadcast %139 : vector<1x208xf32> to vector<16x208xf32>
    %141 = arith.mulf %138, %140 : vector<16x208xf32>
    %c0_92 = arith.constant 0 : index
    %c0_93 = arith.constant 0 : index
    %142 = vector.load %arg4[%c0_92, %c0_93] : memref<1x208xf32, #tpu.memory_space<vmem>>, vector<1x208xf32>
    %143 = vector.broadcast %142 : vector<1x208xf32> to vector<16x208xf32>
    %144 = arith.addf %141, %143 : vector<16x208xf32>
    %cst_94 = arith.constant 0.000000e+00 : f32
    %145 = vector.broadcast %cst_94 : f32 to vector<16x208xf32>
    %146 = arith.maximumf %144, %145 : vector<16x208xf32>
    %147 = vector.extract_strided_slice %135 {offsets = [0, 0], sizes = [16, 104], strides = [1, 1]} : vector<16x208xf32> to vector<16x104xf32>
    %148 = vector.extract_strided_slice %135 {offsets = [0, 104], sizes = [16, 104], strides = [1, 1]} : vector<16x208xf32> to vector<16x104xf32>
    %149 = arith.maximumf %147, %148 : vector<16x104xf32>
    %150 = vector.extract_strided_slice %146 {offsets = [0, 0], sizes = [16, 104], strides = [1, 1]} : vector<16x208xf32> to vector<16x104xf32>
    %151 = vector.extract_strided_slice %146 {offsets = [0, 104], sizes = [16, 104], strides = [1, 1]} : vector<16x208xf32> to vector<16x104xf32>
    %152 = arith.maximumf %150, %151 : vector<16x104xf32>
    %153 = arith.maximumf %149, %152 : vector<16x104xf32>
    %154 = tpu.concatenate %153, %0 in 1 : vector<16x104xf32>, vector<16x24xf32> -> vector<16x128xf32>
    %c0_95 = arith.constant 0 : index
    %c512 = arith.constant 512 : index
    %155 = vector.load %arg14[%c0_95, %c512] : memref<16x1536xf32, #tpu.memory_space<vmem>>, vector<16x128xf32>
    tpu.vector_store %arg14[%c0_95, %c512], %154 {strides = array<i32>} : memref<16x1536xf32, #tpu.memory_space<vmem>>, vector<16x128xf32>,
    %c0_96 = arith.constant 0 : index
    %c280 = arith.constant 280 : index
    %156 = vector.load %arg1[%c0_96, %c280] : memref<16x784xf32, #tpu.memory_space<vmem>>, vector<16x84xf32>
    %c0_97 = arith.constant 0 : index
    %c0_98 = arith.constant 0 : index
    %157 = vector.load %arg2[%c0_97, %c0_98] : memref<84x208xf32, #tpu.memory_space<vmem>>, vector<84x208xf32>
    %cst_99 = arith.constant dense<0.000000e+00> : vector<16x208xf32>
    %158 = tpu.matmul %156, %157, %cst_99 {dimension_numbers = #tpu.dot_dimension_numbers<[1], [0], [0], [1], [0, 0, 1, 1], [], []>} : vector<16x84xf32>, vector<84x208xf32>, vector<16x208xf32> -> vector<16x208xf32>
    %c0_100 = arith.constant 0 : index
    %c0_101 = arith.constant 0 : index
    %159 = vector.load %arg3[%c0_100, %c0_101] : memref<1x208xf32, #tpu.memory_space<vmem>>, vector<1x208xf32>
    %160 = vector.broadcast %159 : vector<1x208xf32> to vector<16x208xf32>
    %161 = arith.mulf %158, %160 : vector<16x208xf32>
    %c0_102 = arith.constant 0 : index
    %c0_103 = arith.constant 0 : index
    %162 = vector.load %arg4[%c0_102, %c0_103] : memref<1x208xf32, #tpu.memory_space<vmem>>, vector<1x208xf32>
    %163 = vector.broadcast %162 : vector<1x208xf32> to vector<16x208xf32>
    %164 = arith.addf %161, %163 : vector<16x208xf32>
    %cst_104 = arith.constant 0.000000e+00 : f32
    %165 = vector.broadcast %cst_104 : f32 to vector<16x208xf32>
    %166 = arith.maximumf %164, %165 : vector<16x208xf32>
    %c0_105 = arith.constant 0 : index
    %c308 = arith.constant 308 : index
    %167 = vector.load %arg1[%c0_105, %c308] : memref<16x784xf32, #tpu.memory_space<vmem>>, vector<16x84xf32>
    %c0_106 = arith.constant 0 : index
    %c0_107 = arith.constant 0 : index
    %168 = vector.load %arg2[%c0_106, %c0_107] : memref<84x208xf32, #tpu.memory_space<vmem>>, vector<84x208xf32>
    %cst_108 = arith.constant dense<0.000000e+00> : vector<16x208xf32>
    %169 = tpu.matmul %167, %168, %cst_108 {dimension_numbers = #tpu.dot_dimension_numbers<[1], [0], [0], [1], [0, 0, 1, 1], [], []>} : vector<16x84xf32>, vector<84x208xf32>, vector<16x208xf32> -> vector<16x208xf32>
    %c0_109 = arith.constant 0 : index
    %c0_110 = arith.constant 0 : index
    %170 = vector.load %arg3[%c0_109, %c0_110] : memref<1x208xf32, #tpu.memory_space<vmem>>, vector<1x208xf32>
    %171 = vector.broadcast %170 : vector<1x208xf32> to vector<16x208xf32>
    %172 = arith.mulf %169, %171 : vector<16x208xf32>
    %c0_111 = arith.constant 0 : index
    %c0_112 = arith.constant 0 : index
    %173 = vector.load %arg4[%c0_111, %c0_112] : memref<1x208xf32, #tpu.memory_space<vmem>>, vector<1x208xf32>
    %174 = vector.broadcast %173 : vector<1x208xf32> to vector<16x208xf32>
    %175 = arith.addf %172, %174 : vector<16x208xf32>
    %cst_113 = arith.constant 0.000000e+00 : f32
    %176 = vector.broadcast %cst_113 : f32 to vector<16x208xf32>
    %177 = arith.maximumf %175, %176 : vector<16x208xf32>
    %178 = vector.extract_strided_slice %166 {offsets = [0, 0], sizes = [16, 104], strides = [1, 1]} : vector<16x208xf32> to vector<16x104xf32>
    %179 = vector.extract_strided_slice %166 {offsets = [0, 104], sizes = [16, 104], strides = [1, 1]} : vector<16x208xf32> to vector<16x104xf32>
    %180 = arith.maximumf %178, %179 : vector<16x104xf32>
    %181 = vector.extract_strided_slice %177 {offsets = [0, 0], sizes = [16, 104], strides = [1, 1]} : vector<16x208xf32> to vector<16x104xf32>
    %182 = vector.extract_strided_slice %177 {offsets = [0, 104], sizes = [16, 104], strides = [1, 1]} : vector<16x208xf32> to vector<16x104xf32>
    %183 = arith.maximumf %181, %182 : vector<16x104xf32>
    %184 = arith.maximumf %180, %183 : vector<16x104xf32>
    %185 = tpu.concatenate %184, %0 in 1 : vector<16x104xf32>, vector<16x24xf32> -> vector<16x128xf32>
    %c0_114 = arith.constant 0 : index
    %c640 = arith.constant 640 : index
    %186 = vector.load %arg14[%c0_114, %c640] : memref<16x1536xf32, #tpu.memory_space<vmem>>, vector<16x128xf32>
    tpu.vector_store %arg14[%c0_114, %c640], %185 {strides = array<i32>} : memref<16x1536xf32, #tpu.memory_space<vmem>>, vector<16x128xf32>,
    %c0_115 = arith.constant 0 : index
    %c336 = arith.constant 336 : index
    %187 = vector.load %arg1[%c0_115, %c336] : memref<16x784xf32, #tpu.memory_space<vmem>>, vector<16x84xf32>
    %c0_116 = arith.constant 0 : index
    %c0_117 = arith.constant 0 : index
    %188 = vector.load %arg2[%c0_116, %c0_117] : memref<84x208xf32, #tpu.memory_space<vmem>>, vector<84x208xf32>
    %cst_118 = arith.constant dense<0.000000e+00> : vector<16x208xf32>
    %189 = tpu.matmul %187, %188, %cst_118 {dimension_numbers = #tpu.dot_dimension_numbers<[1], [0], [0], [1], [0, 0, 1, 1], [], []>} : vector<16x84xf32>, vector<84x208xf32>, vector<16x208xf32> -> vector<16x208xf32>
    %c0_119 = arith.constant 0 : index
    %c0_120 = arith.constant 0 : index
    %190 = vector.load %arg3[%c0_119, %c0_120] : memref<1x208xf32, #tpu.memory_space<vmem>>, vector<1x208xf32>
    %191 = vector.broadcast %190 : vector<1x208xf32> to vector<16x208xf32>
    %192 = arith.mulf %189, %191 : vector<16x208xf32>
    %c0_121 = arith.constant 0 : index
    %c0_122 = arith.constant 0 : index
    %193 = vector.load %arg4[%c0_121, %c0_122] : memref<1x208xf32, #tpu.memory_space<vmem>>, vector<1x208xf32>
    %194 = vector.broadcast %193 : vector<1x208xf32> to vector<16x208xf32>
    %195 = arith.addf %192, %194 : vector<16x208xf32>
    %cst_123 = arith.constant 0.000000e+00 : f32
    %196 = vector.broadcast %cst_123 : f32 to vector<16x208xf32>
    %197 = arith.maximumf %195, %196 : vector<16x208xf32>
    %c0_124 = arith.constant 0 : index
    %c364 = arith.constant 364 : index
    %198 = vector.load %arg1[%c0_124, %c364] : memref<16x784xf32, #tpu.memory_space<vmem>>, vector<16x84xf32>
    %c0_125 = arith.constant 0 : index
    %c0_126 = arith.constant 0 : index
    %199 = vector.load %arg2[%c0_125, %c0_126] : memref<84x208xf32, #tpu.memory_space<vmem>>, vector<84x208xf32>
    %cst_127 = arith.constant dense<0.000000e+00> : vector<16x208xf32>
    %200 = tpu.matmul %198, %199, %cst_127 {dimension_numbers = #tpu.dot_dimension_numbers<[1], [0], [0], [1], [0, 0, 1, 1], [], []>} : vector<16x84xf32>, vector<84x208xf32>, vector<16x208xf32> -> vector<16x208xf32>
    %c0_128 = arith.constant 0 : index
    %c0_129 = arith.constant 0 : index
    %201 = vector.load %arg3[%c0_128, %c0_129] : memref<1x208xf32, #tpu.memory_space<vmem>>, vector<1x208xf32>
    %202 = vector.broadcast %201 : vector<1x208xf32> to vector<16x208xf32>
    %203 = arith.mulf %200, %202 : vector<16x208xf32>
    %c0_130 = arith.constant 0 : index
    %c0_131 = arith.constant 0 : index
    %204 = vector.load %arg4[%c0_130, %c0_131] : memref<1x208xf32, #tpu.memory_space<vmem>>, vector<1x208xf32>
    %205 = vector.broadcast %204 : vector<1x208xf32> to vector<16x208xf32>
    %206 = arith.addf %203, %205 : vector<16x208xf32>
    %cst_132 = arith.constant 0.000000e+00 : f32
    %207 = vector.broadcast %cst_132 : f32 to vector<16x208xf32>
    %208 = arith.maximumf %206, %207 : vector<16x208xf32>
    %209 = vector.extract_strided_slice %197 {offsets = [0, 0], sizes = [16, 104], strides = [1, 1]} : vector<16x208xf32> to vector<16x104xf32>
    %210 = vector.extract_strided_slice %197 {offsets = [0, 104], sizes = [16, 104], strides = [1, 1]} : vector<16x208xf32> to vector<16x104xf32>
    %211 = arith.maximumf %209, %210 : vector<16x104xf32>
    %212 = vector.extract_strided_slice %208 {offsets = [0, 0], sizes = [16, 104], strides = [1, 1]} : vector<16x208xf32> to vector<16x104xf32>
    %213 = vector.extract_strided_slice %208 {offsets = [0, 104], sizes = [16, 104], strides = [1, 1]} : vector<16x208xf32> to vector<16x104xf32>
    %214 = arith.maximumf %212, %213 : vector<16x104xf32>
    %215 = arith.maximumf %211, %214 : vector<16x104xf32>
    %216 = tpu.concatenate %215, %0 in 1 : vector<16x104xf32>, vector<16x24xf32> -> vector<16x128xf32>
    %c0_133 = arith.constant 0 : index
    %c768 = arith.constant 768 : index
    %217 = vector.load %arg14[%c0_133, %c768] : memref<16x1536xf32, #tpu.memory_space<vmem>>, vector<16x128xf32>
    tpu.vector_store %arg14[%c0_133, %c768], %216 {strides = array<i32>} : memref<16x1536xf32, #tpu.memory_space<vmem>>, vector<16x128xf32>,
    %c0_134 = arith.constant 0 : index
    %c392 = arith.constant 392 : index
    %218 = vector.load %arg1[%c0_134, %c392] : memref<16x784xf32, #tpu.memory_space<vmem>>, vector<16x84xf32>
    %c0_135 = arith.constant 0 : index
    %c0_136 = arith.constant 0 : index
    %219 = vector.load %arg2[%c0_135, %c0_136] : memref<84x208xf32, #tpu.memory_space<vmem>>, vector<84x208xf32>
    %cst_137 = arith.constant dense<0.000000e+00> : vector<16x208xf32>
    %220 = tpu.matmul %218, %219, %cst_137 {dimension_numbers = #tpu.dot_dimension_numbers<[1], [0], [0], [1], [0, 0, 1, 1], [], []>} : vector<16x84xf32>, vector<84x208xf32>, vector<16x208xf32> -> vector<16x208xf32>
    %c0_138 = arith.constant 0 : index
    %c0_139 = arith.constant 0 : index
    %221 = vector.load %arg3[%c0_138, %c0_139] : memref<1x208xf32, #tpu.memory_space<vmem>>, vector<1x208xf32>
    %222 = vector.broadcast %221 : vector<1x208xf32> to vector<16x208xf32>
    %223 = arith.mulf %220, %222 : vector<16x208xf32>
    %c0_140 = arith.constant 0 : index
    %c0_141 = arith.constant 0 : index
    %224 = vector.load %arg4[%c0_140, %c0_141] : memref<1x208xf32, #tpu.memory_space<vmem>>, vector<1x208xf32>
    %225 = vector.broadcast %224 : vector<1x208xf32> to vector<16x208xf32>
    %226 = arith.addf %223, %225 : vector<16x208xf32>
    %cst_142 = arith.constant 0.000000e+00 : f32
    %227 = vector.broadcast %cst_142 : f32 to vector<16x208xf32>
    %228 = arith.maximumf %226, %227 : vector<16x208xf32>
    %c0_143 = arith.constant 0 : index
    %c420 = arith.constant 420 : index
    %229 = vector.load %arg1[%c0_143, %c420] : memref<16x784xf32, #tpu.memory_space<vmem>>, vector<16x84xf32>
    %c0_144 = arith.constant 0 : index
    %c0_145 = arith.constant 0 : index
    %230 = vector.load %arg2[%c0_144, %c0_145] : memref<84x208xf32, #tpu.memory_space<vmem>>, vector<84x208xf32>
    %cst_146 = arith.constant dense<0.000000e+00> : vector<16x208xf32>
    %231 = tpu.matmul %229, %230, %cst_146 {dimension_numbers = #tpu.dot_dimension_numbers<[1], [0], [0], [1], [0, 0, 1, 1], [], []>} : vector<16x84xf32>, vector<84x208xf32>, vector<16x208xf32> -> vector<16x208xf32>
    %c0_147 = arith.constant 0 : index
    %c0_148 = arith.constant 0 : index
    %232 = vector.load %arg3[%c0_147, %c0_148] : memref<1x208xf32, #tpu.memory_space<vmem>>, vector<1x208xf32>
    %233 = vector.broadcast %232 : vector<1x208xf32> to vector<16x208xf32>
    %234 = arith.mulf %231, %233 : vector<16x208xf32>
    %c0_149 = arith.constant 0 : index
    %c0_150 = arith.constant 0 : index
    %235 = vector.load %arg4[%c0_149, %c0_150] : memref<1x208xf32, #tpu.memory_space<vmem>>, vector<1x208xf32>
    %236 = vector.broadcast %235 : vector<1x208xf32> to vector<16x208xf32>
    %237 = arith.addf %234, %236 : vector<16x208xf32>
    %cst_151 = arith.constant 0.000000e+00 : f32
    %238 = vector.broadcast %cst_151 : f32 to vector<16x208xf32>
    %239 = arith.maximumf %237, %238 : vector<16x208xf32>
    %240 = vector.extract_strided_slice %228 {offsets = [0, 0], sizes = [16, 104], strides = [1, 1]} : vector<16x208xf32> to vector<16x104xf32>
    %241 = vector.extract_strided_slice %228 {offsets = [0, 104], sizes = [16, 104], strides = [1, 1]} : vector<16x208xf32> to vector<16x104xf32>
    %242 = arith.maximumf %240, %241 : vector<16x104xf32>
    %243 = vector.extract_strided_slice %239 {offsets = [0, 0], sizes = [16, 104], strides = [1, 1]} : vector<16x208xf32> to vector<16x104xf32>
    %244 = vector.extract_strided_slice %239 {offsets = [0, 104], sizes = [16, 104], strides = [1, 1]} : vector<16x208xf32> to vector<16x104xf32>
    %245 = arith.maximumf %243, %244 : vector<16x104xf32>
    %246 = arith.maximumf %242, %245 : vector<16x104xf32>
    %247 = tpu.concatenate %246, %0 in 1 : vector<16x104xf32>, vector<16x24xf32> -> vector<16x128xf32>
    %c0_152 = arith.constant 0 : index
    %c896 = arith.constant 896 : index
    %248 = vector.load %arg14[%c0_152, %c896] : memref<16x1536xf32, #tpu.memory_space<vmem>>, vector<16x128xf32>
    tpu.vector_store %arg14[%c0_152, %c896], %247 {strides = array<i32>} : memref<16x1536xf32, #tpu.memory_space<vmem>>, vector<16x128xf32>,
    %c0_153 = arith.constant 0 : index
    %c448 = arith.constant 448 : index
    %249 = vector.load %arg1[%c0_153, %c448] : memref<16x784xf32, #tpu.memory_space<vmem>>, vector<16x84xf32>
    %c0_154 = arith.constant 0 : index
    %c0_155 = arith.constant 0 : index
    %250 = vector.load %arg2[%c0_154, %c0_155] : memref<84x208xf32, #tpu.memory_space<vmem>>, vector<84x208xf32>
    %cst_156 = arith.constant dense<0.000000e+00> : vector<16x208xf32>
    %251 = tpu.matmul %249, %250, %cst_156 {dimension_numbers = #tpu.dot_dimension_numbers<[1], [0], [0], [1], [0, 0, 1, 1], [], []>} : vector<16x84xf32>, vector<84x208xf32>, vector<16x208xf32> -> vector<16x208xf32>
    %c0_157 = arith.constant 0 : index
    %c0_158 = arith.constant 0 : index
    %252 = vector.load %arg3[%c0_157, %c0_158] : memref<1x208xf32, #tpu.memory_space<vmem>>, vector<1x208xf32>
    %253 = vector.broadcast %252 : vector<1x208xf32> to vector<16x208xf32>
    %254 = arith.mulf %251, %253 : vector<16x208xf32>
    %c0_159 = arith.constant 0 : index
    %c0_160 = arith.constant 0 : index
    %255 = vector.load %arg4[%c0_159, %c0_160] : memref<1x208xf32, #tpu.memory_space<vmem>>, vector<1x208xf32>
    %256 = vector.broadcast %255 : vector<1x208xf32> to vector<16x208xf32>
    %257 = arith.addf %254, %256 : vector<16x208xf32>
    %cst_161 = arith.constant 0.000000e+00 : f32
    %258 = vector.broadcast %cst_161 : f32 to vector<16x208xf32>
    %259 = arith.maximumf %257, %258 : vector<16x208xf32>
    %c0_162 = arith.constant 0 : index
    %c476 = arith.constant 476 : index
    %260 = vector.load %arg1[%c0_162, %c476] : memref<16x784xf32, #tpu.memory_space<vmem>>, vector<16x84xf32>
    %c0_163 = arith.constant 0 : index
    %c0_164 = arith.constant 0 : index
    %261 = vector.load %arg2[%c0_163, %c0_164] : memref<84x208xf32, #tpu.memory_space<vmem>>, vector<84x208xf32>
    %cst_165 = arith.constant dense<0.000000e+00> : vector<16x208xf32>
    %262 = tpu.matmul %260, %261, %cst_165 {dimension_numbers = #tpu.dot_dimension_numbers<[1], [0], [0], [1], [0, 0, 1, 1], [], []>} : vector<16x84xf32>, vector<84x208xf32>, vector<16x208xf32> -> vector<16x208xf32>
    %c0_166 = arith.constant 0 : index
    %c0_167 = arith.constant 0 : index
    %263 = vector.load %arg3[%c0_166, %c0_167] : memref<1x208xf32, #tpu.memory_space<vmem>>, vector<1x208xf32>
    %264 = vector.broadcast %263 : vector<1x208xf32> to vector<16x208xf32>
    %265 = arith.mulf %262, %264 : vector<16x208xf32>
    %c0_168 = arith.constant 0 : index
    %c0_169 = arith.constant 0 : index
    %266 = vector.load %arg4[%c0_168, %c0_169] : memref<1x208xf32, #tpu.memory_space<vmem>>, vector<1x208xf32>
    %267 = vector.broadcast %266 : vector<1x208xf32> to vector<16x208xf32>
    %268 = arith.addf %265, %267 : vector<16x208xf32>
    %cst_170 = arith.constant 0.000000e+00 : f32
    %269 = vector.broadcast %cst_170 : f32 to vector<16x208xf32>
    %270 = arith.maximumf %268, %269 : vector<16x208xf32>
    %271 = vector.extract_strided_slice %259 {offsets = [0, 0], sizes = [16, 104], strides = [1, 1]} : vector<16x208xf32> to vector<16x104xf32>
    %272 = vector.extract_strided_slice %259 {offsets = [0, 104], sizes = [16, 104], strides = [1, 1]} : vector<16x208xf32> to vector<16x104xf32>
    %273 = arith.maximumf %271, %272 : vector<16x104xf32>
    %274 = vector.extract_strided_slice %270 {offsets = [0, 0], sizes = [16, 104], strides = [1, 1]} : vector<16x208xf32> to vector<16x104xf32>
    %275 = vector.extract_strided_slice %270 {offsets = [0, 104], sizes = [16, 104], strides = [1, 1]} : vector<16x208xf32> to vector<16x104xf32>
    %276 = arith.maximumf %274, %275 : vector<16x104xf32>
    %277 = arith.maximumf %273, %276 : vector<16x104xf32>
    %278 = tpu.concatenate %277, %0 in 1 : vector<16x104xf32>, vector<16x24xf32> -> vector<16x128xf32>
    %c0_171 = arith.constant 0 : index
    %c1024 = arith.constant 1024 : index
    %279 = vector.load %arg14[%c0_171, %c1024] : memref<16x1536xf32, #tpu.memory_space<vmem>>, vector<16x128xf32>
    tpu.vector_store %arg14[%c0_171, %c1024], %278 {strides = array<i32>} : memref<16x1536xf32, #tpu.memory_space<vmem>>, vector<16x128xf32>,
    %c0_172 = arith.constant 0 : index
    %c504 = arith.constant 504 : index
    %280 = vector.load %arg1[%c0_172, %c504] : memref<16x784xf32, #tpu.memory_space<vmem>>, vector<16x84xf32>
    %c0_173 = arith.constant 0 : index
    %c0_174 = arith.constant 0 : index
    %281 = vector.load %arg2[%c0_173, %c0_174] : memref<84x208xf32, #tpu.memory_space<vmem>>, vector<84x208xf32>
    %cst_175 = arith.constant dense<0.000000e+00> : vector<16x208xf32>
    %282 = tpu.matmul %280, %281, %cst_175 {dimension_numbers = #tpu.dot_dimension_numbers<[1], [0], [0], [1], [0, 0, 1, 1], [], []>} : vector<16x84xf32>, vector<84x208xf32>, vector<16x208xf32> -> vector<16x208xf32>
    %c0_176 = arith.constant 0 : index
    %c0_177 = arith.constant 0 : index
    %283 = vector.load %arg3[%c0_176, %c0_177] : memref<1x208xf32, #tpu.memory_space<vmem>>, vector<1x208xf32>
    %284 = vector.broadcast %283 : vector<1x208xf32> to vector<16x208xf32>
    %285 = arith.mulf %282, %284 : vector<16x208xf32>
    %c0_178 = arith.constant 0 : index
    %c0_179 = arith.constant 0 : index
    %286 = vector.load %arg4[%c0_178, %c0_179] : memref<1x208xf32, #tpu.memory_space<vmem>>, vector<1x208xf32>
    %287 = vector.broadcast %286 : vector<1x208xf32> to vector<16x208xf32>
    %288 = arith.addf %285, %287 : vector<16x208xf32>
    %cst_180 = arith.constant 0.000000e+00 : f32
    %289 = vector.broadcast %cst_180 : f32 to vector<16x208xf32>
    %290 = arith.maximumf %288, %289 : vector<16x208xf32>
    %c0_181 = arith.constant 0 : index
    %c532 = arith.constant 532 : index
    %291 = vector.load %arg1[%c0_181, %c532] : memref<16x784xf32, #tpu.memory_space<vmem>>, vector<16x84xf32>
    %c0_182 = arith.constant 0 : index
    %c0_183 = arith.constant 0 : index
    %292 = vector.load %arg2[%c0_182, %c0_183] : memref<84x208xf32, #tpu.memory_space<vmem>>, vector<84x208xf32>
    %cst_184 = arith.constant dense<0.000000e+00> : vector<16x208xf32>
    %293 = tpu.matmul %291, %292, %cst_184 {dimension_numbers = #tpu.dot_dimension_numbers<[1], [0], [0], [1], [0, 0, 1, 1], [], []>} : vector<16x84xf32>, vector<84x208xf32>, vector<16x208xf32> -> vector<16x208xf32>
    %c0_185 = arith.constant 0 : index
    %c0_186 = arith.constant 0 : index
    %294 = vector.load %arg3[%c0_185, %c0_186] : memref<1x208xf32, #tpu.memory_space<vmem>>, vector<1x208xf32>
    %295 = vector.broadcast %294 : vector<1x208xf32> to vector<16x208xf32>
    %296 = arith.mulf %293, %295 : vector<16x208xf32>
    %c0_187 = arith.constant 0 : index
    %c0_188 = arith.constant 0 : index
    %297 = vector.load %arg4[%c0_187, %c0_188] : memref<1x208xf32, #tpu.memory_space<vmem>>, vector<1x208xf32>
    %298 = vector.broadcast %297 : vector<1x208xf32> to vector<16x208xf32>
    %299 = arith.addf %296, %298 : vector<16x208xf32>
    %cst_189 = arith.constant 0.000000e+00 : f32
    %300 = vector.broadcast %cst_189 : f32 to vector<16x208xf32>
    %301 = arith.maximumf %299, %300 : vector<16x208xf32>
    %302 = vector.extract_strided_slice %290 {offsets = [0, 0], sizes = [16, 104], strides = [1, 1]} : vector<16x208xf32> to vector<16x104xf32>
    %303 = vector.extract_strided_slice %290 {offsets = [0, 104], sizes = [16, 104], strides = [1, 1]} : vector<16x208xf32> to vector<16x104xf32>
    %304 = arith.maximumf %302, %303 : vector<16x104xf32>
    %305 = vector.extract_strided_slice %301 {offsets = [0, 0], sizes = [16, 104], strides = [1, 1]} : vector<16x208xf32> to vector<16x104xf32>
    %306 = vector.extract_strided_slice %301 {offsets = [0, 104], sizes = [16, 104], strides = [1, 1]} : vector<16x208xf32> to vector<16x104xf32>
    %307 = arith.maximumf %305, %306 : vector<16x104xf32>
    %308 = arith.maximumf %304, %307 : vector<16x104xf32>
    %309 = tpu.concatenate %308, %0 in 1 : vector<16x104xf32>, vector<16x24xf32> -> vector<16x128xf32>
    %c0_190 = arith.constant 0 : index
    %c1152 = arith.constant 1152 : index
    %310 = vector.load %arg14[%c0_190, %c1152] : memref<16x1536xf32, #tpu.memory_space<vmem>>, vector<16x128xf32>
    tpu.vector_store %arg14[%c0_190, %c1152], %309 {strides = array<i32>} : memref<16x1536xf32, #tpu.memory_space<vmem>>, vector<16x128xf32>,
    %c0_191 = arith.constant 0 : index
    %c560 = arith.constant 560 : index
    %311 = vector.load %arg1[%c0_191, %c560] : memref<16x784xf32, #tpu.memory_space<vmem>>, vector<16x84xf32>
    %c0_192 = arith.constant 0 : index
    %c0_193 = arith.constant 0 : index
    %312 = vector.load %arg2[%c0_192, %c0_193] : memref<84x208xf32, #tpu.memory_space<vmem>>, vector<84x208xf32>
    %cst_194 = arith.constant dense<0.000000e+00> : vector<16x208xf32>
    %313 = tpu.matmul %311, %312, %cst_194 {dimension_numbers = #tpu.dot_dimension_numbers<[1], [0], [0], [1], [0, 0, 1, 1], [], []>} : vector<16x84xf32>, vector<84x208xf32>, vector<16x208xf32> -> vector<16x208xf32>
    %c0_195 = arith.constant 0 : index
    %c0_196 = arith.constant 0 : index
    %314 = vector.load %arg3[%c0_195, %c0_196] : memref<1x208xf32, #tpu.memory_space<vmem>>, vector<1x208xf32>
    %315 = vector.broadcast %314 : vector<1x208xf32> to vector<16x208xf32>
    %316 = arith.mulf %313, %315 : vector<16x208xf32>
    %c0_197 = arith.constant 0 : index
    %c0_198 = arith.constant 0 : index
    %317 = vector.load %arg4[%c0_197, %c0_198] : memref<1x208xf32, #tpu.memory_space<vmem>>, vector<1x208xf32>
    %318 = vector.broadcast %317 : vector<1x208xf32> to vector<16x208xf32>
    %319 = arith.addf %316, %318 : vector<16x208xf32>
    %cst_199 = arith.constant 0.000000e+00 : f32
    %320 = vector.broadcast %cst_199 : f32 to vector<16x208xf32>
    %321 = arith.maximumf %319, %320 : vector<16x208xf32>
    %c0_200 = arith.constant 0 : index
    %c588 = arith.constant 588 : index
    %322 = vector.load %arg1[%c0_200, %c588] : memref<16x784xf32, #tpu.memory_space<vmem>>, vector<16x84xf32>
    %c0_201 = arith.constant 0 : index
    %c0_202 = arith.constant 0 : index
    %323 = vector.load %arg2[%c0_201, %c0_202] : memref<84x208xf32, #tpu.memory_space<vmem>>, vector<84x208xf32>
    %cst_203 = arith.constant dense<0.000000e+00> : vector<16x208xf32>
    %324 = tpu.matmul %322, %323, %cst_203 {dimension_numbers = #tpu.dot_dimension_numbers<[1], [0], [0], [1], [0, 0, 1, 1], [], []>} : vector<16x84xf32>, vector<84x208xf32>, vector<16x208xf32> -> vector<16x208xf32>
    %c0_204 = arith.constant 0 : index
    %c0_205 = arith.constant 0 : index
    %325 = vector.load %arg3[%c0_204, %c0_205] : memref<1x208xf32, #tpu.memory_space<vmem>>, vector<1x208xf32>
    %326 = vector.broadcast %325 : vector<1x208xf32> to vector<16x208xf32>
    %327 = arith.mulf %324, %326 : vector<16x208xf32>
    %c0_206 = arith.constant 0 : index
    %c0_207 = arith.constant 0 : index
    %328 = vector.load %arg4[%c0_206, %c0_207] : memref<1x208xf32, #tpu.memory_space<vmem>>, vector<1x208xf32>
    %329 = vector.broadcast %328 : vector<1x208xf32> to vector<16x208xf32>
    %330 = arith.addf %327, %329 : vector<16x208xf32>
    %cst_208 = arith.constant 0.000000e+00 : f32
    %331 = vector.broadcast %cst_208 : f32 to vector<16x208xf32>
    %332 = arith.maximumf %330, %331 : vector<16x208xf32>
    %333 = vector.extract_strided_slice %321 {offsets = [0, 0], sizes = [16, 104], strides = [1, 1]} : vector<16x208xf32> to vector<16x104xf32>
    %334 = vector.extract_strided_slice %321 {offsets = [0, 104], sizes = [16, 104], strides = [1, 1]} : vector<16x208xf32> to vector<16x104xf32>
    %335 = arith.maximumf %333, %334 : vector<16x104xf32>
    %336 = vector.extract_strided_slice %332 {offsets = [0, 0], sizes = [16, 104], strides = [1, 1]} : vector<16x208xf32> to vector<16x104xf32>
    %337 = vector.extract_strided_slice %332 {offsets = [0, 104], sizes = [16, 104], strides = [1, 1]} : vector<16x208xf32> to vector<16x104xf32>
    %338 = arith.maximumf %336, %337 : vector<16x104xf32>
    %339 = arith.maximumf %335, %338 : vector<16x104xf32>
    %340 = tpu.concatenate %339, %0 in 1 : vector<16x104xf32>, vector<16x24xf32> -> vector<16x128xf32>
    %c0_209 = arith.constant 0 : index
    %c1280 = arith.constant 1280 : index
    %341 = vector.load %arg14[%c0_209, %c1280] : memref<16x1536xf32, #tpu.memory_space<vmem>>, vector<16x128xf32>
    tpu.vector_store %arg14[%c0_209, %c1280], %340 {strides = array<i32>} : memref<16x1536xf32, #tpu.memory_space<vmem>>, vector<16x128xf32>,
    %c0_210 = arith.constant 0 : index
    %c616 = arith.constant 616 : index
    %342 = vector.load %arg1[%c0_210, %c616] : memref<16x784xf32, #tpu.memory_space<vmem>>, vector<16x84xf32>
    %c0_211 = arith.constant 0 : index
    %c0_212 = arith.constant 0 : index
    %343 = vector.load %arg2[%c0_211, %c0_212] : memref<84x208xf32, #tpu.memory_space<vmem>>, vector<84x208xf32>
    %cst_213 = arith.constant dense<0.000000e+00> : vector<16x208xf32>
    %344 = tpu.matmul %342, %343, %cst_213 {dimension_numbers = #tpu.dot_dimension_numbers<[1], [0], [0], [1], [0, 0, 1, 1], [], []>} : vector<16x84xf32>, vector<84x208xf32>, vector<16x208xf32> -> vector<16x208xf32>
    %c0_214 = arith.constant 0 : index
    %c0_215 = arith.constant 0 : index
    %345 = vector.load %arg3[%c0_214, %c0_215] : memref<1x208xf32, #tpu.memory_space<vmem>>, vector<1x208xf32>
    %346 = vector.broadcast %345 : vector<1x208xf32> to vector<16x208xf32>
    %347 = arith.mulf %344, %346 : vector<16x208xf32>
    %c0_216 = arith.constant 0 : index
    %c0_217 = arith.constant 0 : index
    %348 = vector.load %arg4[%c0_216, %c0_217] : memref<1x208xf32, #tpu.memory_space<vmem>>, vector<1x208xf32>
    %349 = vector.broadcast %348 : vector<1x208xf32> to vector<16x208xf32>
    %350 = arith.addf %347, %349 : vector<16x208xf32>
    %cst_218 = arith.constant 0.000000e+00 : f32
    %351 = vector.broadcast %cst_218 : f32 to vector<16x208xf32>
    %352 = arith.maximumf %350, %351 : vector<16x208xf32>
    %c0_219 = arith.constant 0 : index
    %c644 = arith.constant 644 : index
    %353 = vector.load %arg1[%c0_219, %c644] : memref<16x784xf32, #tpu.memory_space<vmem>>, vector<16x84xf32>
    %c0_220 = arith.constant 0 : index
    %c0_221 = arith.constant 0 : index
    %354 = vector.load %arg2[%c0_220, %c0_221] : memref<84x208xf32, #tpu.memory_space<vmem>>, vector<84x208xf32>
    %cst_222 = arith.constant dense<0.000000e+00> : vector<16x208xf32>
    %355 = tpu.matmul %353, %354, %cst_222 {dimension_numbers = #tpu.dot_dimension_numbers<[1], [0], [0], [1], [0, 0, 1, 1], [], []>} : vector<16x84xf32>, vector<84x208xf32>, vector<16x208xf32> -> vector<16x208xf32>
    %c0_223 = arith.constant 0 : index
    %c0_224 = arith.constant 0 : index
    %356 = vector.load %arg3[%c0_223, %c0_224] : memref<1x208xf32, #tpu.memory_space<vmem>>, vector<1x208xf32>
    %357 = vector.broadcast %356 : vector<1x208xf32> to vector<16x208xf32>
    %358 = arith.mulf %355, %357 : vector<16x208xf32>
    %c0_225 = arith.constant 0 : index
    %c0_226 = arith.constant 0 : index
    %359 = vector.load %arg4[%c0_225, %c0_226] : memref<1x208xf32, #tpu.memory_space<vmem>>, vector<1x208xf32>
    %360 = vector.broadcast %359 : vector<1x208xf32> to vector<16x208xf32>
    %361 = arith.addf %358, %360 : vector<16x208xf32>
    %cst_227 = arith.constant 0.000000e+00 : f32
    %362 = vector.broadcast %cst_227 : f32 to vector<16x208xf32>
    %363 = arith.maximumf %361, %362 : vector<16x208xf32>
    %364 = vector.extract_strided_slice %352 {offsets = [0, 0], sizes = [16, 104], strides = [1, 1]} : vector<16x208xf32> to vector<16x104xf32>
    %365 = vector.extract_strided_slice %352 {offsets = [0, 104], sizes = [16, 104], strides = [1, 1]} : vector<16x208xf32> to vector<16x104xf32>
    %366 = arith.maximumf %364, %365 : vector<16x104xf32>
    %367 = vector.extract_strided_slice %363 {offsets = [0, 0], sizes = [16, 104], strides = [1, 1]} : vector<16x208xf32> to vector<16x104xf32>
    %368 = vector.extract_strided_slice %363 {offsets = [0, 104], sizes = [16, 104], strides = [1, 1]} : vector<16x208xf32> to vector<16x104xf32>
    %369 = arith.maximumf %367, %368 : vector<16x104xf32>
    %370 = arith.maximumf %366, %369 : vector<16x104xf32>
    %371 = tpu.concatenate %370, %0 in 1 : vector<16x104xf32>, vector<16x24xf32> -> vector<16x128xf32>
    %c0_228 = arith.constant 0 : index
    %c1408 = arith.constant 1408 : index
    %372 = vector.load %arg14[%c0_228, %c1408] : memref<16x1536xf32, #tpu.memory_space<vmem>>, vector<16x128xf32>
    tpu.vector_store %arg14[%c0_228, %c1408], %371 {strides = array<i32>} : memref<16x1536xf32, #tpu.memory_space<vmem>>, vector<16x128xf32>,
    %cst_229 = arith.constant 0.000000e+00 : f32
    %373 = vector.broadcast %cst_229 : f32 to vector<16x64xf32>
    %c0_230 = arith.constant 0 : index
    %c0_231 = arith.constant 0 : index
    %374 = vector.load %arg14[%c0_230, %c0_231] : memref<16x1536xf32, #tpu.memory_space<vmem>>, vector<16x384xf32>
    %c0_232 = arith.constant 0 : index
    %c0_233 = arith.constant 0 : index
    %375 = vector.load %arg5[%c0_232, %c0_233] : memref<384x160xf32, #tpu.memory_space<vmem>>, vector<384x160xf32>
    %cst_234 = arith.constant dense<0.000000e+00> : vector<16x160xf32>
    %376 = tpu.matmul %374, %375, %cst_234 {dimension_numbers = #tpu.dot_dimension_numbers<[1], [0], [0], [1], [0, 0, 1, 1], [], []>} : vector<16x384xf32>, vector<384x160xf32>, vector<16x160xf32> -> vector<16x160xf32>
    %c0_235 = arith.constant 0 : index
    %c0_236 = arith.constant 0 : index
    %377 = vector.load %arg6[%c0_235, %c0_236] : memref<1x160xf32, #tpu.memory_space<vmem>>, vector<1x160xf32>
    %378 = vector.broadcast %377 : vector<1x160xf32> to vector<16x160xf32>
    %379 = arith.mulf %376, %378 : vector<16x160xf32>
    %c0_237 = arith.constant 0 : index
    %c0_238 = arith.constant 0 : index
    %380 = vector.load %arg7[%c0_237, %c0_238] : memref<1x160xf32, #tpu.memory_space<vmem>>, vector<1x160xf32>
    %381 = vector.broadcast %380 : vector<1x160xf32> to vector<16x160xf32>
    %382 = arith.addf %379, %381 : vector<16x160xf32>
    %cst_239 = arith.constant 0.000000e+00 : f32
    %383 = vector.broadcast %cst_239 : f32 to vector<16x160xf32>
    %384 = arith.maximumf %382, %383 : vector<16x160xf32>
    %c0_240 = arith.constant 0 : index
    %c128_241 = arith.constant 128 : index
    %385 = vector.load %arg14[%c0_240, %c128_241] : memref<16x1536xf32, #tpu.memory_space<vmem>>, vector<16x384xf32>
    %c0_242 = arith.constant 0 : index
    %c0_243 = arith.constant 0 : index
    %386 = vector.load %arg5[%c0_242, %c0_243] : memref<384x160xf32, #tpu.memory_space<vmem>>, vector<384x160xf32>
    %cst_244 = arith.constant dense<0.000000e+00> : vector<16x160xf32>
    %387 = tpu.matmul %385, %386, %cst_244 {dimension_numbers = #tpu.dot_dimension_numbers<[1], [0], [0], [1], [0, 0, 1, 1], [], []>} : vector<16x384xf32>, vector<384x160xf32>, vector<16x160xf32> -> vector<16x160xf32>
    %c0_245 = arith.constant 0 : index
    %c0_246 = arith.constant 0 : index
    %388 = vector.load %arg6[%c0_245, %c0_246] : memref<1x160xf32, #tpu.memory_space<vmem>>, vector<1x160xf32>
    %389 = vector.broadcast %388 : vector<1x160xf32> to vector<16x160xf32>
    %390 = arith.mulf %387, %389 : vector<16x160xf32>
    %c0_247 = arith.constant 0 : index
    %c0_248 = arith.constant 0 : index
    %391 = vector.load %arg7[%c0_247, %c0_248] : memref<1x160xf32, #tpu.memory_space<vmem>>, vector<1x160xf32>
    %392 = vector.broadcast %391 : vector<1x160xf32> to vector<16x160xf32>
    %393 = arith.addf %390, %392 : vector<16x160xf32>
    %cst_249 = arith.constant 0.000000e+00 : f32
    %394 = vector.broadcast %cst_249 : f32 to vector<16x160xf32>
    %395 = arith.maximumf %393, %394 : vector<16x160xf32>
    %396 = vector.extract_strided_slice %384 {offsets = [0, 0], sizes = [16, 80], strides = [1, 1]} : vector<16x160xf32> to vector<16x80xf32>
    %397 = vector.extract_strided_slice %384 {offsets = [0, 80], sizes = [16, 80], strides = [1, 1]} : vector<16x160xf32> to vector<16x80xf32>
    %398 = arith.maximumf %396, %397 : vector<16x80xf32>
    %399 = vector.extract_strided_slice %395 {offsets = [0, 0], sizes = [16, 80], strides = [1, 1]} : vector<16x160xf32> to vector<16x80xf32>
    %400 = vector.extract_strided_slice %395 {offsets = [0, 80], sizes = [16, 80], strides = [1, 1]} : vector<16x160xf32> to vector<16x80xf32>
    %401 = arith.maximumf %399, %400 : vector<16x80xf32>
    %402 = arith.maximumf %398, %401 : vector<16x80xf32>
    %c0_250 = arith.constant 0 : index
    %c0_251 = arith.constant 0 : index
    %c0_252 = arith.constant 0 : index
    %403 = vector.load %arg8[%c0_250, %c0_251, %c0_252] : memref<5x80x64xf32, #tpu.memory_space<vmem>>, vector<1x80x64xf32>
    %404 = vector.shape_cast %403 : vector<1x80x64xf32> to vector<80x64xf32>
    %cst_253 = arith.constant dense<0.000000e+00> : vector<16x64xf32>
    %405 = tpu.matmul %402, %404, %cst_253 {dimension_numbers = #tpu.dot_dimension_numbers<[1], [0], [0], [1], [0, 0, 1, 1], [], []>} : vector<16x80xf32>, vector<80x64xf32>, vector<16x64xf32> -> vector<16x64xf32>
    %406 = arith.addf %373, %405 : vector<16x64xf32>
    %c0_254 = arith.constant 0 : index
    %c256_255 = arith.constant 256 : index
    %407 = vector.load %arg14[%c0_254, %c256_255] : memref<16x1536xf32, #tpu.memory_space<vmem>>, vector<16x384xf32>
    %c0_256 = arith.constant 0 : index
    %c0_257 = arith.constant 0 : index
    %408 = vector.load %arg5[%c0_256, %c0_257] : memref<384x160xf32, #tpu.memory_space<vmem>>, vector<384x160xf32>
    %cst_258 = arith.constant dense<0.000000e+00> : vector<16x160xf32>
    %409 = tpu.matmul %407, %408, %cst_258 {dimension_numbers = #tpu.dot_dimension_numbers<[1], [0], [0], [1], [0, 0, 1, 1], [], []>} : vector<16x384xf32>, vector<384x160xf32>, vector<16x160xf32> -> vector<16x160xf32>
    %c0_259 = arith.constant 0 : index
    %c0_260 = arith.constant 0 : index
    %410 = vector.load %arg6[%c0_259, %c0_260] : memref<1x160xf32, #tpu.memory_space<vmem>>, vector<1x160xf32>
    %411 = vector.broadcast %410 : vector<1x160xf32> to vector<16x160xf32>
    %412 = arith.mulf %409, %411 : vector<16x160xf32>
    %c0_261 = arith.constant 0 : index
    %c0_262 = arith.constant 0 : index
    %413 = vector.load %arg7[%c0_261, %c0_262] : memref<1x160xf32, #tpu.memory_space<vmem>>, vector<1x160xf32>
    %414 = vector.broadcast %413 : vector<1x160xf32> to vector<16x160xf32>
    %415 = arith.addf %412, %414 : vector<16x160xf32>
    %cst_263 = arith.constant 0.000000e+00 : f32
    %416 = vector.broadcast %cst_263 : f32 to vector<16x160xf32>
    %417 = arith.maximumf %415, %416 : vector<16x160xf32>
    %c0_264 = arith.constant 0 : index
    %c384_265 = arith.constant 384 : index
    %418 = vector.load %arg14[%c0_264, %c384_265] : memref<16x1536xf32, #tpu.memory_space<vmem>>, vector<16x384xf32>
    %c0_266 = arith.constant 0 : index
    %c0_267 = arith.constant 0 : index
    %419 = vector.load %arg5[%c0_266, %c0_267] : memref<384x160xf32, #tpu.memory_space<vmem>>, vector<384x160xf32>
    %cst_268 = arith.constant dense<0.000000e+00> : vector<16x160xf32>
    %420 = tpu.matmul %418, %419, %cst_268 {dimension_numbers = #tpu.dot_dimension_numbers<[1], [0], [0], [1], [0, 0, 1, 1], [], []>} : vector<16x384xf32>, vector<384x160xf32>, vector<16x160xf32> -> vector<16x160xf32>
    %c0_269 = arith.constant 0 : index
    %c0_270 = arith.constant 0 : index
    %421 = vector.load %arg6[%c0_269, %c0_270] : memref<1x160xf32, #tpu.memory_space<vmem>>, vector<1x160xf32>
    %422 = vector.broadcast %421 : vector<1x160xf32> to vector<16x160xf32>
    %423 = arith.mulf %420, %422 : vector<16x160xf32>
    %c0_271 = arith.constant 0 : index
    %c0_272 = arith.constant 0 : index
    %424 = vector.load %arg7[%c0_271, %c0_272] : memref<1x160xf32, #tpu.memory_space<vmem>>, vector<1x160xf32>
    %425 = vector.broadcast %424 : vector<1x160xf32> to vector<16x160xf32>
    %426 = arith.addf %423, %425 : vector<16x160xf32>
    %cst_273 = arith.constant 0.000000e+00 : f32
    %427 = vector.broadcast %cst_273 : f32 to vector<16x160xf32>
    %428 = arith.maximumf %426, %427 : vector<16x160xf32>
    %429 = vector.extract_strided_slice %417 {offsets = [0, 0], sizes = [16, 80], strides = [1, 1]} : vector<16x160xf32> to vector<16x80xf32>
    %430 = vector.extract_strided_slice %417 {offsets = [0, 80], sizes = [16, 80], strides = [1, 1]} : vector<16x160xf32> to vector<16x80xf32>
    %431 = arith.maximumf %429, %430 : vector<16x80xf32>
    %432 = vector.extract_strided_slice %428 {offsets = [0, 0], sizes = [16, 80], strides = [1, 1]} : vector<16x160xf32> to vector<16x80xf32>
    %433 = vector.extract_strided_slice %428 {offsets = [0, 80], sizes = [16, 80], strides = [1, 1]} : vector<16x160xf32> to vector<16x80xf32>
    %434 = arith.maximumf %432, %433 : vector<16x80xf32>
    %435 = arith.maximumf %431, %434 : vector<16x80xf32>
    %c1 = arith.constant 1 : index
    %c0_274 = arith.constant 0 : index
    %c0_275 = arith.constant 0 : index
    %436 = vector.load %arg8[%c1, %c0_274, %c0_275] : memref<5x80x64xf32, #tpu.memory_space<vmem>>, vector<1x80x64xf32>
    %437 = vector.shape_cast %436 : vector<1x80x64xf32> to vector<80x64xf32>
    %cst_276 = arith.constant dense<0.000000e+00> : vector<16x64xf32>
    %438 = tpu.matmul %435, %437, %cst_276 {dimension_numbers = #tpu.dot_dimension_numbers<[1], [0], [0], [1], [0, 0, 1, 1], [], []>} : vector<16x80xf32>, vector<80x64xf32>, vector<16x64xf32> -> vector<16x64xf32>
    %439 = arith.addf %406, %438 : vector<16x64xf32>
    %c0_277 = arith.constant 0 : index
    %c512_278 = arith.constant 512 : index
    %440 = vector.load %arg14[%c0_277, %c512_278] : memref<16x1536xf32, #tpu.memory_space<vmem>>, vector<16x384xf32>
    %c0_279 = arith.constant 0 : index
    %c0_280 = arith.constant 0 : index
    %441 = vector.load %arg5[%c0_279, %c0_280] : memref<384x160xf32, #tpu.memory_space<vmem>>, vector<384x160xf32>
    %cst_281 = arith.constant dense<0.000000e+00> : vector<16x160xf32>
    %442 = tpu.matmul %440, %441, %cst_281 {dimension_numbers = #tpu.dot_dimension_numbers<[1], [0], [0], [1], [0, 0, 1, 1], [], []>} : vector<16x384xf32>, vector<384x160xf32>, vector<16x160xf32> -> vector<16x160xf32>
    %c0_282 = arith.constant 0 : index
    %c0_283 = arith.constant 0 : index
    %443 = vector.load %arg6[%c0_282, %c0_283] : memref<1x160xf32, #tpu.memory_space<vmem>>, vector<1x160xf32>
    %444 = vector.broadcast %443 : vector<1x160xf32> to vector<16x160xf32>
    %445 = arith.mulf %442, %444 : vector<16x160xf32>
    %c0_284 = arith.constant 0 : index
    %c0_285 = arith.constant 0 : index
    %446 = vector.load %arg7[%c0_284, %c0_285] : memref<1x160xf32, #tpu.memory_space<vmem>>, vector<1x160xf32>
    %447 = vector.broadcast %446 : vector<1x160xf32> to vector<16x160xf32>
    %448 = arith.addf %445, %447 : vector<16x160xf32>
    %cst_286 = arith.constant 0.000000e+00 : f32
    %449 = vector.broadcast %cst_286 : f32 to vector<16x160xf32>
    %450 = arith.maximumf %448, %449 : vector<16x160xf32>
    %c0_287 = arith.constant 0 : index
    %c640_288 = arith.constant 640 : index
    %451 = vector.load %arg14[%c0_287, %c640_288] : memref<16x1536xf32, #tpu.memory_space<vmem>>, vector<16x384xf32>
    %c0_289 = arith.constant 0 : index
    %c0_290 = arith.constant 0 : index
    %452 = vector.load %arg5[%c0_289, %c0_290] : memref<384x160xf32, #tpu.memory_space<vmem>>, vector<384x160xf32>
    %cst_291 = arith.constant dense<0.000000e+00> : vector<16x160xf32>
    %453 = tpu.matmul %451, %452, %cst_291 {dimension_numbers = #tpu.dot_dimension_numbers<[1], [0], [0], [1], [0, 0, 1, 1], [], []>} : vector<16x384xf32>, vector<384x160xf32>, vector<16x160xf32> -> vector<16x160xf32>
    %c0_292 = arith.constant 0 : index
    %c0_293 = arith.constant 0 : index
    %454 = vector.load %arg6[%c0_292, %c0_293] : memref<1x160xf32, #tpu.memory_space<vmem>>, vector<1x160xf32>
    %455 = vector.broadcast %454 : vector<1x160xf32> to vector<16x160xf32>
    %456 = arith.mulf %453, %455 : vector<16x160xf32>
    %c0_294 = arith.constant 0 : index
    %c0_295 = arith.constant 0 : index
    %457 = vector.load %arg7[%c0_294, %c0_295] : memref<1x160xf32, #tpu.memory_space<vmem>>, vector<1x160xf32>
    %458 = vector.broadcast %457 : vector<1x160xf32> to vector<16x160xf32>
    %459 = arith.addf %456, %458 : vector<16x160xf32>
    %cst_296 = arith.constant 0.000000e+00 : f32
    %460 = vector.broadcast %cst_296 : f32 to vector<16x160xf32>
    %461 = arith.maximumf %459, %460 : vector<16x160xf32>
    %462 = vector.extract_strided_slice %450 {offsets = [0, 0], sizes = [16, 80], strides = [1, 1]} : vector<16x160xf32> to vector<16x80xf32>
    %463 = vector.extract_strided_slice %450 {offsets = [0, 80], sizes = [16, 80], strides = [1, 1]} : vector<16x160xf32> to vector<16x80xf32>
    %464 = arith.maximumf %462, %463 : vector<16x80xf32>
    %465 = vector.extract_strided_slice %461 {offsets = [0, 0], sizes = [16, 80], strides = [1, 1]} : vector<16x160xf32> to vector<16x80xf32>
    %466 = vector.extract_strided_slice %461 {offsets = [0, 80], sizes = [16, 80], strides = [1, 1]} : vector<16x160xf32> to vector<16x80xf32>
    %467 = arith.maximumf %465, %466 : vector<16x80xf32>
    %468 = arith.maximumf %464, %467 : vector<16x80xf32>
    %c2 = arith.constant 2 : index
    %c0_297 = arith.constant 0 : index
    %c0_298 = arith.constant 0 : index
    %469 = vector.load %arg8[%c2, %c0_297, %c0_298] : memref<5x80x64xf32, #tpu.memory_space<vmem>>, vector<1x80x64xf32>
    %470 = vector.shape_cast %469 : vector<1x80x64xf32> to vector<80x64xf32>
    %cst_299 = arith.constant dense<0.000000e+00> : vector<16x64xf32>
    %471 = tpu.matmul %468, %470, %cst_299 {dimension_numbers = #tpu.dot_dimension_numbers<[1], [0], [0], [1], [0, 0, 1, 1], [], []>} : vector<16x80xf32>, vector<80x64xf32>, vector<16x64xf32> -> vector<16x64xf32>
    %472 = arith.addf %439, %471 : vector<16x64xf32>
    %c0_300 = arith.constant 0 : index
    %c768_301 = arith.constant 768 : index
    %473 = vector.load %arg14[%c0_300, %c768_301] : memref<16x1536xf32, #tpu.memory_space<vmem>>, vector<16x384xf32>
    %c0_302 = arith.constant 0 : index
    %c0_303 = arith.constant 0 : index
    %474 = vector.load %arg5[%c0_302, %c0_303] : memref<384x160xf32, #tpu.memory_space<vmem>>, vector<384x160xf32>
    %cst_304 = arith.constant dense<0.000000e+00> : vector<16x160xf32>
    %475 = tpu.matmul %473, %474, %cst_304 {dimension_numbers = #tpu.dot_dimension_numbers<[1], [0], [0], [1], [0, 0, 1, 1], [], []>} : vector<16x384xf32>, vector<384x160xf32>, vector<16x160xf32> -> vector<16x160xf32>
    %c0_305 = arith.constant 0 : index
    %c0_306 = arith.constant 0 : index
    %476 = vector.load %arg6[%c0_305, %c0_306] : memref<1x160xf32, #tpu.memory_space<vmem>>, vector<1x160xf32>
    %477 = vector.broadcast %476 : vector<1x160xf32> to vector<16x160xf32>
    %478 = arith.mulf %475, %477 : vector<16x160xf32>
    %c0_307 = arith.constant 0 : index
    %c0_308 = arith.constant 0 : index
    %479 = vector.load %arg7[%c0_307, %c0_308] : memref<1x160xf32, #tpu.memory_space<vmem>>, vector<1x160xf32>
    %480 = vector.broadcast %479 : vector<1x160xf32> to vector<16x160xf32>
    %481 = arith.addf %478, %480 : vector<16x160xf32>
    %cst_309 = arith.constant 0.000000e+00 : f32
    %482 = vector.broadcast %cst_309 : f32 to vector<16x160xf32>
    %483 = arith.maximumf %481, %482 : vector<16x160xf32>
    %c0_310 = arith.constant 0 : index
    %c896_311 = arith.constant 896 : index
    %484 = vector.load %arg14[%c0_310, %c896_311] : memref<16x1536xf32, #tpu.memory_space<vmem>>, vector<16x384xf32>
    %c0_312 = arith.constant 0 : index
    %c0_313 = arith.constant 0 : index
    %485 = vector.load %arg5[%c0_312, %c0_313] : memref<384x160xf32, #tpu.memory_space<vmem>>, vector<384x160xf32>
    %cst_314 = arith.constant dense<0.000000e+00> : vector<16x160xf32>
    %486 = tpu.matmul %484, %485, %cst_314 {dimension_numbers = #tpu.dot_dimension_numbers<[1], [0], [0], [1], [0, 0, 1, 1], [], []>} : vector<16x384xf32>, vector<384x160xf32>, vector<16x160xf32> -> vector<16x160xf32>
    %c0_315 = arith.constant 0 : index
    %c0_316 = arith.constant 0 : index
    %487 = vector.load %arg6[%c0_315, %c0_316] : memref<1x160xf32, #tpu.memory_space<vmem>>, vector<1x160xf32>
    %488 = vector.broadcast %487 : vector<1x160xf32> to vector<16x160xf32>
    %489 = arith.mulf %486, %488 : vector<16x160xf32>
    %c0_317 = arith.constant 0 : index
    %c0_318 = arith.constant 0 : index
    %490 = vector.load %arg7[%c0_317, %c0_318] : memref<1x160xf32, #tpu.memory_space<vmem>>, vector<1x160xf32>
    %491 = vector.broadcast %490 : vector<1x160xf32> to vector<16x160xf32>
    %492 = arith.addf %489, %491 : vector<16x160xf32>
    %cst_319 = arith.constant 0.000000e+00 : f32
    %493 = vector.broadcast %cst_319 : f32 to vector<16x160xf32>
    %494 = arith.maximumf %492, %493 : vector<16x160xf32>
    %495 = vector.extract_strided_slice %483 {offsets = [0, 0], sizes = [16, 80], strides = [1, 1]} : vector<16x160xf32> to vector<16x80xf32>
    %496 = vector.extract_strided_slice %483 {offsets = [0, 80], sizes = [16, 80], strides = [1, 1]} : vector<16x160xf32> to vector<16x80xf32>
    %497 = arith.maximumf %495, %496 : vector<16x80xf32>
    %498 = vector.extract_strided_slice %494 {offsets = [0, 0], sizes = [16, 80], strides = [1, 1]} : vector<16x160xf32> to vector<16x80xf32>
    %499 = vector.extract_strided_slice %494 {offsets = [0, 80], sizes = [16, 80], strides = [1, 1]} : vector<16x160xf32> to vector<16x80xf32>
    %500 = arith.maximumf %498, %499 : vector<16x80xf32>
    %501 = arith.maximumf %497, %500 : vector<16x80xf32>
    %c3 = arith.constant 3 : index
    %c0_320 = arith.constant 0 : index
    %c0_321 = arith.constant 0 : index
    %502 = vector.load %arg8[%c3, %c0_320, %c0_321] : memref<5x80x64xf32, #tpu.memory_space<vmem>>, vector<1x80x64xf32>
    %503 = vector.shape_cast %502 : vector<1x80x64xf32> to vector<80x64xf32>
    %cst_322 = arith.constant dense<0.000000e+00> : vector<16x64xf32>
    %504 = tpu.matmul %501, %503, %cst_322 {dimension_numbers = #tpu.dot_dimension_numbers<[1], [0], [0], [1], [0, 0, 1, 1], [], []>} : vector<16x80xf32>, vector<80x64xf32>, vector<16x64xf32> -> vector<16x64xf32>
    %505 = arith.addf %472, %504 : vector<16x64xf32>
    %c0_323 = arith.constant 0 : index
    %c1024_324 = arith.constant 1024 : index
    %506 = vector.load %arg14[%c0_323, %c1024_324] : memref<16x1536xf32, #tpu.memory_space<vmem>>, vector<16x384xf32>
    %c0_325 = arith.constant 0 : index
    %c0_326 = arith.constant 0 : index
    %507 = vector.load %arg5[%c0_325, %c0_326] : memref<384x160xf32, #tpu.memory_space<vmem>>, vector<384x160xf32>
    %cst_327 = arith.constant dense<0.000000e+00> : vector<16x160xf32>
    %508 = tpu.matmul %506, %507, %cst_327 {dimension_numbers = #tpu.dot_dimension_numbers<[1], [0], [0], [1], [0, 0, 1, 1], [], []>} : vector<16x384xf32>, vector<384x160xf32>, vector<16x160xf32> -> vector<16x160xf32>
    %c0_328 = arith.constant 0 : index
    %c0_329 = arith.constant 0 : index
    %509 = vector.load %arg6[%c0_328, %c0_329] : memref<1x160xf32, #tpu.memory_space<vmem>>, vector<1x160xf32>
    %510 = vector.broadcast %509 : vector<1x160xf32> to vector<16x160xf32>
    %511 = arith.mulf %508, %510 : vector<16x160xf32>
    %c0_330 = arith.constant 0 : index
    %c0_331 = arith.constant 0 : index
    %512 = vector.load %arg7[%c0_330, %c0_331] : memref<1x160xf32, #tpu.memory_space<vmem>>, vector<1x160xf32>
    %513 = vector.broadcast %512 : vector<1x160xf32> to vector<16x160xf32>
    %514 = arith.addf %511, %513 : vector<16x160xf32>
    %cst_332 = arith.constant 0.000000e+00 : f32
    %515 = vector.broadcast %cst_332 : f32 to vector<16x160xf32>
    %516 = arith.maximumf %514, %515 : vector<16x160xf32>
    %c0_333 = arith.constant 0 : index
    %c1152_334 = arith.constant 1152 : index
    %517 = vector.load %arg14[%c0_333, %c1152_334] : memref<16x1536xf32, #tpu.memory_space<vmem>>, vector<16x384xf32>
    %c0_335 = arith.constant 0 : index
    %c0_336 = arith.constant 0 : index
    %518 = vector.load %arg5[%c0_335, %c0_336] : memref<384x160xf32, #tpu.memory_space<vmem>>, vector<384x160xf32>
    %cst_337 = arith.constant dense<0.000000e+00> : vector<16x160xf32>
    %519 = tpu.matmul %517, %518, %cst_337 {dimension_numbers = #tpu.dot_dimension_numbers<[1], [0], [0], [1], [0, 0, 1, 1], [], []>} : vector<16x384xf32>, vector<384x160xf32>, vector<16x160xf32> -> vector<16x160xf32>
    %c0_338 = arith.constant 0 : index
    %c0_339 = arith.constant 0 : index
    %520 = vector.load %arg6[%c0_338, %c0_339] : memref<1x160xf32, #tpu.memory_space<vmem>>, vector<1x160xf32>
    %521 = vector.broadcast %520 : vector<1x160xf32> to vector<16x160xf32>
    %522 = arith.mulf %519, %521 : vector<16x160xf32>
    %c0_340 = arith.constant 0 : index
    %c0_341 = arith.constant 0 : index
    %523 = vector.load %arg7[%c0_340, %c0_341] : memref<1x160xf32, #tpu.memory_space<vmem>>, vector<1x160xf32>
    %524 = vector.broadcast %523 : vector<1x160xf32> to vector<16x160xf32>
    %525 = arith.addf %522, %524 : vector<16x160xf32>
    %cst_342 = arith.constant 0.000000e+00 : f32
    %526 = vector.broadcast %cst_342 : f32 to vector<16x160xf32>
    %527 = arith.maximumf %525, %526 : vector<16x160xf32>
    %528 = vector.extract_strided_slice %516 {offsets = [0, 0], sizes = [16, 80], strides = [1, 1]} : vector<16x160xf32> to vector<16x80xf32>
    %529 = vector.extract_strided_slice %516 {offsets = [0, 80], sizes = [16, 80], strides = [1, 1]} : vector<16x160xf32> to vector<16x80xf32>
    %530 = arith.maximumf %528, %529 : vector<16x80xf32>
    %531 = vector.extract_strided_slice %527 {offsets = [0, 0], sizes = [16, 80], strides = [1, 1]} : vector<16x160xf32> to vector<16x80xf32>
    %532 = vector.extract_strided_slice %527 {offsets = [0, 80], sizes = [16, 80], strides = [1, 1]} : vector<16x160xf32> to vector<16x80xf32>
    %533 = arith.maximumf %531, %532 : vector<16x80xf32>
    %534 = arith.maximumf %530, %533 : vector<16x80xf32>
    %c4 = arith.constant 4 : index
    %c0_343 = arith.constant 0 : index
    %c0_344 = arith.constant 0 : index
    %535 = vector.load %arg8[%c4, %c0_343, %c0_344] : memref<5x80x64xf32, #tpu.memory_space<vmem>>, vector<1x80x64xf32>
    %536 = vector.shape_cast %535 : vector<1x80x64xf32> to vector<80x64xf32>
    %cst_345 = arith.constant dense<0.000000e+00> : vector<16x64xf32>
    %537 = tpu.matmul %534, %536, %cst_345 {dimension_numbers = #tpu.dot_dimension_numbers<[1], [0], [0], [1], [0, 0, 1, 1], [], []>} : vector<16x80xf32>, vector<80x64xf32>, vector<16x64xf32> -> vector<16x64xf32>
    %538 = arith.addf %505, %537 : vector<16x64xf32>
    %c0_346 = arith.constant 0 : index
    %c0_347 = arith.constant 0 : index
    %539 = vector.load %arg9[%c0_346, %c0_347] : memref<1x64xf32, #tpu.memory_space<vmem>>, vector<1x64xf32>
    %540 = vector.broadcast %539 : vector<1x64xf32> to vector<16x64xf32>
    %541 = arith.mulf %538, %540 : vector<16x64xf32>
    %c0_348 = arith.constant 0 : index
    %c0_349 = arith.constant 0 : index
    %542 = vector.load %arg10[%c0_348, %c0_349] : memref<1x64xf32, #tpu.memory_space<vmem>>, vector<1x64xf32>
    %543 = vector.broadcast %542 : vector<1x64xf32> to vector<16x64xf32>
    %544 = arith.addf %541, %543 : vector<16x64xf32>
    %cst_350 = arith.constant 0.000000e+00 : f32
    %545 = vector.broadcast %cst_350 : f32 to vector<16x64xf32>
    %546 = arith.maximumf %544, %545 : vector<16x64xf32>
    %c0_351 = arith.constant 0 : index
    %c0_352 = arith.constant 0 : index
    %547 = vector.load %arg11[%c0_351, %c0_352] : memref<64x128xf32, #tpu.memory_space<vmem>>, vector<64x128xf32>
    %cst_353 = arith.constant dense<0.000000e+00> : vector<16x128xf32>
    %548 = tpu.matmul %546, %547, %cst_353 {dimension_numbers = #tpu.dot_dimension_numbers<[1], [0], [0], [1], [0, 0, 1, 1], [], []>} : vector<16x64xf32>, vector<64x128xf32>, vector<16x128xf32> -> vector<16x128xf32>
    %c0_354 = arith.constant 0 : index
    %c0_355 = arith.constant 0 : index
    %549 = vector.load %arg12[%c0_354, %c0_355] : memref<1x128xf32, #tpu.memory_space<vmem>>, vector<1x128xf32>
    %550 = vector.broadcast %549 : vector<1x128xf32> to vector<16x128xf32>
    %551 = arith.addf %548, %550 : vector<16x128xf32>
    %cst_356 = arith.constant dense<0xFF800000> : vector<16xf32>
    %552 = vector.multi_reduction <maximumf>, %551, %cst_356 [1] : vector<16x128xf32> to vector<16xf32>
    %553 = vector.shape_cast %552 : vector<16xf32> to vector<16x1xf32>
    %554 = vector.broadcast %553 : vector<16x1xf32> to vector<16x128xf32>
    %555 = arith.subf %551, %554 : vector<16x128xf32>
    %556 = math.exp %555 : vector<16x128xf32>
    %cst_357 = arith.constant dense<0.000000e+00> : vector<16xf32>
    %557 = vector.multi_reduction <add>, %556, %cst_357 [1] : vector<16x128xf32> to vector<16xf32>
    %558 = vector.shape_cast %557 : vector<16xf32> to vector<16x1xf32>
    %559 = math.log %558 : vector<16x1xf32>
    %560 = vector.broadcast %559 : vector<16x1xf32> to vector<16x128xf32>
    %561 = arith.subf %555, %560 : vector<16x128xf32>
    %c0_358 = arith.constant 0 : index
    %c0_359 = arith.constant 0 : index
    %562 = vector.load %arg13[%c0_358, %c0_359] : memref<16x128xf32, #tpu.memory_space<vmem>>, vector<16x128xf32>
    tpu.vector_store %arg13[%c0_358, %c0_359], %561 {strides = array<i32>} : memref<16x128xf32, #tpu.memory_space<vmem>>, vector<16x128xf32>,
    return
  }
  func.func @transform_0(%arg0: i32) -> (i32, i32) {
    %c0_i32 = arith.constant 0 : i32
    %c0_i32_0 = arith.constant 0 : i32
    return %arg0, %c0_i32 : i32, i32
  }
  func.func @transform_1(%arg0: i32) -> (i32, i32) {
    %c0_i32 = arith.constant 0 : i32
    %c0_i32_0 = arith.constant 0 : i32
    %c0_i32_1 = arith.constant 0 : i32
    return %c0_i32, %c0_i32_0 : i32, i32
  }
  func.func @transform_2(%arg0: i32) -> (i32, i32) {
    %c0_i32 = arith.constant 0 : i32
    %c0_i32_0 = arith.constant 0 : i32
    %c0_i32_1 = arith.constant 0 : i32
    return %c0_i32, %c0_i32_0 : i32, i32
  }
  func.func @transform_3(%arg0: i32) -> (i32, i32) {
    %c0_i32 = arith.constant 0 : i32
    %c0_i32_0 = arith.constant 0 : i32
    %c0_i32_1 = arith.constant 0 : i32
    return %c0_i32, %c0_i32_0 : i32, i32
  }
  func.func @transform_4(%arg0: i32) -> (i32, i32) {
    %c0_i32 = arith.constant 0 : i32
    %c0_i32_0 = arith.constant 0 : i32
    %c0_i32_1 = arith.constant 0 : i32
    return %c0_i32, %c0_i32_0 : i32, i32
  }
  func.func @transform_5(%arg0: i32) -> (i32, i32) {
    %c0_i32 = arith.constant 0 : i32
    %c0_i32_0 = arith.constant 0 : i32
    %c0_i32_1 = arith.constant 0 : i32
    return %c0_i32, %c0_i32_0 : i32, i32
  }
  func.func @transform_6(%arg0: i32) -> (i32, i32) {
    %c0_i32 = arith.constant 0 : i32
    %c0_i32_0 = arith.constant 0 : i32
    %c0_i32_1 = arith.constant 0 : i32
    return %c0_i32, %c0_i32_0 : i32, i32
  }
  func.func @transform_7(%arg0: i32) -> (i32, i32, i32) {
    %c0_i32 = arith.constant 0 : i32
    %c0_i32_0 = arith.constant 0 : i32
    %c0_i32_1 = arith.constant 0 : i32
    %c0_i32_2 = arith.constant 0 : i32
    return %c0_i32, %c0_i32_0, %c0_i32_1 : i32, i32, i32
  }
  func.func @transform_8(%arg0: i32) -> (i32, i32) {
    %c0_i32 = arith.constant 0 : i32
    %c0_i32_0 = arith.constant 0 : i32
    %c0_i32_1 = arith.constant 0 : i32
    return %c0_i32, %c0_i32_0 : i32, i32
  }
  func.func @transform_9(%arg0: i32) -> (i32, i32) {
    %c0_i32 = arith.constant 0 : i32
    %c0_i32_0 = arith.constant 0 : i32
    %c0_i32_1 = arith.constant 0 : i32
    return %c0_i32, %c0_i32_0 : i32, i32
  }
  func.func @transform_10(%arg0: i32) -> (i32, i32) {
    %c0_i32 = arith.constant 0 : i32
    %c0_i32_0 = arith.constant 0 : i32
    %c0_i32_1 = arith.constant 0 : i32
    return %c0_i32, %c0_i32_0 : i32, i32
  }
  func.func @transform_11(%arg0: i32) -> (i32, i32) {
    %c0_i32 = arith.constant 0 : i32
    %c0_i32_0 = arith.constant 0 : i32
    %c0_i32_1 = arith.constant 0 : i32
    return %c0_i32, %c0_i32_0 : i32, i32
  }
  func.func @transform_12(%arg0: i32) -> (i32, i32) {
    %c0_i32 = arith.constant 0 : i32
    %c0_i32_0 = arith.constant 0 : i32
    return %arg0, %c0_i32 : i32, i32
  }
}

</mosaic_0001>

<bundles_post_ra>
// kernel: net_forward.1
= control target key start
LH: loop header
LB: loop body
LE: loop exit
PB: predicated region body
PF: predicated region fallthrough
CT: control target
= control target key end

     0   :  { %v12029_v2 = vmov 0.0   ;;  %s8389_s25 = smov 72   ;;  %s8390_s26 = smov 100   ;;  %vm72_vm0 = vcmask 1043456   ;;  %vm65_vm1 = vcmask 687104   ;;  %vm371_vm2 = vcmask 588800   ;;  %s12016_s0 = inlined_call_operand.vmem [shape: f32[16,784], index: 0, kind: input, shape index: {}]   ;;  %s12017_s1 = inlined_call_operand.vmem [shape: f32[84,208], index: 1, kind: input, shape index: {}]   ;;  %s12018_s2 = inlined_call_operand.vmem [shape: f32[1,208], index: 2, kind: input, shape index: {}]   ;;  %s12019_s3 = inlined_call_operand.vmem [shape: f32[1,208], index: 3, kind: input, shape index: {}]   ;;  %s12020_s4 = inlined_call_operand.vmem [shape: f32[384,160], index: 4, kind: input, shape index: {}]   ;;  %s12021_s7 = inlined_call_operand.vmem [shape: f32[5,80,64], index: 7, kind: input, shape index: {}]   ;;  %s12022_s5 = inlined_call_operand.vmem [shape: f32[1,160], index: 5, kind: input, shape index: {}]   ;;  %s12023_s6 = inlined_call_operand.vmem [shape: f32[1,160], index: 6, kind: input, shape index: {}]   ;;  %s12024_s10 = inlined_call_operand.vmem [shape: f32[64,128], index: 10, kind: input, shape index: {}]   ;;  %s12025_s8 = inlined_call_operand.vmem [shape: f32[1,64], index: 8, kind: input, shape index: {}]   ;;  %s12026_s9 = inlined_call_operand.vmem [shape: f32[1,64], index: 9, kind: input, shape index: {}]   ;;  %s12027_s11 = inlined_call_operand.vmem [shape: f32[1,128], index: 11, kind: input, shape index: {}]   ;;  %s12028_s12 = inlined_call_operand.vmem [shape: f32[16,128], index: 12, kind: output, shape index: {}]  }
   0x1   :  { %v8480_v0 = vld [vmem:[%s12016_s0] sm:$0xff]  ;;  %v8485_v1 = vld [vmem:[%s12016_s0 + $0x8] sm:$0xff]  ;;  %143 = vmatprep.mubr.f32.mxu0 %v12029_v2  ;;  %264 = vmatprep.mubr.f32.mxu1 %v12029_v2  ;;  %v8495_v3 = vld [vmem:[%s12016_s0 + $0x38] sm:$0xff]  ;;  %s8391_s18 = smov 44   ;;  %s8392_s20 = smov 16   ;;  %vm505_vm3 = vcmask 359424  }
   0x2   :  { %363 = vrot.lane.b32.xlu1 %v8480_v0, %s8389_s25  ;;  %192 = vrot.lane.b32.xlu0 %v8480_v0, %s8390_s26  ;;  %v44_v4 = vld [vmem:[%s12017_s1 + $0x8] sm:$0xff]  ;;  %v46_v5 = vld [vmem:[%s12017_s1 + $0x18] sm:$0xff]  ;;  %s8393_s24 = smov 116   ;;  %s8394_s29 = smov 60   ;;  %vm681_vm4 = vcmask 130048   ;;  %vm1115_vm5 = vcmask 490496  }
   0x3   :  { %v43_v6 = vld [vmem:[%s12017_s1] sm:$0xff]  ;;  %v45_v7 = vld [vmem:[%s12017_s1 + $0x10] sm:$0xff]  ;;  %v8509_v8 = vpack.c.bf16 %v46_v5, %v44_v4  ;;  %v48_v10 = vld [vmem:[%s12017_s1 + $0x28] sm:$0xff]  ;;  %s8395_s14 = smov 4   ;;  %s8396_s16 = smov 88   ;;  %vm1291_vm6 = vcmask 261120  }
   0x4   :  { %v8511_v9 = vpack.c.bf16 %v45_v7, %v43_v6  ;;  %v50_v11 = vld [vmem:[%s12017_s1 + $0x38] sm:$0xff]  ;;  %v47_v13 = vld [vmem:[%s12017_s1 + $0x20] sm:$0xff]  ;;  %v49_v14 = vld [vmem:[%s12017_s1 + $0x30] sm:$0xff]  ;;  %s8397_s19 = smov 76   ;;  %s8398_s23 = smov 20   ;;  %vm1425_vm7 = vcmask 31744  }
   0x5   :  { %v8519_v12 = vpack.c.bf16 %v50_v11, %v48_v10  ;;  %v52_v15 = vld [vmem:[%s12017_s1 + $0x48] sm:$0xff]  ;;  %v54_v16 = vld [vmem:[%s12017_s1 + $0x58] sm:$0xff]  ;;  %6750 = vmatprep.subr.bf16.mxu0 %v8509_v8  ;;  %6770 = vmatprep.subr.bf16.mxu1 %v8509_v8  ;;  %v8539_v17 = vpack.c.bf16 %v49_v14, %v47_v13  ;;  %v51_v19 = vld [vmem:[%s12017_s1 + $0x40] sm:$0xff]  ;;  %s8400_s27 = smov 92   ;;  %s8401_s28 = smov 104   ;;  %vm1732_vm8 = vcmask 621568  }
   0x6   :  { %365 = vrot.lane.b32.xlu1 %v8485_v1, %s8389_s25  ;;  %194 = vrot.lane.b32.xlu0 %v8495_v3, %s8390_s26  ;;  %v8543_v18 = vpack.c.bf16 %v54_v16, %v52_v15  ;;  %v53_v20 = vld [vmem:[%s12017_s1 + $0x50] sm:$0xff]  ;;  %v56_v21 = vld [vmem:[%s12017_s1 + $0x68] sm:$0xff]  ;;  %s8403_s15 = smov 48   ;;  %s8405_s21 = smov 120   ;;  %vm2042_vm9 = vcmask 162816   ;;  %vm2644_vm10 = vcmask 293888  }
   0x7   :  { %6752 = vmatpush1.bf16.msra.mxu0 %v8511_v9  ;;  %6772 = vmatpush1.bf16.msra.mxu1 %v8511_v9  ;;  %v58_v22 = vld [vmem:[%s12017_s1 + $0x78] sm:$0xff]  ;;  %v8563_v23 = vld [vmem:[%s12016_s0 + $0x40] sm:$0xff]  ;;  %v8566_v24 = vpack.c.bf16 %v53_v20, %v51_v19  ;;  %v57_v27 = vld [vmem:[%s12017_s1 + $0x70] sm:$0xff]  ;;  %vm1908_vm11 = vcmask 392192   ;;  %vm3257_vm12 = vcmask 424960   ;;  %vm2510_vm13 = vcmask 523264  }
   0x8   :  { %6754 = vmatprep.subr.bf16.mxu0 %v8519_v12  ;;  %6774 = vmatprep.subr.bf16.mxu1 %v8519_v12  ;;  %v8570_v25 = vpack.c.bf16 %v58_v22, %v56_v21  ;;  %v55_v26 = vld [vmem:[%s12017_s1 + $0x60] sm:$0xff]  ;;  %v60_v28 = vld [vmem:[%s12017_s1 + $0x88] sm:$0xff]  ;;  %v62_v29 = vld [vmem:[%s12017_s1 + $0x98] sm:$0xff]  ;;  %vm2820_vm14 = vcmask 64512   ;;  %s8411_s17 = smov 80   ;;  %vm301_vm15 = vcmask 195584  }
   0x9   :  { %v8590_v30 = vpack.c.bf16 %v57_v27, %v55_v26  ;;  %v8594_v31 = vpack.c.bf16 %v62_v29, %v60_v28  ;;  %v59_v32 = vld [vmem:[%s12017_s1 + $0x80] sm:$0xff]  ;;  %v61_v33 = vld [vmem:[%s12017_s1 + $0x90] sm:$0xff]  ;;  %v64_v35 = vld [vmem:[%s12017_s1 + $0xa8] sm:$0xf] }
   0xa   :  { %499 = vrot.lane.b32.xlu1 %v8485_v1, %s8391_s18  ;;  %497 = vrot.lane.b32.xlu0 %v8480_v0, %s8391_s18  ;;  %v8606_v34 = vpack.c.bf16 %v61_v33, %v59_v32  ;;  %v63_v36 = vld [vmem:[%s12017_s1 + $0xa0] sm:$0xf]  ;;  %v8635_v37 = vld [vmem:[%s12016_s0 + $0x10] sm:$0xff] }
   0xb   :  { %6756 = vmatpush1.bf16.msra.mxu0 %v8539_v17  ;;  %6776 = vmatpush1.bf16.msra.mxu1 %v8539_v17  ;;  %v8648_v38 = vld [vmem:[%s12016_s0 + $0x48] sm:$0xff]  ;;  %v8674_v40 = vld [vmem:[%s12017_s1 + $0xa0] sm:$0xf]  ;;  %v8681_v41 = vld [vmem:[%s12016_s0 + $0x18] sm:$0xff] }
   0xc   :  { %6758 = vmatprep.subr.bf16.mxu0 %v8543_v18  ;;  %6778 = vmatprep.subr.bf16.mxu1 %v8543_v18  ;;  %v8664_v39 = vld [vmem:[%s12017_s1 + $0xa8] sm:$0xf]  ;;  %v8691_v42 = vld [vmem:[%s12016_s0 + $0x50] sm:$0xff]  ;;  %v8710_v43 = vld [vmem:[%s12016_s0 + $0x20] sm:$0xff] }
   0xd   :  { %v8718_v44 = vld [vmem:[%s12016_s0 + $0x58] sm:$0xff]  ;;  %v668_v60 = vld [vmem:[%s12017_s1 + $0xa8] sm:$0xf]  ;;  %v667_v62 = vld [vmem:[%s12017_s1 + $0xa0] sm:$0xf] }
   0xe   :  { %369 = vrot.lane.b32.xlu1 %v8563_v23, %s8389_s25  ;;  %367 = vrot.lane.b32.xlu0 %v8495_v3, %s8389_s25  ;;  %v969_v19 = vld [vmem:[%s12017_s1 + $0xa8] sm:$0xf]  ;;  %v968_v22 = vld [vmem:[%s12017_s1 + $0xa0] sm:$0xf] }
   0xf   :  { %6760 = vmatpush1.bf16.msra.mxu0 %v8566_v24  ;;  %6780 = vmatpush1.bf16.msra.mxu1 %v8566_v24 }
  0x10   :  { %6762 = vmatprep.subr.bf16.mxu0 %v8570_v25  ;;  %6782 = vmatprep.subr.bf16.mxu1 %v8570_v25 }
  0x12   :  { %503 = vrot.lane.b32.xlu1 %v8563_v23, %s8391_s18  ;;  %501 = vrot.lane.b32.xlu0 %v8495_v3, %s8391_s18  ;;  %s8407_s18 = smov 64  }
  0x13   :  { %6764 = vmatpush1.bf16.msra.mxu0 %v8590_v30  ;;  %6784 = vmatpush1.bf16.msra.mxu1 %v8590_v30 }
  0x14   :  { %6766 = vmatprep.subr.bf16.mxu0 %v8594_v31  ;;  %6786 = vmatprep.subr.bf16.mxu1 %v8594_v31 }
  0x16   :  { %675 = vrot.lane.b32.xlu1 %v8485_v1, %s8392_s20  ;;  %673 = vrot.lane.b32.xlu0 %v8480_v0, %s8392_s20 }
  0x17   :  { %6768 = vmatpush1.bf16.msra.mxu0 %v8606_v34  ;;  %6788 = vmatpush1.bf16.msra.mxu1 %v8606_v34 }
  0x18   :  { %6334 = vmatprep.subr.msk.mxu0 %vm72_vm0, %v64_v35  ;;  %6338 = vmatprep.subr.msk.mxu1 %vm72_vm0, %v64_v35 }
  0x1a   :  { %807 = vrot.lane.b32.xlu0 %v8485_v1, %s8393_s24  ;;  %677 = vrot.lane.b32.xlu1 %v8495_v3, %s8392_s20 }
  0x1b   :  { %6335 = vmatpush1.msk.msra.mxu0 %vm72_vm0, %v63_v36  ;;  %6339 = vmatpush1.msk.msra.mxu1 %vm72_vm0, %v63_v36 }
  0x1c   :  { %6790 = vmatprep.subr.bf16.mxu0 %v8509_v8  ;;  %6336 = vmatmul.mubr.msk.f32.vlgmr.msra.gmra.mrb[0].mxu0 %vm65_vm1, %v8480_v0 }
  0x1d   :  { %6792 = vmatpush1.bf16.msra.mxu0 %v8511_v9  ;;  %6810 = vmatprep.subr.bf16.mxu1 %v8509_v8 }
  0x1e   :  { %679 = vrot.lane.b32.xlu0 %v8563_v23, %s8392_s20  ;;  %809 = vrot.lane.b32.xlu1 %v8563_v23, %s8393_s24  ;;  %s8399_s24 = smov 32  }
  0x1f   :  { %6794 = vmatprep.subr.bf16.mxu0 %v8519_v12  ;;  %149 = vmatprep.mubr.f32.mxu0 %v12029_v2 }
  0x20   :  { %6337 = vmatmul.mubr.msk.f32.gmra.mrb[2].mxu0 %vm65_vm1, %v8495_v3 }
  0x21   :  { %6796 = vmatpush1.bf16.msra.mxu0 %v8539_v17  ;;  %448 = vmatprep.mubr.f32.mxu0 %v12029_v2 }
  0x22   :  { %1109 = vrot.lane.b32.xlu1 %v8635_v37, %s8394_s29  ;;  %1107 = vrot.lane.b32.xlu0 %v8485_v1, %s8394_s29 }
  0x23   :  { %6798 = vmatprep.subr.bf16.mxu0 %v8543_v18 }
  0x25   :  { %6800 = vmatpush1.bf16.msra.mxu0 %v8566_v24 }
  0x26   :  { %1113 = vrot.lane.b32.xlu1 %v8648_v38, %s8394_s29  ;;  %1111 = vrot.lane.b32.xlu0 %v8563_v23, %s8394_s29  ;;  %s8402_s29 = smov 36  }
  0x27   :  { %6802 = vmatprep.subr.bf16.mxu0 %v8570_v25 }
  0x29   :  { %6804 = vmatpush1.bf16.msra.mxu0 %v8590_v30 }
  0x2a   :  { %1419 = vrot.lane.b32.xlu1 %v8635_v37, %s8395_s14  ;;  %1417 = vrot.lane.b32.xlu0 %v8485_v1, %s8395_s14 }
  0x2b   :  { %6806 = vmatprep.subr.bf16.mxu0 %v8594_v31 }
  0x2d   :  { %6808 = vmatpush1.bf16.msra.mxu0 %v8606_v34 }
  0x2e   :  { %1421 = vrot.lane.b32.xlu1 %v8563_v23, %s8395_s14  ;;  %972 = vrot.lane.b32.xlu0 %v8485_v1, %s8396_s16 }
  0x2f   :  { %6342 = vmatprep.subr.msk.mxu0 %vm72_vm0, %v8664_v39 }
  0x31   :  { %6343 = vmatpush1.msk.msra.mxu0 %vm72_vm0, %v8674_v40 }
  0x32   :  { %1724 = vrot.lane.b32.xlu1 %v8635_v37, %s8397_s19  ;;  %1423 = vrot.lane.b32.xlu0 %v8648_v38, %s8395_s14 }
  0x33   :  { %6830 = vmatprep.subr.bf16.mxu0 %v8509_v8 }
  0x36   :  { %1728 = vrot.lane.b32.xlu1 %v8648_v38, %s8397_s19  ;;  %1726 = vrot.lane.b32.xlu0 %v8681_v41, %s8397_s19 }
  0x3a   :  { %2034 = vrot.lane.b32.xlu1 %v8635_v37, %s8398_s23  ;;  %1730 = vrot.lane.b32.xlu0 %v8691_v42, %s8397_s19  ;;  %s8406_s19 = smov 52  }
  0x3e   :  { %974 = vrot.lane.b32.xlu1 %v8563_v23, %s8396_s16  ;;  %2036 = vrot.lane.b32.xlu0 %v8681_v41, %s8398_s23  ;;  %s8404_s16 = smov 108  }
  0x42   :  { %2040 = vrot.lane.b32.xlu1 %v8691_v42, %s8398_s23  ;;  %2038 = vrot.lane.b32.xlu0 %v8648_v38, %s8398_s23  ;;  %s8410_s23 = smov 24  }
  0x46   :  { %1285 = vrot.lane.b32.xlu1 %v8635_v37, %s8399_s24  ;;  %1283 = vrot.lane.b32.xlu0 %v8485_v1, %s8399_s24 }
  0x4a   :  { %2333 = vrot.lane.b32.xlu0 %v8681_v41, %s8400_s27  ;;  %1287 = vrot.lane.b32.xlu1 %v8563_v23, %s8399_s24 }
  0x4e   :  { %1289 = vrot.lane.b32.xlu0 %v8648_v38, %s8399_s24  ;;  %2335 = vrot.lane.b32.xlu1 %v8691_v42, %s8400_s27  ;;  %s8409_s27 = smov 8  }
  0x52   :  { %1589 = vrot.lane.b32.xlu0 %v8635_v37, %s8401_s28  ;;  %2636 = vrot.lane.b32.xlu1 %v8681_v41, %s8402_s29 }
  0x56   :  { %1591 = vrot.lane.b32.xlu1 %v8648_v38, %s8401_s28  ;;  %2638 = vrot.lane.b32.xlu0 %v8710_v43, %s8402_s29 }
  0x5a   :  { %2640 = vrot.lane.b32.xlu0 %v8691_v42, %s8402_s29  ;;  %2642 = vrot.lane.b32.xlu1 %v8718_v44, %s8402_s29 }
  0x5e   :  { %1902 = vrot.lane.b32.xlu1 %v8681_v41, %s8403_s15  ;;  %1900 = vrot.lane.b32.xlu0 %v8635_v37, %s8403_s15  ;;  %v1278_v37 = vld [vmem:[%s12017_s1 + $0xa8] sm:$0xf] }
  0x62   :  { %1904 = vrot.lane.b32.xlu1 %v8648_v38, %s8403_s15  ;;  %2946 = vrot.lane.b32.xlu0 %v8710_v43, %s8404_s16 }
  0x66   :  { %2948 = vrot.lane.b32.xlu1 %v8718_v44, %s8404_s16  ;;  %1906 = vrot.lane.b32.xlu0 %v8691_v42, %s8403_s15 }
  0x6a   :  { %2206 = vrot.lane.b32.xlu0 %v8681_v41, %s8405_s21  ;;  %3249 = vrot.lane.b32.xlu1 %v8710_v43, %s8406_s19 }
  0x6e   :  { %2208 = vrot.lane.b32.xlu1 %v8691_v42, %s8405_s21 }
  0x74   :  { %v364_v45 = vpop.permute.xlu1 %363  ;;  %v193_v46 = vpop.permute.xlu0 %192 }
  0x75   :  { %6340 = vmatmul.mubr.msk.f32.vlgmr.msra.gmra.mrb[0].mxu1 %vm65_vm1, %v193_v46 }
  0x76   :  { %6812 = vmatpush1.bf16.msra.mxu1 %v8511_v9  ;;  %270 = vmatprep.mubr.f32.mxu1 %v12029_v2 }
  0x77   :  { %6814 = vmatprep.subr.bf16.mxu1 %v8519_v12 }
  0x78   :  { %v366_v47 = vpop.permute.xlu1 %365  ;;  %v195_v48 = vpop.permute.xlu0 %194 }
  0x79   :  { %v372_v49 = vsel %vm371_vm2, %v364_v45, %v366_v47  ;;  %6341 = vmatmul.mubr.msk.f32.gmra.mrb[2].mxu1 %vm65_vm1, %v195_v48  ;;  %v1277_v45 = vld [vmem:[%s12017_s1 + $0xa0] sm:$0xf] }
  0x7a   :  { %6816 = vmatpush1.bf16.msra.mxu1 %v8539_v17  ;;  %6344 = vmatmul.mubr.msk.f32.vlgmr.msra.gmra.mrb[4].mxu0 %vm65_vm1, %v372_v49 }
  0x7b   :  { %6832 = vmatpush1.bf16.msra.mxu0 %v8511_v9  ;;  %6818 = vmatprep.subr.bf16.mxu1 %v8543_v18 }
  0x7c   :  { %6834 = vmatprep.subr.bf16.mxu0 %v8519_v12  ;;  %v500_v50 = vpop.permute.xlu1 %499  ;;  %v498_v51 = vpop.permute.xlu0 %497  ;;  %576 = vmatprep.mubr.f32.mxu1 %v12029_v2 }
  0x7d   :  { %454 = vmatprep.mubr.f32.mxu0 %v12029_v2  ;;  %v506_v57 = vsel %vm505_vm3, %v498_v51, %v500_v50 }
  0x7e   :  { %6820 = vmatpush1.bf16.msra.mxu1 %v8566_v24 }
  0x7f   :  { %6836 = vmatpush1.bf16.msra.mxu0 %v8539_v17  ;;  %6822 = vmatprep.subr.bf16.mxu1 %v8570_v25 }
  0x80   :  { %6838 = vmatprep.subr.bf16.mxu0 %v8543_v18  ;;  %v370_v52 = vpop.permute.xlu1 %369  ;;  %v368_v53 = vpop.permute.xlu0 %367 }
  0x81   :  { %v373_v54 = vsel %vm371_vm2, %v368_v53, %v370_v52  ;;  %v1586_v53 = vld [vmem:[%s12017_s1 + $0xa8] sm:$0xf]  ;;  %vm328_vm2 = vcmask 850944  }
  0x82   :  { %6824 = vmatpush1.bf16.msra.mxu1 %v8590_v30  ;;  %6345 = vmatmul.mubr.msk.f32.gmra.mrb[6].mxu0 %vm65_vm1, %v373_v54 }
  0x83   :  { %6840 = vmatpush1.bf16.msra.mxu0 %v8566_v24  ;;  %6826 = vmatprep.subr.bf16.mxu1 %v8594_v31 }
  0x84   :  { %6842 = vmatprep.subr.bf16.mxu0 %v8570_v25  ;;  %v504_v55 = vpop.permute.xlu1 %503  ;;  %v502_v56 = vpop.permute.xlu0 %501  ;;  %758 = vmatprep.mubr.f32.mxu0 %v12029_v2 }
  0x85   :  { %v507_v61 = vsel %vm505_vm3, %v502_v56, %v504_v55  ;;  %v8938_v55 = vld [vmem:[%s12016_s0 + $0x28] sm:$0xff]  ;;  %v1585_v56 = vld [vmem:[%s12017_s1 + $0xa0] sm:$0xf]  ;;  %vm3123_vm3 = vcmask 654336  }
  0x86   :  { %6828 = vmatpush1.bf16.msra.mxu1 %v8606_v34  ;;  %3251 = vrot.lane.b32.xlu0 %v8938_v55, %s8406_s19 }
  0x87   :  { %6844 = vmatpush1.bf16.msra.mxu0 %v8590_v30  ;;  %6346 = vmatprep.subr.msk.mxu1 %vm72_vm0, %v8664_v39 }
  0x88   :  { %6846 = vmatprep.subr.bf16.mxu0 %v8594_v31  ;;  %v676_v58 = vpop.permute.xlu1 %675  ;;  %v674_v59 = vpop.permute.xlu0 %673 }
  0x89   :  { %v682_v1 = vsel %vm681_vm4, %v674_v59, %v676_v58  ;;  %v1874_v58 = vld [vmem:[%s12017_s1] sm:$0xff]  ;;  %v1876_v59 = vld [vmem:[%s12017_s1 + $0x10] sm:$0xff] }
  0x8a   :  { %6347 = vmatpush1.msk.msra.mxu1 %vm72_vm0, %v8674_v40  ;;  %3253 = vrot.lane.b32.xlu0 %v8718_v44, %s8406_s19 }
  0x8b   :  { %6348 = vmatmul.mubr.msk.f32.vlgmr.msra.gmra.mrb[4].mxu1 %vm65_vm1, %v506_v57  ;;  %6848 = vmatpush1.bf16.msra.mxu0 %v8606_v34  ;;  %v1877_v57 = vld [vmem:[%s12017_s1 + $0x18] sm:$0xff] }
  0x8c   :  { %6850 = vmatprep.subr.bf16.mxu1 %v8509_v8  ;;  %6350 = vmatprep.subr.msk.mxu0 %vm72_vm0, %v668_v60  ;;  %v808_v63 = vpop.permute.xlu0 %807  ;;  %v678_v0 = vpop.permute.xlu1 %677 }
  0x8d   :  { %6852 = vmatpush1.bf16.msra.mxu1 %v8511_v9  ;;  %582 = vmatprep.mubr.f32.mxu1 %v12029_v2 }
  0x8e   :  { %6854 = vmatprep.subr.bf16.mxu1 %v8519_v12  ;;  %2502 = vrot.lane.b32.xlu0 %v8681_v41, %s8407_s18 }
  0x8f   :  { %6351 = vmatpush1.msk.msra.mxu0 %vm72_vm0, %v667_v62  ;;  %6349 = vmatmul.mubr.msk.f32.gmra.mrb[6].mxu1 %vm65_vm1, %v507_v61  ;;  %v1881_v61 = vld [vmem:[%s12017_s1 + $0x38] sm:$0xff] }
  0x90   :  { %6352 = vmatmul.mubr.msk.f32.vlgmr.msra.gmra.mrb[8].mxu0 %vm65_vm1, %v682_v1  ;;  %879 = vmatprep.mubr.f32.mxu1 %v12029_v2  ;;  %v680_v3 = vpop.permute.xlu0 %679  ;;  %v810_v4 = vpop.permute.xlu1 %809  ;;  %v1878_v1 = vld [vmem:[%s12017_s1 + $0x20] sm:$0xff] }
  0x91   :  { %6856 = vmatpush1.bf16.msra.mxu1 %v8539_v17  ;;  %v683_v5 = vsel %vm681_vm4, %v678_v0, %v680_v3  ;;  %764 = vmatprep.mubr.f32.mxu0 %v12029_v2  ;;  %v8986_v0 = vld [vmem:[%s12016_s0 + $0x60] sm:$0xff]  ;;  %v1880_v3 = vld [vmem:[%s12017_s1 + $0x30] sm:$0xff] }
  0x92   :  { %6858 = vmatprep.subr.bf16.mxu1 %v8543_v18  ;;  %6870 = vmatprep.subr.bf16.mxu0 %v8509_v8 }
  0x93   :  { %6872 = vmatpush1.bf16.msra.mxu0 %v8511_v9  ;;  %3255 = vrot.lane.b32.xlu1 %v8986_v0, %s8406_s19  ;;  %s8408_s19 = smov 124  }
  0x94   :  { %6353 = vmatmul.mubr.msk.f32.gmra.mrb[10].mxu0 %vm65_vm1, %v683_v5  ;;  %6874 = vmatprep.subr.bf16.mxu0 %v8519_v12  ;;  %v8790_v6 = vpop.permute.xlu1 %1109  ;;  %v8792_v7 = vpop.permute.xlu0 %1107  ;;  %v9005_v5 = vpack.c.bf16 %v1880_v3, %v1878_v1  ;;  %v9264_v1 = vld [vmem:[%s12017_s1 + $0xa8] sm:$0xf] }
  0x95   :  { %6860 = vmatpush1.bf16.msra.mxu1 %v8566_v24  ;;  %1050 = vmatprep.mubr.f32.mxu0 %v12029_v2  ;;  %v1116_v36 = vsel %vm1115_vm5, %v8792_v7, %v8790_v6  ;;  %v3400_v3 = vld [vmem:[%s12017_s1 + $0x8] sm:$0xff] }
  0x96   :  { %6862 = vmatprep.subr.bf16.mxu1 %v8570_v25  ;;  %3558 = vrot.lane.b32.xlu0 %v8938_v55, %s8408_s19 }
  0x97   :  { %6876 = vmatpush1.bf16.msra.mxu0 %v8539_v17  ;;  %2504 = vrot.lane.b32.xlu1 %v8710_v43, %s8407_s18 }
  0x98   :  { %6878 = vmatprep.subr.bf16.mxu0 %v8543_v18  ;;  %v8799_v10 = vpop.permute.xlu1 %1113  ;;  %v8801_v11 = vpop.permute.xlu0 %1111 }
  0x99   :  { %6864 = vmatpush1.bf16.msra.mxu1 %v8590_v30  ;;  %v1117_v39 = vsel %vm1115_vm5, %v8801_v11, %v8799_v10 }
  0x9a   :  { %6866 = vmatprep.subr.bf16.mxu1 %v8594_v31  ;;  %2508 = vrot.lane.b32.xlu0 %v8718_v44, %s8407_s18  ;;  %v1895_v44 = vld [vmem:[%s12017_s1 + $0xa8] sm:$0xf] }
  0x9b   :  { %6880 = vmatpush1.bf16.msra.mxu0 %v8566_v24  ;;  %2506 = vrot.lane.b32.xlu1 %v8691_v42, %s8407_s18  ;;  %v2782_v42 = vld [vmem:[%s12016_s0 + $0x18] sm:$0xff] }
  0x9c   :  { %6882 = vmatprep.subr.bf16.mxu0 %v8570_v25  ;;  %v8807_v13 = vpop.permute.xlu1 %1419  ;;  %v8809_v14 = vpop.permute.xlu0 %1417 }
  0x9d   :  { %6868 = vmatpush1.bf16.msra.mxu1 %v8606_v34  ;;  %v1426_v52 = vsel %vm1425_vm7, %v8809_v14, %v8807_v13  ;;  %v2190_v13 = vld [vmem:[%s12017_s1 + $0x40] sm:$0xff]  ;;  %v2192_v14 = vld [vmem:[%s12017_s1 + $0x50] sm:$0xff] }
  0x9e   :  { %6354 = vmatprep.subr.msk.mxu1 %vm72_vm0, %v668_v60  ;;  %2814 = vrot.lane.b32.xlu0 %v8710_v43, %s8409_s27 }
  0x9f   :  { %6884 = vmatpush1.bf16.msra.mxu0 %v8590_v30  ;;  %2812 = vrot.lane.b32.xlu1 %v2782_v42, %s8409_s27 }
  0xa0   :  { %6886 = vmatprep.subr.bf16.mxu0 %v8594_v31  ;;  %v8815_v15 = vpop.permute.xlu1 %1421  ;;  %v973_v16 = vpop.permute.xlu0 %972 }
  0xa1   :  { %6355 = vmatpush1.msk.msra.mxu1 %vm72_vm0, %v667_v62 }
  0xa2   :  { %6356 = vmatmul.mubr.msk.f32.vlgmr.msra.gmra.mrb[8].mxu1 %vm65_vm1, %v808_v63  ;;  %6890 = vmatprep.subr.bf16.mxu1 %v8509_v8  ;;  %v8981_v63 = vpack.c.bf16 %v1876_v59, %v1874_v58 }
  0xa3   :  { %885 = vmatprep.mubr.f32.mxu1 %v12029_v2  ;;  %6892 = vmatpush1.bf16.msra.mxu1 %v8511_v9 }
  0xa4   :  { %6894 = vmatprep.subr.bf16.mxu1 %v8519_v12  ;;  %6888 = vmatpush1.bf16.msra.mxu0 %v8606_v34  ;;  %v8827_v20 = vpop.permute.xlu1 %1724  ;;  %v8829_v21 = vpop.permute.xlu0 %1423 }
  0xa5   :  { %6358 = vmatprep.subr.msk.mxu0 %vm72_vm0, %v969_v19  ;;  %v1427_v54 = vsel %vm1425_vm7, %v8815_v15, %v8829_v21  ;;  %v2195_v15 = vld [vmem:[%s12017_s1 + $0x68] sm:$0xff]  ;;  %v2194_v21 = vld [vmem:[%s12017_s1 + $0x60] sm:$0xff] }
  0xa6   :  { %6357 = vmatmul.mubr.msk.f32.gmra.mrb[10].mxu1 %vm65_vm1, %v810_v4 }
  0xa7   :  { %6896 = vmatpush1.bf16.msra.mxu1 %v8539_v17  ;;  %1186 = vmatprep.mubr.f32.mxu1 %v12029_v2 }
  0xa8   :  { %6898 = vmatprep.subr.bf16.mxu1 %v8543_v18  ;;  %6359 = vmatpush1.msk.msra.mxu0 %vm72_vm0, %v968_v22  ;;  %v8840_v23 = vpop.permute.xlu1 %1728  ;;  %v8842_v26 = vpop.permute.xlu0 %1726 }
  0xa9   :  { %6910 = vmatprep.subr.bf16.mxu0 %v8509_v8  ;;  %6360 = vmatmul.mubr.msk.f32.vlgmr.msra.gmra.mrb[12].mxu0 %vm65_vm1, %v973_v16  ;;  %v1733_v41 = vsel %vm1732_vm8, %v8827_v20, %v8842_v26  ;;  %v2197_v16 = vld [vmem:[%s12017_s1 + $0x78] sm:$0xff] }
  0xaa   :  { %6912 = vmatpush1.bf16.msra.mxu0 %v8511_v9  ;;  %1056 = vmatprep.mubr.f32.mxu0 %v12029_v2  ;;  %v9105_v20 = vpack.c.bf16 %v2197_v16, %v2195_v15  ;;  %v2201_v26 = vld [vmem:[%s12017_s1 + $0x98] sm:$0xff]  ;;  %v9300_v15 = vld [vmem:[%s12017_s1 + $0xa0] sm:$0xf] }
  0xab   :  { %6900 = vmatpush1.bf16.msra.mxu1 %v8566_v24  ;;  %6914 = vmatprep.subr.bf16.mxu0 %v8519_v12 }
  0xac   :  { %6902 = vmatprep.subr.bf16.mxu1 %v8570_v25  ;;  %v8851_v27 = vpop.permute.xlu1 %2034  ;;  %v8853_v28 = vpop.permute.xlu0 %1730 }
  0xad   :  { %v1734_v6 = vsel %vm1732_vm8, %v8840_v23, %v8853_v28  ;;  %v2199_v23 = vld [vmem:[%s12017_s1 + $0x88] sm:$0xff] }
  0xae   :  { %6916 = vmatpush1.bf16.msra.mxu0 %v8539_v17  ;;  %v9123_v28 = vpack.c.bf16 %v2201_v26, %v2199_v23 }
  0xaf   :  { %6904 = vmatpush1.bf16.msra.mxu1 %v8590_v30  ;;  %6918 = vmatprep.subr.bf16.mxu0 %v8543_v18 }
  0xb0   :  { %6906 = vmatprep.subr.bf16.mxu1 %v8594_v31  ;;  %v975_v29 = vpop.permute.xlu1 %974  ;;  %v8859_v32 = vpop.permute.xlu0 %2036 }
  0xb1   :  { %6361 = vmatmul.mubr.msk.f32.gmra.mrb[14].mxu0 %vm65_vm1, %v975_v29  ;;  %v2043_v10 = vsel %vm2042_vm9, %v8851_v27, %v8859_v32  ;;  %v2198_v29 = vld [vmem:[%s12017_s1 + $0x80] sm:$0xff]  ;;  %v2200_v32 = vld [vmem:[%s12017_s1 + $0x90] sm:$0xff] }
  0xb2   :  { %6920 = vmatpush1.bf16.msra.mxu0 %v8566_v24  ;;  %1368 = vmatprep.mubr.f32.mxu0 %v12029_v2 }
  0xb3   :  { %6908 = vmatpush1.bf16.msra.mxu1 %v8606_v34  ;;  %6922 = vmatprep.subr.bf16.mxu0 %v8570_v25 }
  0xb4   :  { %6362 = vmatprep.subr.msk.mxu1 %vm72_vm0, %v969_v19  ;;  %v8867_v33 = vpop.permute.xlu1 %2040  ;;  %v8869_v35 = vpop.permute.xlu0 %2038  ;;  %v9101_v19 = vpack.c.bf16 %v2192_v14, %v2190_v13  ;;  %v3406_v13 = vld [vmem:[%s12017_s1 + $0x38] sm:$0xff] }
  0xb6   :  { %6924 = vmatpush1.bf16.msra.mxu0 %v8590_v30 }
  0xb7   :  { %6363 = vmatpush1.msk.msra.mxu1 %vm72_vm0, %v968_v22  ;;  %6926 = vmatprep.subr.bf16.mxu0 %v8594_v31  ;;  %v2196_v22 = vld [vmem:[%s12017_s1 + $0x70] sm:$0xff] }
  0xb8   :  { %6364 = vmatmul.mubr.msk.f32.vlgmr.msra.gmra.mrb[12].mxu1 %vm65_vm1, %v1116_v36  ;;  %6930 = vmatprep.subr.bf16.mxu1 %v8509_v8  ;;  %v1284_v38 = vpop.permute.xlu0 %1283  ;;  %v1286_v40 = vpop.permute.xlu1 %1285  ;;  %v9120_v27 = vpack.c.bf16 %v2196_v22, %v2194_v21  ;;  %v9146_v36 = vld [vmem:[%s12017_s1 + $0xa0] sm:$0xf] }
  0xb9   :  { %6932 = vmatpush1.bf16.msra.mxu1 %v8511_v9  ;;  %1192 = vmatprep.mubr.f32.mxu1 %v12029_v2  ;;  %v1292_v46 = vsel %vm1291_vm6, %v1284_v38, %v1286_v40  ;;  %v9168_v40 = vld [vmem:[%s12017_s1 + $0xa8] sm:$0xf] }
  0xba   :  { %6934 = vmatprep.subr.bf16.mxu1 %v8519_v12  ;;  %6928 = vmatpush1.bf16.msra.mxu0 %v8606_v34 }
  0xbb   :  { %6366 = vmatprep.subr.msk.mxu0 %vm72_vm0, %v1278_v37 }
  0xbc   :  { %6365 = vmatmul.mubr.msk.f32.gmra.mrb[14].mxu1 %vm65_vm1, %v1117_v39  ;;  %v8895_v47 = vpop.permute.xlu0 %2333  ;;  %v1288_v48 = vpop.permute.xlu1 %1287 }
  0xbd   :  { %6936 = vmatpush1.bf16.msra.mxu1 %v8539_v17  ;;  %1496 = vmatprep.mubr.f32.mxu1 %v12029_v2 }
  0xbe   :  { %6938 = vmatprep.subr.bf16.mxu1 %v8543_v18  ;;  %6367 = vmatpush1.msk.msra.mxu0 %vm72_vm0, %v1277_v45 }
  0xbf   :  { %6950 = vmatprep.subr.bf16.mxu0 %v8509_v8  ;;  %6368 = vmatmul.mubr.msk.f32.vlgmr.msra.gmra.mrb[16].mxu0 %vm65_vm1, %v1292_v46 }
  0xc0   :  { %6952 = vmatpush1.bf16.msra.mxu0 %v8511_v9  ;;  %v1290_v49 = vpop.permute.xlu0 %1289  ;;  %1374 = vmatprep.mubr.f32.mxu0 %v12029_v2  ;;  %v8919_v51 = vpop.permute.xlu1 %2335 }
  0xc1   :  { %6940 = vmatpush1.bf16.msra.mxu1 %v8566_v24  ;;  %6954 = vmatprep.subr.bf16.mxu0 %v8519_v12  ;;  %v1293_v50 = vsel %vm1291_vm6, %v1288_v48, %v1290_v49  ;;  %v9177_v48 = vld [vmem:[%s12017_s1 + $0xa0] sm:$0xf] }
  0xc2   :  { %6942 = vmatprep.subr.bf16.mxu1 %v8570_v25 }
  0xc3   :  { %6369 = vmatmul.mubr.msk.f32.gmra.mrb[18].mxu0 %vm65_vm1, %v1293_v50 }
  0xc4   :  { %6956 = vmatpush1.bf16.msra.mxu0 %v8539_v17  ;;  %1667 = vmatprep.mubr.f32.mxu0 %v12029_v2 }
  0xc5   :  { %6944 = vmatpush1.bf16.msra.mxu1 %v8590_v30  ;;  %6958 = vmatprep.subr.bf16.mxu0 %v8543_v18 }
  0xc6   :  { %6946 = vmatprep.subr.bf16.mxu1 %v8594_v31 }
  0xc8   :  { %6960 = vmatpush1.bf16.msra.mxu0 %v8566_v24 }
  0xc9   :  { %6948 = vmatpush1.bf16.msra.mxu1 %v8606_v34  ;;  %6962 = vmatprep.subr.bf16.mxu0 %v8570_v25 }
  0xca   :  { %6370 = vmatprep.subr.msk.mxu1 %vm72_vm0, %v1278_v37 }
  0xcc   :  { %6964 = vmatpush1.bf16.msra.mxu0 %v8590_v30 }
  0xcd   :  { %6371 = vmatpush1.msk.msra.mxu1 %vm72_vm0, %v1277_v45  ;;  %6966 = vmatprep.subr.bf16.mxu0 %v8594_v31 }
  0xce   :  { %6372 = vmatmul.mubr.msk.f32.vlgmr.msra.gmra.mrb[16].mxu1 %vm65_vm1, %v1426_v52  ;;  %6970 = vmatprep.subr.bf16.mxu1 %v8509_v8  ;;  %v8942_v8 = vpop.permute.xlu1 %2636 }
  0xcf   :  { %6972 = vmatpush1.bf16.msra.mxu1 %v8511_v9  ;;  %1502 = vmatprep.mubr.f32.mxu1 %v12029_v2  ;;  %v1590_v9 = vpop.permute.xlu0 %1589 }
  0xd0   :  { %6974 = vmatprep.subr.bf16.mxu1 %v8519_v12  ;;  %6968 = vmatpush1.bf16.msra.mxu0 %v8606_v34  ;;  %v1875_v12 = vld [vmem:[%s12017_s1 + $0x8] sm:$0xff] }
  0xd1   :  { %6374 = vmatprep.subr.msk.mxu0 %vm72_vm0, %v1586_v53  ;;  %v8970_v60 = vpack.c.bf16 %v1877_v57, %v1875_v12 }
  0xd2   :  { %6373 = vmatmul.mubr.msk.f32.gmra.mrb[18].mxu1 %vm65_vm1, %v1427_v54  ;;  %v1592_v62 = vpop.permute.xlu1 %1591 }
  0xd3   :  { %6976 = vmatpush1.bf16.msra.mxu1 %v8539_v17  ;;  %1803 = vmatprep.mubr.f32.mxu1 %v12029_v2  ;;  %v1879_v17 = vld [vmem:[%s12017_s1 + $0x28] sm:$0xff]  ;;  %v2639_v37 = vpop.permute.xlu0 %2638 }
  0xd4   :  { %6978 = vmatprep.subr.bf16.mxu1 %v8543_v18  ;;  %6375 = vmatpush1.msk.msra.mxu0 %vm72_vm0, %v1585_v56  ;;  %v8999_v4 = vpack.c.bf16 %v1881_v61, %v1879_v17  ;;  %v2645_v49 = vsel %vm2644_vm10, %v8942_v8, %v2639_v37  ;;  %v9213_v8 = vld [vmem:[%s12017_s1 + $0xa8] sm:$0xf] }
  0xd5   :  { %6376 = vmatmul.mubr.msk.f32.vlgmr.msra.gmra.mrb[20].mxu0 %vm65_vm1, %v1590_v9  ;;  %6990 = vmatprep.subr.bf16.mxu0 %v8970_v60  ;;  %v9224_v9 = vld [vmem:[%s12017_s1 + $0xa0] sm:$0xf] }
  0xd6   :  { %1673 = vmatprep.mubr.f32.mxu0 %v12029_v2  ;;  %6992 = vmatpush1.bf16.msra.mxu0 %v8981_v63  ;;  %v2643_v38 = vpop.permute.xlu1 %2642 }
  0xd7   :  { %6980 = vmatpush1.bf16.msra.mxu1 %v8566_v24  ;;  %6994 = vmatprep.subr.bf16.mxu0 %v8999_v4  ;;  %v2641_v39 = vpop.permute.xlu0 %2640 }
  0xd8   :  { %6982 = vmatprep.subr.bf16.mxu1 %v8570_v25  ;;  %v2646_v50 = vsel %vm2644_vm10, %v2641_v39, %v2643_v38 }
  0xd9   :  { %6377 = vmatmul.mubr.msk.f32.gmra.mrb[22].mxu0 %vm65_vm1, %v1592_v62 }
  0xda   :  { %1985 = vmatprep.mubr.f32.mxu0 %v12029_v2  ;;  %6996 = vmatpush1.bf16.msra.mxu0 %v9005_v5  ;;  %v1903_v45 = vpop.permute.xlu1 %1902 }
  0xdb   :  { %6984 = vmatpush1.bf16.msra.mxu1 %v8590_v30  ;;  %6998 = vmatprep.subr.bf16.mxu0 %v8543_v18  ;;  %v1901_v46 = vpop.permute.xlu0 %1900 }
  0xdc   :  { %6986 = vmatprep.subr.bf16.mxu1 %v8594_v31 }
  0xde   :  { %7000 = vmatpush1.bf16.msra.mxu0 %v8566_v24  ;;  %v1905_v52 = vpop.permute.xlu1 %1904 }
  0xdf   :  { %6988 = vmatpush1.bf16.msra.mxu1 %v8606_v34  ;;  %7002 = vmatprep.subr.bf16.mxu0 %v8570_v25 }
  0xe0   :  { %6378 = vmatprep.subr.msk.mxu1 %vm72_vm0, %v1586_v53 }
  0xe2   :  { %7004 = vmatpush1.bf16.msra.mxu0 %v8590_v30  ;;  %v2949_v12 = vpop.permute.xlu1 %2948 }
  0xe3   :  { %6379 = vmatpush1.msk.msra.mxu1 %vm72_vm0, %v1585_v56  ;;  %7006 = vmatprep.subr.bf16.mxu0 %v8594_v31 }
  0xe4   :  { %6380 = vmatmul.mubr.msk.f32.vlgmr.msra.gmra.mrb[20].mxu1 %vm65_vm1, %v1733_v41  ;;  %7010 = vmatprep.subr.bf16.mxu1 %v8970_v60  ;;  %v3402_v41 = vld [vmem:[%s12017_s1 + $0x18] sm:$0xff] }
  0xe5   :  { %1809 = vmatprep.mubr.f32.mxu1 %v12029_v2  ;;  %7012 = vmatpush1.bf16.msra.mxu1 %v8981_v63  ;;  %v9302_v16 = vpack.c.bf16 %v3402_v41, %v3400_v3  ;;  %v771_v3 = vld [vmem:[%s12018_s2] sm:$0x3] }
  0xe6   :  { %7014 = vmatprep.subr.bf16.mxu1 %v8999_v4  ;;  %7008 = vmatpush1.bf16.msra.mxu0 %v8606_v34  ;;  %v3250_v57 = vpop.permute.xlu1 %3249 }
  0xe7   :  { %6382 = vmatprep.subr.msk.mxu0 %vm72_vm0, %v1895_v44 }
  0xe8   :  { %6381 = vmatmul.mubr.msk.f32.gmra.mrb[22].mxu1 %vm65_vm1, %v1734_v6 }
  0xe9   :  { %7016 = vmatpush1.bf16.msra.mxu1 %v9005_v5  ;;  %2113 = vmatprep.mubr.f32.mxu1 %v12029_v2 }
  0xea   :  { %7018 = vmatprep.subr.bf16.mxu1 %v8543_v18  ;;  %v1894_v18 = vld [vmem:[%s12017_s1 + $0xa0] sm:$0xf]  ;;  %v2209_v59 = vpop.permute.xlu1 %2208 }
  0xeb   :  { %6383 = vmatpush1.msk.msra.mxu0 %vm72_vm0, %v1894_v18 }
  0xec   :  { %7030 = vmatprep.subr.bf16.mxu0 %v8970_v60 }
  0xed   :  { %7020 = vmatpush1.bf16.msra.mxu1 %v8566_v24 }
  0xee   :  { %7022 = vmatprep.subr.bf16.mxu1 %v8570_v25 }
  0xef   :  { %v9055_v7 = vpop.f32.mrb[0].mxu0 }
  0xf0   :  { %v9059_v43 = vpop.f32.mrb[1].mxu0 }
  0xf1   :  { %7024 = vmatpush1.bf16.msra.mxu1 %v8590_v30  ;;  %v2191_v30 = vld [vmem:[%s12017_s1 + $0x48] sm:$0xff] }
  0xf2   :  { %7026 = vmatprep.subr.bf16.mxu1 %v8594_v31  ;;  %v2193_v31 = vld [vmem:[%s12017_s1 + $0x58] sm:$0xff] }
  0xf3   :  { %v9063_v24 = vpop.f32.mrb[2].mxu0  ;;  %v9085_v11 = vpack.c.bf16 %v2193_v31, %v2191_v30 }
  0xf4   :  { %v9066_v25 = vpop.f32.mrb[3].mxu0 }
  0xf5   :  { %7028 = vmatpush1.bf16.msra.mxu1 %v8606_v34  ;;  %v2044_v34 = vsel %vm2042_vm9, %v8869_v35, %v8867_v33  ;;  %v9132_v33 = vpack.c.bf16 %v2200_v32, %v2198_v29  ;;  %v9138_v35 = vld [vmem:[%s12017_s1 + $0xa8] sm:$0xf]  ;;  %v3403_v29 = vld [vmem:[%s12017_s1 + $0x20] sm:$0xff]  ;;  %v3405_v32 = vld [vmem:[%s12017_s1 + $0x30] sm:$0xff] }
  0xf6   :  { %6386 = vmatprep.subr.msk.mxu1 %vm72_vm0, %v1895_v44  ;;  %v3399_v44 = vld [vmem:[%s12017_s1] sm:$0xff]  ;;  %v9327_v37 = vpack.c.bf16 %v3405_v32, %v3403_v29  ;;  %v3768_v29 = vld [vmem:[%s12020_s4 + $0x208] sm:$0xff]  ;;  %v3770_v32 = vld [vmem:[%s12020_s4 + $0x218] sm:$0xff] }
  0xf9   :  { %6387 = vmatpush1.msk.msra.mxu1 %vm72_vm0, %v1894_v18  ;;  %v3401_v18 = vld [vmem:[%s12017_s1 + $0x10] sm:$0xff] }
  0xfa   :  { %6388 = vmatmul.mubr.msk.f32.vlgmr.msra.gmra.mrb[24].mxu1 %vm65_vm1, %v2043_v10  ;;  %7050 = vmatprep.subr.bf16.mxu1 %v8970_v60  ;;  %v9307_v22 = vpack.c.bf16 %v3401_v18, %v3399_v44 }
  0xfb   :  { %7052 = vmatpush1.bf16.msra.mxu1 %v8981_v63  ;;  %2119 = vmatprep.mubr.f32.mxu1 %v12029_v2 }
  0xfc   :  { %7054 = vmatprep.subr.bf16.mxu1 %v8999_v4 }
  0xfe   :  { %6389 = vmatmul.mubr.msk.f32.gmra.mrb[26].mxu1 %vm65_vm1, %v2044_v34  ;;  %v3404_v34 = vld [vmem:[%s12017_s1 + $0x28] sm:$0xff] }
  0xff   :  { %7056 = vmatpush1.bf16.msra.mxu1 %v9005_v5  ;;  %2405 = vmatprep.mubr.f32.mxu1 %v12029_v2  ;;  %v9310_v26 = vpack.c.bf16 %v3406_v13, %v3404_v34 }
 0x100   :  { %7058 = vmatprep.subr.bf16.mxu1 %v9085_v11 }
 0x103   :  { %7060 = vmatpush1.bf16.msra.mxu1 %v9101_v19 }
 0x104   :  { %7062 = vmatprep.subr.bf16.mxu1 %v9105_v20 }
 0x105   :  { %v3256_v6 = vpop.permute.xlu1 %3255 }
 0x107   :  { %7064 = vmatpush1.bf16.msra.mxu1 %v9120_v27 }
 0x108   :  { %7066 = vmatprep.subr.bf16.mxu1 %v9123_v28 }
 0x109   :  { %v2505_v23 = vpop.permute.xlu1 %2504 }
 0x10b   :  { %7068 = vmatpush1.bf16.msra.mxu1 %v9132_v33 }
 0x10c   :  { %6394 = vmatprep.subr.msk.mxu1 %vm72_vm0, %v9138_v35 }
 0x10f   :  { %6395 = vmatpush1.msk.msra.mxu1 %vm72_vm0, %v9146_v36 }
 0x110   :  { %7090 = vmatprep.subr.bf16.mxu1 %v8970_v60  ;;  %6396 = vmatmul.mubr.msk.f32.vlgmr.msra.gmra.mrb[28].mxu1 %vm65_vm1, %v8895_v47  ;;  %v1909_v47 = vsel %vm1908_vm11, %v1901_v46, %v1903_v45  ;;  %v3414_v45 = vld [vmem:[%s12017_s1 + $0x78] sm:$0xff]  ;;  %v158_v46 = vlaneseq }
 0x111   :  { %7092 = vmatpush1.bf16.msra.mxu1 %v8981_v63  ;;  %2411 = vmatprep.mubr.f32.mxu1 %v12029_v2 }
 0x112   :  { %7094 = vmatprep.subr.bf16.mxu1 %v8999_v4  ;;  %6384 = vmatmul.mubr.msk.f32.vlgmr.msra.gmra.mrb[24].mxu0 %vm65_vm1, %v1909_v47 }
 0x113   :  { %7032 = vmatpush1.bf16.msra.mxu0 %v8981_v63  ;;  %1991 = vmatprep.mubr.f32.mxu0 %v12029_v2 }
 0x114   :  { %6397 = vmatmul.mubr.msk.f32.gmra.mrb[30].mxu1 %vm65_vm1, %v8919_v51  ;;  %7034 = vmatprep.subr.bf16.mxu0 %v8999_v4  ;;  %v2947_v51 = vpop.permute.xlu0 %2946 }
 0x115   :  { %7096 = vmatpush1.bf16.msra.mxu1 %v9005_v5  ;;  %2715 = vmatprep.mubr.f32.mxu1 %v12029_v2 }
 0x116   :  { %7098 = vmatprep.subr.bf16.mxu1 %v9085_v11 }
 0x117   :  { %7036 = vmatpush1.bf16.msra.mxu0 %v9005_v5 }
 0x118   :  { %7038 = vmatprep.subr.bf16.mxu0 %v9085_v11  ;;  %v1907_v53 = vpop.permute.xlu0 %1906 }
 0x119   :  { %7100 = vmatpush1.bf16.msra.mxu1 %v9101_v19  ;;  %v1910_v54 = vsel %vm1908_vm11, %v1905_v52, %v1907_v53  ;;  %v3416_v53 = vld [vmem:[%s12017_s1 + $0x88] sm:$0xff] }
 0x11a   :  { %7102 = vmatprep.subr.bf16.mxu1 %v9105_v20  ;;  %6385 = vmatmul.mubr.msk.f32.gmra.mrb[26].mxu0 %vm65_vm1, %v1910_v54  ;;  %v3418_v54 = vld [vmem:[%s12017_s1 + $0x98] sm:$0xff] }
 0x11b   :  { %7040 = vmatpush1.bf16.msra.mxu0 %v9101_v19  ;;  %2284 = vmatprep.mubr.f32.mxu0 %v12029_v2 }
 0x11c   :  { %7042 = vmatprep.subr.bf16.mxu0 %v9105_v20  ;;  %v2207_v56 = vpop.permute.xlu0 %2206 }
 0x11d   :  { %7104 = vmatpush1.bf16.msra.mxu1 %v9120_v27 }
 0x11e   :  { %7106 = vmatprep.subr.bf16.mxu1 %v9123_v28 }
 0x11f   :  { %7044 = vmatpush1.bf16.msra.mxu0 %v9120_v27 }
 0x120   :  { %7046 = vmatprep.subr.bf16.mxu0 %v9123_v28  ;;  %v3252_v58 = vpop.permute.xlu0 %3251 }
 0x121   :  { %7108 = vmatpush1.bf16.msra.mxu1 %v9132_v33  ;;  %v3258_v21 = vsel %vm3257_vm12, %v3250_v57, %v3252_v58  ;;  %v9372_v58 = vpack.c.bf16 %v3418_v54, %v3416_v53 }
 0x122   :  { %6402 = vmatprep.subr.msk.mxu1 %vm72_vm0, %v9168_v40 }
 0x123   :  { %7048 = vmatpush1.bf16.msra.mxu0 %v9132_v33 }
 0x124   :  { %6390 = vmatprep.subr.msk.mxu0 %vm72_vm0, %v9138_v35  ;;  %v3254_v61 = vpop.permute.xlu0 %3253 }
 0x125   :  { %6403 = vmatpush1.msk.msra.mxu1 %vm72_vm0, %v9177_v48  ;;  %v3259_v38 = vsel %vm3257_vm12, %v3254_v61, %v3256_v6  ;;  %v3417_v61 = vld [vmem:[%s12017_s1 + $0x90] sm:$0xff] }
 0x126   :  { %6404 = vmatmul.mubr.msk.f32.vlgmr.msra.gmra.mrb[32].mxu1 %vm65_vm1, %v2645_v49  ;;  %7130 = vmatprep.subr.bf16.mxu1 %v8970_v60  ;;  %v3411_v49 = vld [vmem:[%s12017_s1 + $0x60] sm:$0xff] }
 0x127   :  { %7132 = vmatpush1.bf16.msra.mxu1 %v8981_v63  ;;  %2721 = vmatprep.mubr.f32.mxu1 %v12029_v2 }
 0x128   :  { %7134 = vmatprep.subr.bf16.mxu1 %v8999_v4  ;;  %6391 = vmatpush1.msk.msra.mxu0 %vm72_vm0, %v9146_v36  ;;  %v2503_v10 = vpop.permute.xlu0 %2502 }
 0x129   :  { %6392 = vmatmul.mubr.msk.f32.vlgmr.msra.gmra.mrb[28].mxu0 %vm65_vm1, %v2207_v56  ;;  %7070 = vmatprep.subr.bf16.mxu0 %v8970_v60  ;;  %v2511_v35 = vsel %vm2510_vm13, %v2503_v10, %v2505_v23  ;;  %v787_v10 = vld [vmem:[%s12019_s3] sm:$0x3]  ;;  %v9410_v23 = vld [vmem:[%s12017_s1 + $0xa8] sm:$0xf] }
 0x12a   :  { %6405 = vmatmul.mubr.msk.f32.gmra.mrb[34].mxu1 %vm65_vm1, %v2646_v50  ;;  %7072 = vmatpush1.bf16.msra.mxu0 %v8981_v63  ;;  %v3413_v50 = vld [vmem:[%s12017_s1 + $0x70] sm:$0xff] }
 0x12b   :  { %7136 = vmatpush1.bf16.msra.mxu1 %v9005_v5  ;;  %3018 = vmatprep.mubr.f32.mxu1 %v12029_v2  ;;  %v9368_v57 = vpack.c.bf16 %v3413_v50, %v3411_v49 }
 0x12c   :  { %7138 = vmatprep.subr.bf16.mxu1 %v9085_v11  ;;  %2290 = vmatprep.mubr.f32.mxu0 %v12029_v2  ;;  %v9324_v36 = vpop.permute.xlu0 %3558 }
 0x12d   :  { %7074 = vmatprep.subr.bf16.mxu0 %v8999_v4  ;;  %6393 = vmatmul.mubr.msk.f32.gmra.mrb[30].mxu0 %vm65_vm1, %v2209_v59  ;;  %v3415_v59 = vld [vmem:[%s12017_s1 + $0x80] sm:$0xff] }
 0x12e   :  { %7076 = vmatpush1.bf16.msra.mxu0 %v9005_v5  ;;  %2587 = vmatprep.mubr.f32.mxu0 %v12029_v2  ;;  %v9397_v34 = vpack.c.bf16 %v3417_v61, %v3415_v59 }
 0x12f   :  { %7140 = vmatpush1.bf16.msra.mxu1 %v9101_v19  ;;  %7078 = vmatprep.subr.bf16.mxu0 %v9085_v11 }
 0x130   :  { %7142 = vmatprep.subr.bf16.mxu1 %v9105_v20  ;;  %v2509_v52 = vpop.permute.xlu0 %2508 }
 0x132   :  { %7080 = vmatpush1.bf16.msra.mxu0 %v9101_v19 }
 0x133   :  { %7144 = vmatpush1.bf16.msra.mxu1 %v9120_v27  ;;  %7082 = vmatprep.subr.bf16.mxu0 %v9105_v20 }
 0x134   :  { %7146 = vmatprep.subr.bf16.mxu1 %v9123_v28 }
 0x136   :  { %7084 = vmatpush1.bf16.msra.mxu0 %v9120_v27 }
 0x137   :  { %7148 = vmatpush1.bf16.msra.mxu1 %v9132_v33  ;;  %7086 = vmatprep.subr.bf16.mxu0 %v9123_v28 }
 0x138   :  { %6410 = vmatprep.subr.msk.mxu1 %vm72_vm0, %v9213_v8 }
 0x13a   :  { %7088 = vmatpush1.bf16.msra.mxu0 %v9132_v33 }
 0x13b   :  { %6411 = vmatpush1.msk.msra.mxu1 %vm72_vm0, %v9224_v9  ;;  %6398 = vmatprep.subr.msk.mxu0 %vm72_vm0, %v9168_v40  ;;  %v3412_v40 = vld [vmem:[%s12017_s1 + $0x68] sm:$0xff] }
 0x13c   :  { %7170 = vmatprep.subr.bf16.mxu1 %v8970_v60  ;;  %6412 = vmatmul.mubr.msk.f32.vlgmr.msra.gmra.mrb[36].mxu1 %vm65_vm1, %v2947_v51  ;;  %v2507_v51 = vpop.permute.xlu1 %2506 }
 0x13d   :  { %7172 = vmatpush1.bf16.msra.mxu1 %v8981_v63  ;;  %3024 = vmatprep.mubr.f32.mxu1 %v12029_v2  ;;  %v2512_v56 = vsel %vm2510_vm13, %v2507_v51, %v2509_v52  ;;  %v3772_v51 = vld [vmem:[%s12020_s4 + $0x228] sm:$0xff]  ;;  %v3774_v52 = vld [vmem:[%s12020_s4 + $0x238] sm:$0xff] }
 0x13e   :  { %7174 = vmatprep.subr.bf16.mxu1 %v8999_v4  ;;  %6399 = vmatpush1.msk.msra.mxu0 %vm72_vm0, %v9177_v48  ;;  %v9349_v48 = vpack.c.bf16 %v3414_v45, %v3412_v40  ;;  %v3767_v40 = vld [vmem:[%s12020_s4 + $0x200] sm:$0xff]  ;;  %v3769_v45 = vld [vmem:[%s12020_s4 + $0x210] sm:$0xff] }
 0x13f   :  { %7110 = vmatprep.subr.bf16.mxu0 %v8970_v60  ;;  %6400 = vmatmul.mubr.msk.f32.vlgmr.msra.gmra.mrb[32].mxu0 %vm65_vm1, %v2511_v35  ;;  %v9454_v61 = vpack.c.bf16 %v3769_v45, %v3767_v40 }
 0x140   :  { %6413 = vmatmul.mubr.msk.f32.gmra.mrb[38].mxu1 %vm65_vm1, %v2949_v12  ;;  %7112 = vmatpush1.bf16.msra.mxu0 %v8981_v63  ;;  %v159_v12 = vshrl.u32 %v158_v46, 7 }
 0x141   :  { %7176 = vmatpush1.bf16.msra.mxu1 %v9005_v5  ;;  %3328 = vmatprep.mubr.f32.mxu1 %v12029_v2  ;;  %12233 = vst [vmem:[#allocation7_spill] sm:$0xff] %v9454_v61 }
 0x142   :  { %7178 = vmatprep.subr.bf16.mxu1 %v9085_v11  ;;  %7114 = vmatprep.subr.bf16.mxu0 %v8999_v4  ;;  %v9385_v41 = vsub.s32 0, %v159_v12  ;;  %v9389_v44 = vsub.s32 1, %v159_v12  ;;  %v9450_v12 = vpack.c.bf16 %v3770_v32, %v3768_v29  ;;  %v3771_v29 = vld [vmem:[%s12020_s4 + $0x220] sm:$0xff]  ;;  %v3773_v32 = vld [vmem:[%s12020_s4 + $0x230] sm:$0xff] }
 0x143   :  { %2593 = vmatprep.mubr.f32.mxu0 %v12029_v2 }
 0x144   :  { %7116 = vmatpush1.bf16.msra.mxu0 %v9005_v5  ;;  %12229 = vst [vmem:[#allocation3_spill] sm:$0xff] %v9385_v41  ;;  %12230 = vst [vmem:[#allocation4_spill] sm:$0xff] %v9389_v44  ;;  %v9400_v13 = vrot.slane %v771_v3, %v9385_v41  ;;  %v9420_v35 = vrot.slane %v787_v10, %v9385_v41  ;;  %v9431_v49 = vrot.slane %v787_v10, %v9389_v44  ;;  %v2813_v10 = vpop.permute.xlu1 %2812 }
 0x145   :  { %7180 = vmatpush1.bf16.msra.mxu1 %v9101_v19  ;;  %7118 = vmatprep.subr.bf16.mxu0 %v9085_v11  ;;  %12232 = vst [vmem:[#allocation6_spill] sm:$0xff] %v9450_v12 }
 0x146   :  { %7182 = vmatprep.subr.bf16.mxu1 %v9105_v20  ;;  %6401 = vmatmul.mubr.msk.f32.gmra.mrb[34].mxu0 %vm65_vm1, %v2512_v56  ;;  %v9448_v56 = vld [vmem:[%s12017_s1 + $0xa0] sm:$0xf] }
 0x147   :  { %2897 = vmatprep.mubr.f32.mxu0 %v12029_v2  ;;  %12231 = vst [vmem:[#allocation5_spill] sm:$0xff] %v9448_v56 }
 0x148   :  { %v9252_v17 = vpop.f32.mrb[0].mxu1  ;;  %7120 = vmatpush1.bf16.msra.mxu0 %v9101_v19 }
 0x149   :  { %v9255_v62 = vpop.f32.mrb[1].mxu1  ;;  %7184 = vmatpush1.bf16.msra.mxu1 %v9120_v27  ;;  %7122 = vmatprep.subr.bf16.mxu0 %v9105_v20 }
 0x14a   :  { %7186 = vmatprep.subr.bf16.mxu1 %v9123_v28 }
 0x14c   :  { %v9274_v42 = vpop.f32.mrb[2].mxu1  ;;  %7124 = vmatpush1.bf16.msra.mxu0 %v9120_v27 }
 0x14d   :  { %v9282_v30 = vpop.f32.mrb[4].mxu0  ;;  %v9284_v31 = vpop.f32.mrb[3].mxu1  ;;  %7188 = vmatpush1.bf16.msra.mxu1 %v9132_v33  ;;  %7126 = vmatprep.subr.bf16.mxu0 %v9123_v28 }
 0x14e   :  { %v9293_v14 = vpop.f32.mrb[5].mxu0  ;;  %6418 = vmatprep.subr.msk.mxu1 %vm72_vm0, %v9264_v1 }
 0x150   :  { %7128 = vmatpush1.bf16.msra.mxu0 %v9132_v33 }
 0x151   :  { %6419 = vmatpush1.msk.msra.mxu1 %vm72_vm0, %v9300_v15  ;;  %6406 = vmatprep.subr.msk.mxu0 %vm72_vm0, %v9213_v8  ;;  %v2815_v8 = vpop.permute.xlu0 %2814 }
 0x152   :  { %7210 = vmatprep.subr.bf16.mxu1 %v9302_v16  ;;  %6420 = vmatmul.mubr.msk.f32.vlgmr.msra.gmra.mrb[40].mxu1 %vm65_vm1, %v3258_v21  ;;  %v9405_v21 = vrot.slane %v771_v3, %v9389_v44 }
 0x153   :  { %7212 = vmatpush1.bf16.msra.mxu1 %v9307_v22  ;;  %3334 = vmatprep.mubr.f32.mxu1 %v12029_v2 }
 0x154   :  { %7214 = vmatprep.subr.bf16.mxu1 %v9310_v26  ;;  %6407 = vmatpush1.msk.msra.mxu0 %vm72_vm0, %v9224_v9  ;;  %v3780_v9 = vld [vmem:[%s12020_s4 + $0x268] sm:$0xff] }
 0x155   :  { %v9333_v39 = vpop.f32.mrb[6].mxu0  ;;  %7150 = vmatprep.subr.bf16.mxu0 %v8970_v60  ;;  %v3781_v60 = vld [vmem:[%s12020_s4 + $0x270] sm:$0xff] }
 0x156   :  { %v9343_v47 = vpop.f32.mrb[7].mxu0  ;;  %6421 = vmatmul.mubr.msk.f32.gmra.mrb[42].mxu1 %vm65_vm1, %v3259_v38 }
 0x157   :  { %7216 = vmatpush1.bf16.msra.mxu1 %v9327_v37  ;;  %3630 = vmatprep.mubr.f32.mxu1 %v12029_v2 }
 0x158   :  { %7218 = vmatprep.subr.bf16.mxu1 %v9085_v11 }
 0x15b   :  { %7220 = vmatpush1.bf16.msra.mxu1 %v9101_v19 }
 0x15c   :  { %7222 = vmatprep.subr.bf16.mxu1 %v9349_v48 }
 0x15e   :  { %v9387_v6 = vpop.f32.mrb[4].mxu1 }
 0x15f   :  { %v9391_v18 = vpop.f32.mrb[5].mxu1  ;;  %7224 = vmatpush1.bf16.msra.mxu1 %v9368_v57 }
 0x160   :  { %7226 = vmatprep.subr.bf16.mxu1 %v9372_v58 }
 0x162   :  { %v9422_v38 = vpop.f32.mrb[6].mxu1 }
 0x163   :  { %v760_v46 = vpop.f32.mrb[8].mxu0  ;;  %v9433_v50 = vpop.f32.mrb[7].mxu1  ;;  %7228 = vmatpush1.bf16.msra.mxu1 %v9397_v34 }
 0x164   :  { %v783_v53 = vmul.f32 %v9400_v13, %v760_v46  ;;  %v762_v54 = vpop.f32.mrb[9].mxu0  ;;  %6426 = vmatprep.subr.msk.mxu1 %vm72_vm0, %v9410_v23  ;;  %v9461_v46 = vpack.c.bf16 %v3774_v52, %v3772_v51  ;;  %v3776_v51 = vld [vmem:[%s12020_s4 + $0x248] sm:$0xff]  ;;  %v3778_v52 = vld [vmem:[%s12020_s4 + $0x258] sm:$0xff] }
 0x165   :  { %v784_v59 = vmul.f32 %v9405_v21, %v762_v54 }
 0x166   :  { %v9459_v3 = vadd.f32 %v9420_v35, %v783_v53  ;;  %12234 = vst [vmem:[#allocation8_spill] sm:$0xff] %v9461_v46 }
 0x167   :  { %v800_v40 = vadd.f32 %v9431_v49, %v784_v59  ;;  %v9470_v45 = vpop.f32.mrb[10].mxu0  ;;  %6427 = vmatpush1.msk.msra.mxu1 %vm72_vm0, %v9448_v56  ;;  %v2821_v59 = vsel %vm2820_vm14, %v2813_v10, %v2815_v8  ;;  %v9488_v56 = vpack.c.bf16 %v3773_v32, %v3771_v29  ;;  %v3777_v10 = vld [vmem:[%s12020_s4 + $0x250] sm:$0xff]  ;;  %v3782_v29 = vld [vmem:[%s12020_s4 + $0x278] sm:$0xff]  ;;  %v12237_v32 = vmov 0.0   ;;  %v3779_v8 = vld [vmem:[%s12020_s4 + $0x260] sm:$0xff] }
 0x168   :  { %v12034_v53 = vmax.f32 %v9459_v3, 0.0  ;;  %v9481_v54 = vpop.f32.mrb[11].mxu0  ;;  %7294 = vmatprep.subr.bf16.mxu1 %v9450_v12  ;;  %6428 = vmatmul.mubr.msk.f32.vlgmr.msra.gmra.mrb[44].mxu1 %vm65_vm1, %v9324_v36  ;;  %v9496_v12 = vpack.c.bf16 %v3778_v52, %v3776_v51  ;;  %v3775_v36 = vld [vmem:[%s12020_s4 + $0x240] sm:$0xff]  ;;  %v3784_v51 = vld [vmem:[%s12020_s4 + $0x288] sm:$0xff]  ;;  %v9536_v52 = vpack.c.bf16 %v3781_v60, %v3779_v8 }
 0x169   :  { %v804_v2 = vmax.f32 %v800_v40, 0.0  ;;  %7296 = vmatpush1.bf16.msra.mxu1 %v9454_v61  ;;  %12235 = vst [vmem:[#allocation9_spill] sm:$0xff] %v9488_v56  ;;  %6408 = vmatmul.mubr.msk.f32.vlgmr.msra.gmra.mrb[36].mxu0 %vm65_vm1, %v2821_v59  ;;  %v9515_v40 = vpack.c.bf16 %v3777_v10, %v3775_v36  ;;  %v3785_v36 = vld [vmem:[%s12020_s4 + $0x290] sm:$0xff]  ;;  %v3788_v10 = vld [vmem:[%s12020_s4 + $0x2a8] sm:$0xff] }
 0x16a   :  { %908 = vrot.lane.b32.xlu1 %v12034_v53, %s8410_s23  ;;  %7298 = vmatprep.subr.bf16.mxu1 %v9461_v46  ;;  %12236 = vst [vmem:[#allocation10_spill] sm:$0xff] %v9496_v12  ;;  %12240 = vst [vmem:[#allocation13_spill] sm:$0xff] %v9536_v52  ;;  %v3789_v53 = vld [vmem:[%s12020_s4 + $0x2b0] sm:$0xff] }
 0x16b   :  { %910 = vrot.lane.b32.xlu0 %v804_v2, %s8410_s23  ;;  %3636 = vmatprep.mubr.f32.mxu1 %v12237_v32  ;;  %12238 = vst [vmem:[#allocation11_spill] sm:$0xff] %v9515_v40  ;;  %v9519_v2 = vpack.c.bf16 %v3782_v29, %v3780_v9 }
 0x16c   :  { %7152 = vmatpush1.bf16.msra.mxu0 %v8981_v63  ;;  %v3786_v63 = vld [vmem:[%s12020_s4 + $0x298] sm:$0xff]  ;;  %2903 = vmatprep.mubr.f32.mxu0 %v12237_v32 }
 0x16d   :  { %7300 = vmatpush1.bf16.msra.mxu1 %v9488_v56  ;;  %12239 = vst [vmem:[#allocation12_spill] sm:$0xff] %v9519_v2  ;;  %7154 = vmatprep.subr.bf16.mxu0 %v8999_v4  ;;  %v9540_v59 = vpack.c.bf16 %v3786_v63, %v3784_v51  ;;  %v3783_v4 = vld [vmem:[%s12020_s4 + $0x280] sm:$0xff] }
 0x16e   :  { %7302 = vmatprep.subr.bf16.mxu1 %v9496_v12  ;;  %v9556_v29 = vpack.c.bf16 %v3785_v36, %v3783_v4  ;;  %v3787_v63 = vld [vmem:[%s12020_s4 + $0x2a0] sm:$0xff]  ;;  %v3792_v36 = vld [vmem:[%s12020_s4 + $0x2c8] sm:$0xff] }
 0x16f   :  { %12241 = vst [vmem:[#allocation14_spill] sm:$0xff] %v9540_v59 }
 0x170   :  { %7156 = vmatpush1.bf16.msra.mxu0 %v9005_v5  ;;  %v3790_v5 = vld [vmem:[%s12020_s4 + $0x2b8] sm:$0xff]  ;;  %12242 = vst [vmem:[#allocation15_spill] sm:$0xff] %v9556_v29 }
 0x171   :  { %7304 = vmatpush1.bf16.msra.mxu1 %v9515_v40  ;;  %7158 = vmatprep.subr.bf16.mxu0 %v9085_v11  ;;  %v9561_v51 = vpack.c.bf16 %v3790_v5, %v3788_v10  ;;  %v3794_v10 = vld [vmem:[%s12020_s4 + $0x2d8] sm:$0xff] }
 0x172   :  { %7306 = vmatprep.subr.bf16.mxu1 %v9519_v2  ;;  %v9591_v2 = vpack.c.bf16 %v3794_v10, %v3792_v36 }
 0x173   :  { %12243 = vst [vmem:[#allocation16_spill] sm:$0xff] %v9561_v51 }
 0x174   :  { %7160 = vmatpush1.bf16.msra.mxu0 %v9101_v19  ;;  %12245 = vst [vmem:[#allocation18_spill] sm:$0xff] %v9591_v2 }
 0x175   :  { %v881_v9 = vpop.f32.mrb[8].mxu1  ;;  %7308 = vmatpush1.bf16.msra.mxu1 %v9536_v52  ;;  %7162 = vmatprep.subr.bf16.mxu0 %v9105_v20  ;;  %v9584_v20 = vpack.c.bf16 %v3789_v53, %v3787_v63  ;;  %v3798_v63 = vld [vmem:[%s12020_s4 + $0x2f8] sm:$0xff] }
 0x176   :  { %v892_v8 = vmul.f32 %v881_v9, %v9400_v13  ;;  %v883_v60 = vpop.f32.mrb[9].mxu1  ;;  %7310 = vmatprep.subr.bf16.mxu1 %v9540_v59 }
 0x177   :  { %v893_v4 = vmul.f32 %v883_v60, %v9405_v21  ;;  %12244 = vst [vmem:[#allocation17_spill] sm:$0xff] %v9584_v20 }
 0x178   :  { %v9578_v5 = vadd.f32 %v892_v8, %v9420_v35  ;;  %7164 = vmatpush1.bf16.msra.mxu0 %v9120_v27  ;;  %v3791_v8 = vld [vmem:[%s12020_s4 + $0x2c0] sm:$0xff]  ;;  %v3796_v27 = vld [vmem:[%s12020_s4 + $0x2e8] sm:$0xff] }
 0x179   :  { %v897_v9 = vadd.f32 %v893_v4, %v9431_v49  ;;  %v9581_v59 = vpop.f32.mrb[10].mxu1  ;;  %7312 = vmatpush1.bf16.msra.mxu1 %v9556_v29  ;;  %v3793_v4 = vld [vmem:[%s12020_s4 + $0x2d0] sm:$0xff]  ;;  %7166 = vmatprep.subr.bf16.mxu0 %v9123_v28 }
 0x17a   :  { %v12043_v60 = vmax.f32 %v9578_v5, 0.0  ;;  %v9588_v52 = vpop.f32.mrb[11].mxu1  ;;  %7314 = vmatprep.subr.bf16.mxu1 %v9561_v51  ;;  %v9615_v28 = vpack.c.bf16 %v3793_v4, %v3791_v8  ;;  %v9621_v51 = vpack.c.bf16 %v3798_v63, %v3796_v27  ;;  %v3704_v8 = vld [vmem:[%s12020_s4 + $0x8] sm:$0xff]  ;;  %v3706_v4 = vld [vmem:[%s12020_s4 + $0x18] sm:$0xff] }
 0x17b   :  { %v901_v53 = vmax.f32 %v897_v9, 0.0  ;;  %v2784_v9 = vld [vmem:[%s12016_s0 + $0x50] sm:$0xff]  ;;  %v9656_v63 = vld [vmem:[%s12016_s0 + $0x58] sm:$0xff] }
 0x17c   :  { %926 = vrot.lane.b32.xlu1 %v12043_v60, %s8410_s23  ;;  %v9609_v36 = vpop.f32.mrb[12].mxu0  ;;  %12246 = vst [vmem:[#allocation19_spill] sm:$0xff] %v9615_v28  ;;  %12247 = vst [vmem:[#allocation20_spill] sm:$0xff] %v9621_v51  ;;  %v3795_v60 = vld [vmem:[%s12020_s4 + $0x2e0] sm:$0xff]  ;;  %7168 = vmatpush1.bf16.msra.mxu0 %v9132_v33  ;;  %v9645_v33 = vpack.c.bf16 %v3706_v4, %v3704_v8  ;;  %v786_v4 = vmul.f32 %v9405_v21, %v9481_v54 }
 0x17d   :  { %928 = vrot.lane.b32.xlu0 %v901_v53, %s8410_s23  ;;  %v9612_v10 = vpop.f32.mrb[13].mxu0  ;;  %7316 = vmatpush1.bf16.msra.mxu1 %v9584_v20  ;;  %v3797_v53 = vld [vmem:[%s12020_s4 + $0x2f0] sm:$0xff]  ;;  %v477_v8 = vld [vmem:[%s12019_s3] sm:$0x3] }
 0x17e   :  { %7318 = vmatprep.subr.bf16.mxu1 %v9591_v2  ;;  %6414 = vmatprep.subr.msk.mxu0 %vm72_vm0, %v9264_v1  ;;  %v9642_v27 = vpack.c.bf16 %v3797_v53, %v3795_v60  ;;  %12249 = vst [vmem:[#allocation22_spill] sm:$0xff] %v9645_v33  ;;  %v461_v1 = vld [vmem:[%s12018_s2] sm:$0x3]  ;;  %v802_v20 = vadd.f32 %v9431_v49, %v786_v4 }
 0x17f   :  { %v466_v53 = vrot.slane %v461_v1, %v9385_v41  ;;  %v895_v4 = vmul.f32 %v9588_v52, %v9405_v21 }
 0x180   :  { %3560 = vrot.lane.b32.xlu1 %v8986_v0, %s8408_s19  ;;  %12248 = vst [vmem:[#allocation21_spill] sm:$0xff] %v9642_v27  ;;  %6415 = vmatpush1.msk.msra.mxu0 %vm72_vm0, %v9300_v15  ;;  %v8386_v15 = vld [vmem:[%s12016_s0 + $0x20] sm:$0xff] }
 0x181   :  { %2816 = vrot.lane.b32.xlu0 %v2784_v9, %s8409_s27  ;;  %7320 = vmatpush1.bf16.msra.mxu1 %v9615_v28  ;;  %v482_v28 = vrot.slane %v477_v8, %v9385_v41  ;;  %v899_v21 = vadd.f32 %v895_v4, %v9431_v49  ;;  %v156_v49 = vld [vmem:[%s12018_s2] sm:$0x3] }
 0x182   :  { %7322 = vmatprep.subr.bf16.mxu1 %v9621_v51  ;;  %7190 = vmatprep.subr.bf16.mxu0 %v9302_v16  ;;  %v785_v16 = vmul.f32 %v9400_v13, %v9470_v45  ;;  %v473_v51 = vmul.f32 %v466_v53, %v9282_v30  ;;  %v486_v30 = vrot.slane %v477_v8, %v9389_v44 }
 0x184   :  { %2818 = vrot.lane.b32.xlu1 %v9656_v63, %s8409_s27  ;;  %v9660_v60 = vpop.f32.mrb[14].mxu0  ;;  %v9680_v45 = vadd.f32 %v9420_v35, %v785_v16  ;;  %v894_v16 = vmul.f32 %v9581_v59, %v9400_v13  ;;  %v9697_v40 = vadd.f32 %v482_v28, %v473_v51 }
 0x185   :  { %3115 = vrot.lane.b32.xlu0 %v8386_v15, %s8411_s17  ;;  %v9667_v9 = vpop.f32.mrb[15].mxu0  ;;  %7324 = vmatpush1.bf16.msra.mxu1 %v9642_v27  ;;  %v470_v27 = vrot.slane %v461_v1, %v9389_v44 }
 0x186   :  { %7326 = vmatprep.subr.bf16.mxu1 %v9645_v33  ;;  %v12250_v13 = vmax.f32 %v9680_v45, 0.0 }
 0x187   :  { %v474_v1 = vmul.f32 %v470_v27, %v9293_v14  ;;  %v9711_v14 = vadd.f32 %v894_v16, %v9420_v35  ;;  %v590_v8 = vmul.f32 %v9391_v18, %v470_v27  ;;  %v476_v4 = vmul.f32 %v470_v27, %v9343_v47 }
 0x188   :  { %3117 = vrot.lane.b32.xlu1 %v8938_v55, %s8411_s17  ;;  %v9756_v47 = vrot.slane %v156_v49, %v9389_v44 }
 0x189   :  { %3119 = vrot.lane.b32.xlu0 %v9656_v63, %s8411_s17  ;;  %v490_v59 = vadd.f32 %v486_v30, %v474_v1  ;;  %v12061_v52 = vmax.f32 %v9711_v14, 0.0  ;;  %v594_v18 = vadd.f32 %v590_v8, %v486_v30  ;;  %v492_v8 = vadd.f32 %v486_v30, %v476_v4 }
 0x18b   :  { %v9685_v2 = vpop.f32.mrb[12].mxu1  ;;  %v494_v35 = vmax.f32 %v490_v59, 0.0  ;;  %v9742_v59 = vrot.slane %v156_v49, %v9385_v41 }
 0x18c   :  { %3121 = vrot.lane.b32.xlu1 %v8986_v0, %s8411_s17  ;;  %v9689_v29 = vpop.f32.mrb[13].mxu1  ;;  %v806_v0 = vmax.f32 %v802_v20, 0.0  ;;  %v12060_v20 = vmax.f32 %v9697_v40, 0.0 }
 0x18d   :  { %3425 = vrot.lane.b32.xlu0 %v8386_v15, %s8410_s23  ;;  %v589_v15 = vmul.f32 %v9387_v6, %v466_v53  ;;  %v475_v6 = vmul.f32 %v466_v53, %v9333_v39 }
 0x18f   :  { %v9699_v12 = vpop.f32.mrb[14].mxu1  ;;  %v9728_v1 = vadd.f32 %v589_v15, %v482_v28  ;;  %v9745_v15 = vadd.f32 %v482_v28, %v475_v6  ;;  %v592_v6 = vmul.f32 %v9433_v50, %v470_v27 }
 0x190   :  { %3427 = vrot.lane.b32.xlu1 %v8938_v55, %s8410_s23  ;;  %v9705_v54 = vpop.f32.mrb[15].mxu1 }
 0x191   :  { %912 = vrot.lane.b32.xlu0 %v12250_v13, %s8410_s23  ;;  %v12062_v39 = vmax.f32 %v9728_v1, 0.0 }
 0x192   :  { %v9713_v51 = vpop.f32.mrb[16].mxu0 }
 0x193   :  { %v9717_v55 = vpop.f32.mrb[17].mxu0 }
 0x194   :  { %914 = vrot.lane.b32.xlu1 %v806_v0, %s8410_s23  ;;  %v903_v0 = vmax.f32 %v899_v21, 0.0  ;;  %v172_v21 = vld [vmem:[%s12019_s3] sm:$0x3] }
 0x195   :  { %605 = vrot.lane.b32.xlu0 %v12060_v20, %s8410_s23  ;;  %v591_v20 = vmul.f32 %v9422_v38, %v466_v53  ;;  %v1063_v38 = vld [vmem:[%s12018_s2] sm:$0x3]  ;;  %v168_v53 = vmul.f32 %v9742_v59, %v9055_v7  ;;  %v169_v7 = vmul.f32 %v9756_v47, %v9059_v43  ;;  %v9782_v49 = vrot.slane %v172_v21, %v9389_v44 }
 0x196   :  { %v9726_v16 = vpop.f32.mrb[18].mxu0  ;;  %v9775_v50 = vrot.slane %v1063_v38, %v9385_v41  ;;  %v9797_v43 = vrot.slane %v1063_v38, %v9389_v44 }
 0x197   :  { %v9731_v13 = vpop.f32.mrb[19].mxu0 }
 0x198   :  { %607 = vrot.lane.b32.xlu1 %v494_v35, %s8410_s23  ;;  %v598_v35 = vmax.f32 %v594_v18, 0.0  ;;  %v496_v18 = vmax.f32 %v492_v8, 0.0 }
 0x199   :  { %930 = vrot.lane.b32.xlu0 %v12061_v52, %s8410_s23  ;;  %v12063_v52 = vmax.f32 %v9745_v15, 0.0 }
 0x19c   :  { %932 = vrot.lane.b32.xlu1 %v903_v0, %s8410_s23  ;;  %v9765_v0 = vrot.slane %v172_v21, %v9385_v41 }
 0x19d   :  { %623 = vrot.lane.b32.xlu0 %v12062_v39, %s8410_s23  ;;  %v9768_v39 = vadd.f32 %v591_v20, %v482_v28  ;;  %v596_v28 = vadd.f32 %v592_v6, %v486_v30  ;;  %v1079_v20 = vld [vmem:[%s12019_s3] sm:$0x3]  ;;  %v1075_v30 = vmul.f32 %v9775_v50, %v9609_v36  ;;  %v278_v6 = vmul.f32 %v9255_v62, %v9756_v47 }
 0x19e   :  { %v9805_v21 = vrot.slane %v1079_v20, %v9385_v41  ;;  %v1076_v36 = vmul.f32 %v9797_v43, %v9612_v10  ;;  %v9822_v46 = vrot.slane %v1079_v20, %v9389_v44 }
 0x19f   :  { %v12066_v56 = vmax.f32 %v9768_v39, 0.0  ;;  %v282_v10 = vadd.f32 %v278_v6, %v9782_v49 }
 0x1a0   :  { %625 = vrot.lane.b32.xlu1 %v598_v35, %s8410_s23  ;;  %v9790_v35 = vadd.f32 %v9765_v0, %v168_v53  ;;  %v600_v53 = vmax.f32 %v596_v28, 0.0  ;;  %v9830_v62 = vadd.f32 %v9805_v21, %v1075_v30  ;;  %v1092_v61 = vadd.f32 %v9822_v46, %v1076_v36 }
 0x1a1   :  { %609 = vrot.lane.b32.xlu0 %v12063_v52, %s8410_s23  ;;  %v9777_v27 = vpop.f32.mrb[16].mxu1  ;;  %v277_v52 = vmul.f32 %v9252_v17, %v9742_v59  ;;  %v185_v17 = vadd.f32 %v9782_v49, %v169_v7  ;;  %v286_v6 = vmax.f32 %v282_v10, 0.0 }
 0x1a2   :  { %v9787_v4 = vpop.f32.mrb[17].mxu1  ;;  %12251 = vst [vmem:[#allocation23_spill] sm:$0xff] %v9790_v35  ;;  %12253 = vst [vmem:[#allocation25_spill] sm:$0xff] %v9830_v62  ;;  %v12075_v30 = vmax.f32 %v9830_v62, 0.0 }
 0x1a4   :  { %611 = vrot.lane.b32.xlu1 %v496_v18, %s8410_s23  ;;  %v12071_v18 = vmax.f32 %v9790_v35, 0.0 }
 0x1a5   :  { %627 = vrot.lane.b32.xlu0 %v12066_v56, %s8410_s23  ;;  %v9807_v8 = vpop.f32.mrb[18].mxu1  ;;  %v9816_v56 = vadd.f32 %v277_v52, %v9765_v0  ;;  %v1199_v52 = vmul.f32 %v9685_v2, %v9775_v50 }
 0x1a6   :  { %v9812_v38 = vpop.f32.mrb[19].mxu1 }
 0x1a7   :  { %12252 = vst [vmem:[#allocation24_spill] sm:$0xff] %v9816_v56  ;;  %v12073_v20 = vmax.f32 %v9816_v56, 0.0  ;;  %v9849_v2 = vadd.f32 %v1199_v52, %v9805_v21 }
 0x1a8   :  { %629 = vrot.lane.b32.xlu1 %v600_v53, %s8410_s23  ;;  %v9824_v7 = vpop.f32.mrb[20].mxu0  ;;  %v189_v53 = vmax.f32 %v185_v17, 0.0 }
 0x1a9   :  { %293 = vrot.lane.b32.xlu0 %v12071_v18, %s8410_s23  ;;  %v9834_v28 = vpop.f32.mrb[21].mxu0  ;;  %v1200_v18 = vmul.f32 %v9689_v29, %v9797_v43  ;;  %v12076_v29 = vmax.f32 %v9849_v2, 0.0 }
 0x1ab   :  { %v1204_v36 = vadd.f32 %v1200_v18, %v9822_v46  ;;  %v1381_v18 = vld [vmem:[%s12018_s2] sm:$0x3] }
 0x1ac   :  { %295 = vrot.lane.b32.xlu1 %v189_v53, %s8410_s23  ;;  %v9842_v35 = vpop.f32.mrb[22].mxu0  ;;  %v1096_v53 = vmax.f32 %v1092_v61, 0.0  ;;  %v171_v61 = vmul.f32 %v9756_v47, %v9066_v25  ;;  %v1077_v25 = vmul.f32 %v9775_v50, %v9660_v60  ;;  %v8387_v60 = vld [vmem:[%s12016_s0 + $0x60] sm:$0xff] }
 0x1ad   :  { %312 = vrot.lane.b32.xlu0 %v12073_v20, %s8410_s23  ;;  %v9851_v17 = vpop.f32.mrb[23].mxu0  ;;  %v170_v20 = vmul.f32 %v9742_v59, %v9063_v24  ;;  %v1208_v56 = vmax.f32 %v1204_v36, 0.0  ;;  %v279_v24 = vmul.f32 %v9274_v42, %v9742_v59  ;;  %v280_v42 = vmul.f32 %v9284_v31, %v9756_v47 }
 0x1ae   :  { %v1078_v31 = vmul.f32 %v9797_v43, %v9667_v9  ;;  %v9906_v47 = vrot.slane %v1381_v18, %v9389_v44 }
 0x1af   :  { %v9871_v52 = vadd.f32 %v9765_v0, %v170_v20  ;;  %v187_v20 = vadd.f32 %v9782_v49, %v171_v61  ;;  %v9895_v36 = vadd.f32 %v279_v24, %v9765_v0  ;;  %v9914_v0 = vadd.f32 %v9805_v21, %v1077_v25 }
 0x1b0   :  { %314 = vrot.lane.b32.xlu1 %v286_v6, %s8410_s23  ;;  %v284_v9 = vadd.f32 %v280_v42, %v9782_v49 }
 0x1b1   :  { %1215 = vrot.lane.b32.xlu0 %v12075_v30, %s8410_s23  ;;  %v12077_v59 = vmax.f32 %v9871_v52, 0.0  ;;  %v191_v30 = vmax.f32 %v187_v20, 0.0  ;;  %v12080_v62 = vmax.f32 %v9914_v0, 0.0  ;;  %v1201_v20 = vmul.f32 %v9699_v12, %v9775_v50 }
 0x1b2   :  { %v288_v49 = vmax.f32 %v284_v9, 0.0 }
 0x1b4   :  { %1217 = vrot.lane.b32.xlu1 %v1096_v53, %s8410_s23  ;;  %v9885_v53 = vrot.slane %v1381_v18, %v9385_v41  ;;  %v12089_v18 = vmax.f32 %v9895_v36, 0.0 }
 0x1b5   :  { %1233 = vrot.lane.b32.xlu0 %v12076_v29, %s8410_s23  ;;  %v1094_v29 = vadd.f32 %v9822_v46, %v1078_v31  ;;  %v1680_v31 = vld [vmem:[%s12018_s2] sm:$0x3] }
 0x1b6   :  { %v1393_v24 = vmul.f32 %v9885_v53, %v9713_v51  ;;  %v1509_v12 = vmul.f32 %v9777_v27, %v9885_v53  ;;  %v1696_v27 = vld [vmem:[%s12019_s3] sm:$0x3] }
 0x1b7   :  { %v9875_v10 = vpop.f32.mrb[20].mxu1 }
 0x1b8   :  { %1235 = vrot.lane.b32.xlu1 %v1208_v56, %s8410_s23  ;;  %v9878_v6 = vpop.f32.mrb[21].mxu1  ;;  %v1397_v56 = vld [vmem:[%s12019_s3] sm:$0x3] }
 0x1b9   :  { %3429 = vrot.lane.b32.xlu0 %v9656_v63, %s8410_s23  ;;  %v1406_v25 = vrot.slane %v1397_v56, %v9389_v44 }
 0x1bb   :  { %v9897_v63 = vpop.f32.mrb[22].mxu1 }
 0x1bc   :  { %3431 = vrot.lane.b32.xlu1 %v8387_v60, %s8410_s23  ;;  %v9908_v61 = vpop.f32.mrb[23].mxu1  ;;  %v1402_v60 = vrot.slane %v1397_v56, %v9385_v41  ;;  %v1202_v56 = vmul.f32 %v9705_v54, %v9797_v43  ;;  %v1395_v54 = vmul.f32 %v9885_v53, %v9726_v16  ;;  %v1685_v43 = vrot.slane %v1680_v31, %v9385_v41 }
 0x1bd   :  { %297 = vrot.lane.b32.xlu0 %v12077_v59, %s8410_s23  ;;  %v1394_v59 = vmul.f32 %v9906_v47, %v9717_v55  ;;  %v1396_v16 = vmul.f32 %v9906_v47, %v9731_v13 }
 0x1be   :  { %v9930_v51 = vadd.f32 %v1402_v60, %v1393_v24  ;;  %v9945_v24 = vadd.f32 %v1201_v20, %v9805_v21  ;;  %v1510_v21 = vmul.f32 %v9787_v4, %v9906_v47  ;;  %v9963_v9 = vadd.f32 %v1509_v12, %v1402_v60 }
 0x1bf   :  { %v1410_v42 = vadd.f32 %v1406_v25, %v1394_v59  ;;  %v1692_v4 = vmul.f32 %v1685_v43, %v9824_v7  ;;  %v1701_v20 = vrot.slane %v1696_v27, %v9385_v41  ;;  %v3756_v41 = vld [vmem:[%s12020_s4 + $0x1a8] sm:$0xff] }
 0x1c0   :  { %299 = vrot.lane.b32.xlu1 %v191_v30, %s8410_s23  ;;  %v1098_v30 = vmax.f32 %v1094_v29, 0.0  ;;  %v12079_v55 = vmax.f32 %v9930_v51, 0.0  ;;  %v1206_v29 = vadd.f32 %v1202_v56, %v9822_v46  ;;  %v12081_v59 = vmax.f32 %v9945_v24, 0.0 }
 0x1c1   :  { %316 = vrot.lane.b32.xlu0 %v12089_v18, %s8410_s23  ;;  %v1414_v50 = vmax.f32 %v1410_v42, 0.0  ;;  %v9972_v46 = vadd.f32 %v1402_v60, %v1395_v54  ;;  %v1514_v56 = vadd.f32 %v1510_v21, %v1406_v25  ;;  %v12082_v13 = vmax.f32 %v9963_v9, 0.0 }
 0x1c2   :  { %v1210_v42 = vmax.f32 %v1206_v29, 0.0  ;;  %v1705_v54 = vrot.slane %v1696_v27, %v9389_v44  ;;  %v9988_v7 = vadd.f32 %v1701_v20, %v1692_v4  ;;  %v1511_v29 = vmul.f32 %v9807_v8, %v9885_v53 }
 0x1c3   :  { %12254 = vst [vmem:[#allocation26_spill] sm:$0xff] %v9972_v46  ;;  %v1512_v27 = vmul.f32 %v9812_v38, %v9906_v47  ;;  %v1694_v8 = vmul.f32 %v1685_v43, %v9842_v35  ;;  %v1816_v47 = vmul.f32 %v9875_v10, %v1685_v43 }
 0x1c4   :  { %318 = vrot.lane.b32.xlu1 %v288_v49, %s8410_s23  ;;  %v1689_v49 = vrot.slane %v1680_v31, %v9389_v44  ;;  %v1412_v31 = vadd.f32 %v1406_v25, %v1396_v16  ;;  %12257 = vst [vmem:[#allocation29_spill] sm:$0xff] %v9988_v7 }
 0x1c5   :  { %1219 = vrot.lane.b32.xlu0 %v12080_v62, %s8410_s23  ;;  %v1518_v62 = vmax.f32 %v1514_v56, 0.0  ;;  %v1516_v4 = vadd.f32 %v1512_v27, %v1406_v25  ;;  %v10012_v38 = vadd.f32 %v1701_v20, %v1694_v8 }
 0x1c6   :  { %v1416_v16 = vmax.f32 %v1412_v31, 0.0  ;;  %v1817_v31 = vmul.f32 %v9878_v6, %v1689_v49 }
 0x1c7   :  { %12261 = vst [vmem:[#allocation33_spill] sm:$0xff] %v10012_v38  ;;  %v12083_v25 = vmax.f32 %v10012_v38, 0.0 }
 0x1c8   :  { %1221 = vrot.lane.b32.xlu1 %v1098_v30, %s8410_s23  ;;  %v1821_v10 = vadd.f32 %v1817_v31, %v1705_v54  ;;  %v12268_v31 = vmax.f32 %v9578_v5, 0.0  ;;  %v12269_v5 = vmax.f32 %v9459_v3, 0.0  ;;  %v3709_v3 = vld [vmem:[%s12020_s4 + $0x30] sm:$0xff] }
 0x1c9   :  { %1525 = vrot.lane.b32.xlu0 %v12079_v55, %s8410_s23  ;;  %v12087_v55 = vmax.f32 %v9972_v46, 0.0 }
 0x1ca   :  { %v1825_v8 = vmax.f32 %v1821_v10, 0.0  ;;  %v3705_v10 = vld [vmem:[%s12020_s4 + $0x10] sm:$0xff] }
 0x1cc   :  { %1527 = vrot.lane.b32.xlu1 %v1414_v50, %s8410_s23  ;;  %v1693_v50 = vmul.f32 %v1689_v49, %v9834_v28 }
 0x1cd   :  { %1237 = vrot.lane.b32.xlu0 %v12081_v59, %s8410_s23  ;;  %v9976_v30 = vpop.f32.mrb[24].mxu1  ;;  %v12085_v59 = vmax.f32 %v9988_v7, 0.0  ;;  %v3757_v7 = vld [vmem:[%s12020_s4 + $0x1b0] sm:$0xff] }
 0x1ce   :  { %12255 = vst [vmem:[#allocation27_spill] sm:$0xff] %v9976_v30  ;;  %v9978_v12 = vpop.f32.mrb[25].mxu1  ;;  %v1709_v28 = vadd.f32 %v1705_v54, %v1693_v50  ;;  %v10018_v50 = vadd.f32 %v1816_v47, %v1701_v20 }
 0x1cf   :  { %12256 = vst [vmem:[#allocation28_spill] sm:$0xff] %v9978_v12  ;;  %v3747_v12 = vld [vmem:[%s12020_s4 + $0x160] sm:$0xff] }
 0x1d0   :  { %1239 = vrot.lane.b32.xlu1 %v1210_v42, %s8410_s23  ;;  %v1713_v53 = vmax.f32 %v1709_v28, 0.0  ;;  %12262 = vst [vmem:[#allocation34_spill] sm:$0xff] %v10018_v50  ;;  %v12086_v28 = vmax.f32 %v10018_v50, 0.0 }
 0x1d1   :  { %1543 = vrot.lane.b32.xlu0 %v12082_v13, %s8410_s23  ;;  %v9992_v21 = vpop.f32.mrb[26].mxu1  ;;  %v10000_v13 = vadd.f32 %v1511_v29, %v1402_v60  ;;  %v1520_v60 = vmax.f32 %v1516_v4, 0.0 }
 0x1d2   :  { %12258 = vst [vmem:[#allocation30_spill] sm:$0xff] %v9992_v21  ;;  %v9994_v42 = vpop.f32.mrb[27].mxu1 }
 0x1d3   :  { %12259 = vst [vmem:[#allocation31_spill] sm:$0xff] %v9994_v42  ;;  %12260 = vst [vmem:[#allocation32_spill] sm:$0xff] %v10000_v13  ;;  %v12088_v56 = vmax.f32 %v10000_v13, 0.0 }
 0x1d4   :  { %1545 = vrot.lane.b32.xlu1 %v1518_v62, %s8410_s23  ;;  %v1695_v62 = vmul.f32 %v1689_v49, %v9851_v17  ;;  %v1818_v17 = vmul.f32 %v9897_v63, %v1685_v43 }
 0x1d5   :  { %1529 = vrot.lane.b32.xlu0 %v12087_v55, %s8410_s23 }
 0x1d6   :  { %v1711_v35 = vadd.f32 %v1705_v54, %v1695_v62  ;;  %v10027_v27 = vadd.f32 %v1818_v17, %v1701_v20 }
 0x1d8   :  { %1531 = vrot.lane.b32.xlu1 %v1416_v16, %s8410_s23  ;;  %v1715_v29 = vmax.f32 %v1711_v35, 0.0  ;;  %v1819_v16 = vmul.f32 %v9908_v61, %v1689_v49  ;;  %12263 = vst [vmem:[#allocation35_spill] sm:$0xff] %v10027_v27 }
 0x1d9   :  { %1832 = vrot.lane.b32.xlu0 %v12085_v59, %s8410_s23 }
 0x1da   :  { %v1823_v63 = vadd.f32 %v1819_v16, %v1705_v54 }
 0x1dc   :  { %1834 = vrot.lane.b32.xlu1 %v1713_v53, %s8410_s23  ;;  %v12084_v53 = vmax.f32 %v10027_v27, 0.0  ;;  %v1827_v49 = vmax.f32 %v1823_v63, 0.0  ;;  %v909_v54 = vpop.permute.xlu1 %908  ;;  %v3710_v63 = vld [vmem:[%s12020_s4 + $0x38] sm:$0xff]  ;;  %v3755_v27 = vld [vmem:[%s12020_s4 + $0x1a0] sm:$0xff] }
 0x1dd   :  { %1547 = vrot.lane.b32.xlu0 %v12088_v56, %s8410_s23  ;;  %v911_v4 = vpop.permute.xlu0 %910  ;;  %v3719_v56 = vld [vmem:[%s12020_s4 + $0x80] sm:$0xff] }
 0x1e0   :  { %1549 = vrot.lane.b32.xlu1 %v1520_v60, %s8410_s23  ;;  %v916_v60 = vsel %vm301_vm15, %v909_v54, %v911_v4 }
 0x1e1   :  { %1836 = vrot.lane.b32.xlu0 %v12083_v25, %s8410_s23 }
 0x1e3   :  { %v10032_v6 = vpop.f32.mrb[28].mxu1 }
 0x1e4   :  { %12264 = vst [vmem:[#allocation36_spill] sm:$0xff] %v10032_v6  ;;  %1838 = vrot.lane.b32.xlu1 %v1715_v29, %s8410_s23  ;;  %v10035_v43 = vpop.f32.mrb[29].mxu1  ;;  %v3703_v29 = vld [vmem:[%s12020_s4] sm:$0xff] }
 0x1e5   :  { %12265 = vst [vmem:[#allocation37_spill] sm:$0xff] %v10035_v43  ;;  %1850 = vrot.lane.b32.xlu0 %v12086_v28, %s8410_s23  ;;  %v10070_v4 = vpack.c.bf16 %v3705_v10, %v3703_v29  ;;  %v3712_v29 = vld [vmem:[%s12020_s4 + $0x48] sm:$0xff]  ;;  %v3715_v28 = vld [vmem:[%s12020_s4 + $0x60] sm:$0xff]  ;;  %v3733_v43 = vld [vmem:[%s12020_s4 + $0xf0] sm:$0xff] }
 0x1e7   :  { %v10041_v61 = vpop.f32.mrb[30].mxu1 }
 0x1e8   :  { %12266 = vst [vmem:[#allocation38_spill] sm:$0xff] %v10041_v61  ;;  %1852 = vrot.lane.b32.xlu1 %v1825_v8, %s8410_s23  ;;  %v10044_v20 = vpop.f32.mrb[31].mxu1  ;;  %v3708_v8 = vld [vmem:[%s12020_s4 + $0x28] sm:$0xff]  ;;  %v3731_v61 = vld [vmem:[%s12020_s4 + $0xe0] sm:$0xff] }
 0x1e9   :  { %12267 = vst [vmem:[#allocation39_spill] sm:$0xff] %v10044_v20  ;;  %1854 = vrot.lane.b32.xlu0 %v12084_v53, %s8410_s23  ;;  %v10255_v21 = vpack.c.bf16 %v3733_v43, %v3731_v61  ;;  %v3740_v61 = vld [vmem:[%s12020_s4 + $0x128] sm:$0xff] }
 0x1ec   :  { %1856 = vrot.lane.b32.xlu1 %v1827_v49, %s8410_s23  ;;  %v920_v49 = vmax.f32 %v12269_v5, %v916_v60  ;;  %v10082_v60 = vpop.f32.mrb[24].mxu0 }
 0x1ed   :  { %12271 = vst [vmem:[#allocation41_spill] sm:$0xff] %v10082_v60  ;;  %v3753_v60 = vld [vmem:[%s12020_s4 + $0x190] sm:$0xff] }
 0x1ee   :  { %v927_v62 = vpop.permute.xlu1 %926 }
 0x1ef   :  { %v929_v47 = vpop.permute.xlu0 %928 }
 0x1f0   :  { %v934_v35 = vsel %vm301_vm15, %v927_v62, %v929_v47  ;;  %v10074_v47 = vpack.c.bf16 %v3710_v63, %v3708_v8  ;;  %v10093_v8 = vpop.f32.mrb[25].mxu0 }
 0x1f1   :  { %v938_v17 = vmax.f32 %v12268_v31, %v934_v35  ;;  %v3707_v35 = vld [vmem:[%s12020_s4 + $0x20] sm:$0xff]  ;;  %12272 = vst [vmem:[#allocation42_spill] sm:$0xff] %v10093_v8 }
 0x1f2   :  { %v3561_v16 = vpop.permute.xlu1 %3560  ;;  %v10097_v63 = vpack.c.bf16 %v3709_v3, %v3707_v35  ;;  %v3716_v35 = vld [vmem:[%s12020_s4 + $0x68] sm:$0xff]  ;;  %v3718_v3 = vld [vmem:[%s12020_s4 + $0x78] sm:$0xff]  ;;  %v3751_v8 = vld [vmem:[%s12020_s4 + $0x180] sm:$0xff] }
 0x1f3   :  { %6429 = vmatmul.mubr.msk.f32.gmra.mrb[46].mxu1 %vm65_vm1, %v3561_v16  ;;  %v2817_v54 = vpop.permute.xlu0 %2816  ;;  %v10072_v62 = vmax.f32 %v920_v49, %v938_v17  ;;  %v3714_v17 = vld [vmem:[%s12020_s4 + $0x58] sm:$0xff]  ;;  %v3711_v49 = vld [vmem:[%s12020_s4 + $0x40] sm:$0xff]  ;;  %v10127_v59 = vpack.c.bf16 %v3718_v3, %v3716_v35 }
 0x1f4   :  { %3940 = vmatprep.mubr.f32.mxu1 %v12237_v32  ;;  %v10101_v5 = vpack.c.bf16 %v3714_v17, %v3712_v29 }
 0x1f5   :  { %12270 = vst [vmem:[#allocation40_spill] sm:$0xff] %v10072_v62 }
 0x1f6   :  { %v2819_v31 = vpop.permute.xlu1 %2818 }
 0x1f7   :  { %v2822_v10 = vsel %vm2820_vm14, %v2817_v54, %v2819_v31  ;;  %6489 = vmatmul.mubr.msk.f32.vlgmr.msra.gmra.mrb[48].mxu1 %vm328_vm2, %v10072_v62  ;;  %v3116_v16 = vpop.permute.xlu0 %3115  ;;  %v3713_v54 = vld [vmem:[%s12020_s4 + $0x50] sm:$0xff] }
 0x1f8   :  { %7328 = vmatpush1.bf16.msra.mxu1 %v10070_v4  ;;  %6409 = vmatmul.mubr.msk.f32.gmra.mrb[38].mxu0 %vm65_vm1, %v2822_v10  ;;  %v10123_v53 = vpack.c.bf16 %v3713_v54, %v3711_v49  ;;  %v3722_v49 = vld [vmem:[%s12020_s4 + $0x98] sm:$0xff] }
 0x1f9   :  { %7330 = vmatprep.subr.bf16.mxu1 %v10074_v47  ;;  %3200 = vmatprep.mubr.f32.mxu0 %v12237_v32  ;;  %v10109_v31 = vpop.f32.mrb[32].mxu1 }
 0x1fa   :  { %12273 = vst [vmem:[#allocation43_spill] sm:$0xff] %v10109_v31  ;;  %v3118_v10 = vpop.permute.xlu1 %3117  ;;  %3946 = vmatprep.mubr.f32.mxu1 %v12237_v32  ;;  %v10118_v29 = vpop.f32.mrb[33].mxu1 }
 0x1fb   :  { %12274 = vst [vmem:[#allocation44_spill] sm:$0xff] %v10118_v29  ;;  %v3124_v17 = vsel %vm3123_vm3, %v3116_v16, %v3118_v10  ;;  %v3120_v25 = vpop.permute.xlu0 %3119  ;;  %v3717_v16 = vld [vmem:[%s12020_s4 + $0x70] sm:$0xff] }
 0x1fc   :  { %7332 = vmatpush1.bf16.msra.mxu1 %v10097_v63  ;;  %6416 = vmatmul.mubr.msk.f32.vlgmr.msra.gmra.mrb[40].mxu0 %vm65_vm1, %v3124_v17  ;;  %v10149_v17 = vpack.c.bf16 %v3717_v16, %v3715_v28  ;;  %v3724_v28 = vld [vmem:[%s12020_s4 + $0xa8] sm:$0xff] }
 0x1fd   :  { %7192 = vmatpush1.bf16.msra.mxu0 %v9307_v22  ;;  %7334 = vmatprep.subr.bf16.mxu1 %v10101_v5  ;;  %v10135_v10 = vpop.f32.mrb[34].mxu1  ;;  %v3720_v22 = vld [vmem:[%s12020_s4 + $0x88] sm:$0xff] }
 0x1fe   :  { %12275 = vst [vmem:[#allocation45_spill] sm:$0xff] %v10135_v10  ;;  %v3122_v55 = vpop.permute.xlu1 %3121  ;;  %7194 = vmatprep.subr.bf16.mxu0 %v9310_v26  ;;  %3206 = vmatprep.mubr.f32.mxu0 %v12237_v32  ;;  %v10145_v54 = vpop.f32.mrb[35].mxu1  ;;  %v10154_v26 = vpack.c.bf16 %v3722_v49, %v3720_v22  ;;  %v3723_v49 = vld [vmem:[%s12020_s4 + $0xa0] sm:$0xff]  ;;  %v3729_v10 = vld [vmem:[%s12020_s4 + $0xd0] sm:$0xff] }
 0x1ff   :  { %12276 = vst [vmem:[#allocation46_spill] sm:$0xff] %v10145_v54  ;;  %v3125_v35 = vsel %vm3123_vm3, %v3120_v25, %v3122_v55  ;;  %v3426_v3 = vpop.permute.xlu0 %3425  ;;  %v3721_v55 = vld [vmem:[%s12020_s4 + $0x90] sm:$0xff]  ;;  %v3727_v54 = vld [vmem:[%s12020_s4 + $0xc0] sm:$0xff] }
 0x200   :  { %7336 = vmatpush1.bf16.msra.mxu1 %v10123_v53  ;;  %6417 = vmatmul.mubr.msk.f32.gmra.mrb[42].mxu0 %vm65_vm1, %v3125_v35  ;;  %v10171_v22 = vpack.c.bf16 %v3721_v55, %v3719_v56  ;;  %v3725_v35 = vld [vmem:[%s12020_s4 + $0xb0] sm:$0xff]  ;;  %v3728_v56 = vld [vmem:[%s12020_s4 + $0xc8] sm:$0xff] }
 0x201   :  { %7196 = vmatpush1.bf16.msra.mxu0 %v9327_v37  ;;  %7338 = vmatprep.subr.bf16.mxu1 %v10127_v59  ;;  %v3726_v37 = vld [vmem:[%s12020_s4 + $0xb8] sm:$0xff] }
 0x202   :  { %v3428_v25 = vpop.permute.xlu1 %3427  ;;  %7198 = vmatprep.subr.bf16.mxu0 %v9085_v11  ;;  %3509 = vmatprep.mubr.f32.mxu0 %v12237_v32  ;;  %v10175_v11 = vpack.c.bf16 %v3726_v37, %v3724_v28  ;;  %v10193_v28 = vpack.c.bf16 %v3725_v35, %v3723_v49  ;;  %v10195_v37 = vpop.f32.mrb[26].mxu0  ;;  %v3734_v35 = vld [vmem:[%s12020_s4 + $0xf8] sm:$0xff] }
 0x203   :  { %v913_v16 = vpop.permute.xlu0 %912  ;;  %12278 = vst [vmem:[#allocation48_spill] sm:$0xff] %v10195_v37  ;;  %v10207_v29 = vpop.f32.mrb[27].mxu0  ;;  %v12289_v37 = vld [vmem:[#allocation5_spill] sm:$0xff] }
 0x204   :  { %7340 = vmatpush1.bf16.msra.mxu1 %v10149_v17  ;;  %12277 = vst [vmem:[#allocation47_spill] sm:$0xff] %v10193_v28  ;;  %12280 = vst [vmem:[#allocation50_spill] sm:$0xff] %v10207_v29  ;;  %v10221_v31 = vpop.f32.mrb[28].mxu0 }
 0x205   :  { %7200 = vmatpush1.bf16.msra.mxu0 %v9101_v19  ;;  %7342 = vmatprep.subr.bf16.mxu1 %v10154_v26  ;;  %v3730_v19 = vld [vmem:[%s12020_s4 + $0xd8] sm:$0xff]  ;;  %12282 = vst [vmem:[#allocation52_spill] sm:$0xff] %v10221_v31 }
 0x206   :  { %v915_v18 = vpop.permute.xlu1 %914  ;;  %7202 = vmatprep.subr.bf16.mxu0 %v9349_v48  ;;  %v10199_v48 = vpack.c.bf16 %v3730_v19, %v3728_v56  ;;  %v10219_v19 = vpack.c.bf16 %v3729_v10, %v3727_v54  ;;  %v10234_v10 = vpop.f32.mrb[29].mxu0 }
 0x207   :  { %v10190_v55 = vpop.permute.xlu0 %605  ;;  %v917_v20 = vsel %vm301_vm15, %v913_v16, %v915_v18  ;;  %12284 = vst [vmem:[#allocation54_spill] sm:$0xff] %v10234_v10  ;;  %v3738_v18 = vld [vmem:[%s12020_s4 + $0x118] sm:$0xff]  ;;  %v3433_v16 = vsel %vm301_vm15, %v3426_v3, %v3428_v25  ;;  %v12286_v10 = vmax.f32 %v9680_v45, 0.0  ;;  %v3735_v45 = vld [vmem:[%s12020_s4 + $0x100] sm:$0xff] }
 0x208   :  { %7344 = vmatpush1.bf16.msra.mxu1 %v10171_v22  ;;  %12279 = vst [vmem:[#allocation49_spill] sm:$0xff] %v10199_v48  ;;  %12281 = vst [vmem:[#allocation51_spill] sm:$0xff] %v10219_v19  ;;  %v3742_v25 = vld [vmem:[%s12020_s4 + $0x138] sm:$0xff] }
 0x209   :  { %7204 = vmatpush1.bf16.msra.mxu0 %v9368_v57  ;;  %7346 = vmatprep.subr.bf16.mxu1 %v10175_v11  ;;  %v3732_v57 = vld [vmem:[%s12020_s4 + $0xe8] sm:$0xff]  ;;  %v921_v31 = vmax.f32 %v12286_v10, %v917_v20  ;;  %v10297_v10 = vpack.c.bf16 %v3742_v25, %v3740_v61  ;;  %v3743_v61 = vld [vmem:[%s12020_s4 + $0x140] sm:$0xff]  ;;  %v3745_v25 = vld [vmem:[%s12020_s4 + $0x150] sm:$0xff] }
 0x20a   :  { %v10209_v49 = vpop.permute.xlu1 %607  ;;  %7206 = vmatprep.subr.bf16.mxu0 %v9372_v58  ;;  %v10226_v58 = vpack.c.bf16 %v3734_v35, %v3732_v57 }
 0x20b   :  { %v931_v56 = vpop.permute.xlu0 %930  ;;  %v613_v13 = vsel %vm301_vm15, %v10190_v55, %v10209_v49  ;;  %v12304_v49 = vmax.f32 %v9697_v40, 0.0 }
 0x20c   :  { %7348 = vmatpush1.bf16.msra.mxu1 %v10193_v28  ;;  %12283 = vst [vmem:[#allocation53_spill] sm:$0xff] %v10226_v58 }
 0x20d   :  { %7208 = vmatpush1.bf16.msra.mxu0 %v9397_v34  ;;  %7350 = vmatprep.subr.bf16.mxu1 %v10199_v48  ;;  %v3736_v34 = vld [vmem:[%s12020_s4 + $0x108] sm:$0xff] }
 0x20e   :  { %v933_v54 = vpop.permute.xlu1 %932  ;;  %6422 = vmatprep.subr.msk.mxu0 %vm72_vm0, %v9410_v23  ;;  %v12287_v23 = vmax.f32 %v9711_v14, 0.0  ;;  %v10262_v3 = vpack.c.bf16 %v3738_v18, %v3736_v34  ;;  %v3737_v14 = vld [vmem:[%s12020_s4 + $0x110] sm:$0xff] }
 0x20f   :  { %v935_v57 = vsel %vm301_vm15, %v931_v56, %v933_v54  ;;  %v10246_v35 = vpop.permute.xlu0 %623  ;;  %v10248_v6 = vpop.f32.mrb[36].mxu1  ;;  %v3739_v54 = vld [vmem:[%s12020_s4 + $0x120] sm:$0xff]  ;;  %v3741_v34 = vld [vmem:[%s12020_s4 + $0x130] sm:$0xff] }
 0x210   :  { %12285 = vst [vmem:[#allocation55_spill] sm:$0xff] %v10248_v6  ;;  %v939_v42 = vmax.f32 %v12287_v23, %v935_v57  ;;  %7352 = vmatpush1.bf16.msra.mxu1 %v10219_v19  ;;  %v10257_v29 = vpop.f32.mrb[37].mxu1  ;;  %v3746_v57 = vld [vmem:[%s12020_s4 + $0x158] sm:$0xff] }
 0x211   :  { %12288 = vst [vmem:[#allocation56_spill] sm:$0xff] %v10257_v29  ;;  %6423 = vmatpush1.msk.msra.mxu0 %vm72_vm0, %v12289_v37  ;;  %7354 = vmatprep.subr.bf16.mxu1 %v10226_v58 }
 0x212   :  { %v10270_v20 = vmax.f32 %v921_v31, %v939_v42  ;;  %6424 = vmatmul.mubr.msk.f32.vlgmr.msra.gmra.mrb[44].mxu0 %vm65_vm1, %v3433_v16  ;;  %7230 = vmatprep.subr.bf16.mxu0 %v9645_v33  ;;  %v10274_v43 = vpop.permute.xlu1 %625  ;;  %v10290_v31 = vpack.c.bf16 %v3737_v14, %v3735_v45  ;;  %v3744_v16 = vld [vmem:[%s12020_s4 + $0x148] sm:$0xff]  ;;  %v10320_v45 = vpack.c.bf16 %v3741_v34, %v3739_v54  ;;  %v3750_v54 = vld [vmem:[%s12020_s4 + $0x178] sm:$0xff] }
 0x213   :  { %7232 = vmatpush1.bf16.msra.mxu0 %v10070_v4  ;;  %v10283_v37 = vpop.permute.xlu0 %609  ;;  %3515 = vmatprep.mubr.f32.mxu0 %v12237_v32  ;;  %v10286_v42 = vpop.f32.mrb[38].mxu1  ;;  %v10323_v14 = vpack.c.bf16 %v3746_v57, %v3744_v16  ;;  %v10346_v57 = vpack.c.bf16 %v3745_v25, %v3743_v61  ;;  %v3752_v61 = vld [vmem:[%s12020_s4 + $0x188] sm:$0xff]  ;;  %v3754_v25 = vld [vmem:[%s12020_s4 + $0x198] sm:$0xff] }
 0x214   :  { %12290 = vst [vmem:[#allocation5_spill] sm:$0xff] %v10270_v20  ;;  %12291 = vst [vmem:[#allocation57_spill] sm:$0xff] %v10286_v42  ;;  %7356 = vmatpush1.bf16.msra.mxu1 %v10255_v21  ;;  %7234 = vmatprep.subr.bf16.mxu0 %v10074_v47  ;;  %v10292_v56 = vpop.f32.mrb[39].mxu1  ;;  %v3748_v42 = vld [vmem:[%s12020_s4 + $0x168] sm:$0xff]  ;;  %v10342_v16 = vpop.f32.mrb[30].mxu0 }
 0x215   :  { %12292 = vst [vmem:[#allocation58_spill] sm:$0xff] %v10292_v56  ;;  %6490 = vmatmul.mubr.msk.f32.gmra.mrb[50].mxu1 %vm328_vm2, %v10270_v20  ;;  %7358 = vmatprep.subr.bf16.mxu1 %v10262_v3  ;;  %12293 = vst [vmem:[#allocation59_spill] sm:$0xff] %v10342_v16  ;;  %v10348_v29 = vpop.f32.mrb[31].mxu0  ;;  %v10351_v6 = vpack.c.bf16 %v3750_v54, %v3748_v42  ;;  %v3749_v16 = vld [vmem:[%s12020_s4 + $0x170] sm:$0xff] }
 0x216   :  { %6491 = vmatprep.mubr.msk.f32.mxu1 %vm328_vm2, %v10072_v62  ;;  %v10307_v18 = vpop.permute.xlu1 %611  ;;  %12294 = vst [vmem:[#allocation60_spill] sm:$0xff] %v10348_v29  ;;  %v10372_v54 = vpack.c.bf16 %v3749_v16, %v3747_v12  ;;  %v10375_v29 = vpack.c.bf16 %v3754_v25, %v3752_v61  ;;  %v3758_v12 = vld [vmem:[%s12020_s4 + $0x1b8] sm:$0xff]  ;;  %v10396_v61 = vpack.c.bf16 %v3753_v60, %v3751_v8  ;;  %v10398_v25 = vpop.f32.mrb[32].mxu0  ;;  %v3760_v8 = vld [vmem:[%s12020_s4 + $0x1c8] sm:$0xff] }
 0x217   :  { %7236 = vmatpush1.bf16.msra.mxu0 %v10097_v63  ;;  %v10316_v23 = vpop.permute.xlu0 %627  ;;  %12295 = vst [vmem:[#allocation61_spill] sm:$0xff] %v10398_v25  ;;  %v10401_v38 = vpack.c.bf16 %v3758_v12, %v3756_v41  ;;  %v10411_v46 = vpop.f32.mrb[33].mxu0  ;;  %v3762_v41 = vld [vmem:[%s12020_s4 + $0x1d8] sm:$0xff]  ;;  %v10431_v25 = vpack.c.bf16 %v3757_v7, %v3755_v27 }
 0x218   :  { %7360 = vmatpush1.bf16.msra.mxu1 %v10290_v31  ;;  %7238 = vmatprep.subr.bf16.mxu0 %v10101_v5  ;;  %12297 = vst [vmem:[#allocation63_spill] sm:$0xff] %v10411_v46  ;;  %v10434_v62 = vpack.c.bf16 %v3762_v41, %v3760_v8  ;;  %v12302_v8 = vmax.f32 %v9728_v1, 0.0  ;;  %v617_v1 = vmax.f32 %v12304_v49, %v613_v13  ;;  %v12311_v49 = vmax.f32 %v9745_v15, 0.0 }
 0x219   :  { %7362 = vmatprep.subr.bf16.mxu1 %v10297_v10 }
 0x21a   :  { %v10331_v56 = vpop.permute.xlu1 %629  ;;  %12299 = vst [vmem:[#allocation65_spill] sm:$0xff] %v10434_v62 }
 0x21b   :  { %7240 = vmatpush1.bf16.msra.mxu0 %v10123_v53  ;;  %v10340_v34 = vpop.permute.xlu0 %293 }
 0x21c   :  { %7364 = vmatpush1.bf16.msra.mxu1 %v10320_v45  ;;  %7242 = vmatprep.subr.bf16.mxu0 %v10127_v59 }
 0x21d   :  { %7366 = vmatprep.subr.bf16.mxu1 %v10323_v14 }
 0x21e   :  { %v10359_v30 = vpop.permute.xlu1 %295 }
 0x21f   :  { %7244 = vmatpush1.bf16.msra.mxu0 %v10149_v17  ;;  %v10368_v42 = vpop.permute.xlu0 %312 }
 0x220   :  { %7368 = vmatpush1.bf16.msra.mxu1 %v10346_v57  ;;  %7246 = vmatprep.subr.bf16.mxu0 %v10154_v26 }
 0x221   :  { %7370 = vmatprep.subr.bf16.mxu1 %v10351_v6 }
 0x222   :  { %v10383_v44 = vpop.permute.xlu1 %314 }
 0x223   :  { %7248 = vmatpush1.bf16.msra.mxu0 %v10171_v22  ;;  %v10392_v16 = vpop.permute.xlu0 %1215 }
 0x224   :  { %7372 = vmatpush1.bf16.msra.mxu1 %v10372_v54  ;;  %7250 = vmatprep.subr.bf16.mxu0 %v10175_v11 }
 0x225   :  { %7374 = vmatprep.subr.bf16.mxu1 %v10375_v29  ;;  %v10409_v50 = vpop.f32.mrb[40].mxu1 }
 0x226   :  { %12296 = vst [vmem:[#allocation62_spill] sm:$0xff] %v10409_v50  ;;  %v10413_v60 = vpop.permute.xlu1 %1217  ;;  %v10421_v12 = vpop.f32.mrb[41].mxu1  ;;  %v631_v50 = vsel %vm301_vm15, %v10246_v35, %v10274_v43  ;;  %v3761_v35 = vld [vmem:[%s12020_s4 + $0x1d0] sm:$0xff] }
 0x227   :  { %12298 = vst [vmem:[#allocation64_spill] sm:$0xff] %v10421_v12  ;;  %7252 = vmatpush1.bf16.msra.mxu0 %v10193_v28  ;;  %v10428_v46 = vpop.permute.xlu0 %1233  ;;  %v3759_v12 = vld [vmem:[%s12020_s4 + $0x1c0] sm:$0xff]  ;;  %v635_v41 = vmax.f32 %v12302_v8, %v631_v50  ;;  %v3765_v8 = vld [vmem:[%s12020_s4 + $0x1f0] sm:$0xff] }
 0x228   :  { %7376 = vmatpush1.bf16.msra.mxu1 %v10396_v61  ;;  %7254 = vmatprep.subr.bf16.mxu0 %v10199_v48  ;;  %v3764_v48 = vld [vmem:[%s12020_s4 + $0x1e8] sm:$0xff]  ;;  %v10462_v55 = vpack.c.bf16 %v3761_v35, %v3759_v12  ;;  %v3763_v50 = vld [vmem:[%s12020_s4 + $0x1e0] sm:$0xff] }
 0x229   :  { %7378 = vmatprep.subr.bf16.mxu1 %v10401_v38  ;;  %v10442_v43 = vpop.f32.mrb[42].mxu1  ;;  %v10479_v13 = vpack.c.bf16 %v3765_v8, %v3763_v50 }
 0x22a   :  { %12300 = vst [vmem:[#allocation66_spill] sm:$0xff] %v10442_v43  ;;  %v10447_v7 = vpop.permute.xlu1 %1235  ;;  %v10449_v27 = vpop.f32.mrb[43].mxu1  ;;  %v3766_v43 = vld [vmem:[%s12020_s4 + $0x1f8] sm:$0xff]  ;;  %12303 = vst [vmem:[#allocation68_spill] sm:$0xff] %v10462_v55 }
 0x22b   :  { %12301 = vst [vmem:[#allocation67_spill] sm:$0xff] %v10449_v27  ;;  %7256 = vmatpush1.bf16.msra.mxu0 %v10219_v19  ;;  %v3430_v27 = vpop.permute.xlu0 %3429  ;;  %v10473_v28 = vpack.c.bf16 %v3766_v43, %v3764_v48  ;;  %12306 = vst [vmem:[#allocation70_spill] sm:$0xff] %v10479_v13  ;;  %v632_v48 = vsel %vm301_vm15, %v10316_v23, %v10331_v56  ;;  %v10493_v43 = vpop.f32.mrb[34].mxu0  ;;  %v12309_v56 = vld [vmem:[#allocation6_spill] sm:$0xff] }
 0x22c   :  { %7380 = vmatpush1.bf16.msra.mxu1 %v10431_v25  ;;  %7258 = vmatprep.subr.bf16.mxu0 %v10226_v58  ;;  %v637_v58 = vmax.f32 %v617_v1, %v635_v41  ;;  %12307 = vst [vmem:[#allocation71_spill] sm:$0xff] %v10493_v43  ;;  %v10498_v23 = vpop.f32.mrb[35].mxu0  ;;  %v12323_v43 = vld [vmem:[#allocation14_spill] sm:$0xff] }
 0x22d   :  { %7382 = vmatprep.subr.bf16.mxu1 %v10434_v62  ;;  %12305 = vst [vmem:[#allocation69_spill] sm:$0xff] %v10473_v28  ;;  %12310 = vst [vmem:[#allocation72_spill] sm:$0xff] %v10498_v23  ;;  %v12322_v23 = vld [vmem:[#allocation13_spill] sm:$0xff] }
 0x22e   :  { %v3432_v19 = vpop.permute.xlu1 %3431 }
 0x22f   :  { %7260 = vmatpush1.bf16.msra.mxu0 %v10255_v21  ;;  %v3434_v40 = vsel %vm301_vm15, %v3430_v27, %v3432_v19  ;;  %v614_v19 = vsel %vm301_vm15, %v10283_v37, %v10307_v18  ;;  %v298_v35 = vpop.permute.xlu0 %297  ;;  %v12308_v27 = vmax.f32 %v9768_v39, 0.0  ;;  %v12312_v18 = vld [vmem:[#allocation7_spill] sm:$0xff]  ;;  %v12313_v39 = vld [vmem:[#allocation8_spill] sm:$0xff] }
 0x230   :  { %7384 = vmatpush1.bf16.msra.mxu1 %v10462_v55  ;;  %6425 = vmatmul.mubr.msk.f32.gmra.mrb[46].mxu0 %vm65_vm1, %v3434_v40  ;;  %v618_v1 = vmax.f32 %v12311_v49, %v614_v19  ;;  %v12315_v40 = vld [vmem:[#allocation9_spill] sm:$0xff] }
 0x231   :  { %7262 = vmatprep.subr.bf16.mxu0 %v10262_v3  ;;  %6485 = vmatprep.mubr.msk.f32.mxu0 %vm328_vm2, %v637_v58  ;;  %v636_v41 = vmax.f32 %v12308_v27, %v632_v48  ;;  %v12317_v48 = vld [vmem:[#allocation10_spill] sm:$0xff] }
 0x232   :  { %7386 = vmatprep.subr.bf16.mxu1 %v10473_v28  ;;  %v300_v12 = vpop.permute.xlu1 %299 }
 0x233   :  { %7264 = vmatpush1.bf16.msra.mxu0 %v10290_v31  ;;  %v638_v50 = vmax.f32 %v618_v1, %v636_v41  ;;  %v317_v8 = vpop.permute.xlu0 %316  ;;  %v12320_v1 = vld [vmem:[#allocation11_spill] sm:$0xff] }
 0x234   :  { %7388 = vmatpush1.bf16.msra.mxu1 %v10479_v13  ;;  %7266 = vmatprep.subr.bf16.mxu0 %v10297_v10 }
 0x235   :  { %7390 = vmatprep.subr.bf16.mxu1 %v12309_v56 }
 0x236   :  { %v319_v37 = vpop.permute.xlu1 %318 }
 0x237   :  { %7268 = vmatpush1.bf16.msra.mxu0 %v10320_v45  ;;  %6492 = vmatmul.mubr.msk.f32.vlgmr.msra.gmra.mrb[52].mxu1 %vm328_vm2, %v637_v58  ;;  %v1220_v49 = vpop.permute.xlu0 %1219 }
 0x238   :  { %6493 = vmatprep.mubr.msk.f32.mxu1 %vm328_vm2, %v10270_v20  ;;  %7392 = vmatpush1.bf16.msra.mxu1 %v12312_v18  ;;  %v321_v18 = vsel %vm301_vm15, %v317_v8, %v319_v37  ;;  %v12332_v37 = vmax.f32 %v9895_v36, 0.0  ;;  %v12337_v36 = vld [vmem:[#allocation25_spill] sm:$0xff] }
 0x239   :  { %7270 = vmatprep.subr.bf16.mxu0 %v10323_v14  ;;  %7394 = vmatprep.subr.bf16.mxu1 %v12313_v39 }
 0x23a   :  { %v1222_v19 = vpop.permute.xlu1 %1221  ;;  %v325_v8 = vmax.f32 %v12332_v37, %v321_v18 }
 0x23b   :  { %7272 = vmatpush1.bf16.msra.mxu0 %v10346_v57  ;;  %6494 = vmatmul.mubr.msk.f32.gmra.mrb[54].mxu1 %vm328_vm2, %v638_v50  ;;  %v10511_v15 = vpop.f32.mrb[44].mxu1 }
 0x23c   :  { %12314 = vst [vmem:[#allocation73_spill] sm:$0xff] %v10511_v15  ;;  %7396 = vmatpush1.bf16.msra.mxu1 %v12315_v40  ;;  %7274 = vmatprep.subr.bf16.mxu0 %v10351_v6  ;;  %v10515_v58 = vpop.f32.mrb[45].mxu1  ;;  %v10519_v27 = vpop.f32.mrb[36].mxu0  ;;  %v12321_v15 = vld [vmem:[#allocation12_spill] sm:$0xff] }
 0x23d   :  { %12316 = vst [vmem:[#allocation74_spill] sm:$0xff] %v10515_v58  ;;  %7398 = vmatprep.subr.bf16.mxu1 %v12317_v48  ;;  %4136 = vmatprep.mubr.f32.mxu1 %v12237_v32  ;;  %12318 = vst [vmem:[#allocation75_spill] sm:$0xff] %v10519_v27  ;;  %v10522_v41 = vpop.f32.mrb[37].mxu0  ;;  %v1526_v27 = vpop.permute.xlu0 %1525 }
 0x23e   :  { %12319 = vst [vmem:[#allocation76_spill] sm:$0xff] %v10522_v41  ;;  %v1528_v58 = vpop.permute.xlu1 %1527  ;;  %v12324_v41 = vld [vmem:[#allocation15_spill] sm:$0xff] }
 0x23f   :  { %7276 = vmatpush1.bf16.msra.mxu0 %v10372_v54 }
 0x240   :  { %7400 = vmatpush1.bf16.msra.mxu1 %v12320_v1  ;;  %7278 = vmatprep.subr.bf16.mxu0 %v10375_v29  ;;  %v12325_v1 = vld [vmem:[#allocation16_spill] sm:$0xff] }
 0x241   :  { %7402 = vmatprep.subr.bf16.mxu1 %v12321_v15  ;;  %v320_v15 = vsel %vm301_vm15, %v10368_v42, %v10383_v44  ;;  %v1238_v39 = vpop.permute.xlu0 %1237  ;;  %v12329_v44 = vld [vmem:[#allocation18_spill] sm:$0xff]  ;;  %v12330_v42 = vld [vmem:[#allocation23_spill] sm:$0xff] }
 0x242   :  { %v1240_v48 = vpop.permute.xlu1 %1239 }
 0x243   :  { %7280 = vmatpush1.bf16.msra.mxu0 %v10396_v61 }
 0x244   :  { %7404 = vmatpush1.bf16.msra.mxu1 %v12322_v23  ;;  %7282 = vmatprep.subr.bf16.mxu0 %v10401_v38  ;;  %v302_v23 = vsel %vm301_vm15, %v10340_v34, %v10359_v30  ;;  %v1241_v30 = vsel %vm301_vm15, %v10428_v46, %v10447_v7  ;;  %v303_v34 = vsel %vm301_vm15, %v298_v35, %v300_v12  ;;  %v12335_v7 = vld [vmem:[#allocation20_spill] sm:$0xff]  ;;  %v12336_v12 = vmax.f32 %v9871_v52, 0.0 }
 0x245   :  { %7406 = vmatprep.subr.bf16.mxu1 %v12323_v43  ;;  %v12326_v43 = vld [vmem:[#allocation24_spill] sm:$0xff]  ;;  %v1242_v35 = vsel %vm301_vm15, %v1238_v39, %v1240_v48  ;;  %v1533_v39 = vsel %vm301_vm15, %v1526_v27, %v1528_v58  ;;  %v12340_v48 = vmax.f32 %v9945_v24, 0.0  ;;  %v12343_v58 = vmax.f32 %v9930_v51, 0.0  ;;  %v12344_v51 = vld [vmem:[#allocation47_spill] sm:$0xff] }
 0x246   :  { %v12327_v40 = vmax.f32 %v12326_v43, 0.0 }
 0x247   :  { %7284 = vmatpush1.bf16.msra.mxu0 %v10431_v25  ;;  %v1537_v27 = vmax.f32 %v12343_v58, %v1533_v39  ;;  %v12359_v58 = vld [vmem:[#allocation11_spill] sm:$0xff] }
 0x248   :  { %7408 = vmatpush1.bf16.msra.mxu1 %v12324_v41  ;;  %7286 = vmatprep.subr.bf16.mxu0 %v10434_v62  ;;  %v324_v20 = vmax.f32 %v12327_v40, %v320_v15  ;;  %v12328_v41 = vld [vmem:[#allocation17_spill] sm:$0xff]  ;;  %v1223_v15 = vsel %vm301_vm15, %v10392_v16, %v10413_v60  ;;  %v1546_v40 = vpop.permute.xlu1 %1545  ;;  %v12338_v16 = vmax.f32 %v12337_v36, 0.0  ;;  %v12349_v36 = vld [vmem:[#allocation32_spill] sm:$0xff] }
 0x249   :  { %7410 = vmatprep.subr.bf16.mxu1 %v12325_v1  ;;  %v12331_v1 = vmax.f32 %v12330_v42, 0.0  ;;  %v12339_v42 = vld [vmem:[#allocation21_spill] sm:$0xff] }
 0x24a   :  { %v1227_v60 = vmax.f32 %v12338_v16, %v1223_v15  ;;  %v12347_v15 = vld [vmem:[#allocation53_spill] sm:$0xff]  ;;  %v12350_v16 = vmax.f32 %v12349_v36, 0.0 }
 0x24b   :  { %7288 = vmatpush1.bf16.msra.mxu0 %v10462_v55  ;;  %v306_v56 = vmax.f32 %v12331_v1, %v302_v23  ;;  %v12334_v23 = vmax.f32 %v9849_v2, 0.0  ;;  %v1224_v1 = vsel %vm301_vm15, %v1220_v49, %v1222_v19  ;;  %v12342_v19 = vmax.f32 %v9914_v0, 0.0 }
 0x24c   :  { %7412 = vmatpush1.bf16.msra.mxu1 %v12328_v41  ;;  %7290 = vmatprep.subr.bf16.mxu0 %v10473_v28 }
 0x24d   :  { %7414 = vmatprep.subr.bf16.mxu1 %v12329_v44  ;;  %v326_v43 = vmax.f32 %v306_v56, %v324_v20  ;;  %v12333_v44 = vld [vmem:[#allocation19_spill] sm:$0xff]  ;;  %v1245_v46 = vmax.f32 %v12334_v23, %v1241_v30  ;;  %v307_v20 = vmax.f32 %v12336_v12, %v303_v34  ;;  %v1544_v56 = vpop.permute.xlu0 %1543  ;;  %v1246_v30 = vmax.f32 %v12340_v48, %v1242_v35  ;;  %v12348_v35 = vld [vmem:[#allocation6_spill] sm:$0xff] }
 0x24e   :  { %v1551_v18 = vsel %vm301_vm15, %v1544_v56, %v1546_v40  ;;  %v1228_v49 = vmax.f32 %v12342_v19, %v1224_v1  ;;  %v12353_v1 = vld [vmem:[#allocation26_spill] sm:$0xff]  ;;  %v12357_v19 = vld [vmem:[#allocation9_spill] sm:$0xff] }
 0x24f   :  { %7292 = vmatpush1.bf16.msra.mxu0 %v10479_v13  ;;  %v327_v2 = vmax.f32 %v307_v20, %v325_v8  ;;  %v10577_v52 = vmax.f32 %v1227_v60, %v1245_v46  ;;  %v1532_v8 = vpop.permute.xlu1 %1531  ;;  %v12354_v39 = vmax.f32 %v12353_v1, 0.0 }
 0x250   :  { %7416 = vmatpush1.bf16.msra.mxu1 %v12333_v44  ;;  %7422 = vmatprep.subr.bf16.mxu0 %v9645_v33  ;;  %v10596_v24 = vmax.f32 %v1228_v49, %v1246_v30  ;;  %v12355_v30 = vld [vmem:[#allocation8_spill] sm:$0xff]  ;;  %v12358_v49 = vld [vmem:[#allocation10_spill] sm:$0xff] }
 0x251   :  { %7418 = vmatprep.subr.bf16.mxu1 %v12335_v7  ;;  %v1530_v37 = vpop.permute.xlu0 %1529 }
 0x252   :  { %6486 = vmatmul.mubr.msk.f32.vlgmr.msra.gmra.mrb[48].mxu0 %vm328_vm2, %v326_v43  ;;  %v12346_v43 = vld [vmem:[#allocation51_spill] sm:$0xff]  ;;  %v1534_v56 = vsel %vm301_vm15, %v1530_v37, %v1532_v8  ;;  %v12362_v37 = vld [vmem:[#allocation14_spill] sm:$0xff] }
 0x253   :  { %6487 = vmatprep.mubr.msk.f32.mxu0 %vm328_vm2, %v638_v50  ;;  %7424 = vmatpush1.bf16.msra.mxu0 %v10070_v4  ;;  %v12341_v50 = vmax.f32 %v9963_v9, 0.0  ;;  %v12345_v9 = vld [vmem:[#allocation49_spill] sm:$0xff]  ;;  %v10653_v23 = vpop.permute.xlu1 %1834  ;;  %v1538_v48 = vmax.f32 %v12354_v39, %v1534_v56  ;;  %v12366_v39 = vld [vmem:[#allocation34_spill] sm:$0xff] }
 0x254   :  { %7420 = vmatpush1.bf16.msra.mxu1 %v12339_v42  ;;  %7426 = vmatprep.subr.bf16.mxu0 %v10074_v47 }
 0x255   :  { %7518 = vmatprep.subr.bf16.mxu1 %v9645_v33  ;;  %v1555_v34 = vmax.f32 %v12341_v50, %v1551_v18  ;;  %v10651_v40 = vpop.permute.xlu0 %1832  ;;  %v12351_v18 = vld [vmem:[#allocation40_spill] sm:$0xff] }
 0x256   :  { %6488 = vmatmul.mubr.msk.f32.gmra.mrb[50].mxu0 %vm328_vm2, %v327_v2  ;;  %v12352_v2 = vld [vmem:[#allocation7_spill] sm:$0xff]  ;;  %v1840_v1 = vsel %vm301_vm15, %v10651_v40, %v10653_v23 }
 0x257   :  { %6495 = vmatmul.mubr.msk.f32.vlgmr.msra.gmra.mrb[52].mxu1 %vm328_vm2, %v10577_v52  ;;  %7428 = vmatpush1.bf16.msra.mxu0 %v10097_v63  ;;  %v10600_v0 = vmax.f32 %v1537_v27, %v1555_v34  ;;  %v1550_v12 = vpop.permute.xlu1 %1549  ;;  %v12356_v34 = vld [vmem:[#allocation5_spill] sm:$0xff]  ;;  %v12360_v27 = vld [vmem:[#allocation12_spill] sm:$0xff]  ;;  %v12371_v23 = vld [vmem:[#allocation35_spill] sm:$0xff] }
 0x258   :  { %6497 = vmatprep.mubr.msk.f32.mxu0 %vm328_vm2, %v10577_v52  ;;  %7520 = vmatpush1.bf16.msra.mxu1 %v10070_v4 }
 0x259   :  { %4142 = vmatprep.mubr.f32.mxu1 %v12237_v32  ;;  %7430 = vmatprep.subr.bf16.mxu0 %v10101_v5  ;;  %v1548_v46 = vpop.permute.xlu0 %1547 }
 0x25a   :  { %7522 = vmatprep.subr.bf16.mxu1 %v10074_v47  ;;  %v1552_v20 = vsel %vm301_vm15, %v1548_v46, %v1550_v12  ;;  %v12363_v12 = vld [vmem:[#allocation15_spill] sm:$0xff] }
 0x25b   :  { %6496 = vmatmul.mubr.msk.f32.gmra.mrb[54].mxu1 %vm328_vm2, %v10596_v24  ;;  %7432 = vmatpush1.bf16.msra.mxu0 %v10123_v53  ;;  %v1556_v60 = vmax.f32 %v12350_v16, %v1552_v20  ;;  %v1839_v46 = vpop.permute.xlu1 %1838  ;;  %v12365_v20 = vld [vmem:[#allocation18_spill] sm:$0xff] }
 0x25c   :  { %7524 = vmatpush1.bf16.msra.mxu1 %v10097_v63  ;;  %6503 = vmatprep.mubr.msk.f32.mxu1 %vm328_vm2, %v10600_v0 }
 0x25d   :  { %7434 = vmatprep.subr.bf16.mxu0 %v10127_v59  ;;  %7526 = vmatprep.subr.bf16.mxu1 %v10101_v5  ;;  %v10681_v50 = vmax.f32 %v1538_v48, %v1556_v60  ;;  %v1837_v8 = vpop.permute.xlu0 %1836  ;;  %v12367_v48 = vmax.f32 %v12366_v39, 0.0 }
 0x25f   :  { %7436 = vmatpush1.bf16.msra.mxu0 %v10149_v17  ;;  %v1853_v36 = vpop.permute.xlu1 %1852 }
 0x260   :  { %7528 = vmatpush1.bf16.msra.mxu1 %v10123_v53  ;;  %7438 = vmatprep.subr.bf16.mxu0 %v10154_v26 }
 0x261   :  { %7530 = vmatprep.subr.bf16.mxu1 %v10127_v59  ;;  %v1851_v56 = vpop.permute.xlu0 %1850 }
 0x262   :  { %v1858_v16 = vsel %vm301_vm15, %v1851_v56, %v1853_v36  ;;  %v12368_v56 = vld [vmem:[#allocation29_spill] sm:$0xff] }
 0x263   :  { %7440 = vmatpush1.bf16.msra.mxu0 %v10171_v22  ;;  %v12369_v36 = vmax.f32 %v12368_v56, 0.0 }
 0x264   :  { %7532 = vmatpush1.bf16.msra.mxu1 %v10149_v17  ;;  %7442 = vmatprep.subr.bf16.mxu0 %v10175_v11 }
 0x265   :  { %7534 = vmatprep.subr.bf16.mxu1 %v10154_v26  ;;  %v1855_v60 = vpop.permute.xlu0 %1854 }
 0x267   :  { %7444 = vmatpush1.bf16.msra.mxu0 %v12344_v51 }
 0x268   :  { %7536 = vmatpush1.bf16.msra.mxu1 %v10171_v22  ;;  %7446 = vmatprep.subr.bf16.mxu0 %v12345_v9 }
 0x269   :  { %7538 = vmatprep.subr.bf16.mxu1 %v10175_v11 }
 0x26b   :  { %7448 = vmatpush1.bf16.msra.mxu0 %v12346_v43 }
 0x26c   :  { %7540 = vmatpush1.bf16.msra.mxu1 %v12344_v51  ;;  %7450 = vmatprep.subr.bf16.mxu0 %v12347_v15 }
 0x26d   :  { %7542 = vmatprep.subr.bf16.mxu1 %v12345_v9 }
 0x26f   :  { %7452 = vmatpush1.bf16.msra.mxu0 %v10255_v21 }
 0x270   :  { %7544 = vmatpush1.bf16.msra.mxu1 %v12346_v43  ;;  %7454 = vmatprep.subr.bf16.mxu0 %v10262_v3 }
 0x271   :  { %7546 = vmatprep.subr.bf16.mxu1 %v12347_v15 }
 0x273   :  { %7456 = vmatpush1.bf16.msra.mxu0 %v10290_v31 }
 0x274   :  { %7548 = vmatpush1.bf16.msra.mxu1 %v10255_v21  ;;  %7458 = vmatprep.subr.bf16.mxu0 %v10297_v10 }
 0x275   :  { %7550 = vmatprep.subr.bf16.mxu1 %v10262_v3 }
 0x277   :  { %7460 = vmatpush1.bf16.msra.mxu0 %v10320_v45 }
 0x278   :  { %7552 = vmatpush1.bf16.msra.mxu1 %v10290_v31  ;;  %7462 = vmatprep.subr.bf16.mxu0 %v10323_v14 }
 0x279   :  { %7554 = vmatprep.subr.bf16.mxu1 %v10297_v10 }
 0x27b   :  { %7464 = vmatpush1.bf16.msra.mxu0 %v10346_v57 }
 0x27c   :  { %7556 = vmatpush1.bf16.msra.mxu1 %v10320_v45  ;;  %7466 = vmatprep.subr.bf16.mxu0 %v10351_v6 }
 0x27d   :  { %7558 = vmatprep.subr.bf16.mxu1 %v10323_v14 }
 0x27f   :  { %7468 = vmatpush1.bf16.msra.mxu0 %v10372_v54 }
 0x280   :  { %7560 = vmatpush1.bf16.msra.mxu1 %v10346_v57  ;;  %7470 = vmatprep.subr.bf16.mxu0 %v10375_v29 }
 0x281   :  { %7562 = vmatprep.subr.bf16.mxu1 %v10351_v6 }
 0x283   :  { %7472 = vmatpush1.bf16.msra.mxu0 %v10396_v61 }
 0x284   :  { %7564 = vmatpush1.bf16.msra.mxu1 %v10372_v54  ;;  %7474 = vmatprep.subr.bf16.mxu0 %v10401_v38 }
 0x285   :  { %7566 = vmatprep.subr.bf16.mxu1 %v10375_v29 }
 0x287   :  { %7476 = vmatpush1.bf16.msra.mxu0 %v10431_v25 }
 0x288   :  { %7568 = vmatpush1.bf16.msra.mxu1 %v10396_v61  ;;  %7478 = vmatprep.subr.bf16.mxu0 %v10434_v62 }
 0x289   :  { %7570 = vmatprep.subr.bf16.mxu1 %v10401_v38 }
 0x28b   :  { %7480 = vmatpush1.bf16.msra.mxu0 %v10462_v55 }
 0x28c   :  { %7572 = vmatpush1.bf16.msra.mxu1 %v10431_v25  ;;  %7482 = vmatprep.subr.bf16.mxu0 %v10473_v28 }
 0x28d   :  { %7574 = vmatprep.subr.bf16.mxu1 %v10434_v62 }
 0x28f   :  { %7484 = vmatpush1.bf16.msra.mxu0 %v10479_v13 }
 0x290   :  { %7576 = vmatpush1.bf16.msra.mxu1 %v10462_v55  ;;  %7486 = vmatprep.subr.bf16.mxu0 %v12348_v35 }
 0x291   :  { %7578 = vmatprep.subr.bf16.mxu1 %v10473_v28 }
 0x292   :  { %6498 = vmatmul.mubr.msk.f32.vlgmr.msra.gmra.mrb[52].mxu0 %vm328_vm2, %v12351_v18  ;;  %v1857_v18 = vpop.permute.xlu1 %1856 }
 0x293   :  { %6499 = vmatprep.mubr.msk.f32.mxu0 %vm328_vm2, %v10596_v24  ;;  %7488 = vmatpush1.bf16.msra.mxu0 %v12352_v2 }
 0x294   :  { %7580 = vmatpush1.bf16.msra.mxu1 %v10479_v13  ;;  %7490 = vmatprep.subr.bf16.mxu0 %v12355_v30 }
 0x295   :  { %7582 = vmatprep.subr.bf16.mxu1 %v12348_v35 }
 0x296   :  { %6500 = vmatmul.mubr.msk.f32.gmra.mrb[54].mxu0 %vm328_vm2, %v12356_v34  ;;  %v1862_v34 = vmax.f32 %v12367_v48, %v1858_v16  ;;  %v12372_v16 = vmax.f32 %v12371_v23, 0.0 }
 0x297   :  { %7492 = vmatpush1.bf16.msra.mxu0 %v12357_v19  ;;  %6504 = vmatmul.mubr.msk.f32.vlgmr.msra.gmra.mrb[56].mxu1 %vm328_vm2, %v10577_v52  ;;  %v12361_v52 = vld [vmem:[#allocation13_spill] sm:$0xff] }
 0x298   :  { %6505 = vmatprep.mubr.msk.f32.mxu1 %vm328_vm2, %v10681_v50  ;;  %7584 = vmatpush1.bf16.msra.mxu1 %v12352_v2 }
 0x299   :  { %7494 = vmatprep.subr.bf16.mxu0 %v12358_v49  ;;  %7586 = vmatprep.subr.bf16.mxu1 %v12355_v30 }
 0x29a   :  { %4356 = vmatprep.mubr.f32.mxu0 %v12237_v32 }
 0x29b   :  { %7496 = vmatpush1.bf16.msra.mxu0 %v12359_v58  ;;  %6506 = vmatmul.mubr.msk.f32.gmra.mrb[58].mxu1 %vm328_vm2, %v10596_v24  ;;  %v12364_v24 = vld [vmem:[#allocation16_spill] sm:$0xff] }
 0x29c   :  { %7588 = vmatpush1.bf16.msra.mxu1 %v12357_v19  ;;  %7498 = vmatprep.subr.bf16.mxu0 %v12360_v27 }
 0x29d   :  { %7590 = vmatprep.subr.bf16.mxu1 %v12358_v49  ;;  %4528 = vmatprep.mubr.f32.mxu1 %v12237_v32 }
 0x29f   :  { %7500 = vmatpush1.bf16.msra.mxu0 %v12361_v52 }
 0x2a0   :  { %7592 = vmatpush1.bf16.msra.mxu1 %v12359_v58  ;;  %7502 = vmatprep.subr.bf16.mxu0 %v12362_v37 }
 0x2a1   :  { %7594 = vmatprep.subr.bf16.mxu1 %v12360_v27 }
 0x2a3   :  { %7504 = vmatpush1.bf16.msra.mxu0 %v12363_v12 }
 0x2a4   :  { %7596 = vmatpush1.bf16.msra.mxu1 %v12361_v52  ;;  %7506 = vmatprep.subr.bf16.mxu0 %v12364_v24 }
 0x2a5   :  { %7598 = vmatprep.subr.bf16.mxu1 %v12362_v37 }
 0x2a7   :  { %7508 = vmatpush1.bf16.msra.mxu0 %v12328_v41 }
 0x2a8   :  { %7600 = vmatpush1.bf16.msra.mxu1 %v12363_v12  ;;  %7510 = vmatprep.subr.bf16.mxu0 %v12365_v20 }
 0x2a9   :  { %7602 = vmatprep.subr.bf16.mxu1 %v12364_v24  ;;  %v1841_v24 = vsel %vm301_vm15, %v1837_v8, %v1839_v46 }
 0x2ab   :  { %7512 = vmatpush1.bf16.msra.mxu0 %v12333_v44 }
 0x2ac   :  { %7604 = vmatpush1.bf16.msra.mxu1 %v12328_v41  ;;  %7514 = vmatprep.subr.bf16.mxu0 %v12335_v7  ;;  %v1859_v41 = vsel %vm301_vm15, %v1855_v60, %v1857_v18  ;;  %v12373_v60 = vld [vmem:[#allocation33_spill] sm:$0xff] }
 0x2ad   :  { %7606 = vmatprep.subr.bf16.mxu1 %v12365_v20  ;;  %v1844_v20 = vmax.f32 %v12369_v36, %v1840_v1  ;;  %v1863_v39 = vmax.f32 %v12372_v16, %v1859_v41  ;;  %v12374_v18 = vmax.f32 %v12373_v60, 0.0 }
 0x2af   :  { %7516 = vmatpush1.bf16.msra.mxu0 %v12339_v42  ;;  %v10734_v40 = vmax.f32 %v1844_v20, %v1862_v34  ;;  %v1845_v48 = vmax.f32 %v12374_v18, %v1841_v24 }
 0x2b0   :  { %7608 = vmatpush1.bf16.msra.mxu1 %v12333_v44 }
 0x2b1   :  { %7610 = vmatprep.subr.bf16.mxu1 %v12335_v7  ;;  %12370 = vst [vmem:[#allocation24_spill] sm:$0xff] %v10734_v40  ;;  %v10747_v8 = vmax.f32 %v1845_v48, %v1863_v39 }
 0x2b2   :  { %6501 = vmatmul.mubr.msk.f32.vlgmr.msra.gmra.mrb[52].mxu0 %vm328_vm2, %v10600_v0 }
 0x2b3   :  { %4362 = vmatprep.mubr.f32.mxu0 %v12237_v32  ;;  %12375 = vst [vmem:[#allocation23_spill] sm:$0xff] %v10747_v8 }
 0x2b4   :  { %7612 = vmatpush1.bf16.msra.mxu1 %v12339_v42 }
 0x2b5   :  { %7654 = vmatprep.subr.bf16.mxu1 %v9645_v33 }
 0x2b6   :  { %6502 = vmatmul.mubr.msk.f32.gmra.mrb[54].mxu0 %vm328_vm2, %v10681_v50 }
 0x2b7   :  { %6507 = vmatmul.mubr.msk.f32.vlgmr.msra.gmra.mrb[56].mxu1 %vm328_vm2, %v10734_v40 }
 0x2b8   :  { %7656 = vmatpush1.bf16.msra.mxu1 %v10070_v4  ;;  %4534 = vmatprep.mubr.f32.mxu1 %v12237_v32 }
 0x2b9   :  { %7658 = vmatprep.subr.bf16.mxu1 %v10074_v47 }
 0x2bb   :  { %6508 = vmatmul.mubr.msk.f32.gmra.mrb[58].mxu1 %vm328_vm2, %v10747_v8 }
 0x2bc   :  { %7660 = vmatpush1.bf16.msra.mxu1 %v10097_v63  ;;  %6509 = vmatprep.mubr.msk.f32.mxu1 %vm328_vm2, %v10734_v40 }
 0x2bd   :  { %7662 = vmatprep.subr.bf16.mxu1 %v10101_v5 }
 0x2c0   :  { %7664 = vmatpush1.bf16.msra.mxu1 %v10123_v53 }
 0x2c1   :  { %7666 = vmatprep.subr.bf16.mxu1 %v10127_v59 }
 0x2c4   :  { %7668 = vmatpush1.bf16.msra.mxu1 %v10149_v17 }
 0x2c5   :  { %7670 = vmatprep.subr.bf16.mxu1 %v10154_v26 }
 0x2c6   :  { %v10760_v41 = vpop.f32.mrb[46].mxu1 }
 0x2c7   :  { %12376 = vst [vmem:[#allocation25_spill] sm:$0xff] %v10760_v41  ;;  %v10762_v46 = vpop.f32.mrb[47].mxu1  ;;  %v12389_v41 = vld [vmem:[#allocation17_spill] sm:$0xff] }
 0x2c8   :  { %12377 = vst [vmem:[#allocation47_spill] sm:$0xff] %v10762_v46  ;;  %7672 = vmatpush1.bf16.msra.mxu1 %v10171_v22 }
 0x2c9   :  { %7674 = vmatprep.subr.bf16.mxu1 %v10175_v11 }
 0x2ca   :  { %v3942_v24 = vpop.f32.mrb[48].mxu1 }
 0x2cb   :  { %v10766_v20 = vpop.f32.mrb[38].mxu0  ;;  %v3944_v1 = vpop.f32.mrb[49].mxu1 }
 0x2cc   :  { %12378 = vst [vmem:[#allocation49_spill] sm:$0xff] %v10766_v20  ;;  %7676 = vmatpush1.bf16.msra.mxu1 %v12344_v51  ;;  %v10769_v34 = vpop.f32.mrb[39].mxu0 }
 0x2cd   :  { %12379 = vst [vmem:[#allocation51_spill] sm:$0xff] %v10769_v34  ;;  %7678 = vmatprep.subr.bf16.mxu1 %v12345_v9 }
 0x2cf   :  { %v10772_v56 = vpop.f32.mrb[40].mxu0 }
 0x2d0   :  { %12380 = vst [vmem:[#allocation53_spill] sm:$0xff] %v10772_v56  ;;  %7680 = vmatpush1.bf16.msra.mxu1 %v12346_v43  ;;  %v10775_v36 = vpop.f32.mrb[41].mxu0 }
 0x2d1   :  { %12381 = vst [vmem:[#allocation32_spill] sm:$0xff] %v10775_v36  ;;  %7682 = vmatprep.subr.bf16.mxu1 %v12347_v15 }
 0x2d3   :  { %v10778_v23 = vpop.f32.mrb[42].mxu0 }
 0x2d4   :  { %12382 = vst [vmem:[#allocation40_spill] sm:$0xff] %v10778_v23  ;;  %7684 = vmatpush1.bf16.msra.mxu1 %v10255_v21  ;;  %v10781_v16 = vpop.f32.mrb[43].mxu0 }
 0x2d5   :  { %12383 = vst [vmem:[#allocation26_spill] sm:$0xff] %v10781_v16  ;;  %7686 = vmatprep.subr.bf16.mxu1 %v10262_v3 }
 0x2d8   :  { %7688 = vmatpush1.bf16.msra.mxu1 %v10290_v31 }
 0x2d9   :  { %7690 = vmatprep.subr.bf16.mxu1 %v10297_v10 }
 0x2dc   :  { %7692 = vmatpush1.bf16.msra.mxu1 %v10320_v45 }
 0x2dd   :  { %7694 = vmatprep.subr.bf16.mxu1 %v10323_v14 }
 0x2e0   :  { %7696 = vmatpush1.bf16.msra.mxu1 %v10346_v57 }
 0x2e1   :  { %7698 = vmatprep.subr.bf16.mxu1 %v10351_v6 }
 0x2e4   :  { %7700 = vmatpush1.bf16.msra.mxu1 %v10372_v54 }
 0x2e5   :  { %v10791_v39 = vpop.f32.mrb[44].mxu0  ;;  %7702 = vmatprep.subr.bf16.mxu1 %v10375_v29 }
 0x2e6   :  { %12384 = vst [vmem:[#allocation5_spill] sm:$0xff] %v10791_v39  ;;  %v10794_v60 = vpop.f32.mrb[45].mxu0 }
 0x2e7   :  { %12385 = vst [vmem:[#allocation34_spill] sm:$0xff] %v10794_v60  ;;  %v12390_v60 = vld [vmem:[#allocation18_spill] sm:$0xff] }
 0x2e8   :  { %v3948_v18 = vpop.f32.mrb[50].mxu1  ;;  %7704 = vmatpush1.bf16.msra.mxu1 %v10396_v61 }
 0x2e9   :  { %v3950_v48 = vpop.f32.mrb[51].mxu1  ;;  %7706 = vmatprep.subr.bf16.mxu1 %v10401_v38 }
 0x2ec   :  { %7708 = vmatpush1.bf16.msra.mxu1 %v10431_v25 }
 0x2ed   :  { %7710 = vmatprep.subr.bf16.mxu1 %v10434_v62 }
 0x2f0   :  { %7712 = vmatpush1.bf16.msra.mxu1 %v10462_v55 }
 0x2f1   :  { %7714 = vmatprep.subr.bf16.mxu1 %v10473_v28 }
 0x2f4   :  { %7716 = vmatpush1.bf16.msra.mxu1 %v10479_v13 }
 0x2f5   :  { %7718 = vmatprep.subr.bf16.mxu1 %v12348_v35  ;;  %v12403_v35 = vld [vmem:[#allocation50_spill] sm:$0xff] }
 0x2f7   :  { %6510 = vmatmul.mubr.msk.f32.vlgmr.msra.gmra.mrb[60].mxu1 %vm328_vm2, %v10600_v0 }
 0x2f8   :  { %6511 = vmatprep.mubr.msk.f32.mxu1 %vm328_vm2, %v10747_v8  ;;  %7720 = vmatpush1.bf16.msra.mxu1 %v12352_v2 }
 0x2f9   :  { %7722 = vmatprep.subr.bf16.mxu1 %v12355_v30 }
 0x2fb   :  { %6512 = vmatmul.mubr.msk.f32.gmra.mrb[62].mxu1 %vm328_vm2, %v10681_v50  ;;  %v12388_v50 = vld [vmem:[#allocation16_spill] sm:$0xff] }
 0x2fc   :  { %7724 = vmatpush1.bf16.msra.mxu1 %v12357_v19  ;;  %4911 = vmatprep.mubr.f32.mxu1 %v12237_v32 }
 0x2fd   :  { %7726 = vmatprep.subr.bf16.mxu1 %v12358_v49 }
 0x300   :  { %7728 = vmatpush1.bf16.msra.mxu1 %v12359_v58 }
 0x301   :  { %7730 = vmatprep.subr.bf16.mxu1 %v12360_v27 }
 0x303   :  { %v10817_v0 = vpop.f32.mrb[46].mxu0 }
 0x304   :  { %12386 = vst [vmem:[#allocation29_spill] sm:$0xff] %v10817_v0  ;;  %v10819_v46 = vpop.f32.mrb[47].mxu0  ;;  %7732 = vmatpush1.bf16.msra.mxu1 %v12361_v52  ;;  %v6436_v52 = vld [vmem:[%s12021_s7 + $0x80] sm:$0xff] }
 0x305   :  { %12387 = vst [vmem:[#allocation35_spill] sm:$0xff] %v10819_v46  ;;  %7734 = vmatprep.subr.bf16.mxu1 %v12362_v37 }
 0x308   :  { %7736 = vmatpush1.bf16.msra.mxu1 %v12363_v12 }
 0x309   :  { %7738 = vmatprep.subr.bf16.mxu1 %v12388_v50 }
 0x30c   :  { %7740 = vmatpush1.bf16.msra.mxu1 %v12389_v41 }
 0x30d   :  { %7742 = vmatprep.subr.bf16.mxu1 %v12390_v60  ;;  %v12393_v60 = vld [vmem:[#allocation4_spill] sm:$0xff] }
 0x310   :  { %7744 = vmatpush1.bf16.msra.mxu1 %v12333_v44 }
 0x311   :  { %7746 = vmatprep.subr.bf16.mxu1 %v12335_v7 }
 0x314   :  { %7748 = vmatpush1.bf16.msra.mxu1 %v12339_v42 }
 0x315   :  { %7866 = vmatprep.subr.bf16.mxu1 %v9645_v33 }
 0x325   :  { %v3865_v46 = vpop.f32.mrb[48].mxu0 }
 0x326   :  { %v10831_v0 = vadd.f32 %v3942_v24, %v3865_v46  ;;  %v3867_v39 = vpop.f32.mrb[49].mxu0  ;;  %v6430_v46 = vld [vmem:[%s12021_s7 + $0x50] sm:$0xff]  ;;  %v6431_v24 = vld [vmem:[%s12021_s7 + $0x58] sm:$0xff] }
 0x327   :  { %v10833_v16 = vadd.f32 %v3944_v1, %v3867_v39  ;;  %v7613_v1 = vpack.c.bf16 %v6431_v24, %v6430_v46  ;;  %v6435_v46 = vld [vmem:[%s12021_s7 + $0x78] sm:$0xff]  ;;  %v3969_v24 = vld [vmem:[%s12023_s6] sm:$0x3] }
 0x329   :  { %v3871_v23 = vpop.f32.mrb[50].mxu0  ;;  %7614 = vmatprep.subr.bf16.mxu0 %v7613_v1 }
 0x32a   :  { %v10835_v36 = vadd.f32 %v3948_v18, %v3871_v23  ;;  %v3873_v56 = vpop.f32.mrb[51].mxu0  ;;  %v10837_v34 = vpop.f32.mrb[52].mxu1  ;;  %7616 = vmatpush3.bf16.msra.mxu0 %v7613_v1  ;;  %v6433_v23 = vld [vmem:[%s12021_s7 + $0x68] sm:$0xff]  ;;  %v3953_v18 = vld [vmem:[%s12022_s5] sm:$0x3] }
 0x32b   :  { %v10839_v20 = vadd.f32 %v3950_v48, %v3873_v56  ;;  %v10841_v44 = vpop.f32.mrb[53].mxu1  ;;  %v6432_v56 = vld [vmem:[%s12021_s7 + $0x60] sm:$0xff]  ;;  %v6434_v48 = vld [vmem:[%s12021_s7 + $0x70] sm:$0xff]  ;;  %v10875_v41 = vrot.slane %v3953_v18, %v12393_v60 }
 0x32c   :  { %v7617_v39 = vpack.c.bf16 %v6433_v23, %v6432_v56  ;;  %v7621_v1 = vpack.c.bf16 %v6435_v46, %v6434_v48  ;;  %v12391_v56 = vld [vmem:[#allocation3_spill] sm:$0xff]  ;;  %v6437_v48 = vld [vmem:[%s12021_s7 + $0x88] sm:$0xff] }
 0x32d   :  { %v10872_v23 = vrot.slane %v3953_v18, %v12391_v56  ;;  %12394 = vst [vmem:[#allocation77_spill] sm:$0xff] %v10875_v41  ;;  %v10878_v50 = vrot.slane %v3969_v24, %v12391_v56  ;;  %v10888_v18 = vrot.slane %v3969_v24, %v12393_v60  ;;  %v7625_v27 = vpack.c.bf16 %v6437_v48, %v6436_v52  ;;  %v6438_v24 = vld [vmem:[%s12021_s7 + $0x90] sm:$0xff]  ;;  %v6439_v52 = vld [vmem:[%s12021_s7 + $0x98] sm:$0xff] }
 0x32e   :  { %v10843_v7 = vpop.f32.mrb[54].mxu1  ;;  %7618 = vmatprep.subr.bf16.mxu0 %v7617_v39  ;;  %v7629_v49 = vpack.c.bf16 %v6439_v52, %v6438_v24 }
 0x32f   :  { %v10845_v42 = vpop.f32.mrb[55].mxu1  ;;  %7620 = vmatpush3.bf16.msra.mxu0 %v7617_v39  ;;  %12392 = vst [vmem:[#allocation33_spill] sm:$0xff] %v10872_v23  ;;  %12395 = vst [vmem:[#allocation78_spill] sm:$0xff] %v10878_v50 }
 0x330   :  { %7622 = vmatprep.subr.bf16.mxu0 %v7621_v1  ;;  %12396 = vst [vmem:[#allocation79_spill] sm:$0xff] %v10888_v18 }
 0x333   :  { %7624 = vmatpush3.bf16.msra.mxu0 %v7621_v1 }
 0x334   :  { %7626 = vmatprep.subr.bf16.mxu0 %v7625_v27 }
 0x337   :  { %7628 = vmatpush3.bf16.msra.mxu0 %v7625_v27 }
 0x338   :  { %7630 = vmatprep.subr.bf16.mxu0 %v7629_v49 }
 0x33b   :  { %7632 = vmatpush3.bf16.msra.mxu0 %v7629_v49  ;;  %v3965_v49 = vmul.f32 %v10872_v23, %v10831_v0  ;;  %v4149_v0 = vmul.f32 %v10837_v34, %v10872_v23 }
 0x33d   :  { %v10964_v34 = vadd.f32 %v4149_v0, %v10878_v50 }
 0x33f   :  { %v12131_v0 = vmax.f32 %v10964_v34, 0.0 }
 0x385   :  { %v4358_v39 = vpop.f32.mrb[52].mxu0 }
 0x386   :  { %v4369_v12 = vmul.f32 %v4358_v39, %v10872_v23  ;;  %v4360_v37 = vpop.f32.mrb[53].mxu0 }
 0x387   :  { %v4370_v46 = vmul.f32 %v4360_v37, %v10875_v41 }
 0x388   :  { %v10892_v58 = vadd.f32 %v4369_v12, %v10878_v50 }
 0x389   :  { %v4374_v39 = vadd.f32 %v4370_v46, %v10888_v18  ;;  %v4364_v1 = vpop.f32.mrb[54].mxu0 }
 0x38a   :  { %v4371_v19 = vmul.f32 %v4364_v1, %v10872_v23  ;;  %v4366_v8 = vpop.f32.mrb[55].mxu0  ;;  %v4530_v30 = vpop.f32.mrb[56].mxu1  ;;  %v12397_v2 = vmax.f32 %v10892_v58, 0.0 }
 0x38b   :  { %v4378_v37 = vmax.f32 %v4374_v39, 0.0  ;;  %v4372_v12 = vmul.f32 %v4366_v8, %v10875_v41  ;;  %v4541_v48 = vmul.f32 %v4530_v30, %v10872_v23  ;;  %v4532_v46 = vpop.f32.mrb[57].mxu1 }
 0x38c   :  { %v10906_v1 = vadd.f32 %v4371_v19, %v10878_v50  ;;  %v4542_v27 = vmul.f32 %v4532_v46, %v10875_v41  ;;  %4557 = vrot.lane.b32.xlu0 %v12397_v2, %s8403_s15  ;;  %v4199_v19 = vld [vmem:[%s12021_s7] sm:$0xff]  ;;  %v4200_v2 = vld [vmem:[%s12021_s7 + $0x8] sm:$0xff] }
 0x38d   :  { %v4376_v40 = vadd.f32 %v4372_v12, %v10888_v18  ;;  %4559 = vrot.lane.b32.xlu1 %v4378_v37, %s8403_s15  ;;  %v10916_v30 = vadd.f32 %v4541_v48, %v10878_v50  ;;  %v10926_v46 = vpack.c.bf16 %v4200_v2, %v4199_v19 }
 0x38e   :  { %v12129_v8 = vmax.f32 %v10906_v1, 0.0  ;;  %v4536_v39 = vpop.f32.mrb[58].mxu1  ;;  %v4546_v52 = vadd.f32 %v4542_v27, %v10888_v18 }
 0x38f   :  { %v4380_v24 = vmax.f32 %v4376_v40, 0.0  ;;  %v4543_v37 = vmul.f32 %v4536_v39, %v10872_v23  ;;  %v4538_v12 = vpop.f32.mrb[59].mxu1  ;;  %7634 = vmatprep.subr.bf16.mxu0 %v10926_v46  ;;  %v12130_v40 = vmax.f32 %v10916_v30, 0.0  ;;  %v3966_v39 = vmul.f32 %v10875_v41, %v10833_v16 }
 0x390   :  { %v4544_v48 = vmul.f32 %v4538_v12, %v10875_v41  ;;  %4561 = vrot.lane.b32.xlu0 %v12129_v8, %s8403_s15  ;;  %v4550_v19 = vmax.f32 %v4546_v52, 0.0  ;;  %v4150_v16 = vmul.f32 %v10841_v44, %v10875_v41 }
 0x391   :  { %4563 = vrot.lane.b32.xlu1 %v4380_v24, %s8403_s15  ;;  %v10938_v27 = vadd.f32 %v4543_v37, %v10878_v50  ;;  %v10948_v24 = vadd.f32 %v10878_v50, %v3965_v49  ;;  %v3982_v12 = vadd.f32 %v10888_v18, %v3966_v39  ;;  %v3967_v49 = vmul.f32 %v10872_v23, %v10835_v36 }
 0x392   :  { %v4548_v2 = vadd.f32 %v4544_v48, %v10888_v18  ;;  %v3968_v39 = vmul.f32 %v10875_v41, %v10839_v20  ;;  %v4154_v44 = vadd.f32 %v4150_v16, %v10888_v18  ;;  %v4151_v20 = vmul.f32 %v10843_v7, %v10872_v23  ;;  %v12398_v7 = vld [vmem:[#allocation41_spill] sm:$0xff] }
 0x393   :  { %v12128_v37 = vmax.f32 %v10938_v27, 0.0  ;;  %v12127_v48 = vmax.f32 %v10948_v24, 0.0  ;;  %v10977_v36 = vadd.f32 %v10878_v50, %v3967_v49  ;;  %v2014_v49 = vld [vmem:[%s12019_s3] sm:$0x3] }
 0x394   :  { %4575 = vrot.lane.b32.xlu0 %v12130_v40, %s8403_s15  ;;  %v4552_v52 = vmax.f32 %v4548_v2, 0.0  ;;  %v1998_v2 = vld [vmem:[%s12018_s2] sm:$0x3]  ;;  %v4158_v16 = vmax.f32 %v4154_v44, 0.0 }
 0x395   :  { %4577 = vrot.lane.b32.xlu1 %v4550_v19, %s8403_s15  ;;  %v3986_v19 = vmax.f32 %v3982_v12, 0.0  ;;  %v3984_v12 = vadd.f32 %v10888_v18, %v3968_v39  ;;  %v12138_v44 = vmax.f32 %v10977_v36, 0.0 }
 0x397   :  { %v3988_v40 = vmax.f32 %v3984_v12, 0.0 }
 0x398   :  { %4579 = vrot.lane.b32.xlu0 %v12128_v37, %s8403_s15  ;;  %v12399_v37 = vld [vmem:[#allocation42_spill] sm:$0xff] }
 0x399   :  { %4581 = vrot.lane.b32.xlu1 %v4552_v52, %s8403_s15  ;;  %v4152_v52 = vmul.f32 %v10845_v42, %v10875_v41  ;;  %v10997_v42 = vadd.f32 %v4151_v20, %v10878_v50  ;;  %v2019_v41 = vrot.slane %v2014_v49, %v12391_v56 }
 0x39b   :  { %v12144_v20 = vmax.f32 %v10997_v42, 0.0 }
 0x39c   :  { %4165 = vrot.lane.b32.xlu0 %v12127_v48, %s8403_s15  ;;  %v2003_v48 = vrot.slane %v1998_v2, %v12391_v56 }
 0x39d   :  { %4167 = vrot.lane.b32.xlu1 %v3986_v19, %s8403_s15  ;;  %v2007_v19 = vrot.slane %v1998_v2, %v12393_v60  ;;  %v2023_v2 = vrot.slane %v2014_v49, %v12393_v60  ;;  %v12402_v49 = vld [vmem:[#allocation48_spill] sm:$0xff] }
 0x39e   :  { %v2010_v39 = vmul.f32 %v2003_v48, %v12398_v7 }
 0x39f   :  { %v2011_v8 = vmul.f32 %v2007_v19, %v12399_v37  ;;  %v12401_v37 = vld [vmem:[#allocation28_spill] sm:$0xff]  ;;  %v2013_v13 = vmul.f32 %v2007_v19, %v12403_v35 }
 0x3a0   :  { %4183 = vrot.lane.b32.xlu0 %v12131_v0, %s8403_s15  ;;  %v4156_v0 = vadd.f32 %v4152_v52, %v10888_v18  ;;  %v11008_v23 = vadd.f32 %v2019_v41, %v2010_v39  ;;  %v2127_v12 = vmul.f32 %v12401_v37, %v2007_v19 }
 0x3a1   :  { %4185 = vrot.lane.b32.xlu1 %v4158_v16, %s8403_s15  ;;  %v12400_v16 = vld [vmem:[#allocation27_spill] sm:$0xff]  ;;  %v2027_v50 = vadd.f32 %v2023_v2, %v2011_v8  ;;  %v2029_v35 = vadd.f32 %v2023_v2, %v2013_v13 }
 0x3a2   :  { %v2126_v7 = vmul.f32 %v12400_v16, %v2003_v48  ;;  %v4160_v52 = vmax.f32 %v4156_v0, 0.0  ;;  %v2012_v16 = vmul.f32 %v2003_v48, %v12402_v49  ;;  %v2131_v39 = vadd.f32 %v2127_v12, %v2023_v2  ;;  %v2297_v8 = vld [vmem:[%s12018_s2] sm:$0x3] }
 0x3a3   :  { %v2031_v18 = vmax.f32 %v2027_v50, 0.0  ;;  %v12405_v50 = vld [vmem:[#allocation31_spill] sm:$0xff] }
 0x3a4   :  { %4169 = vrot.lane.b32.xlu0 %v12138_v44, %s8403_s15  ;;  %v11016_v44 = vadd.f32 %v2126_v7, %v2019_v41  ;;  %v12404_v7 = vld [vmem:[#allocation30_spill] sm:$0xff]  ;;  %v2135_v12 = vmax.f32 %v2131_v39, 0.0  ;;  %v2129_v49 = vmul.f32 %v12405_v50, %v2007_v19  ;;  %v12406_v19 = vld [vmem:[#allocation52_spill] sm:$0xff] }
 0x3a5   :  { %4171 = vrot.lane.b32.xlu1 %v3988_v40, %s8403_s15  ;;  %v12145_v40 = vmax.f32 %v11008_v23, 0.0  ;;  %v2128_v37 = vmul.f32 %v12404_v7, %v2003_v48  ;;  %v2033_v7 = vmax.f32 %v2029_v35, 0.0  ;;  %v12407_v50 = vld [vmem:[#allocation54_spill] sm:$0xff] }
 0x3a6   :  { %v12148_v0 = vmax.f32 %v11016_v44, 0.0  ;;  %v2133_v39 = vadd.f32 %v2129_v49, %v2023_v2  ;;  %v12409_v49 = vld [vmem:[#allocation37_spill] sm:$0xff] }
 0x3a7   :  { %v11042_v48 = vadd.f32 %v2128_v37, %v2019_v41  ;;  %v12408_v37 = vld [vmem:[#allocation36_spill] sm:$0xff] }
 0x3a8   :  { %4187 = vrot.lane.b32.xlu0 %v12144_v20, %s8403_s15  ;;  %v2302_v20 = vrot.slane %v2297_v8, %v12391_v56  ;;  %v2137_v2 = vmax.f32 %v2133_v39, 0.0  ;;  %v12412_v39 = vld [vmem:[#allocation38_spill] sm:$0xff] }
 0x3a9   :  { %4189 = vrot.lane.b32.xlu1 %v4160_v52, %s8403_s15  ;;  %v11030_v52 = vadd.f32 %v2019_v41, %v2012_v16  ;;  %v12154_v41 = vmax.f32 %v11042_v48, 0.0 }
 0x3aa   :  { %v2309_v13 = vmul.f32 %v2302_v20, %v12406_v19 }
 0x3ab   :  { %v12151_v16 = vmax.f32 %v11030_v52, 0.0 }
 0x3ac   :  { %2142 = vrot.lane.b32.xlu0 %v12145_v40, %s8410_s23  ;;  %v2306_v40 = vrot.slane %v2297_v8, %v12393_v60 }
 0x3ad   :  { %2144 = vrot.lane.b32.xlu1 %v2031_v18, %s8410_s23  ;;  %v2313_v18 = vld [vmem:[%s12019_s3] sm:$0x3] }
 0x3ae   :  { %v2310_v28 = vmul.f32 %v2306_v40, %v12407_v50  ;;  %v2322_v8 = vrot.slane %v2313_v18, %v12393_v60  ;;  %v2419_v35 = vmul.f32 %v12409_v49, %v2306_v40 }
 0x3b0   :  { %2160 = vrot.lane.b32.xlu0 %v12148_v0, %s8410_s23  ;;  %v2318_v0 = vrot.slane %v2313_v18, %v12391_v56  ;;  %v2326_v19 = vadd.f32 %v2322_v8, %v2310_v28  ;;  %v2423_v60 = vadd.f32 %v2419_v35, %v2322_v8 }
 0x3b1   :  { %2162 = vrot.lane.b32.xlu1 %v2135_v12, %s8410_s23  ;;  %v2418_v12 = vmul.f32 %v12408_v37, %v2302_v20 }
 0x3b2   :  { %v11055_v55 = vadd.f32 %v2318_v0, %v2309_v13  ;;  %v2330_v37 = vmax.f32 %v2326_v19, 0.0  ;;  %v12411_v13 = vld [vmem:[#allocation60_spill] sm:$0xff]  ;;  %v2427_v49 = vmax.f32 %v2423_v60, 0.0 }
 0x3b3   :  { %v11062_v50 = vadd.f32 %v2418_v12, %v2318_v0  ;;  %v2312_v56 = vmul.f32 %v2306_v40, %v12411_v13 }
 0x3b4   :  { %2146 = vrot.lane.b32.xlu0 %v12151_v16, %s8410_s23  ;;  %v2329_v18 = vmax.f32 %v11055_v55, 0.0 }
 0x3b5   :  { %2148 = vrot.lane.b32.xlu1 %v2033_v7, %s8410_s23  ;;  %v12410_v7 = vld [vmem:[#allocation59_spill] sm:$0xff]  ;;  %v12159_v28 = vmax.f32 %v11062_v50, 0.0 }
 0x3b6   :  { %v2311_v16 = vmul.f32 %v2302_v20, %v12410_v7  ;;  %v2328_v7 = vadd.f32 %v2322_v8, %v2312_v56 }
 0x3b8   :  { %2164 = vrot.lane.b32.xlu0 %v12154_v41, %s8410_s23  ;;  %v11073_v12 = vadd.f32 %v2318_v0, %v2311_v16  ;;  %v12413_v41 = vld [vmem:[#allocation39_spill] sm:$0xff]  ;;  %v2332_v13 = vmax.f32 %v2328_v7, 0.0  ;;  %v12415_v7 = vmax.f32 %v10916_v30, 0.0  ;;  %v12417_v30 = vmax.f32 %v10938_v27, 0.0 }
 0x3b9   :  { %2166 = vrot.lane.b32.xlu1 %v2137_v2, %s8410_s23  ;;  %v2420_v2 = vmul.f32 %v12412_v39, %v2302_v20  ;;  %v2421_v62 = vmul.f32 %v12413_v41, %v2306_v40 }
 0x3ba   :  { %v12157_v19 = vmax.f32 %v11073_v12, 0.0 }
 0x3bb   :  { %v11080_v35 = vadd.f32 %v2420_v2, %v2318_v0  ;;  %v12414_v2 = vmax.f32 %v10892_v58, 0.0  ;;  %v12416_v58 = vmax.f32 %v10906_v1, 0.0 }
 0x3bc   :  { %2434 = vrot.lane.b32.xlu0 %v2329_v18, %s8410_s23 }
 0x3bd   :  { %2436 = vrot.lane.b32.xlu1 %v2330_v37, %s8410_s23  ;;  %v2425_v37 = vadd.f32 %v2421_v62, %v2322_v8  ;;  %v12158_v60 = vmax.f32 %v11080_v35, 0.0 }
 0x3bf   :  { %v2429_v56 = vmax.f32 %v2425_v37, 0.0 }
 0x3c0   :  { %2452 = vrot.lane.b32.xlu0 %v12159_v28, %s8410_s23 }
 0x3c1   :  { %2454 = vrot.lane.b32.xlu1 %v2427_v49, %s8410_s23 }
 0x3c4   :  { %2438 = vrot.lane.b32.xlu0 %v12157_v19, %s8410_s23 }
 0x3c5   :  { %2440 = vrot.lane.b32.xlu1 %v2332_v13, %s8410_s23 }
 0x3c8   :  { %2456 = vrot.lane.b32.xlu0 %v12158_v60, %s8410_s23 }
 0x3c9   :  { %2458 = vrot.lane.b32.xlu1 %v2429_v56, %s8410_s23 }
 0x3fe   :  { %v4558_v20 = vpop.permute.xlu0 %4557 }
 0x3ff   :  { %v4560_v40 = vpop.permute.xlu1 %4559 }
 0x400   :  { %v4565_v16 = vsel %vm1908_vm11, %v4558_v20, %v4560_v40  ;;  %v4201_v20 = vld [vmem:[%s12021_s7 + $0x10] sm:$0xff]  ;;  %v4202_v40 = vld [vmem:[%s12021_s7 + $0x18] sm:$0xff] }
 0x401   :  { %v4569_v49 = vmax.f32 %v12414_v2, %v4565_v16 }
 0x402   :  { %v4562_v0 = vpop.permute.xlu0 %4561 }
 0x403   :  { %v4564_v62 = vpop.permute.xlu1 %4563 }
 0x404   :  { %v4566_v13 = vsel %vm1908_vm11, %v4562_v0, %v4564_v62 }
 0x405   :  { %v4570_v16 = vmax.f32 %v12416_v58, %v4566_v13  ;;  %v12418_v13 = vmax.f32 %v10948_v24, 0.0 }
 0x406   :  { %v4576_v8 = vpop.permute.xlu0 %4575 }
 0x407   :  { %v4578_v41 = vpop.permute.xlu1 %4577 }
 0x408   :  { %v4583_v39 = vsel %vm1908_vm11, %v4576_v8, %v4578_v41 }
 0x409   :  { %v4587_v37 = vmax.f32 %v12415_v7, %v4583_v39  ;;  %v4204_v39 = vld [vmem:[%s12021_s7 + $0x28] sm:$0xff]  ;;  %v4205_v7 = vld [vmem:[%s12021_s7 + $0x30] sm:$0xff] }
 0x40a   :  { %v4580_v19 = vpop.permute.xlu0 %4579 }
 0x40b   :  { %v4589_v56 = vmax.f32 %v4569_v49, %v4587_v37  ;;  %v4582_v60 = vpop.permute.xlu1 %4581  ;;  %v4206_v37 = vld [vmem:[%s12021_s7 + $0x38] sm:$0xff] }
 0x40c   :  { %v4584_v28 = vsel %vm1908_vm11, %v4580_v19, %v4582_v60  ;;  %v7637_v19 = vpack.c.bf16 %v4202_v40, %v4201_v20  ;;  %v4203_v60 = vld [vmem:[%s12021_s7 + $0x20] sm:$0xff]  ;;  %v12419_v20 = vmax.f32 %v10964_v34, 0.0 }
 0x40d   :  { %v4588_v8 = vmax.f32 %v12417_v30, %v4584_v28  ;;  %6635 = vmatprep.mubr.msk.f32.mxu0 %vm3123_vm3, %v4589_v56  ;;  %v7641_v2 = vpack.c.bf16 %v4204_v39, %v4203_v60  ;;  %v7645_v30 = vpack.c.bf16 %v4206_v37, %v4205_v7  ;;  %v12420_v39 = vmax.f32 %v10997_v42, 0.0 }
 0x40e   :  { %v4166_v0 = vpop.permute.xlu0 %4165  ;;  %v12423_v42 = vmax.f32 %v11016_v44, 0.0 }
 0x40f   :  { %v4590_v62 = vmax.f32 %v4570_v16, %v4588_v8  ;;  %v4168_v41 = vpop.permute.xlu1 %4167  ;;  %v4207_v8 = vld [vmem:[%s12021_s7 + $0x40] sm:$0xff] }
 0x410   :  { %v4173_v1 = vsel %vm1908_vm11, %v4166_v0, %v4168_v41  ;;  %v4208_v0 = vld [vmem:[%s12021_s7 + $0x48] sm:$0xff] }
 0x411   :  { %6636 = vmatmul.mubr.msk.f32.vlgmr.msra.gmra.mrb[56].mxu0 %vm3123_vm3, %v4590_v62  ;;  %v4177_v56 = vmax.f32 %v12418_v13, %v4173_v1  ;;  %v7649_v62 = vpack.c.bf16 %v4208_v0, %v4207_v8  ;;  %v12424_v0 = vmax.f32 %v11030_v52, 0.0 }
 0x412   :  { %7636 = vmatpush3.bf16.msra.mxu0 %v10926_v46  ;;  %v4184_v27 = vpop.permute.xlu0 %4183 }
 0x413   :  { %v4186_v28 = vpop.permute.xlu1 %4185  ;;  %7638 = vmatprep.subr.bf16.mxu0 %v7637_v19 }
 0x414   :  { %v4191_v49 = vsel %vm1908_vm11, %v4184_v27, %v4186_v28  ;;  %v12421_v28 = vmax.f32 %v10977_v36, 0.0 }
 0x415   :  { %v4195_v46 = vmax.f32 %v12419_v20, %v4191_v49  ;;  %v12422_v20 = vmax.f32 %v11008_v23, 0.0 }
 0x416   :  { %7640 = vmatpush3.bf16.msra.mxu0 %v7637_v19  ;;  %v4170_v40 = vpop.permute.xlu0 %4169 }
 0x417   :  { %v4197_v58 = vmax.f32 %v4177_v56, %v4195_v46  ;;  %v4172_v16 = vpop.permute.xlu1 %4171  ;;  %7642 = vmatprep.subr.bf16.mxu0 %v7641_v2 }
 0x418   :  { %v4174_v19 = vsel %vm1908_vm11, %v4170_v40, %v4172_v16 }
 0x419   :  { %6658 = vmatprep.mubr.msk.f32.mxu0 %vm3123_vm3, %v4197_v58  ;;  %v4178_v49 = vmax.f32 %v12421_v28, %v4174_v19  ;;  %v12426_v28 = vmax.f32 %v11062_v50, 0.0 }
 0x41a   :  { %7644 = vmatpush3.bf16.msra.mxu0 %v7641_v2  ;;  %v4188_v24 = vpop.permute.xlu0 %4187 }
 0x41b   :  { %v4190_v34 = vpop.permute.xlu1 %4189  ;;  %7646 = vmatprep.subr.bf16.mxu0 %v7645_v30 }
 0x41c   :  { %v4192_v41 = vsel %vm1908_vm11, %v4188_v24, %v4190_v34  ;;  %v12425_v34 = vmax.f32 %v11042_v48, 0.0 }
 0x41d   :  { %v4196_v1 = vmax.f32 %v12420_v39, %v4192_v41 }
 0x41e   :  { %7648 = vmatpush3.bf16.msra.mxu0 %v7645_v30  ;;  %v2143_v60 = vpop.permute.xlu0 %2142 }
 0x41f   :  { %v2145_v27 = vpop.permute.xlu1 %2144  ;;  %7650 = vmatprep.subr.bf16.mxu0 %v7649_v62  ;;  %v4198_v37 = vmax.f32 %v4178_v49, %v4196_v1 }
 0x420   :  { %v2150_v2 = vsel %vm301_vm15, %v2143_v60, %v2145_v27 }
 0x421   :  { %v2154_v46 = vmax.f32 %v12422_v20, %v2150_v2 }
 0x422   :  { %7652 = vmatpush3.bf16.msra.mxu0 %v7649_v62  ;;  %v2161_v7 = vpop.permute.xlu0 %2160 }
 0x423   :  { %v2163_v13 = vpop.permute.xlu1 %2162  ;;  %7750 = vmatprep.subr.bf16.mxu0 %v9645_v33 }
 0x424   :  { %v2168_v56 = vsel %vm301_vm15, %v2161_v7, %v2163_v13  ;;  %v12428_v7 = vld [vmem:[#allocation68_spill] sm:$0xff] }
 0x425   :  { %v2172_v40 = vmax.f32 %v12423_v42, %v2168_v56  ;;  %6659 = vmatmul.mubr.msk.f32.vlgmr.msra.gmra.mrb[56].mxu0 %vm3123_vm3, %v4198_v37  ;;  %v12429_v56 = vld [vmem:[#allocation69_spill] sm:$0xff]  ;;  %v12431_v42 = vld [vmem:[#allocation6_spill] sm:$0xff] }
 0x426   :  { %7752 = vmatpush1.bf16.msra.mxu0 %v10070_v4  ;;  %v2147_v36 = vpop.permute.xlu0 %2146 }
 0x427   :  { %v11153_v58 = vmax.f32 %v2154_v46, %v2172_v40  ;;  %v2149_v16 = vpop.permute.xlu1 %2148  ;;  %7754 = vmatprep.subr.bf16.mxu0 %v10074_v47  ;;  %v12430_v46 = vld [vmem:[#allocation70_spill] sm:$0xff] }
 0x428   :  { %v2151_v23 = vsel %vm301_vm15, %v2147_v36, %v2149_v16  ;;  %v12432_v36 = vmax.f32 %v11080_v35, 0.0  ;;  %v12438_v35 = vld [vmem:[#allocation23_spill] sm:$0xff] }
 0x429   :  { %6513 = vmatmul.mubr.msk.f32.vlgmr.msra.gmra.mrb[60].mxu1 %vm328_vm2, %v11153_v58  ;;  %6515 = vmatprep.mubr.msk.f32.mxu0 %vm328_vm2, %v11153_v58  ;;  %v2155_v24 = vmax.f32 %v12424_v0, %v2151_v23  ;;  %v12433_v23 = vld [vmem:[#allocation24_spill] sm:$0xff] }
 0x42a   :  { %7756 = vmatpush1.bf16.msra.mxu0 %v10097_v63  ;;  %7868 = vmatpush1.bf16.msra.mxu1 %v10070_v4  ;;  %v2165_v44 = vpop.permute.xlu0 %2164  ;;  %v12436_v0 = vld [vmem:[#allocation8_spill] sm:$0xff] }
 0x42b   :  { %v2167_v30 = vpop.permute.xlu1 %2166  ;;  %7758 = vmatprep.subr.bf16.mxu0 %v10101_v5  ;;  %7870 = vmatprep.subr.bf16.mxu1 %v10074_v47 }
 0x42c   :  { %v2169_v8 = vsel %vm301_vm15, %v2165_v44, %v2167_v30  ;;  %4917 = vmatprep.mubr.f32.mxu1 %v12237_v32  ;;  %v12434_v44 = vld [vmem:[#allocation7_spill] sm:$0xff]  ;;  %v12435_v30 = vmax.f32 %v11073_v12, 0.0  ;;  %v12440_v12 = vld [vmem:[#allocation10_spill] sm:$0xff] }
 0x42d   :  { %v2173_v62 = vmax.f32 %v12425_v34, %v2169_v8  ;;  %v12439_v34 = vld [vmem:[#allocation9_spill] sm:$0xff] }
 0x42e   :  { %7760 = vmatpush1.bf16.msra.mxu0 %v10123_v53  ;;  %7872 = vmatpush1.bf16.msra.mxu1 %v10097_v63  ;;  %v2435_v41 = vpop.permute.xlu0 %2434 }
 0x42f   :  { %v11173_v19 = vmax.f32 %v2155_v24, %v2173_v62  ;;  %v2437_v60 = vpop.permute.xlu1 %2436  ;;  %7762 = vmatprep.subr.bf16.mxu0 %v10127_v59  ;;  %7874 = vmatprep.subr.bf16.mxu1 %v10101_v5  ;;  %v12441_v62 = vld [vmem:[#allocation11_spill] sm:$0xff] }
 0x430   :  { %v2442_v52 = vsel %vm301_vm15, %v2435_v41, %v2437_v60  ;;  %v12442_v41 = vld [vmem:[#allocation12_spill] sm:$0xff]  ;;  %v12444_v60 = vld [vmem:[#allocation14_spill] sm:$0xff] }
 0x431   :  { %6514 = vmatmul.mubr.msk.f32.gmra.mrb[62].mxu1 %vm328_vm2, %v11173_v19  ;;  %v2446_v27 = vmax.f32 %v2329_v18, %v2442_v52  ;;  %v12427_v18 = vld [vmem:[#allocation65_spill] sm:$0xff]  ;;  %v12445_v52 = vld [vmem:[#allocation15_spill] sm:$0xff] }
 0x432   :  { %7764 = vmatpush1.bf16.msra.mxu0 %v10149_v17  ;;  %7876 = vmatpush1.bf16.msra.mxu1 %v10123_v53  ;;  %v2453_v48 = vpop.permute.xlu0 %2452 }
 0x433   :  { %v2455_v39 = vpop.permute.xlu1 %2454  ;;  %7766 = vmatprep.subr.bf16.mxu0 %v10154_v26  ;;  %7878 = vmatprep.subr.bf16.mxu1 %v10127_v59 }
 0x434   :  { %v2460_v1 = vsel %vm301_vm15, %v2453_v48, %v2455_v39  ;;  %v12447_v48 = vld [vmem:[#allocation17_spill] sm:$0xff]  ;;  %v12448_v39 = vld [vmem:[#allocation18_spill] sm:$0xff] }
 0x435   :  { %v2464_v49 = vmax.f32 %v12426_v28, %v2460_v1  ;;  %v12449_v1 = vld [vmem:[#allocation19_spill] sm:$0xff]  ;;  %v12451_v28 = vld [vmem:[#allocation21_spill] sm:$0xff] }
 0x436   :  { %7768 = vmatpush1.bf16.msra.mxu0 %v10171_v22  ;;  %7880 = vmatpush1.bf16.msra.mxu1 %v10149_v17  ;;  %v2439_v55 = vpop.permute.xlu0 %2438 }
 0x437   :  { %v11191_v2 = vmax.f32 %v2446_v27, %v2464_v49  ;;  %7770 = vmatprep.subr.bf16.mxu0 %v10175_v11  ;;  %7882 = vmatprep.subr.bf16.mxu1 %v10154_v26  ;;  %v2441_v50 = vpop.permute.xlu1 %2440  ;;  %v12450_v27 = vld [vmem:[#allocation20_spill] sm:$0xff] }
 0x438   :  { %v2443_v40 = vsel %vm301_vm15, %v2439_v55, %v2441_v50  ;;  %v12452_v55 = vld [vmem:[#allocation33_spill] sm:$0xff] }
 0x439   :  { %6521 = vmatprep.mubr.msk.f32.mxu1 %vm328_vm2, %v11191_v2  ;;  %v2447_v8 = vmax.f32 %v12435_v30, %v2443_v40  ;;  %v12454_v40 = vld [vmem:[#allocation78_spill] sm:$0xff] }
 0x43a   :  { %7772 = vmatpush1.bf16.msra.mxu0 %v12344_v51  ;;  %7884 = vmatpush1.bf16.msra.mxu1 %v10171_v22  ;;  %v2457_v37 = vpop.permute.xlu0 %2456 }
 0x43b   :  { %7774 = vmatprep.subr.bf16.mxu0 %v12345_v9  ;;  %7886 = vmatprep.subr.bf16.mxu1 %v10175_v11  ;;  %v2459_v13 = vpop.permute.xlu1 %2458 }
 0x43c   :  { %v2461_v20 = vsel %vm301_vm15, %v2457_v37, %v2459_v13  ;;  %v12453_v13 = vld [vmem:[#allocation77_spill] sm:$0xff] }
 0x43d   :  { %v2465_v16 = vmax.f32 %v12432_v36, %v2461_v20 }
 0x43e   :  { %7776 = vmatpush1.bf16.msra.mxu0 %v12346_v43  ;;  %7888 = vmatpush1.bf16.msra.mxu1 %v12344_v51 }
 0x43f   :  { %7778 = vmatprep.subr.bf16.mxu0 %v12347_v15  ;;  %7890 = vmatprep.subr.bf16.mxu1 %v12345_v9  ;;  %v11255_v24 = vmax.f32 %v2447_v8, %v2465_v16  ;;  %v12455_v16 = vld [vmem:[#allocation79_spill] sm:$0xff] }
 0x441   :  { %12437 = vst [vmem:[#allocation41_spill] sm:$0xff] %v11255_v24 }
 0x442   :  { %7780 = vmatpush1.bf16.msra.mxu0 %v10255_v21  ;;  %7892 = vmatpush1.bf16.msra.mxu1 %v12346_v43 }
 0x443   :  { %7782 = vmatprep.subr.bf16.mxu0 %v10262_v3  ;;  %7894 = vmatprep.subr.bf16.mxu1 %v12347_v15 }
 0x446   :  { %7784 = vmatpush1.bf16.msra.mxu0 %v10290_v31  ;;  %7896 = vmatpush1.bf16.msra.mxu1 %v10255_v21 }
 0x447   :  { %7786 = vmatprep.subr.bf16.mxu0 %v10297_v10  ;;  %7898 = vmatprep.subr.bf16.mxu1 %v10262_v3 }
 0x44a   :  { %7788 = vmatpush1.bf16.msra.mxu0 %v10320_v45  ;;  %7900 = vmatpush1.bf16.msra.mxu1 %v10290_v31 }
 0x44b   :  { %7790 = vmatprep.subr.bf16.mxu0 %v10323_v14  ;;  %7902 = vmatprep.subr.bf16.mxu1 %v10297_v10 }
 0x44e   :  { %7792 = vmatpush1.bf16.msra.mxu0 %v10346_v57  ;;  %7904 = vmatpush1.bf16.msra.mxu1 %v10320_v45 }
 0x44f   :  { %7794 = vmatprep.subr.bf16.mxu0 %v10351_v6  ;;  %7906 = vmatprep.subr.bf16.mxu1 %v10323_v14 }
 0x452   :  { %7796 = vmatpush1.bf16.msra.mxu0 %v10372_v54  ;;  %7908 = vmatpush1.bf16.msra.mxu1 %v10346_v57 }
 0x453   :  { %7798 = vmatprep.subr.bf16.mxu0 %v10375_v29  ;;  %7910 = vmatprep.subr.bf16.mxu1 %v10351_v6 }
 0x456   :  { %7800 = vmatpush1.bf16.msra.mxu0 %v10396_v61  ;;  %7912 = vmatpush1.bf16.msra.mxu1 %v10372_v54 }
 0x457   :  { %7802 = vmatprep.subr.bf16.mxu0 %v10401_v38  ;;  %7914 = vmatprep.subr.bf16.mxu1 %v10375_v29 }
 0x45a   :  { %7804 = vmatpush1.bf16.msra.mxu0 %v10431_v25  ;;  %7916 = vmatpush1.bf16.msra.mxu1 %v10396_v61 }
 0x45b   :  { %7806 = vmatprep.subr.bf16.mxu0 %v12427_v18  ;;  %7918 = vmatprep.subr.bf16.mxu1 %v10401_v38 }
 0x45e   :  { %7808 = vmatpush1.bf16.msra.mxu0 %v12428_v7  ;;  %7920 = vmatpush1.bf16.msra.mxu1 %v10431_v25 }
 0x45f   :  { %7810 = vmatprep.subr.bf16.mxu0 %v12429_v56  ;;  %7922 = vmatprep.subr.bf16.mxu1 %v12427_v18 }
 0x462   :  { %7812 = vmatpush1.bf16.msra.mxu0 %v12430_v46  ;;  %7924 = vmatpush1.bf16.msra.mxu1 %v12428_v7 }
 0x463   :  { %7814 = vmatprep.subr.bf16.mxu0 %v12431_v42  ;;  %7926 = vmatprep.subr.bf16.mxu1 %v12429_v56 }
 0x465   :  { %6516 = vmatmul.mubr.msk.f32.vlgmr.msra.gmra.mrb[58].mxu0 %vm328_vm2, %v12433_v23 }
 0x466   :  { %6517 = vmatprep.mubr.msk.f32.mxu0 %vm328_vm2, %v11173_v19  ;;  %7816 = vmatpush1.bf16.msra.mxu0 %v12434_v44 }
 0x467   :  { %7928 = vmatpush1.bf16.msra.mxu1 %v12430_v46  ;;  %7818 = vmatprep.subr.bf16.mxu0 %v12436_v0 }
 0x468   :  { %7930 = vmatprep.subr.bf16.mxu1 %v12431_v42 }
 0x469   :  { %6518 = vmatmul.mubr.msk.f32.gmra.mrb[60].mxu0 %vm328_vm2, %v12438_v35 }
 0x46a   :  { %6522 = vmatmul.mubr.msk.f32.vlgmr.msra.gmra.mrb[64].mxu1 %vm328_vm2, %v11153_v58  ;;  %7820 = vmatpush1.bf16.msra.mxu0 %v12439_v34  ;;  %v12443_v58 = vld [vmem:[#allocation13_spill] sm:$0xff] }
 0x46b   :  { %6523 = vmatprep.mubr.msk.f32.mxu1 %vm328_vm2, %v11255_v24  ;;  %7822 = vmatprep.subr.bf16.mxu0 %v12440_v12 }
 0x46c   :  { %5083 = vmatprep.mubr.f32.mxu0 %v12237_v32  ;;  %7932 = vmatpush1.bf16.msra.mxu1 %v12434_v44 }
 0x46d   :  { %7934 = vmatprep.subr.bf16.mxu1 %v12436_v0 }
 0x46e   :  { %6524 = vmatmul.mubr.msk.f32.gmra.mrb[66].mxu1 %vm328_vm2, %v11173_v19  ;;  %7824 = vmatpush1.bf16.msra.mxu0 %v12441_v62  ;;  %v12446_v19 = vld [vmem:[#allocation16_spill] sm:$0xff] }
 0x46f   :  { %7826 = vmatprep.subr.bf16.mxu0 %v12442_v41  ;;  %5387 = vmatprep.mubr.f32.mxu1 %v12237_v32 }
 0x470   :  { %7936 = vmatpush1.bf16.msra.mxu1 %v12439_v34 }
 0x471   :  { %7938 = vmatprep.subr.bf16.mxu1 %v12440_v12 }
 0x472   :  { %7828 = vmatpush1.bf16.msra.mxu0 %v12443_v58 }
 0x473   :  { %7830 = vmatprep.subr.bf16.mxu0 %v12444_v60 }
 0x474   :  { %7940 = vmatpush1.bf16.msra.mxu1 %v12441_v62 }
 0x475   :  { %7942 = vmatprep.subr.bf16.mxu1 %v12442_v41 }
 0x476   :  { %7832 = vmatpush1.bf16.msra.mxu0 %v12445_v52 }
 0x477   :  { %7834 = vmatprep.subr.bf16.mxu0 %v12446_v19 }
 0x478   :  { %7944 = vmatpush1.bf16.msra.mxu1 %v12443_v58  ;;  %v12459_v58 = vld [vmem:[#allocation63_spill] sm:$0xff] }
 0x479   :  { %7946 = vmatprep.subr.bf16.mxu1 %v12444_v60 }
 0x47a   :  { %7836 = vmatpush1.bf16.msra.mxu0 %v12447_v48 }
 0x47b   :  { %7838 = vmatprep.subr.bf16.mxu0 %v12448_v39 }
 0x47c   :  { %7948 = vmatpush1.bf16.msra.mxu1 %v12445_v52  ;;  %v12458_v52 = vld [vmem:[#allocation61_spill] sm:$0xff] }
 0x47d   :  { %7950 = vmatprep.subr.bf16.mxu1 %v12446_v19 }
 0x47e   :  { %7840 = vmatpush1.bf16.msra.mxu0 %v12449_v1 }
 0x47f   :  { %7842 = vmatprep.subr.bf16.mxu0 %v12450_v27 }
 0x480   :  { %7952 = vmatpush1.bf16.msra.mxu1 %v12447_v48 }
 0x481   :  { %7954 = vmatprep.subr.bf16.mxu1 %v12448_v39  ;;  %v6449_v39 = vld [vmem:[%s12021_s7 + $0xc8] sm:$0xff] }
 0x482   :  { %7844 = vmatpush1.bf16.msra.mxu0 %v12451_v28 }
 0x484   :  { %7956 = vmatpush1.bf16.msra.mxu1 %v12449_v1  ;;  %v6448_v1 = vld [vmem:[%s12021_s7 + $0xc0] sm:$0xff] }
 0x485   :  { %6519 = vmatmul.mubr.msk.f32.vlgmr.msra.gmra.mrb[58].mxu0 %vm328_vm2, %v11191_v2  ;;  %7958 = vmatprep.subr.bf16.mxu1 %v12450_v27 }
 0x486   :  { %5089 = vmatprep.mubr.f32.mxu0 %v12237_v32 }
 0x488   :  { %7960 = vmatpush1.bf16.msra.mxu1 %v12451_v28 }
 0x489   :  { %6520 = vmatmul.mubr.msk.f32.gmra.mrb[60].mxu0 %vm328_vm2, %v11255_v24  ;;  %8078 = vmatprep.subr.bf16.mxu1 %v9645_v33 }
 0x4fc   :  { %v4913_v49 = vpop.f32.mrb[60].mxu1 }
 0x4fd   :  { %v4924_v50 = vmul.f32 %v4913_v49, %v12452_v55  ;;  %v4915_v37 = vpop.f32.mrb[61].mxu1  ;;  %v6444_v49 = vld [vmem:[%s12021_s7 + $0xa0] sm:$0xff] }
 0x4fe   :  { %v4925_v20 = vmul.f32 %v4915_v37, %v12453_v13  ;;  %v6446_v37 = vld [vmem:[%s12021_s7 + $0xb0] sm:$0xff] }
 0x4ff   :  { %v11304_v36 = vadd.f32 %v4924_v50, %v12454_v40  ;;  %v6445_v50 = vld [vmem:[%s12021_s7 + $0xa8] sm:$0xff] }
 0x500   :  { %v4929_v23 = vadd.f32 %v4925_v20, %v12455_v16  ;;  %v7845_v28 = vpack.c.bf16 %v6445_v50, %v6444_v49  ;;  %v7853_v50 = vpack.c.bf16 %v6449_v39, %v6448_v1  ;;  %v6452_v39 = vld [vmem:[%s12021_s7 + $0xe0] sm:$0xff]  ;;  %v6453_v1 = vld [vmem:[%s12021_s7 + $0xe8] sm:$0xff] }
 0x501   :  { %v12161_v30 = vmax.f32 %v11304_v36, 0.0 }
 0x502   :  { %v4933_v8 = vmax.f32 %v4929_v23, 0.0  ;;  %7846 = vmatprep.subr.bf16.mxu0 %v7845_v28 }
 0x503   :  { %5112 = vrot.lane.b32.xlu0 %v12161_v30, %s8403_s15  ;;  %7848 = vmatpush3.bf16.msra.mxu0 %v7845_v28  ;;  %v6451_v28 = vld [vmem:[%s12021_s7 + $0xd8] sm:$0xff] }
 0x504   :  { %5114 = vrot.lane.b32.xlu1 %v4933_v8, %s8403_s15  ;;  %v4919_v35 = vpop.f32.mrb[62].mxu1  ;;  %v6447_v8 = vld [vmem:[%s12021_s7 + $0xb8] sm:$0xff] }
 0x505   :  { %v4926_v20 = vmul.f32 %v4919_v35, %v12452_v55  ;;  %v4921_v23 = vpop.f32.mrb[63].mxu1  ;;  %v7849_v27 = vpack.c.bf16 %v6447_v8, %v6446_v37 }
 0x506   :  { %v4927_v30 = vmul.f32 %v4921_v23, %v12453_v13  ;;  %v2600_v23 = vld [vmem:[%s12018_s2] sm:$0x3] }
 0x507   :  { %v11333_v48 = vadd.f32 %v4926_v20, %v12454_v40  ;;  %7850 = vmatprep.subr.bf16.mxu0 %v7849_v27  ;;  %v6450_v20 = vld [vmem:[%s12021_s7 + $0xd0] sm:$0xff] }
 0x508   :  { %v4931_v35 = vadd.f32 %v4927_v30, %v12455_v16  ;;  %7852 = vmatpush3.bf16.msra.mxu0 %v7849_v27  ;;  %v7857_v30 = vpack.c.bf16 %v6451_v28, %v6450_v20  ;;  %v7861_v27 = vpack.c.bf16 %v6453_v1, %v6452_v39  ;;  %v12456_v20 = vld [vmem:[#allocation3_spill] sm:$0xff]  ;;  %v12457_v1 = vld [vmem:[#allocation4_spill] sm:$0xff] }
 0x509   :  { %v12166_v49 = vmax.f32 %v11333_v48, 0.0  ;;  %7854 = vmatprep.subr.bf16.mxu0 %v7853_v50  ;;  %v2605_v28 = vrot.slane %v2600_v23, %v12456_v20  ;;  %v2616_v39 = vld [vmem:[%s12019_s3] sm:$0x3] }
 0x50a   :  { %v4935_v37 = vmax.f32 %v4931_v35, 0.0  ;;  %v2621_v12 = vrot.slane %v2616_v39, %v12456_v20 }
 0x50b   :  { %5116 = vrot.lane.b32.xlu0 %v12166_v49, %s8403_s15  ;;  %v2609_v49 = vrot.slane %v2600_v23, %v12457_v1 }
 0x50c   :  { %5118 = vrot.lane.b32.xlu1 %v4935_v37, %s8403_s15  ;;  %7856 = vmatpush3.bf16.msra.mxu0 %v7853_v50 }
 0x50d   :  { %7858 = vmatprep.subr.bf16.mxu0 %v7857_v30  ;;  %v2613_v41 = vmul.f32 %v2609_v49, %v12459_v58 }
 0x510   :  { %7860 = vmatpush3.bf16.msra.mxu0 %v7857_v30 }
 0x511   :  { %7862 = vmatprep.subr.bf16.mxu0 %v7861_v27 }
 0x514   :  { %7864 = vmatpush3.bf16.msra.mxu0 %v7861_v27  ;;  %v2612_v27 = vmul.f32 %v2605_v28, %v12458_v52  ;;  %v2625_v52 = vrot.slane %v2616_v39, %v12457_v1 }
 0x515   :  { %7962 = vmatprep.subr.bf16.mxu0 %v9645_v33 }
 0x558   :  { %v5085_v8 = vpop.f32.mrb[58].mxu0 }
 0x559   :  { %v5096_v35 = vmul.f32 %v5085_v8, %v12452_v55  ;;  %v5087_v50 = vpop.f32.mrb[59].mxu0 }
 0x55a   :  { %v5097_v37 = vmul.f32 %v5087_v50, %v12453_v13 }
 0x55b   :  { %v11361_v30 = vadd.f32 %v5096_v35, %v12454_v40 }
 0x55c   :  { %v5101_v19 = vadd.f32 %v5097_v37, %v12455_v16  ;;  %v5091_v8 = vpop.f32.mrb[60].mxu0  ;;  %v12460_v37 = vld [vmem:[#allocation43_spill] sm:$0xff] }
 0x55d   :  { %v12178_v50 = vmax.f32 %v11361_v30, 0.0  ;;  %v5098_v33 = vmul.f32 %v5091_v8, %v12452_v55  ;;  %v5093_v60 = vpop.f32.mrb[61].mxu0  ;;  %v2728_v58 = vmul.f32 %v12460_v37, %v2605_v28  ;;  %v12461_v8 = vld [vmem:[#allocation44_spill] sm:$0xff] }
 0x55e   :  { %v5105_v35 = vmax.f32 %v5101_v19, 0.0  ;;  %v5099_v62 = vmul.f32 %v5093_v60, %v12453_v13  ;;  %v11384_v19 = vadd.f32 %v2621_v12, %v2612_v27  ;;  %v2729_v13 = vmul.f32 %v12461_v8, %v2609_v49 }
 0x55f   :  { %v11375_v34 = vadd.f32 %v5098_v33, %v12454_v40  ;;  %5130 = vrot.lane.b32.xlu0 %v12178_v50, %s8403_s15  ;;  %v2629_v33 = vadd.f32 %v2625_v52, %v2613_v41  ;;  %v11392_v39 = vadd.f32 %v2728_v58, %v2621_v12  ;;  %v2910_v41 = vld [vmem:[%s12018_s2] sm:$0x3] }
 0x560   :  { %v5103_v23 = vadd.f32 %v5099_v62, %v12455_v16  ;;  %5132 = vrot.lane.b32.xlu1 %v5105_v35, %s8403_s15  ;;  %v12182_v62 = vmax.f32 %v11384_v19, 0.0  ;;  %v12462_v35 = vld [vmem:[#allocation71_spill] sm:$0xff]  ;;  %v2733_v27 = vadd.f32 %v2729_v13, %v2625_v52  ;;  %v12463_v16 = vld [vmem:[#allocation72_spill] sm:$0xff] }
 0x561   :  { %v12181_v60 = vmax.f32 %v11375_v34, 0.0  ;;  %v2614_v37 = vmul.f32 %v2605_v28, %v12462_v35  ;;  %v2633_v50 = vmax.f32 %v2629_v33, 0.0  ;;  %v2615_v55 = vmul.f32 %v2609_v49, %v12463_v16  ;;  %v12465_v33 = vld [vmem:[#allocation46_spill] sm:$0xff] }
 0x562   :  { %v5107_v40 = vmax.f32 %v5103_v23, 0.0  ;;  %v12464_v23 = vld [vmem:[#allocation45_spill] sm:$0xff]  ;;  %v2737_v13 = vmax.f32 %v2733_v27, 0.0  ;;  %v2731_v35 = vmul.f32 %v12465_v33, %v2609_v49  ;;  %v12466_v49 = vld [vmem:[#allocation75_spill] sm:$0xff]  ;;  %v12467_v33 = vld [vmem:[#allocation76_spill] sm:$0xff] }
 0x563   :  { %5134 = vrot.lane.b32.xlu0 %v12181_v60, %s8403_s15  ;;  %v2730_v58 = vmul.f32 %v12464_v23, %v2605_v28  ;;  %v11406_v8 = vadd.f32 %v2621_v12, %v2614_v37  ;;  %v2631_v16 = vadd.f32 %v2625_v52, %v2615_v55  ;;  %v2915_v60 = vrot.slane %v2910_v41, %v12456_v20 }
 0x564   :  { %5136 = vrot.lane.b32.xlu1 %v5107_v40, %s8403_s15  ;;  %v12184_v40 = vmax.f32 %v11392_v39, 0.0  ;;  %v2735_v27 = vadd.f32 %v2731_v35, %v2625_v52  ;;  %v12469_v35 = vld [vmem:[#allocation56_spill] sm:$0xff] }
 0x565   :  { %v11418_v28 = vadd.f32 %v2730_v58, %v2621_v12  ;;  %v12186_v37 = vmax.f32 %v11406_v8, 0.0  ;;  %v2922_v55 = vmul.f32 %v2915_v60, %v12466_v49  ;;  %v2635_v23 = vmax.f32 %v2631_v16, 0.0  ;;  %v12468_v58 = vld [vmem:[#allocation55_spill] sm:$0xff] }
 0x566   :  { %v2739_v52 = vmax.f32 %v2735_v27, 0.0  ;;  %v12472_v27 = vld [vmem:[#allocation57_spill] sm:$0xff] }
 0x567   :  { %2744 = vrot.lane.b32.xlu0 %v12182_v62, %s8410_s23  ;;  %v2919_v62 = vrot.slane %v2910_v41, %v12457_v1  ;;  %v12189_v12 = vmax.f32 %v11418_v28, 0.0 }
 0x568   :  { %2746 = vrot.lane.b32.xlu1 %v2633_v50, %s8410_s23  ;;  %v2926_v50 = vld [vmem:[%s12019_s3] sm:$0x3] }
 0x569   :  { %v2923_v24 = vmul.f32 %v2919_v62, %v12467_v33  ;;  %v2935_v41 = vrot.slane %v2926_v50, %v12457_v1  ;;  %v3032_v16 = vmul.f32 %v12469_v35, %v2919_v62 }
 0x56b   :  { %2762 = vrot.lane.b32.xlu0 %v12184_v40, %s8410_s23  ;;  %v2931_v40 = vrot.slane %v2926_v50, %v12456_v20  ;;  %v2939_v49 = vadd.f32 %v2935_v41, %v2923_v24  ;;  %v3036_v1 = vadd.f32 %v3032_v16, %v2935_v41 }
 0x56c   :  { %2764 = vrot.lane.b32.xlu1 %v2737_v13, %s8410_s23  ;;  %v3031_v13 = vmul.f32 %v12468_v58, %v2915_v60 }
 0x56d   :  { %v11431_v0 = vadd.f32 %v2931_v40, %v2922_v55  ;;  %v2943_v58 = vmax.f32 %v2939_v49, 0.0  ;;  %v12471_v55 = vld [vmem:[#allocation51_spill] sm:$0xff]  ;;  %v3040_v35 = vmax.f32 %v3036_v1, 0.0 }
 0x56e   :  { %v11438_v33 = vadd.f32 %v3031_v13, %v2931_v40  ;;  %v2925_v20 = vmul.f32 %v2919_v62, %v12471_v55 }
 0x56f   :  { %2748 = vrot.lane.b32.xlu0 %v12186_v37, %s8410_s23  ;;  %v12194_v50 = vmax.f32 %v11431_v0, 0.0 }
 0x570   :  { %2750 = vrot.lane.b32.xlu1 %v2635_v23, %s8410_s23  ;;  %v12470_v23 = vld [vmem:[#allocation49_spill] sm:$0xff]  ;;  %v12193_v24 = vmax.f32 %v11438_v33, 0.0 }
 0x571   :  { %v2924_v37 = vmul.f32 %v2915_v60, %v12470_v23  ;;  %v2941_v23 = vadd.f32 %v2935_v41, %v2925_v20 }
 0x573   :  { %2766 = vrot.lane.b32.xlu0 %v12189_v12, %s8410_s23  ;;  %v11449_v13 = vadd.f32 %v2931_v40, %v2924_v37  ;;  %v12474_v12 = vld [vmem:[#allocation58_spill] sm:$0xff]  ;;  %v2945_v55 = vmax.f32 %v2941_v23, 0.0  ;;  %v12476_v23 = vmax.f32 %v11361_v30, 0.0 }
 0x574   :  { %2768 = vrot.lane.b32.xlu1 %v2739_v52, %s8410_s23  ;;  %v3033_v52 = vmul.f32 %v12472_v27, %v2915_v60  ;;  %v3034_v44 = vmul.f32 %v12474_v12, %v2919_v62 }
 0x575   :  { %12473 = vst [vmem:[#allocation42_spill] sm:$0xff] %v11449_v13  ;;  %v12191_v49 = vmax.f32 %v11449_v13, 0.0  ;;  %v5113_v60 = vpop.permute.xlu0 %5112 }
 0x576   :  { %v11456_v16 = vadd.f32 %v3033_v52, %v2931_v40  ;;  %v5115_v62 = vpop.permute.xlu1 %5114  ;;  %v12475_v52 = vmax.f32 %v11304_v36, 0.0 }
 0x577   :  { %3047 = vrot.lane.b32.xlu0 %v12194_v50, %s8410_s23  ;;  %v5120_v37 = vsel %vm1908_vm11, %v5113_v60, %v5115_v62  ;;  %v12477_v50 = vmax.f32 %v11333_v48, 0.0  ;;  %v12478_v62 = vmax.f32 %v11375_v34, 0.0  ;;  %v12479_v34 = vmax.f32 %v11384_v19, 0.0 }
 0x578   :  { %3049 = vrot.lane.b32.xlu1 %v2943_v58, %s8410_s23  ;;  %v3038_v58 = vadd.f32 %v3034_v44, %v2935_v41  ;;  %v12192_v20 = vmax.f32 %v11456_v16, 0.0 }
 0x57a   :  { %v3042_v1 = vmax.f32 %v3038_v58, 0.0 }
 0x57b   :  { %3065 = vrot.lane.b32.xlu0 %v12193_v24, %s8410_s23 }
 0x57c   :  { %3067 = vrot.lane.b32.xlu1 %v3040_v35, %s8410_s23  ;;  %v5124_v35 = vmax.f32 %v12475_v52, %v5120_v37 }
 0x57d   :  { %v5117_v40 = vpop.permute.xlu0 %5116 }
 0x57e   :  { %v5119_v44 = vpop.permute.xlu1 %5118 }
 0x57f   :  { %3051 = vrot.lane.b32.xlu0 %v12191_v49, %s8410_s23 }
 0x580   :  { %3053 = vrot.lane.b32.xlu1 %v2945_v55, %s8410_s23  ;;  %v5121_v55 = vsel %vm1908_vm11, %v5117_v40, %v5119_v44 }
 0x581   :  { %v5125_v60 = vmax.f32 %v12477_v50, %v5121_v55 }
 0x583   :  { %3069 = vrot.lane.b32.xlu0 %v12192_v20, %s8410_s23 }
 0x584   :  { %3071 = vrot.lane.b32.xlu1 %v3042_v1, %s8410_s23 }
 0x5d1   :  { %v5131_v41 = vpop.permute.xlu0 %5130 }
 0x5d2   :  { %v5133_v12 = vpop.permute.xlu1 %5132 }
 0x5d3   :  { %v5138_v27 = vsel %vm1908_vm11, %v5131_v41, %v5133_v12 }
 0x5d4   :  { %v5142_v58 = vmax.f32 %v12476_v23, %v5138_v27 }
 0x5d5   :  { %v5135_v49 = vpop.permute.xlu0 %5134 }
 0x5d6   :  { %v5144_v1 = vmax.f32 %v5124_v35, %v5142_v58  ;;  %v5137_v20 = vpop.permute.xlu1 %5136  ;;  %v12481_v35 = vmax.f32 %v11406_v8, 0.0  ;;  %v12482_v58 = vmax.f32 %v11418_v28, 0.0 }
 0x5d7   :  { %v5139_v24 = vsel %vm1908_vm11, %v5135_v49, %v5137_v20 }
 0x5d8   :  { %v5143_v13 = vmax.f32 %v12478_v62, %v5139_v24  ;;  %6681 = vmatprep.mubr.msk.f32.mxu0 %vm3123_vm3, %v5144_v1  ;;  %v12480_v24 = vmax.f32 %v11392_v39, 0.0 }
 0x5d9   :  { %v2745_v36 = vpop.permute.xlu0 %2744 }
 0x5da   :  { %v5145_v37 = vmax.f32 %v5125_v60, %v5143_v13  ;;  %v2747_v41 = vpop.permute.xlu1 %2746 }
 0x5db   :  { %v2752_v30 = vsel %vm301_vm15, %v2745_v36, %v2747_v41  ;;  %v12483_v41 = vmax.f32 %v11431_v0, 0.0 }
 0x5dc   :  { %6682 = vmatmul.mubr.msk.f32.vlgmr.msra.gmra.mrb[56].mxu0 %vm3123_vm3, %v5145_v37  ;;  %v2756_v50 = vmax.f32 %v12479_v34, %v2752_v30 }
 0x5dd   :  { %7964 = vmatpush1.bf16.msra.mxu0 %v10070_v4  ;;  %v2763_v40 = vpop.permute.xlu0 %2762 }
 0x5de   :  { %v2765_v44 = vpop.permute.xlu1 %2764  ;;  %7966 = vmatprep.subr.bf16.mxu0 %v10074_v47 }
 0x5df   :  { %v2770_v48 = vsel %vm301_vm15, %v2763_v40, %v2765_v44  ;;  %v12484_v40 = vmax.f32 %v11438_v33, 0.0 }
 0x5e0   :  { %v2774_v49 = vmax.f32 %v12480_v24, %v2770_v48 }
 0x5e1   :  { %7968 = vmatpush1.bf16.msra.mxu0 %v10097_v63  ;;  %v2749_v13 = vpop.permute.xlu0 %2748 }
 0x5e2   :  { %v11491_v20 = vmax.f32 %v2756_v50, %v2774_v49  ;;  %v2751_v12 = vpop.permute.xlu1 %2750  ;;  %7970 = vmatprep.subr.bf16.mxu0 %v10101_v5  ;;  %v12485_v49 = vld [vmem:[#allocation7_spill] sm:$0xff] }
 0x5e3   :  { %v2753_v19 = vsel %vm301_vm15, %v2749_v13, %v2751_v12  ;;  %v12486_v13 = vld [vmem:[#allocation8_spill] sm:$0xff] }
 0x5e4   :  { %6525 = vmatmul.mubr.msk.f32.vlgmr.msra.gmra.mrb[64].mxu1 %vm328_vm2, %v11491_v20  ;;  %6527 = vmatprep.mubr.msk.f32.mxu0 %vm328_vm2, %v11491_v20  ;;  %v2757_v23 = vmax.f32 %v12481_v35, %v2753_v19  ;;  %v12487_v19 = vmax.f32 %v11456_v16, 0.0  ;;  %v12494_v16 = vld [vmem:[#allocation11_spill] sm:$0xff] }
 0x5e5   :  { %7972 = vmatpush1.bf16.msra.mxu0 %v10123_v53  ;;  %8080 = vmatpush1.bf16.msra.mxu1 %v10070_v4  ;;  %v2767_v39 = vpop.permute.xlu0 %2766 }
 0x5e6   :  { %v2769_v27 = vpop.permute.xlu1 %2768  ;;  %7974 = vmatprep.subr.bf16.mxu0 %v10127_v59  ;;  %8082 = vmatprep.subr.bf16.mxu1 %v10074_v47 }
 0x5e7   :  { %v2771_v52 = vsel %vm301_vm15, %v2767_v39, %v2769_v27  ;;  %5393 = vmatprep.mubr.f32.mxu1 %v12237_v32  ;;  %v12488_v27 = vld [vmem:[#allocation41_spill] sm:$0xff] }
 0x5e8   :  { %v2775_v55 = vmax.f32 %v12482_v58, %v2771_v52  ;;  %v12490_v52 = vld [vmem:[#allocation42_spill] sm:$0xff] }
 0x5e9   :  { %7976 = vmatpush1.bf16.msra.mxu0 %v10149_v17  ;;  %8084 = vmatpush1.bf16.msra.mxu1 %v10097_v63  ;;  %v3048_v1 = vpop.permute.xlu0 %3047  ;;  %v12491_v35 = vmax.f32 %v12490_v52, 0.0  ;;  %v12492_v58 = vld [vmem:[#allocation10_spill] sm:$0xff] }
 0x5ea   :  { %v11511_v60 = vmax.f32 %v2757_v23, %v2775_v55  ;;  %v3050_v62 = vpop.permute.xlu1 %3049  ;;  %7978 = vmatprep.subr.bf16.mxu0 %v10154_v26  ;;  %8086 = vmatprep.subr.bf16.mxu1 %v10101_v5  ;;  %v6457_v52 = vld [vmem:[%s12021_s7 + $0xf8] sm:$0xff] }
 0x5eb   :  { %v3055_v8 = vsel %vm301_vm15, %v3048_v1, %v3050_v62  ;;  %v12495_v1 = vld [vmem:[#allocation12_spill] sm:$0xff]  ;;  %v12496_v62 = vld [vmem:[#allocation13_spill] sm:$0xff] }
 0x5ec   :  { %6526 = vmatmul.mubr.msk.f32.gmra.mrb[66].mxu1 %vm328_vm2, %v11511_v60  ;;  %v3059_v30 = vmax.f32 %v12483_v41, %v3055_v8  ;;  %v12497_v8 = vld [vmem:[#allocation14_spill] sm:$0xff]  ;;  %v12503_v41 = vld [vmem:[#allocation20_spill] sm:$0xff] }
 0x5ed   :  { %7980 = vmatpush1.bf16.msra.mxu0 %v10171_v22  ;;  %8088 = vmatpush1.bf16.msra.mxu1 %v10123_v53  ;;  %v3066_v28 = vpop.permute.xlu0 %3065 }
 0x5ee   :  { %v3068_v36 = vpop.permute.xlu1 %3067  ;;  %7982 = vmatprep.subr.bf16.mxu0 %v10175_v11  ;;  %8090 = vmatprep.subr.bf16.mxu1 %v10127_v59 }
 0x5ef   :  { %v3073_v37 = vsel %vm301_vm15, %v3066_v28, %v3068_v36  ;;  %v12499_v28 = vld [vmem:[#allocation16_spill] sm:$0xff]  ;;  %v12500_v36 = vld [vmem:[#allocation17_spill] sm:$0xff] }
 0x5f0   :  { %v3077_v44 = vmax.f32 %v12484_v40, %v3073_v37  ;;  %v12502_v37 = vld [vmem:[#allocation19_spill] sm:$0xff] }
 0x5f1   :  { %7984 = vmatpush1.bf16.msra.mxu0 %v12344_v51  ;;  %8092 = vmatpush1.bf16.msra.mxu1 %v10149_v17  ;;  %v3052_v0 = vpop.permute.xlu0 %3051 }
 0x5f2   :  { %v11529_v48 = vmax.f32 %v3059_v30, %v3077_v44  ;;  %7986 = vmatprep.subr.bf16.mxu0 %v12345_v9  ;;  %8094 = vmatprep.subr.bf16.mxu1 %v10154_v26  ;;  %v3054_v33 = vpop.permute.xlu1 %3053  ;;  %v12504_v30 = vld [vmem:[#allocation21_spill] sm:$0xff] }
 0x5f3   :  { %v3056_v12 = vsel %vm301_vm15, %v3052_v0, %v3054_v33  ;;  %v12505_v44 = vld [vmem:[#allocation33_spill] sm:$0xff] }
 0x5f4   :  { %6533 = vmatprep.mubr.msk.f32.mxu1 %vm328_vm2, %v11529_v48  ;;  %v3060_v23 = vmax.f32 %v12491_v35, %v3056_v12  ;;  %v6458_v35 = vld [vmem:[%s12021_s7 + $0x100] sm:$0xff] }
 0x5f5   :  { %7988 = vmatpush1.bf16.msra.mxu0 %v12346_v43  ;;  %8096 = vmatpush1.bf16.msra.mxu1 %v10171_v22  ;;  %v3070_v34 = vpop.permute.xlu0 %3069 }
 0x5f6   :  { %7990 = vmatprep.subr.bf16.mxu0 %v12347_v15  ;;  %8098 = vmatprep.subr.bf16.mxu1 %v10175_v11  ;;  %v3072_v50 = vpop.permute.xlu1 %3071 }
 0x5f7   :  { %v3074_v24 = vsel %vm301_vm15, %v3070_v34, %v3072_v50  ;;  %v12506_v34 = vld [vmem:[#allocation77_spill] sm:$0xff] }
 0x5f8   :  { %v3078_v39 = vmax.f32 %v12487_v19, %v3074_v24  ;;  %v12507_v24 = vld [vmem:[#allocation78_spill] sm:$0xff]  ;;  %v12508_v19 = vld [vmem:[#allocation79_spill] sm:$0xff] }
 0x5f9   :  { %7992 = vmatpush1.bf16.msra.mxu0 %v10255_v21  ;;  %8100 = vmatpush1.bf16.msra.mxu1 %v12344_v51 }
 0x5fa   :  { %7994 = vmatprep.subr.bf16.mxu0 %v10262_v3  ;;  %8102 = vmatprep.subr.bf16.mxu1 %v12345_v9  ;;  %v11596_v55 = vmax.f32 %v3060_v23, %v3078_v39 }
 0x5fc   :  { %12493 = vst [vmem:[#allocation27_spill] sm:$0xff] %v11596_v55 }
 0x5fd   :  { %7996 = vmatpush1.bf16.msra.mxu0 %v10290_v31  ;;  %8104 = vmatpush1.bf16.msra.mxu1 %v12346_v43 }
 0x5fe   :  { %7998 = vmatprep.subr.bf16.mxu0 %v10297_v10  ;;  %8106 = vmatprep.subr.bf16.mxu1 %v12347_v15 }
 0x601   :  { %8000 = vmatpush1.bf16.msra.mxu0 %v10320_v45  ;;  %8108 = vmatpush1.bf16.msra.mxu1 %v10255_v21 }
 0x602   :  { %8002 = vmatprep.subr.bf16.mxu0 %v10323_v14  ;;  %8110 = vmatprep.subr.bf16.mxu1 %v10262_v3 }
 0x605   :  { %8004 = vmatpush1.bf16.msra.mxu0 %v10346_v57  ;;  %8112 = vmatpush1.bf16.msra.mxu1 %v10290_v31 }
 0x606   :  { %8006 = vmatprep.subr.bf16.mxu0 %v10351_v6  ;;  %8114 = vmatprep.subr.bf16.mxu1 %v10297_v10 }
 0x609   :  { %8008 = vmatpush1.bf16.msra.mxu0 %v10372_v54  ;;  %8116 = vmatpush1.bf16.msra.mxu1 %v10320_v45 }
 0x60a   :  { %8010 = vmatprep.subr.bf16.mxu0 %v10375_v29  ;;  %8118 = vmatprep.subr.bf16.mxu1 %v10323_v14 }
 0x60d   :  { %8012 = vmatpush1.bf16.msra.mxu0 %v10396_v61  ;;  %8120 = vmatpush1.bf16.msra.mxu1 %v10346_v57 }
 0x60e   :  { %8014 = vmatprep.subr.bf16.mxu0 %v10401_v38  ;;  %8122 = vmatprep.subr.bf16.mxu1 %v10351_v6 }
 0x611   :  { %8016 = vmatpush1.bf16.msra.mxu0 %v10431_v25  ;;  %8124 = vmatpush1.bf16.msra.mxu1 %v10372_v54 }
 0x612   :  { %8018 = vmatprep.subr.bf16.mxu0 %v12427_v18  ;;  %8126 = vmatprep.subr.bf16.mxu1 %v10375_v29 }
 0x615   :  { %8020 = vmatpush1.bf16.msra.mxu0 %v12428_v7  ;;  %8128 = vmatpush1.bf16.msra.mxu1 %v10396_v61 }
 0x616   :  { %8022 = vmatprep.subr.bf16.mxu0 %v12429_v56  ;;  %8130 = vmatprep.subr.bf16.mxu1 %v10401_v38 }
 0x619   :  { %8024 = vmatpush1.bf16.msra.mxu0 %v12430_v46  ;;  %8132 = vmatpush1.bf16.msra.mxu1 %v10431_v25 }
 0x61a   :  { %8026 = vmatprep.subr.bf16.mxu0 %v12431_v42  ;;  %8134 = vmatprep.subr.bf16.mxu1 %v12427_v18 }
 0x61c   :  { %6528 = vmatmul.mubr.msk.f32.vlgmr.msra.gmra.mrb[62].mxu0 %vm328_vm2, %v11191_v2  ;;  %v12489_v2 = vld [vmem:[#allocation9_spill] sm:$0xff] }
 0x61d   :  { %6529 = vmatprep.mubr.msk.f32.mxu0 %vm328_vm2, %v11511_v60  ;;  %8028 = vmatpush1.bf16.msra.mxu0 %v12485_v49 }
 0x61e   :  { %8136 = vmatpush1.bf16.msra.mxu1 %v12428_v7  ;;  %8030 = vmatprep.subr.bf16.mxu0 %v12486_v13 }
 0x61f   :  { %8138 = vmatprep.subr.bf16.mxu1 %v12429_v56 }
 0x620   :  { %6530 = vmatmul.mubr.msk.f32.gmra.mrb[64].mxu0 %vm328_vm2, %v12488_v27  ;;  %v6456_v27 = vld [vmem:[%s12021_s7 + $0xf0] sm:$0xff] }
 0x621   :  { %8032 = vmatpush1.bf16.msra.mxu0 %v12489_v2  ;;  %5559 = vmatprep.mubr.f32.mxu0 %v12237_v32 }
 0x622   :  { %8140 = vmatpush1.bf16.msra.mxu1 %v12430_v46  ;;  %8034 = vmatprep.subr.bf16.mxu0 %v12492_v58 }
 0x623   :  { %8142 = vmatprep.subr.bf16.mxu1 %v12431_v42 }
 0x625   :  { %6534 = vmatmul.mubr.msk.f32.vlgmr.msra.gmra.mrb[68].mxu1 %vm328_vm2, %v11491_v20  ;;  %8036 = vmatpush1.bf16.msra.mxu0 %v12494_v16  ;;  %v12498_v20 = vld [vmem:[#allocation15_spill] sm:$0xff] }
 0x626   :  { %6535 = vmatprep.mubr.msk.f32.mxu1 %vm328_vm2, %v11596_v55  ;;  %8038 = vmatprep.subr.bf16.mxu0 %v12495_v1 }
 0x627   :  { %8144 = vmatpush1.bf16.msra.mxu1 %v12485_v49 }
 0x628   :  { %8146 = vmatprep.subr.bf16.mxu1 %v12486_v13 }
 0x629   :  { %6536 = vmatmul.mubr.msk.f32.gmra.mrb[70].mxu1 %vm328_vm2, %v11511_v60  ;;  %8040 = vmatpush1.bf16.msra.mxu0 %v12496_v62  ;;  %v12501_v60 = vld [vmem:[#allocation18_spill] sm:$0xff] }
 0x62a   :  { %8042 = vmatprep.subr.bf16.mxu0 %v12497_v8  ;;  %5863 = vmatprep.mubr.f32.mxu1 %v12237_v32 }
 0x62b   :  { %8148 = vmatpush1.bf16.msra.mxu1 %v12489_v2 }
 0x62c   :  { %8150 = vmatprep.subr.bf16.mxu1 %v12492_v58 }
 0x62d   :  { %8044 = vmatpush1.bf16.msra.mxu0 %v12498_v20 }
 0x62e   :  { %8046 = vmatprep.subr.bf16.mxu0 %v12499_v28 }
 0x62f   :  { %8152 = vmatpush1.bf16.msra.mxu1 %v12494_v16 }
 0x630   :  { %8154 = vmatprep.subr.bf16.mxu1 %v12495_v1 }
 0x631   :  { %8048 = vmatpush1.bf16.msra.mxu0 %v12500_v36 }
 0x632   :  { %8050 = vmatprep.subr.bf16.mxu0 %v12501_v60 }
 0x633   :  { %8156 = vmatpush1.bf16.msra.mxu1 %v12496_v62  ;;  %v12513_v62 = vld [vmem:[#allocation32_spill] sm:$0xff] }
 0x634   :  { %8158 = vmatprep.subr.bf16.mxu1 %v12497_v8 }
 0x635   :  { %8052 = vmatpush1.bf16.msra.mxu0 %v12502_v37 }
 0x636   :  { %8054 = vmatprep.subr.bf16.mxu0 %v12503_v41 }
 0x637   :  { %8160 = vmatpush1.bf16.msra.mxu1 %v12498_v20  ;;  %v12512_v20 = vld [vmem:[#allocation53_spill] sm:$0xff] }
 0x638   :  { %8162 = vmatprep.subr.bf16.mxu1 %v12499_v28 }
 0x639   :  { %8056 = vmatpush1.bf16.msra.mxu0 %v12504_v30 }
 0x63b   :  { %8164 = vmatpush1.bf16.msra.mxu1 %v12500_v36 }
 0x63c   :  { %6531 = vmatmul.mubr.msk.f32.vlgmr.msra.gmra.mrb[62].mxu0 %vm328_vm2, %v11529_v48  ;;  %8166 = vmatprep.subr.bf16.mxu1 %v12501_v60 }
 0x63d   :  { %5565 = vmatprep.mubr.f32.mxu0 %v12237_v32 }
 0x63f   :  { %8168 = vmatpush1.bf16.msra.mxu1 %v12502_v37 }
 0x640   :  { %6532 = vmatmul.mubr.msk.f32.gmra.mrb[64].mxu0 %vm328_vm2, %v11596_v55  ;;  %8170 = vmatprep.subr.bf16.mxu1 %v12503_v41  ;;  %v6461_v41 = vld [vmem:[%s12021_s7 + $0x118] sm:$0xff] }
 0x643   :  { %8172 = vmatpush1.bf16.msra.mxu1 %v12504_v30  ;;  %v6460_v30 = vld [vmem:[%s12021_s7 + $0x110] sm:$0xff] }
 0x6b7   :  { %v5389_v40 = vpop.f32.mrb[64].mxu1 }
 0x6b8   :  { %v5400_v0 = vmul.f32 %v5389_v40, %v12505_v44  ;;  %v5391_v33 = vpop.f32.mrb[65].mxu1  ;;  %v8057_v40 = vpack.c.bf16 %v6457_v52, %v6456_v27 }
 0x6b9   :  { %v5401_v50 = vmul.f32 %v5391_v33, %v12506_v34 }
 0x6ba   :  { %v11639_v12 = vadd.f32 %v5400_v0, %v12507_v24  ;;  %v6459_v0 = vld [vmem:[%s12021_s7 + $0x108] sm:$0xff]  ;;  %8058 = vmatprep.subr.bf16.mxu0 %v8057_v40 }
 0x6bb   :  { %v5405_v39 = vadd.f32 %v5401_v50, %v12508_v19  ;;  %v8061_v50 = vpack.c.bf16 %v6459_v0, %v6458_v35  ;;  %8060 = vmatpush3.bf16.msra.mxu0 %v8057_v40  ;;  %v8065_v35 = vpack.c.bf16 %v6461_v41, %v6460_v30  ;;  %v6462_v41 = vld [vmem:[%s12021_s7 + $0x120] sm:$0xff]  ;;  %v6463_v30 = vld [vmem:[%s12021_s7 + $0x128] sm:$0xff] }
 0x6bc   :  { %v12200_v23 = vmax.f32 %v11639_v12, 0.0  ;;  %v8069_v40 = vpack.c.bf16 %v6463_v30, %v6462_v41  ;;  %v12510_v41 = vld [vmem:[#allocation3_spill] sm:$0xff] }
 0x6bd   :  { %v5409_v33 = vmax.f32 %v5405_v39, 0.0  ;;  %8062 = vmatprep.subr.bf16.mxu0 %v8061_v50 }
 0x6be   :  { %5588 = vrot.lane.b32.xlu0 %v12200_v23, %s8403_s15 }
 0x6bf   :  { %5590 = vrot.lane.b32.xlu1 %v5409_v33, %s8403_s15  ;;  %v5395_v27 = vpop.f32.mrb[66].mxu1  ;;  %8064 = vmatpush3.bf16.msra.mxu0 %v8061_v50  ;;  %v3213_v50 = vld [vmem:[%s12018_s2] sm:$0x3] }
 0x6c0   :  { %v5402_v39 = vmul.f32 %v5395_v27, %v12505_v44  ;;  %v5397_v52 = vpop.f32.mrb[67].mxu1  ;;  %8066 = vmatprep.subr.bf16.mxu0 %v8065_v35  ;;  %v3218_v30 = vrot.slane %v3213_v50, %v12510_v41 }
 0x6c1   :  { %v5403_v0 = vmul.f32 %v5397_v52, %v12506_v34 }
 0x6c2   :  { %v11668_v37 = vadd.f32 %v5402_v39, %v12507_v24 }
 0x6c3   :  { %v5407_v60 = vadd.f32 %v5403_v0, %v12508_v19  ;;  %8068 = vmatpush3.bf16.msra.mxu0 %v8065_v35  ;;  %v12509_v0 = vld [vmem:[#allocation22_spill] sm:$0xff] }
 0x6c4   :  { %v12202_v23 = vmax.f32 %v11668_v37, 0.0  ;;  %8070 = vmatprep.subr.bf16.mxu0 %v8069_v40 }
 0x6c5   :  { %v5411_v36 = vmax.f32 %v5407_v60, 0.0  ;;  %v6464_v60 = vld [vmem:[%s12021_s7 + $0x130] sm:$0xff] }
 0x6c6   :  { %5592 = vrot.lane.b32.xlu0 %v12202_v23, %s8403_s15 }
 0x6c7   :  { %5594 = vrot.lane.b32.xlu1 %v5411_v36, %s8403_s15  ;;  %8072 = vmatpush3.bf16.msra.mxu0 %v8069_v40  ;;  %v6465_v36 = vld [vmem:[%s12021_s7 + $0x138] sm:$0xff] }
 0x6c8   :  { %v8073_v33 = vpack.c.bf16 %v6465_v36, %v6464_v60  ;;  %v3229_v60 = vld [vmem:[%s12019_s3] sm:$0x3]  ;;  %v12511_v36 = vld [vmem:[#allocation4_spill] sm:$0xff] }
 0x6c9   :  { %v3222_v23 = vrot.slane %v3213_v50, %v12511_v36  ;;  %v3234_v58 = vrot.slane %v3229_v60, %v12510_v41 }
 0x6ca   :  { %8074 = vmatprep.subr.bf16.mxu0 %v8073_v33 }
 0x6cb   :  { %8076 = vmatpush3.bf16.msra.mxu0 %v8073_v33  ;;  %v3225_v33 = vmul.f32 %v3218_v30, %v12512_v20  ;;  %v3226_v1 = vmul.f32 %v3222_v23, %v12513_v62  ;;  %v3238_v20 = vrot.slane %v3229_v60, %v12511_v36 }
 0x6cc   :  { %8174 = vmatprep.subr.bf16.mxu0 %v12509_v0 }
 0x70f   :  { %v5561_v27 = vpop.f32.mrb[62].mxu0 }
 0x710   :  { %v5572_v39 = vmul.f32 %v5561_v27, %v12505_v44  ;;  %v5563_v52 = vpop.f32.mrb[63].mxu0 }
 0x711   :  { %v5573_v35 = vmul.f32 %v5563_v52, %v12506_v34 }
 0x712   :  { %v11696_v40 = vadd.f32 %v5572_v39, %v12507_v24 }
 0x713   :  { %v5577_v28 = vadd.f32 %v5573_v35, %v12508_v19  ;;  %v5567_v27 = vpop.f32.mrb[64].mxu0  ;;  %v12514_v35 = vld [vmem:[#allocation62_spill] sm:$0xff] }
 0x714   :  { %v12213_v52 = vmax.f32 %v11696_v40, 0.0  ;;  %v5574_v0 = vmul.f32 %v5567_v27, %v12505_v44  ;;  %v5569_v8 = vpop.f32.mrb[65].mxu0  ;;  %v3341_v62 = vmul.f32 %v12514_v35, %v3218_v30  ;;  %v12515_v27 = vld [vmem:[#allocation64_spill] sm:$0xff] }
 0x715   :  { %v5581_v39 = vmax.f32 %v5577_v28, 0.0  ;;  %v5575_v16 = vmul.f32 %v5569_v8, %v12506_v34  ;;  %v11719_v28 = vadd.f32 %v3234_v58, %v3225_v33  ;;  %v3342_v34 = vmul.f32 %v12515_v27, %v3222_v23 }
 0x716   :  { %v11710_v2 = vadd.f32 %v5574_v0, %v12507_v24  ;;  %5606 = vrot.lane.b32.xlu0 %v12213_v52, %s8403_s15  ;;  %v3242_v0 = vadd.f32 %v3238_v20, %v3226_v1  ;;  %v11727_v60 = vadd.f32 %v3341_v62, %v3234_v58  ;;  %v3522_v1 = vld [vmem:[%s12018_s2] sm:$0x3] }
 0x717   :  { %v5579_v50 = vadd.f32 %v5575_v16, %v12508_v19  ;;  %5608 = vrot.lane.b32.xlu1 %v5581_v39, %s8403_s15  ;;  %v12217_v16 = vmax.f32 %v11719_v28, 0.0  ;;  %v12516_v39 = vld [vmem:[#allocation40_spill] sm:$0xff]  ;;  %v3346_v33 = vadd.f32 %v3342_v34, %v3238_v20  ;;  %v12517_v19 = vld [vmem:[#allocation26_spill] sm:$0xff] }
 0x718   :  { %v12216_v8 = vmax.f32 %v11710_v2, 0.0  ;;  %v3227_v35 = vmul.f32 %v3218_v30, %v12516_v39  ;;  %v3246_v52 = vmax.f32 %v3242_v0, 0.0  ;;  %v3228_v44 = vmul.f32 %v3222_v23, %v12517_v19  ;;  %v12519_v0 = vld [vmem:[#allocation67_spill] sm:$0xff] }
 0x719   :  { %v5583_v24 = vmax.f32 %v5579_v50, 0.0  ;;  %v12518_v50 = vld [vmem:[#allocation66_spill] sm:$0xff]  ;;  %v3350_v34 = vmax.f32 %v3346_v33, 0.0  ;;  %v3344_v39 = vmul.f32 %v12519_v0, %v3222_v23  ;;  %v12520_v23 = vld [vmem:[#allocation5_spill] sm:$0xff] }
 0x71a   :  { %5610 = vrot.lane.b32.xlu0 %v12216_v8, %s8403_s15  ;;  %v3343_v62 = vmul.f32 %v12518_v50, %v3218_v30  ;;  %v11741_v27 = vadd.f32 %v3234_v58, %v3227_v35  ;;  %v3244_v19 = vadd.f32 %v3238_v20, %v3228_v44  ;;  %v3527_v8 = vrot.slane %v3522_v1, %v12510_v41  ;;  %v12521_v0 = vld [vmem:[#allocation34_spill] sm:$0xff] }
 0x71b   :  { %5612 = vrot.lane.b32.xlu1 %v5583_v24, %s8403_s15  ;;  %v12219_v24 = vmax.f32 %v11727_v60, 0.0  ;;  %v3348_v33 = vadd.f32 %v3344_v39, %v3238_v20  ;;  %v12523_v39 = vld [vmem:[#allocation74_spill] sm:$0xff] }
 0x71c   :  { %v11753_v30 = vadd.f32 %v3343_v62, %v3234_v58  ;;  %v12221_v35 = vmax.f32 %v11741_v27, 0.0  ;;  %v3534_v44 = vmul.f32 %v3527_v8, %v12520_v23  ;;  %v3248_v50 = vmax.f32 %v3244_v19, 0.0  ;;  %v12522_v62 = vld [vmem:[#allocation73_spill] sm:$0xff] }
 0x71d   :  { %v3352_v20 = vmax.f32 %v3348_v33, 0.0  ;;  %v12526_v33 = vld [vmem:[#allocation25_spill] sm:$0xff] }
 0x71e   :  { %3357 = vrot.lane.b32.xlu0 %v12217_v16, %s8410_s23  ;;  %v3531_v16 = vrot.slane %v3522_v1, %v12511_v36  ;;  %v12222_v58 = vmax.f32 %v11753_v30, 0.0 }
 0x71f   :  { %3359 = vrot.lane.b32.xlu1 %v3246_v52, %s8410_s23  ;;  %v3538_v52 = vld [vmem:[%s12019_s3] sm:$0x3] }
 0x720   :  { %v3535_v55 = vmul.f32 %v3531_v16, %v12521_v0  ;;  %v3547_v1 = vrot.slane %v3538_v52, %v12511_v36  ;;  %v3644_v19 = vmul.f32 %v12523_v39, %v3531_v16 }
 0x722   :  { %3375 = vrot.lane.b32.xlu0 %v12219_v24, %s8410_s23  ;;  %v3543_v24 = vrot.slane %v3538_v52, %v12510_v41  ;;  %v3551_v23 = vadd.f32 %v3547_v1, %v3535_v55  ;;  %v12524_v52 = vld [vmem:[#allocation29_spill] sm:$0xff]  ;;  %v3648_v0 = vadd.f32 %v3644_v19, %v3547_v1 }
 0x723   :  { %3377 = vrot.lane.b32.xlu1 %v3350_v34, %s8410_s23  ;;  %v3643_v34 = vmul.f32 %v12522_v62, %v3527_v8 }
 0x724   :  { %v11766_v13 = vadd.f32 %v3543_v24, %v3534_v44  ;;  %v3555_v62 = vmax.f32 %v3551_v23, 0.0  ;;  %v12525_v44 = vld [vmem:[#allocation35_spill] sm:$0xff]  ;;  %v3652_v39 = vmax.f32 %v3648_v0, 0.0 }
 0x725   :  { %v11773_v41 = vadd.f32 %v3643_v34, %v3543_v24 }
 0x726   :  { %3361 = vrot.lane.b32.xlu0 %v12221_v35, %s8410_s23  ;;  %v12226_v36 = vmax.f32 %v11766_v13, 0.0  ;;  %v3537_v35 = vmul.f32 %v3531_v16, %v12525_v44 }
 0x727   :  { %3363 = vrot.lane.b32.xlu1 %v3248_v50, %s8410_s23  ;;  %v3536_v50 = vmul.f32 %v3527_v8, %v12524_v52  ;;  %v12227_v55 = vmax.f32 %v11773_v41, 0.0 }
 0x728   :  { %v3553_v52 = vadd.f32 %v3547_v1, %v3537_v35 }
 0x729   :  { %v11784_v34 = vadd.f32 %v3543_v24, %v3536_v50 }
 0x72a   :  { %3379 = vrot.lane.b32.xlu0 %v12222_v58, %s8410_s23  ;;  %v12528_v58 = vld [vmem:[#allocation47_spill] sm:$0xff]  ;;  %v3557_v44 = vmax.f32 %v3553_v52, 0.0  ;;  %v12530_v52 = vmax.f32 %v11696_v40, 0.0 }
 0x72b   :  { %3381 = vrot.lane.b32.xlu1 %v3352_v20, %s8410_s23  ;;  %v3645_v20 = vmul.f32 %v12526_v33, %v3527_v8  ;;  %12527 = vst [vmem:[#allocation28_spill] sm:$0xff] %v11784_v34  ;;  %v3646_v49 = vmul.f32 %v12528_v58, %v3531_v16  ;;  %v12224_v23 = vmax.f32 %v11784_v34, 0.0 }
 0x72d   :  { %v11791_v19 = vadd.f32 %v3645_v20, %v3543_v24  ;;  %v12529_v20 = vmax.f32 %v11639_v12, 0.0 }
 0x72e   :  { %3659 = vrot.lane.b32.xlu0 %v12226_v36, %s8410_s23 }
 0x72f   :  { %3661 = vrot.lane.b32.xlu1 %v3555_v62, %s8410_s23  ;;  %v3650_v62 = vadd.f32 %v3646_v49, %v3547_v1  ;;  %v12225_v8 = vmax.f32 %v11791_v19, 0.0 }
 0x730   :  { %v5589_v24 = vpop.permute.xlu0 %5588 }
 0x731   :  { %v3654_v16 = vmax.f32 %v3650_v62, 0.0  ;;  %v5591_v35 = vpop.permute.xlu1 %5590 }
 0x732   :  { %3677 = vrot.lane.b32.xlu0 %v12227_v55, %s8410_s23  ;;  %v5596_v1 = vsel %vm1908_vm11, %v5589_v24, %v5591_v35  ;;  %v12531_v55 = vmax.f32 %v11668_v37, 0.0  ;;  %v12532_v35 = vmax.f32 %v11710_v2, 0.0  ;;  %v12533_v2 = vmax.f32 %v11719_v28, 0.0 }
 0x733   :  { %3679 = vrot.lane.b32.xlu1 %v3652_v39, %s8410_s23  ;;  %v5600_v39 = vmax.f32 %v12529_v20, %v5596_v1 }
 0x736   :  { %3663 = vrot.lane.b32.xlu0 %v12224_v23, %s8410_s23 }
 0x737   :  { %3665 = vrot.lane.b32.xlu1 %v3557_v44, %s8410_s23 }
 0x738   :  { %v5593_v58 = vpop.permute.xlu0 %5592 }
 0x739   :  { %v5595_v49 = vpop.permute.xlu1 %5594 }
 0x73a   :  { %3681 = vrot.lane.b32.xlu0 %v12225_v8, %s8410_s23  ;;  %v5597_v44 = vsel %vm1908_vm11, %v5593_v58, %v5595_v49 }
 0x73b   :  { %3683 = vrot.lane.b32.xlu1 %v3654_v16, %s8410_s23  ;;  %v5601_v24 = vmax.f32 %v12531_v55, %v5597_v44  ;;  %v12534_v55 = vmax.f32 %v11727_v60, 0.0  ;;  %v12535_v60 = vmax.f32 %v11741_v27, 0.0  ;;  %v12555_v44 = vmax.f32 %v11791_v19, 0.0  ;;  %v12561_v19 = vld [vmem:[#allocation79_spill] sm:$0xff] }
 0x788   :  { %v5607_v50 = vpop.permute.xlu0 %5606 }
 0x789   :  { %v5609_v0 = vpop.permute.xlu1 %5608 }
 0x78a   :  { %v5614_v33 = vsel %vm1908_vm11, %v5607_v50, %v5609_v0 }
 0x78b   :  { %v5618_v62 = vmax.f32 %v12530_v52, %v5614_v33  ;;  %v12554_v52 = vld [vmem:[#allocation21_spill] sm:$0xff] }
 0x78c   :  { %v5611_v23 = vpop.permute.xlu0 %5610 }
 0x78d   :  { %v5620_v16 = vmax.f32 %v5600_v39, %v5618_v62  ;;  %v5613_v8 = vpop.permute.xlu1 %5612 }
 0x78e   :  { %v5615_v36 = vsel %vm1908_vm11, %v5611_v23, %v5613_v8 }
 0x78f   :  { %v5619_v34 = vmax.f32 %v12532_v35, %v5615_v36  ;;  %6704 = vmatprep.mubr.msk.f32.mxu0 %vm3123_vm3, %v5620_v16 }
 0x790   :  { %v3358_v12 = vpop.permute.xlu0 %3357 }
 0x791   :  { %v5621_v1 = vmax.f32 %v5601_v24, %v5619_v34  ;;  %v3360_v50 = vpop.permute.xlu1 %3359  ;;  %v12556_v24 = vld [vmem:[#allocation28_spill] sm:$0xff] }
 0x792   :  { %v3365_v40 = vsel %vm301_vm15, %v3358_v12, %v3360_v50  ;;  %v12557_v35 = vmax.f32 %v12556_v24, 0.0 }
 0x793   :  { %6705 = vmatmul.mubr.msk.f32.vlgmr.msra.gmra.mrb[56].mxu0 %vm3123_vm3, %v5621_v1  ;;  %v3369_v36 = vmax.f32 %v12533_v2, %v3365_v40  ;;  %v12558_v1 = vld [vmem:[#allocation33_spill] sm:$0xff] }
 0x794   :  { %8176 = vmatpush1.bf16.msra.mxu0 %v10070_v4  ;;  %v3376_v58 = vpop.permute.xlu0 %3375 }
 0x795   :  { %v3378_v49 = vpop.permute.xlu1 %3377  ;;  %8178 = vmatprep.subr.bf16.mxu0 %v10074_v47 }
 0x796   :  { %v3383_v37 = vsel %vm301_vm15, %v3376_v58, %v3378_v49  ;;  %v12559_v58 = vld [vmem:[#allocation77_spill] sm:$0xff] }
 0x797   :  { %v3387_v23 = vmax.f32 %v12534_v55, %v3383_v37  ;;  %v12560_v37 = vld [vmem:[#allocation78_spill] sm:$0xff]  ;;  %v6468_v55 = vld [vmem:[%s12021_s7 + $0x140] sm:$0xff] }
 0x798   :  { %8180 = vmatpush1.bf16.msra.mxu0 %v10097_v63  ;;  %v3362_v34 = vpop.permute.xlu0 %3361 }
 0x799   :  { %v3389_v8 = vmax.f32 %v3369_v36, %v3387_v23  ;;  %v3364_v0 = vpop.permute.xlu1 %3363  ;;  %8182 = vmatprep.subr.bf16.mxu0 %v10101_v5  ;;  %v12536_v5 = vmax.f32 %v11753_v30, 0.0  ;;  %v6470_v23 = vld [vmem:[%s12021_s7 + $0x150] sm:$0xff] }
 0x79a   :  { %v3366_v4 = vsel %vm301_vm15, %v3362_v34, %v3364_v0  ;;  %v6471_v0 = vld [vmem:[%s12021_s7 + $0x158] sm:$0xff] }
 0x79b   :  { %6537 = vmatmul.mubr.msk.f32.vlgmr.msra.gmra.mrb[68].mxu1 %vm328_vm2, %v3389_v8  ;;  %6539 = vmatprep.mubr.msk.f32.mxu0 %vm328_vm2, %v3389_v8  ;;  %v3370_v33 = vmax.f32 %v12535_v60, %v3366_v4 }
 0x79c   :  { %8184 = vmatpush1.bf16.msra.mxu0 %v10123_v53  ;;  %v3380_v47 = vpop.permute.xlu0 %3379  ;;  %5869 = vmatprep.mubr.f32.mxu1 %v12237_v32 }
 0x79d   :  { %v3382_v28 = vpop.permute.xlu1 %3381  ;;  %8186 = vmatprep.subr.bf16.mxu0 %v10127_v59  ;;  %v12537_v59 = vld [vmem:[#allocation7_spill] sm:$0xff] }
 0x79e   :  { %v3384_v63 = vsel %vm301_vm15, %v3380_v47, %v3382_v28  ;;  %v8273_v47 = vpack.c.bf16 %v6471_v0, %v6470_v23  ;;  %v6472_v28 = vld [vmem:[%s12021_s7 + $0x160] sm:$0xff]  ;;  %v6217_v23 = vld [vmem:[%s12024_s10 + $0x28] sm:$0xff]  ;;  %v6219_v0 = vld [vmem:[%s12024_s10 + $0x38] sm:$0xff] }
 0x79f   :  { %v3388_v20 = vmax.f32 %v12536_v5, %v3384_v63  ;;  %v6473_v63 = vld [vmem:[%s12021_s7 + $0x168] sm:$0xff] }
 0x7a0   :  { %8188 = vmatpush1.bf16.msra.mxu0 %v10149_v17  ;;  %v3660_v53 = vpop.permute.xlu0 %3659  ;;  %v12541_v17 = vld [vmem:[#allocation10_spill] sm:$0xff] }
 0x7a1   :  { %v3390_v39 = vmax.f32 %v3370_v33, %v3388_v20  ;;  %8190 = vmatprep.subr.bf16.mxu0 %v10154_v26  ;;  %v12542_v26 = vld [vmem:[#allocation11_spill] sm:$0xff]  ;;  %v8277_v20 = vpack.c.bf16 %v6473_v63, %v6472_v28 }
 0x7a2   :  { %v6481_v63 = vld [vmem:[%s12026_s9] ss:$0 sm:$0xff] }
 0x7a3   :  { %6538 = vmatmul.mubr.msk.f32.gmra.mrb[70].mxu1 %vm328_vm2, %v3390_v39 }
 0x7a4   :  { %8192 = vmatpush1.bf16.msra.mxu0 %v10171_v22  ;;  %v12543_v22 = vld [vmem:[#allocation12_spill] sm:$0xff] }
 0x7a5   :  { %8194 = vmatprep.subr.bf16.mxu0 %v10175_v11  ;;  %v3678_v11 = vpop.permute.xlu0 %3677 }
 0x7a8   :  { %8196 = vmatpush1.bf16.msra.mxu0 %v12344_v51 }
 0x7a9   :  { %8198 = vmatprep.subr.bf16.mxu0 %v12345_v9 }
 0x7ac   :  { %8200 = vmatpush1.bf16.msra.mxu0 %v12346_v43 }
 0x7ad   :  { %8202 = vmatprep.subr.bf16.mxu0 %v12347_v15 }
 0x7b0   :  { %8204 = vmatpush1.bf16.msra.mxu0 %v10255_v21  ;;  %v12538_v21 = vld [vmem:[#allocation8_spill] sm:$0xff] }
 0x7b1   :  { %8206 = vmatprep.subr.bf16.mxu0 %v10262_v3 }
 0x7b4   :  { %8208 = vmatpush1.bf16.msra.mxu0 %v10290_v31  ;;  %v12544_v31 = vld [vmem:[#allocation13_spill] sm:$0xff] }
 0x7b5   :  { %8210 = vmatprep.subr.bf16.mxu0 %v10297_v10  ;;  %v12545_v10 = vld [vmem:[#allocation14_spill] sm:$0xff] }
 0x7b8   :  { %8212 = vmatpush1.bf16.msra.mxu0 %v10320_v45  ;;  %v12546_v45 = vld [vmem:[#allocation15_spill] sm:$0xff] }
 0x7b9   :  { %8214 = vmatprep.subr.bf16.mxu0 %v10323_v14  ;;  %v3664_v14 = vpop.permute.xlu0 %3663 }
 0x7bc   :  { %8216 = vmatpush1.bf16.msra.mxu0 %v10346_v57 }
 0x7bd   :  { %8218 = vmatprep.subr.bf16.mxu0 %v10351_v6  ;;  %v12540_v6 = vld [vmem:[#allocation9_spill] sm:$0xff]  ;;  %v3682_v9 = vpop.permute.xlu0 %3681 }
 0x7c0   :  { %8220 = vmatpush1.bf16.msra.mxu0 %v10372_v54  ;;  %v12547_v54 = vld [vmem:[#allocation16_spill] sm:$0xff] }
 0x7c1   :  { %8222 = vmatprep.subr.bf16.mxu0 %v10375_v29  ;;  %v3662_v29 = vpop.permute.xlu1 %3661 }
 0x7c2   :  { %v3667_v15 = vsel %vm301_vm15, %v3660_v53, %v3662_v29  ;;  %v6474_v53 = vld [vmem:[%s12021_s7 + $0x170] sm:$0xff]  ;;  %v6475_v29 = vld [vmem:[%s12021_s7 + $0x178] sm:$0xff] }
 0x7c4   :  { %8224 = vmatpush1.bf16.msra.mxu0 %v10396_v61  ;;  %v12548_v61 = vld [vmem:[#allocation17_spill] sm:$0xff] }
 0x7c5   :  { %8226 = vmatprep.subr.bf16.mxu0 %v10401_v38  ;;  %v12539_v38 = vld [vmem:[#allocation27_spill] sm:$0xff]  ;;  %v3680_v3 = vpop.permute.xlu1 %3679 }
 0x7c6   :  { %v3685_v51 = vsel %vm301_vm15, %v3678_v11, %v3680_v3 }
 0x7c8   :  { %8228 = vmatpush1.bf16.msra.mxu0 %v10431_v25  ;;  %v12549_v25 = vld [vmem:[#allocation18_spill] sm:$0xff] }
 0x7c9   :  { %8230 = vmatprep.subr.bf16.mxu0 %v12427_v18  ;;  %v3666_v57 = vpop.permute.xlu1 %3665  ;;  %v12550_v18 = vld [vmem:[#allocation19_spill] sm:$0xff] }
 0x7ca   :  { %v3668_v30 = vsel %vm301_vm15, %v3664_v14, %v3666_v57 }
 0x7cb   :  { %v3672_v12 = vmax.f32 %v12557_v35, %v3668_v30 }
 0x7cc   :  { %8232 = vmatpush1.bf16.msra.mxu0 %v12428_v7  ;;  %v12551_v7 = vmax.f32 %v11773_v41, 0.0 }
 0x7cd   :  { %8234 = vmatprep.subr.bf16.mxu0 %v12429_v56  ;;  %v3684_v43 = vpop.permute.xlu1 %3683 }
 0x7ce   :  { %v3689_v56 = vmax.f32 %v12551_v7, %v3685_v51 }
 0x7d0   :  { %8236 = vmatpush1.bf16.msra.mxu0 %v12430_v46  ;;  %v12552_v46 = vld [vmem:[#allocation20_spill] sm:$0xff] }
 0x7d1   :  { %8238 = vmatprep.subr.bf16.mxu0 %v12431_v42  ;;  %v3686_v42 = vsel %vm301_vm15, %v3682_v9, %v3684_v43  ;;  %v6212_v9 = vld [vmem:[%s12024_s10] sm:$0xff]  ;;  %v6213_v43 = vld [vmem:[%s12024_s10 + $0x8] sm:$0xff] }
 0x7d2   :  { %v3690_v16 = vmax.f32 %v12555_v44, %v3686_v42 }
 0x7d3   :  { %6540 = vmatmul.mubr.msk.f32.vlgmr.msra.gmra.mrb[66].mxu0 %vm328_vm2, %v11529_v48  ;;  %v12553_v48 = vmax.f32 %v11766_v13, 0.0 }
 0x7d4   :  { %6541 = vmatprep.mubr.msk.f32.mxu0 %vm328_vm2, %v3390_v39  ;;  %8240 = vmatpush1.bf16.msra.mxu0 %v12537_v59  ;;  %v3692_v41 = vmax.f32 %v3672_v12, %v3690_v16 }
 0x7d5   :  { %8242 = vmatprep.subr.bf16.mxu0 %v12538_v21  ;;  %v3671_v27 = vmax.f32 %v12553_v48, %v3667_v15  ;;  %v6214_v15 = vld [vmem:[%s12024_s10 + $0x10] sm:$0xff] }
 0x7d7   :  { %6542 = vmatmul.mubr.msk.f32.gmra.mrb[68].mxu0 %vm328_vm2, %v12539_v38  ;;  %v3691_v62 = vmax.f32 %v3671_v27, %v3689_v56  ;;  %v8289_v56 = vpack.c.bf16 %v6213_v43, %v6212_v9 }
 0x7d8   :  { %8244 = vmatpush1.bf16.msra.mxu0 %v12540_v6  ;;  %6035 = vmatprep.mubr.f32.mxu0 %v12237_v32 }
 0x7d9   :  { %8246 = vmatprep.subr.bf16.mxu0 %v12541_v17  ;;  %v8281_v17 = vpack.c.bf16 %v6475_v29, %v6474_v53  ;;  %8290 = vmatprep.subr.bf16.mxu1 %v8289_v56 }
 0x7da   :  { %8292 = vmatpush3.bf16.msra.mxu1 %v8289_v56 }
 0x7dc   :  { %8248 = vmatpush1.bf16.msra.mxu0 %v12542_v26  ;;  %v6476_v26 = vld [vmem:[%s12021_s7 + $0x180] sm:$0xff] }
 0x7dd   :  { %8250 = vmatprep.subr.bf16.mxu0 %v12543_v22  ;;  %v6477_v22 = vld [vmem:[%s12021_s7 + $0x188] sm:$0xff] }
 0x7de   :  { %v8285_v11 = vpack.c.bf16 %v6477_v22, %v6476_v26 }
 0x7e0   :  { %8252 = vmatpush1.bf16.msra.mxu0 %v12544_v31 }
 0x7e1   :  { %8254 = vmatprep.subr.bf16.mxu0 %v12545_v10 }
 0x7e4   :  { %8256 = vmatpush1.bf16.msra.mxu0 %v12546_v45 }
 0x7e5   :  { %8258 = vmatprep.subr.bf16.mxu0 %v12547_v54 }
 0x7e8   :  { %8260 = vmatpush1.bf16.msra.mxu0 %v12548_v61 }
 0x7e9   :  { %8262 = vmatprep.subr.bf16.mxu0 %v12549_v25 }
 0x7ec   :  { %8264 = vmatpush1.bf16.msra.mxu0 %v12550_v18 }
 0x7ed   :  { %8266 = vmatprep.subr.bf16.mxu0 %v12552_v46  ;;  %v6215_v46 = vld [vmem:[%s12024_s10 + $0x18] sm:$0xff] }
 0x7ee   :  { %v8293_v48 = vpack.c.bf16 %v6215_v46, %v6214_v15 }
 0x7f0   :  { %8268 = vmatpush1.bf16.msra.mxu0 %v12554_v52  ;;  %8294 = vmatprep.subr.bf16.mxu1 %v8293_v48 }
 0x7f1   :  { %8296 = vmatpush3.bf16.msra.mxu1 %v8293_v48 }
 0x7f3   :  { %6543 = vmatmul.mubr.msk.f32.vlgmr.msra.gmra.mrb[66].mxu0 %vm328_vm2, %v3691_v62 }
 0x7f4   :  { %6041 = vmatprep.mubr.f32.mxu0 %v12237_v32  ;;  %v6469_v32 = vld [vmem:[%s12021_s7 + $0x148] sm:$0xff] }
 0x7f5   :  { %v8269_v8 = vpack.c.bf16 %v6469_v32, %v6468_v55 }
 0x7f7   :  { %6544 = vmatmul.mubr.msk.f32.gmra.mrb[68].mxu0 %vm328_vm2, %v3692_v41  ;;  %8270 = vmatprep.subr.bf16.mxu0 %v8269_v8 }
 0x7f8   :  { %8272 = vmatpush3.bf16.msra.mxu0 %v8269_v8  ;;  %v6218_v8 = vld [vmem:[%s12024_s10 + $0x30] sm:$0xff] }
 0x7f9   :  { %8274 = vmatprep.subr.bf16.mxu0 %v8273_v47 }
 0x7fc   :  { %8276 = vmatpush3.bf16.msra.mxu0 %v8273_v47  ;;  %v6480_v47 = vld [vmem:[%s12025_s8] ss:$0 sm:$0xff] }
 0x7fd   :  { %8278 = vmatprep.subr.bf16.mxu0 %v8277_v20 }
 0x800   :  { %8280 = vmatpush3.bf16.msra.mxu0 %v8277_v20 }
 0x801   :  { %8282 = vmatprep.subr.bf16.mxu0 %v8281_v17 }
 0x804   :  { %8284 = vmatpush3.bf16.msra.mxu0 %v8281_v17 }
 0x805   :  { %8286 = vmatprep.subr.bf16.mxu0 %v8285_v11 }
 0x808   :  { %8288 = vmatpush3.bf16.msra.mxu0 %v8285_v11 }
 0x86e   :  { %v5865_v13 = vpop.f32.mrb[68].mxu1 }
 0x86f   :  { %v5876_v50 = vmul.f32 %v5865_v13, %v12558_v1  ;;  %v5867_v40 = vpop.f32.mrb[69].mxu1 }
 0x870   :  { %v5877_v49 = vmul.f32 %v5867_v40, %v12559_v58 }
 0x871   :  { %v11904_v2 = vadd.f32 %v5876_v50, %v12560_v37 }
 0x872   :  { %v5881_v36 = vadd.f32 %v5877_v49, %v12561_v19 }
 0x873   :  { %v5884_v34 = vmax.f32 %v11904_v2, 0.0  ;;  %v6216_v2 = vld [vmem:[%s12024_s10 + $0x20] sm:$0xff] }
 0x874   :  { %v5885_v4 = vmax.f32 %v5881_v36, 0.0 }
 0x875   :  { %6064 = vrot.lane.b32.xlu0 %v5884_v34, %s8403_s15 }
 0x876   :  { %6066 = vrot.lane.b32.xlu1 %v5885_v4, %s8403_s15  ;;  %v5871_v60 = vpop.f32.mrb[70].mxu1  ;;  %v8301_v4 = vpack.c.bf16 %v6219_v0, %v6218_v8 }
 0x877   :  { %v5878_v33 = vmul.f32 %v5871_v60, %v12558_v1  ;;  %v5873_v5 = vpop.f32.mrb[71].mxu1 }
 0x878   :  { %v5879_v39 = vmul.f32 %v5873_v5, %v12559_v58 }
 0x879   :  { %v11933_v59 = vadd.f32 %v5878_v33, %v12560_v37 }
 0x87a   :  { %v5883_v21 = vadd.f32 %v5879_v39, %v12561_v19 }
 0x87b   :  { %v5886_v38 = vmax.f32 %v11933_v59, 0.0 }
 0x87c   :  { %v5887_v6 = vmax.f32 %v5883_v21, 0.0 }
 0x87d   :  { %6068 = vrot.lane.b32.xlu0 %v5886_v38, %s8403_s15 }
 0x87e   :  { %6070 = vrot.lane.b32.xlu1 %v5887_v6, %s8403_s15 }
 0x8c6   :  { %v6037_v3 = vpop.f32.mrb[66].mxu0 }
 0x8c7   :  { %v6048_v31 = vmul.f32 %v6037_v3, %v12558_v1  ;;  %v6039_v10 = vpop.f32.mrb[67].mxu0 }
 0x8c8   :  { %v6049_v45 = vmul.f32 %v6039_v10, %v12559_v58 }
 0x8c9   :  { %v6052_v14 = vadd.f32 %v6048_v31, %v12560_v37 }
 0x8ca   :  { %v6053_v57 = vadd.f32 %v6049_v45, %v12561_v19  ;;  %v6043_v54 = vpop.f32.mrb[68].mxu0 }
 0x8cb   :  { %v6056_v61 = vmax.f32 %v6052_v14, 0.0  ;;  %v6050_v25 = vmul.f32 %v6043_v54, %v12558_v1  ;;  %v6045_v51 = vpop.f32.mrb[69].mxu0 }
 0x8cc   :  { %v6057_v18 = vmax.f32 %v6053_v57, 0.0  ;;  %v6051_v7 = vmul.f32 %v6045_v51, %v12559_v58 }
 0x8cd   :  { %v6054_v42 = vadd.f32 %v6050_v25, %v12560_v37  ;;  %6082 = vrot.lane.b32.xlu0 %v6056_v61, %s8403_s15 }
 0x8ce   :  { %v6055_v27 = vadd.f32 %v6051_v7, %v12561_v19  ;;  %6084 = vrot.lane.b32.xlu1 %v6057_v18, %s8403_s15 }
 0x8cf   :  { %v6058_v30 = vmax.f32 %v6054_v42, 0.0 }
 0x8d0   :  { %v6059_v52 = vmax.f32 %v6055_v27, 0.0 }
 0x8d1   :  { %6086 = vrot.lane.b32.xlu0 %v6058_v30, %s8403_s15 }
 0x8d2   :  { %6088 = vrot.lane.b32.xlu1 %v6059_v52, %s8403_s15 }
 0x8e7   :  { %v6065_v62 = vpop.permute.xlu0 %6064 }
 0x8e8   :  { %v6067_v44 = vpop.permute.xlu1 %6066 }
 0x8e9   :  { %v6072_v35 = vsel %vm1908_vm11, %v6065_v62, %v6067_v44 }
 0x8ea   :  { %v6076_v1 = vmax.f32 %v5884_v34, %v6072_v35  ;;  %v8297_v34 = vpack.c.bf16 %v6217_v23, %v6216_v2 }
 0x8ec   :  { %8298 = vmatprep.subr.bf16.mxu1 %v8297_v34 }
 0x8ed   :  { %8300 = vmatpush3.bf16.msra.mxu1 %v8297_v34 }
 0x8ee   :  { %8302 = vmatprep.subr.bf16.mxu1 %v8301_v4 }
 0x8ef   :  { %v6069_v16 = vpop.permute.xlu0 %6068 }
 0x8f0   :  { %v6071_v24 = vpop.permute.xlu1 %6070 }
 0x8f1   :  { %v6073_v40 = vsel %vm1908_vm11, %v6069_v16, %v6071_v24  ;;  %8304 = vmatpush3.bf16.msra.mxu1 %v8301_v4 }
 0x8f2   :  { %v6077_v36 = vmax.f32 %v5886_v38, %v6073_v40  ;;  %v6482_v38 = vld [vmem:[%s12027_s11] ss:$0 sm:$0xff] }
 0x93f   :  { %v6083_v12 = vpop.permute.xlu0 %6082 }
 0x940   :  { %v6085_v41 = vpop.permute.xlu1 %6084 }
 0x941   :  { %v6090_v13 = vsel %vm1908_vm11, %v6083_v12, %v6085_v41 }
 0x942   :  { %v6094_v50 = vmax.f32 %v6056_v61, %v6090_v13 }
 0x943   :  { %v6087_v58 = vpop.permute.xlu0 %6086 }
 0x944   :  { %v6096_v49 = vmax.f32 %v6076_v1, %v6094_v50  ;;  %v6089_v37 = vpop.permute.xlu1 %6088 }
 0x945   :  { %v6091_v19 = vsel %vm1908_vm11, %v6087_v58, %v6089_v37 }
 0x946   :  { %v6095_v55 = vmax.f32 %v6058_v30, %v6091_v19  ;;  %6727 = vmatprep.mubr.msk.f32.mxu0 %vm3123_vm3, %v6096_v49 }
 0x948   :  { %v6097_v32 = vmax.f32 %v6077_v36, %v6095_v55 }
 0x94a   :  { %6728 = vmatmul.mubr.msk.f32.vlgmr.msra.gmra.mrb[56].mxu0 %vm3123_vm3, %v6097_v32 }
 0xa1d   :  { %v6729_v28 = vpop.f32.mrb[56].mxu0 }
 0xa1e   :  { %v6200_v60 = vmul.f32 %v6729_v28, %v6480_v47  ;;  %v6181_v33 = vpop.f32.mrb[57].mxu0 }
 0xa1f   :  { %v6199_v5 = vmul.f32 %v6480_v47, %v6181_v33 }
 0xa20   :  { %v6209_v20 = vadd.f32 %v6481_v63, %v6200_v60 }
 0xa21   :  { %v6208_v39 = vadd.f32 %v6481_v63, %v6199_v5 }
 0xa22   :  { %v6211_v21 = vmax.f32 %v6209_v20, 0.0 }
 0xa23   :  { %v6210_v59 = vmax.f32 %v6208_v39, 0.0 }
 0xa25   :  { %6746 = vmatprep.mubr.msk.f32.mxu1 %vm2510_vm13, %v6210_v59 }
 0xa26   :  { %6747 = vmatmul.mubr.msk.f32.vlgmr.msra.gmra.mrb[72].mxu1 %vm2510_vm13, %v6211_v21 }
 0xaf9   :  { %v6748_v6 = vpop.f32.mrb[72].mxu1 }
 0xafa   :  { %v6305_v53 = vadd.f32 %v6748_v6, %v6482_v38  ;;  %v6299_v29 = vpop.f32.mrb[73].mxu1 }
 0xafb   :  { %v6300_v17 = vadd.f32 %v6482_v38, %v6299_v29 }
 0xafc   :  { %6310 = vmax.xlane.f32.xlu1 %v6305_v53 }
 0xafd   :  { %6308 = vmax.xlane.f32.xlu0 %v6300_v17 }
 0xb89   :  { %v6311_v26 = vpop.xlane.xlu1 %6310 }
 0xb8a   :  { %v6309_v22 = vpop.xlane.xlu0 %6308  ;;  %v6313_v11 = vsub.f32 %v6305_v53, %v6311_v26 }
 0xb8b   :  { %v6312_v3 = vsub.f32 %v6300_v17, %v6309_v22 }
 0xb8c   :  { %v6316_v10 = vmul.f32 1.442695, %v6313_v11 }
 0xb8d   :  { %v6314_v31 = vmul.f32 1.442695, %v6312_v3 }
 0xb8f   :  { %8377 = vpow2.f32 %v6314_v31 }
 0xb90   :  { %8379 = vpow2.f32 %v6316_v10 }
 0xb99   :  { %v8378_v45 = vpop.eup %8377 }
 0xb9a   :  { %6318 = vadd.xlane.f32.xlu0 %v8378_v45  ;;  %v8380_v14 = vpop.eup %8379 }
 0xb9e   :  { %6320 = vadd.xlane.f32.xlu0 %v8380_v14 }
 0xc27   :  { %v6319_v57 = vpop.xlane.xlu0 %6318 }
 0xc28   :  { %8381 = vlog2.f32 %v6319_v57 }
 0xc2b   :  { %v6321_v54 = vpop.xlane.xlu0 %6320 }
 0xc2c   :  { %8383 = vlog2.f32 %v6321_v54 }
 0xc32   :  { %v8382_v61 = vpop.eup %8381 }
 0xc33   :  { %v6323_v25 = vmul.f32 0.6931472, %v8382_v61 }
 0xc35   :  { %v6326_v51 = vsub.f32 %v6312_v3, %v6323_v25 }
 0xc36   :  { %v8384_v9 = vpop.eup %8383 }
 0xc37   :  { %6328 = vst [vmem:[%s12028_s12] sm:$0xff] %v6326_v51  ;;  %v6325_v43 = vmul.f32 0.6931472, %v8384_v9 }
 0xc39   :  { %v6327_v15 = vsub.f32 %v6313_v11, %v6325_v43 }
 0xc3b   :  { %6329 = vst [vmem:[%s12028_s12 + $0x8] sm:$0xff] %v6327_v15 }

</bundles_post_ra>
